<compile_context>
chip_gen: v7x
topology: tpu7x:2x2x1
jax: 0.10.0
libtpu: 0.0.40
codegen_flags: <defaults>
</compile_context>

<pallas_src>
import functools
import numpy as np
import jax
import jax.numpy as jnp
from jax import lax
from jax.experimental import pallas as pl
from jax.experimental.pallas import tpu as pltpu

_MXU_DTYPE = jnp.bfloat16      # MXU operand dtype; accumulation is always f32.
                               # Set to jnp.float32 for bit-closer parity runs.
_SQRT_HALF = 0.7071067811865476
_LN_EPS = 1e-5


# ----------------------------- in-kernel helpers -----------------------------
def _erf(x):
    # Abramowitz & Stegun 7.1.26 (|err| < 1.5e-7): matches torch's exact-erf
    # GELU to f32 noise.  The divide is routed to the EUP via pl.reciprocal.
    a1, a2, a3, a4, a5 = (0.254829592, -0.284496736, 1.421413741,
                          -1.453152027, 1.061405429)
    p = 0.3275911
    sgn = jnp.where(x >= 0.0, 1.0, -1.0)
    ax = jnp.abs(x)
    t = pl.reciprocal(1.0 + p * ax)
    poly = ((((a5 * t + a4) * t + a3) * t + a2) * t + a1) * t
    return sgn * (1.0 - poly * jnp.exp(-ax * ax))


def _gelu(x):
    # exact (erf-based) GELU, matching torch.nn.GELU() default.
    return 0.5 * x * (1.0 + _erf(x * _SQRT_HALF))


def _layernorm(x, eps=_LN_EPS):
    # Plain normalization: gamma/beta of both LayerNorms are folded host-side
    # into the following Linear's weight/bias (exact rewrite).
    mu = jnp.mean(x, axis=-1, keepdims=True)
    xc = x - mu
    var = jnp.mean(xc * xc, axis=-1, keepdims=True)
    return xc * lax.rsqrt(var + eps)


def _mm(a, b):
    return jnp.dot(a.astype(_MXU_DTYPE), b.astype(_MXU_DTYPE),
                   preferred_element_type=jnp.float32)


def _mm_nt(a, b):
    # a (M, K) . b (N, K)^T -> (M, N), no explicit transpose op.
    return lax.dot_general(a.astype(_MXU_DTYPE), b.astype(_MXU_DTYPE),
                           (((1,), (1,)), ((), ())),
                           preferred_element_type=jnp.float32)


def _dwconv3x3(h1, wconv, bconv, cmask, H, W):
    """Depthwise 3x3, padding=1, on tokens kept flat in raster order.

    Neighbour (dh, dw) of token i is token i + dh*W + dw, fetched with a
    pltpu.roll (XLU slot, which has slack) and zeroed at the image border by
    the precomputed 0/1 mask column for that tap (cmask: (L, 9)).
    """
    L = h1.shape[0]
    acc = h1 * wconv[1, 1]                              # centre tap: no shift/mask
    for dh in (-1, 0, 1):
        for dwi in (-1, 0, 1):
            if dh == 0 and dwi == 0:
                continue
            s = dh * W + dwi
            nbr = pltpu.roll(h1, (-s) % L, axis=0)      # nbr[i] = h1[i + s]
            t = (dh + 1) * 3 + (dwi + 1)
            acc = acc + (nbr * cmask[:, t:t + 1]) * wconv[1 + dh, 1 + dwi]
    return acc + bconv


# --------------------------- fused whole-layer kernel ------------------------
def _layer_kernel(x_ref, cmask_ref,
                  wqkv_ref, bqkv_ref, bias_ref, wp_ref, bp_ref,
                  w1_ref, b1_ref, dww_ref, dwb_ref, w2_ref, b2_ref,
                  o_ref, *, depth, num_heads, H, W):
    L = H * W
    C = x_ref.shape[-1]
    d = C // num_heads

    x = x_ref[0].astype(jnp.float32)                    # (L, C) raw tokens
    cmask = cmask_ref[...].astype(jnp.float32)          # (L, 9) conv border mask

    for blk in range(depth):                            # static depth loop
        # ---- attention: LN1 -> fused QKV -> per-head masked attn -> proj -> +res
        xn = _layernorm(x)                              # LN1 affine folded in wqkv
        qkv = _mm(xn, wqkv_ref[blk]) + bqkv_ref[blk].astype(jnp.float32)  # (L, 3C)

        heads = []
        for h in range(num_heads):                      # small static loop
            qh = qkv[:, h * d:(h + 1) * d]              # qk scale pre-folded
            kh = qkv[:, C + h * d:C + (h + 1) * d]
            vh = qkv[:, 2 * C + h * d:2 * C + (h + 1) * d]
            s = _mm_nt(qh, kh) + bias_ref[blk, h]       # (L, L) + rel-pos / mask
            s = s - jnp.max(s, axis=-1, keepdims=True)
            p = jnp.exp(s)
            p = p * pl.reciprocal(jnp.sum(p, axis=-1, keepdims=True), approx=True)
            heads.append(_mm(p, vh))                    # (L, d)
        attn = jnp.concatenate(heads, axis=-1)          # (L, C) head concat
        x = x + _mm(attn, wp_ref[blk]) + bp_ref[blk].astype(jnp.float32)

        # ---- DWCFF MLP: LN2 -> Linear+GELU -> dw3x3+GELU -> Linear -> +res
        xn2 = _layernorm(x)                             # LN2 affine folded in w1
        h1 = _gelu(_mm(xn2, w1_ref[blk]) + b1_ref[blk].astype(jnp.float32))
        h2 = _gelu(_dwconv3x3(h1,
                              dww_ref[blk].astype(jnp.float32),
                              dwb_ref[blk].astype(jnp.float32),
                              cmask, H, W))
        x = x + _mm(h2, w2_ref[blk]) + b2_ref[blk].astype(jnp.float32)

    o_ref[0] = x.astype(o_ref.dtype)


def guideformer_layer_forward(x, stacked, *, input_size, num_heads):
    H, W = input_size
    B, L, C = x.shape
    assert H * W == L, "input H x W is not the same with L!"
    depth = stacked["wqkv"].shape[0]
    hid = stacked["w1"].shape[-1]
    kern = functools.partial(_layer_kernel, depth=depth, num_heads=num_heads,
                             H=H, W=W)

    def rep(shape):      # whole-array block, same block index every grid step
        return pl.BlockSpec(shape, lambda b, n=len(shape): (0,) * n)

    return pl.pallas_call(
        kern,
        out_shape=jax.ShapeDtypeStruct((B, L, C), x.dtype),
        grid=(B,),
        in_specs=[
            pl.BlockSpec((1, L, C), lambda b: (b, 0, 0)),
            rep((L, 9)),
            rep((depth, C, 3 * C)), rep((depth, 1, 3 * C)),
            rep((depth, num_heads, L, L)),
            rep((depth, C, C)), rep((depth, 1, C)),
            rep((depth, C, hid)), rep((depth, 1, hid)),
            rep((depth, 3, 3, hid)), rep((depth, 1, hid)),
            rep((depth, hid, C)), rep((depth, 1, C)),
        ],
        out_specs=pl.BlockSpec((1, L, C), lambda b: (b, 0, 0)),
        compiler_params=pltpu.CompilerParams(dimension_semantics=("parallel",)),
    )(x, stacked["cmask"],
      stacked["wqkv"], stacked["bqkv"], stacked["attn_bias"],
      stacked["wp"], stacked["bp"],
      stacked["w1"], stacked["b1"], stacked["dw_w"], stacked["dw_b"],
      stacked["w2"], stacked["b2"])


# --------------------- host-side constant precomputation ---------------------
def _build_attn_bias(rpb, H, W, ws, shift, num_heads):
    """(num_heads, L, L) additive tensor reproducing shifted-window attention
    over tokens kept in raster order: same (shifted) window -> relative-position
    bias (+ -100 region mask for shifted blocks); different window -> -1e30."""
    hh, ww = np.meshgrid(np.arange(H), np.arange(W), indexing="ij")
    hh, ww = hh.reshape(-1), ww.reshape(-1)
    rh = (hh - shift) % H                       # coords after roll(-shift)
    rw = (ww - shift) % W
    win_id = (rh // ws) * (W // ws) + (rw // ws)
    same_win = win_id[:, None] == win_id[None, :]
    ih, iw = rh % ws, rw % ws                   # in-window coords (as reference)
    rel = ((ih[:, None] - ih[None, :] + ws - 1) * (2 * ws - 1)
           + (iw[:, None] - iw[None, :] + ws - 1))            # (L, L)
    table = np.asarray(rpb, np.float64)                       # ((2ws-1)^2, nh)
    bias = np.transpose(table[rel], (2, 0, 1))                # (nh, L, L)
    if shift > 0:
        region = np.zeros((H, W), np.int64)
        cnt = 0
        sl = (slice(0, -ws), slice(-ws, -shift), slice(-shift, None))
        for hs in sl:
            for wsl in sl:
                region[hs, wsl] = cnt
                cnt += 1
        reg = region[rh, rw]
        bias = bias + np.where(reg[:, None] != reg[None, :], -100.0, 0.0)[None]
    bias = np.where(same_win[None], bias, -1e30)
    return bias.astype(np.float32)


def _build_conv_mask(H, W):
    """(L, 9) 0/1 mask; column (dh+1)*3+(dw+1) is 1 where neighbour (dh, dw)
    of the token is inside the image (zero padding of the 3x3 depthwise conv)."""
    hh, ww = np.meshgrid(np.arange(H), np.arange(W), indexing="ij")
    hh, ww = hh.reshape(-1), ww.reshape(-1)
    cols = []
    for dh in (-1, 0, 1):
        for dwi in (-1, 0, 1):
            cols.append(((hh + dh >= 0) & (hh + dh < H)
                         & (ww + dwi >= 0) & (ww + dwi < W)).astype(np.float32))
    return np.stack(cols, axis=1)


def prepare_layer(block_params_list, *, H, W, win_size, num_heads):
    """Fold LN affines + qk scale into the adjacent Linears, concatenate q|k|v,
    precompute per-block attention bias + conv border mask, and stack all
    per-block weights along a leading depth axis (one pallas_call per layer)."""
    assert H % win_size == 0 and W % win_size == 0, \
        "demo assumes no window padding"
    # TODO(synk): handle H/W not divisible by win_size (reference pads, crops).
    wqkv, bqkv, bias, wp, bp = [], [], [], [], []
    w1, b1, dww, dwb, w2, b2 = [], [], [], [], [], []
    for i, prm in enumerate(block_params_list):
        C = np.asarray(prm["wq"]).shape[0]
        d = C // num_heads
        scale = float(d) ** -0.5
        shift = 0 if i % 2 == 0 else win_size // 2

        g1 = np.asarray(prm["ln1_g"], np.float64)
        be1 = np.asarray(prm["ln1_b"], np.float64)
        wq = np.asarray(prm["wq"], np.float64) * scale        # qk scale folded
        bq = np.asarray(prm["bq"], np.float64) * scale
        wkv = np.asarray(prm["wkv"], np.float64)
        bkv = np.asarray(prm["bkv"], np.float64)
        wcat = np.concatenate([wq, wkv[:, :C], wkv[:, C:]], axis=1)   # (C, 3C)
        wqkv.append(g1[:, None] * wcat)                       # LN1 gamma folded
        bqkv.append((be1 @ wcat
                     + np.concatenate([bq, bkv[:C], bkv[C:]]))[None, :])

        wp.append(np.asarray(prm["wp"], np.float64))
        bp.append(np.asarray(prm["bp"], np.float64)[None, :])

        g2 = np.asarray(prm["ln2_g"], np.float64)
        be2 = np.asarray(prm["ln2_b"], np.float64)
        w1_ = np.asarray(prm["w1"], np.float64)
        w1.append(g2[:, None] * w1_)                          # LN2 gamma folded
        b1.append((be2 @ w1_ + np.asarray(prm["b1"], np.float64))[None, :])

        dww.append(np.asarray(prm["dw_w"], np.float64))
        dwb.append(np.asarray(prm["dw_b"], np.float64)[None, :])
        w2.append(np.asarray(prm["w2"], np.float64))
        b2.append(np.asarray(prm["b2"], np.float64)[None, :])
        bias.append(_build_attn_bias(prm["rpb"], H, W, win_size, shift,
                                     num_heads))

    f32 = lambda xs: jnp.asarray(np.stack(xs, axis=0), jnp.float32)
    return dict(
        wqkv=f32(wqkv), bqkv=f32(bqkv), attn_bias=f32(bias),
        wp=f32(wp), bp=f32(bp), w1=f32(w1), b1=f32(b1),
        dw_w=f32(dww), dw_b=f32(dwb), w2=f32(w2), b2=f32(b2),
        cmask=jnp.asarray(_build_conv_mask(H, W), jnp.float32),
    )


# --------------------------- deterministic params ----------------------------
def init_block_params(key, C, hidden, win_size, num_heads):
    ks = jax.random.split(key, 9)
    rnd = lambda k, s: jax.random.normal(k, s, jnp.float32) * 0.02
    return dict(
        ln1_g=jnp.ones((C,), jnp.float32), ln1_b=jnp.zeros((C,), jnp.float32),
        ln2_g=jnp.ones((C,), jnp.float32), ln2_b=jnp.zeros((C,), jnp.float32),
        wq=rnd(ks[0], (C, C)), bq=rnd(ks[1], (C,)),
        wkv=rnd(ks[2], (C, 2 * C)), bkv=rnd(ks[3], (2 * C,)),
        wp=rnd(ks[4], (C, C)), bp=jnp.zeros((C,), jnp.float32),
        rpb=rnd(ks[5], ((2 * win_size - 1) ** 2, num_heads)),
        w1=rnd(ks[6], (C, hidden)), b1=jnp.zeros((hidden,), jnp.float32),
        dw_w=rnd(ks[7], (3, 3, hidden)), dw_b=jnp.zeros((hidden,), jnp.float32),
        w2=rnd(ks[8], (hidden, C)), b2=jnp.zeros((C,), jnp.float32),
    )


if __name__ == "__main__":
    B, H, W = 2, 8, 8          # B >= 2 keeps both v7x TensorCores busy
    dim = out_dim = 32         # dim == out_dim -> proj_in is nn.Identity()
    num_heads = 4
    win_size = 4
    depth = 2                  # block 0: shift=0, block 1: shift=win_size//2
    mlp_ratio = 4.0
    L = H * W

    key = jax.random.PRNGKey(0)
    kx, kp = jax.random.split(key)
    x = jax.random.normal(kx, (B, L, dim), jnp.float32)

    params = []
    for i in range(depth):
        kp, sub = jax.random.split(kp)
        params.append(init_block_params(sub, out_dim, int(out_dim * mlp_ratio),
                                        win_size, num_heads))
    stacked = prepare_layer(params, H=H, W=W, win_size=win_size,
                            num_heads=num_heads)

    fwd = jax.jit(functools.partial(guideformer_layer_forward,
                                    input_size=(H, W), num_heads=num_heads))
    out = jax.block_until_ready(fwd(x, stacked))
    assert out.shape == (B, L, out_dim) and out.dtype == jnp.float32
    assert bool(jnp.all(jnp.isfinite(out)))
    print("KERNEL_OK")
</pallas_src>

<mosaic_0001>
module attributes {stable_mosaic.version = 11 : i64} {
  func.func @_layer_kernel(%arg0: i32, %arg1: memref<1x64x32xf32, #tpu.memory_space<vmem>>, %arg2: memref<64x9xf32, #tpu.memory_space<vmem>>, %arg3: memref<2x32x96xf32, #tpu.memory_space<vmem>>, %arg4: memref<2x1x96xf32, #tpu.memory_space<vmem>>, %arg5: memref<2x4x64x64xf32, #tpu.memory_space<vmem>>, %arg6: memref<2x32x32xf32, #tpu.memory_space<vmem>>, %arg7: memref<2x1x32xf32, #tpu.memory_space<vmem>>, %arg8: memref<2x32x128xf32, #tpu.memory_space<vmem>>, %arg9: memref<2x1x128xf32, #tpu.memory_space<vmem>>, %arg10: memref<2x3x3x128xf32, #tpu.memory_space<vmem>>, %arg11: memref<2x1x128xf32, #tpu.memory_space<vmem>>, %arg12: memref<2x128x32xf32, #tpu.memory_space<vmem>>, %arg13: memref<2x1x32xf32, #tpu.memory_space<vmem>>, %arg14: memref<1x64x32xf32, #tpu.memory_space<vmem>>) attributes {dimension_semantics = [#tpu.dimension_semantics<parallel>], iteration_bounds = array<i64: 2>, scalar_prefetch = 0 : i64, scratch_operands = 0 : i64, tpu.core_type = #tpu.core_type<tc>, window_params = [{transform_indices = @transform_0, window_bounds = array<i64: 1, 64, 32>}, {pipeline_mode = #tpu.pipeline_mode<synchronous>, transform_indices = @transform_1, window_bounds = array<i64: 64, 9>}, {pipeline_mode = #tpu.pipeline_mode<synchronous>, transform_indices = @transform_2, window_bounds = array<i64: 2, 32, 96>}, {pipeline_mode = #tpu.pipeline_mode<synchronous>, transform_indices = @transform_3, window_bounds = array<i64: 2, 1, 96>}, {pipeline_mode = #tpu.pipeline_mode<synchronous>, transform_indices = @transform_4, window_bounds = array<i64: 2, 4, 64, 64>}, {pipeline_mode = #tpu.pipeline_mode<synchronous>, transform_indices = @transform_5, window_bounds = array<i64: 2, 32, 32>}, {pipeline_mode = #tpu.pipeline_mode<synchronous>, transform_indices = @transform_6, window_bounds = array<i64: 2, 1, 32>}, {pipeline_mode = #tpu.pipeline_mode<synchronous>, transform_indices = @transform_7, window_bounds = array<i64: 2, 32, 128>}, {pipeline_mode = #tpu.pipeline_mode<synchronous>, transform_indices = @transform_8, window_bounds = array<i64: 2, 1, 128>}, {pipeline_mode = #tpu.pipeline_mode<synchronous>, transform_indices = @transform_9, window_bounds = array<i64: 2, 3, 3, 128>}, {pipeline_mode = #tpu.pipeline_mode<synchronous>, transform_indices = @transform_10, window_bounds = array<i64: 2, 1, 128>}, {pipeline_mode = #tpu.pipeline_mode<synchronous>, transform_indices = @transform_11, window_bounds = array<i64: 2, 128, 32>}, {pipeline_mode = #tpu.pipeline_mode<synchronous>, transform_indices = @transform_12, window_bounds = array<i64: 2, 1, 32>}, {transform_indices = @transform_13, window_bounds = array<i64: 1, 64, 32>}]} {
    %c0 = arith.constant 0 : index
    %c0_0 = arith.constant 0 : index
    %c0_1 = arith.constant 0 : index
    %0 = vector.load %arg1[%c0, %c0_0, %c0_1] : memref<1x64x32xf32, #tpu.memory_space<vmem>>, vector<1x64x32xf32>
    %1 = vector.shape_cast %0 : vector<1x64x32xf32> to vector<64x32xf32>
    %c0_2 = arith.constant 0 : index
    %c0_3 = arith.constant 0 : index
    %2 = vector.load %arg2[%c0_2, %c0_3] : memref<64x9xf32, #tpu.memory_space<vmem>>, vector<64x9xf32>
    %cst = arith.constant dense<0.000000e+00> : vector<64xf32>
    %3 = vector.multi_reduction <add>, %1, %cst [1] : vector<64x32xf32> to vector<64xf32>
    %4 = vector.shape_cast %3 : vector<64xf32> to vector<64x1xf32>
    %cst_4 = arith.constant 3.200000e+01 : f32
    %5 = vector.broadcast %cst_4 : f32 to vector<64x1xf32>
    %6 = arith.divf %4, %5 : vector<64x1xf32>
    %7 = vector.broadcast %6 : vector<64x1xf32> to vector<64x32xf32>
    %8 = arith.subf %1, %7 : vector<64x32xf32>
    %9 = arith.mulf %8, %8 : vector<64x32xf32>
    %cst_5 = arith.constant dense<0.000000e+00> : vector<64xf32>
    %10 = vector.multi_reduction <add>, %9, %cst_5 [1] : vector<64x32xf32> to vector<64xf32>
    %11 = vector.shape_cast %10 : vector<64xf32> to vector<64x1xf32>
    %cst_6 = arith.constant 3.200000e+01 : f32
    %12 = vector.broadcast %cst_6 : f32 to vector<64x1xf32>
    %13 = arith.divf %11, %12 : vector<64x1xf32>
    %cst_7 = arith.constant 9.99999974E-6 : f32
    %14 = vector.broadcast %cst_7 : f32 to vector<64x1xf32>
    %15 = arith.addf %13, %14 : vector<64x1xf32>
    %16 = math.rsqrt %15 : vector<64x1xf32>
    %17 = vector.broadcast %16 : vector<64x1xf32> to vector<64x32xf32>
    %18 = arith.mulf %8, %17 : vector<64x32xf32>
    %c0_8 = arith.constant 0 : index
    %c0_9 = arith.constant 0 : index
    %c0_10 = arith.constant 0 : index
    %19 = vector.load %arg3[%c0_8, %c0_9, %c0_10] : memref<2x32x96xf32, #tpu.memory_space<vmem>>, vector<1x32x96xf32>
    %20 = vector.shape_cast %19 : vector<1x32x96xf32> to vector<32x96xf32>
    %21 = arith.truncf %18 : vector<64x32xf32> to vector<64x32xbf16>
    %22 = arith.truncf %20 : vector<32x96xf32> to vector<32x96xbf16>
    %cst_11 = arith.constant dense<0.000000e+00> : vector<64x96xf32>
    %23 = tpu.matmul %21, %22, %cst_11 {dimension_numbers = #tpu.dot_dimension_numbers<[1], [0], [0], [1], [0, 0, 1, 1], [], []>} : vector<64x32xbf16>, vector<32x96xbf16>, vector<64x96xf32> -> vector<64x96xf32>
    %c0_12 = arith.constant 0 : index
    %c0_13 = arith.constant 0 : index
    %c0_14 = arith.constant 0 : index
    %24 = vector.load %arg4[%c0_12, %c0_13, %c0_14] : memref<2x1x96xf32, #tpu.memory_space<vmem>>, vector<1x1x96xf32>
    %25 = vector.shape_cast %24 : vector<1x1x96xf32> to vector<1x96xf32>
    %26 = vector.broadcast %25 : vector<1x96xf32> to vector<64x96xf32>
    %27 = arith.addf %23, %26 : vector<64x96xf32>
    %28 = vector.extract_strided_slice %27 {offsets = [0, 0], sizes = [64, 8], strides = [1, 1]} : vector<64x96xf32> to vector<64x8xf32>
    %29 = vector.extract_strided_slice %27 {offsets = [0, 32], sizes = [64, 8], strides = [1, 1]} : vector<64x96xf32> to vector<64x8xf32>
    %30 = vector.extract_strided_slice %27 {offsets = [0, 64], sizes = [64, 8], strides = [1, 1]} : vector<64x96xf32> to vector<64x8xf32>
    %31 = arith.truncf %28 : vector<64x8xf32> to vector<64x8xbf16>
    %32 = arith.truncf %29 : vector<64x8xf32> to vector<64x8xbf16>
    %cst_15 = arith.constant dense<0.000000e+00> : vector<64x64xf32>
    %33 = tpu.matmul %31, %32, %cst_15 {dimension_numbers = #tpu.dot_dimension_numbers<[1], [1], [0], [0], [0, 0, 1, 0], [], []>} : vector<64x8xbf16>, vector<64x8xbf16>, vector<64x64xf32> -> vector<64x64xf32>
    %c0_16 = arith.constant 0 : index
    %c0_17 = arith.constant 0 : index
    %c0_18 = arith.constant 0 : index
    %c0_19 = arith.constant 0 : index
    %34 = vector.load %arg5[%c0_16, %c0_17, %c0_18, %c0_19] : memref<2x4x64x64xf32, #tpu.memory_space<vmem>>, vector<1x1x64x64xf32>
    %35 = vector.shape_cast %34 : vector<1x1x64x64xf32> to vector<64x64xf32>
    %36 = arith.addf %33, %35 : vector<64x64xf32>
    %cst_20 = arith.constant dense<0xFF800000> : vector<64xf32>
    %37 = vector.multi_reduction <maximumf>, %36, %cst_20 [1] : vector<64x64xf32> to vector<64xf32>
    %38 = vector.shape_cast %37 : vector<64xf32> to vector<64x1xf32>
    %39 = vector.broadcast %38 : vector<64x1xf32> to vector<64x64xf32>
    %40 = arith.subf %36, %39 : vector<64x64xf32>
    %41 = math.exp %40 : vector<64x64xf32>
    %cst_21 = arith.constant dense<0.000000e+00> : vector<64xf32>
    %42 = vector.multi_reduction <add>, %41, %cst_21 [1] : vector<64x64xf32> to vector<64xf32>
    %43 = vector.shape_cast %42 : vector<64xf32> to vector<64x1xf32>
    %44 = tpu.reciprocal %43 {approx = true} : vector<64x1xf32> -> vector<64x1xf32>
    %45 = vector.broadcast %44 : vector<64x1xf32> to vector<64x64xf32>
    %46 = arith.mulf %41, %45 : vector<64x64xf32>
    %47 = arith.truncf %46 : vector<64x64xf32> to vector<64x64xbf16>
    %48 = arith.truncf %30 : vector<64x8xf32> to vector<64x8xbf16>
    %cst_22 = arith.constant dense<0.000000e+00> : vector<64x8xf32>
    %49 = tpu.matmul %47, %48, %cst_22 {dimension_numbers = #tpu.dot_dimension_numbers<[1], [0], [0], [1], [0, 0, 1, 1], [], []>} : vector<64x64xbf16>, vector<64x8xbf16>, vector<64x8xf32> -> vector<64x8xf32>
    %50 = vector.extract_strided_slice %27 {offsets = [0, 8], sizes = [64, 8], strides = [1, 1]} : vector<64x96xf32> to vector<64x8xf32>
    %51 = vector.extract_strided_slice %27 {offsets = [0, 40], sizes = [64, 8], strides = [1, 1]} : vector<64x96xf32> to vector<64x8xf32>
    %52 = vector.extract_strided_slice %27 {offsets = [0, 72], sizes = [64, 8], strides = [1, 1]} : vector<64x96xf32> to vector<64x8xf32>
    %53 = arith.truncf %50 : vector<64x8xf32> to vector<64x8xbf16>
    %54 = arith.truncf %51 : vector<64x8xf32> to vector<64x8xbf16>
    %cst_23 = arith.constant dense<0.000000e+00> : vector<64x64xf32>
    %55 = tpu.matmul %53, %54, %cst_23 {dimension_numbers = #tpu.dot_dimension_numbers<[1], [1], [0], [0], [0, 0, 1, 0], [], []>} : vector<64x8xbf16>, vector<64x8xbf16>, vector<64x64xf32> -> vector<64x64xf32>
    %c0_24 = arith.constant 0 : index
    %c1 = arith.constant 1 : index
    %c0_25 = arith.constant 0 : index
    %c0_26 = arith.constant 0 : index
    %56 = vector.load %arg5[%c0_24, %c1, %c0_25, %c0_26] : memref<2x4x64x64xf32, #tpu.memory_space<vmem>>, vector<1x1x64x64xf32>
    %57 = vector.shape_cast %56 : vector<1x1x64x64xf32> to vector<64x64xf32>
    %58 = arith.addf %55, %57 : vector<64x64xf32>
    %cst_27 = arith.constant dense<0xFF800000> : vector<64xf32>
    %59 = vector.multi_reduction <maximumf>, %58, %cst_27 [1] : vector<64x64xf32> to vector<64xf32>
    %60 = vector.shape_cast %59 : vector<64xf32> to vector<64x1xf32>
    %61 = vector.broadcast %60 : vector<64x1xf32> to vector<64x64xf32>
    %62 = arith.subf %58, %61 : vector<64x64xf32>
    %63 = math.exp %62 : vector<64x64xf32>
    %cst_28 = arith.constant dense<0.000000e+00> : vector<64xf32>
    %64 = vector.multi_reduction <add>, %63, %cst_28 [1] : vector<64x64xf32> to vector<64xf32>
    %65 = vector.shape_cast %64 : vector<64xf32> to vector<64x1xf32>
    %66 = tpu.reciprocal %65 {approx = true} : vector<64x1xf32> -> vector<64x1xf32>
    %67 = vector.broadcast %66 : vector<64x1xf32> to vector<64x64xf32>
    %68 = arith.mulf %63, %67 : vector<64x64xf32>
    %69 = arith.truncf %68 : vector<64x64xf32> to vector<64x64xbf16>
    %70 = arith.truncf %52 : vector<64x8xf32> to vector<64x8xbf16>
    %cst_29 = arith.constant dense<0.000000e+00> : vector<64x8xf32>
    %71 = tpu.matmul %69, %70, %cst_29 {dimension_numbers = #tpu.dot_dimension_numbers<[1], [0], [0], [1], [0, 0, 1, 1], [], []>} : vector<64x64xbf16>, vector<64x8xbf16>, vector<64x8xf32> -> vector<64x8xf32>
    %72 = vector.extract_strided_slice %27 {offsets = [0, 16], sizes = [64, 8], strides = [1, 1]} : vector<64x96xf32> to vector<64x8xf32>
    %73 = vector.extract_strided_slice %27 {offsets = [0, 48], sizes = [64, 8], strides = [1, 1]} : vector<64x96xf32> to vector<64x8xf32>
    %74 = vector.extract_strided_slice %27 {offsets = [0, 80], sizes = [64, 8], strides = [1, 1]} : vector<64x96xf32> to vector<64x8xf32>
    %75 = arith.truncf %72 : vector<64x8xf32> to vector<64x8xbf16>
    %76 = arith.truncf %73 : vector<64x8xf32> to vector<64x8xbf16>
    %cst_30 = arith.constant dense<0.000000e+00> : vector<64x64xf32>
    %77 = tpu.matmul %75, %76, %cst_30 {dimension_numbers = #tpu.dot_dimension_numbers<[1], [1], [0], [0], [0, 0, 1, 0], [], []>} : vector<64x8xbf16>, vector<64x8xbf16>, vector<64x64xf32> -> vector<64x64xf32>
    %c0_31 = arith.constant 0 : index
    %c2 = arith.constant 2 : index
    %c0_32 = arith.constant 0 : index
    %c0_33 = arith.constant 0 : index
    %78 = vector.load %arg5[%c0_31, %c2, %c0_32, %c0_33] : memref<2x4x64x64xf32, #tpu.memory_space<vmem>>, vector<1x1x64x64xf32>
    %79 = vector.shape_cast %78 : vector<1x1x64x64xf32> to vector<64x64xf32>
    %80 = arith.addf %77, %79 : vector<64x64xf32>
    %cst_34 = arith.constant dense<0xFF800000> : vector<64xf32>
    %81 = vector.multi_reduction <maximumf>, %80, %cst_34 [1] : vector<64x64xf32> to vector<64xf32>
    %82 = vector.shape_cast %81 : vector<64xf32> to vector<64x1xf32>
    %83 = vector.broadcast %82 : vector<64x1xf32> to vector<64x64xf32>
    %84 = arith.subf %80, %83 : vector<64x64xf32>
    %85 = math.exp %84 : vector<64x64xf32>
    %cst_35 = arith.constant dense<0.000000e+00> : vector<64xf32>
    %86 = vector.multi_reduction <add>, %85, %cst_35 [1] : vector<64x64xf32> to vector<64xf32>
    %87 = vector.shape_cast %86 : vector<64xf32> to vector<64x1xf32>
    %88 = tpu.reciprocal %87 {approx = true} : vector<64x1xf32> -> vector<64x1xf32>
    %89 = vector.broadcast %88 : vector<64x1xf32> to vector<64x64xf32>
    %90 = arith.mulf %85, %89 : vector<64x64xf32>
    %91 = arith.truncf %90 : vector<64x64xf32> to vector<64x64xbf16>
    %92 = arith.truncf %74 : vector<64x8xf32> to vector<64x8xbf16>
    %cst_36 = arith.constant dense<0.000000e+00> : vector<64x8xf32>
    %93 = tpu.matmul %91, %92, %cst_36 {dimension_numbers = #tpu.dot_dimension_numbers<[1], [0], [0], [1], [0, 0, 1, 1], [], []>} : vector<64x64xbf16>, vector<64x8xbf16>, vector<64x8xf32> -> vector<64x8xf32>
    %94 = vector.extract_strided_slice %27 {offsets = [0, 24], sizes = [64, 8], strides = [1, 1]} : vector<64x96xf32> to vector<64x8xf32>
    %95 = vector.extract_strided_slice %27 {offsets = [0, 56], sizes = [64, 8], strides = [1, 1]} : vector<64x96xf32> to vector<64x8xf32>
    %96 = vector.extract_strided_slice %27 {offsets = [0, 88], sizes = [64, 8], strides = [1, 1]} : vector<64x96xf32> to vector<64x8xf32>
    %97 = arith.truncf %94 : vector<64x8xf32> to vector<64x8xbf16>
    %98 = arith.truncf %95 : vector<64x8xf32> to vector<64x8xbf16>
    %cst_37 = arith.constant dense<0.000000e+00> : vector<64x64xf32>
    %99 = tpu.matmul %97, %98, %cst_37 {dimension_numbers = #tpu.dot_dimension_numbers<[1], [1], [0], [0], [0, 0, 1, 0], [], []>} : vector<64x8xbf16>, vector<64x8xbf16>, vector<64x64xf32> -> vector<64x64xf32>
    %c0_38 = arith.constant 0 : index
    %c3 = arith.constant 3 : index
    %c0_39 = arith.constant 0 : index
    %c0_40 = arith.constant 0 : index
    %100 = vector.load %arg5[%c0_38, %c3, %c0_39, %c0_40] : memref<2x4x64x64xf32, #tpu.memory_space<vmem>>, vector<1x1x64x64xf32>
    %101 = vector.shape_cast %100 : vector<1x1x64x64xf32> to vector<64x64xf32>
    %102 = arith.addf %99, %101 : vector<64x64xf32>
    %cst_41 = arith.constant dense<0xFF800000> : vector<64xf32>
    %103 = vector.multi_reduction <maximumf>, %102, %cst_41 [1] : vector<64x64xf32> to vector<64xf32>
    %104 = vector.shape_cast %103 : vector<64xf32> to vector<64x1xf32>
    %105 = vector.broadcast %104 : vector<64x1xf32> to vector<64x64xf32>
    %106 = arith.subf %102, %105 : vector<64x64xf32>
    %107 = math.exp %106 : vector<64x64xf32>
    %cst_42 = arith.constant dense<0.000000e+00> : vector<64xf32>
    %108 = vector.multi_reduction <add>, %107, %cst_42 [1] : vector<64x64xf32> to vector<64xf32>
    %109 = vector.shape_cast %108 : vector<64xf32> to vector<64x1xf32>
    %110 = tpu.reciprocal %109 {approx = true} : vector<64x1xf32> -> vector<64x1xf32>
    %111 = vector.broadcast %110 : vector<64x1xf32> to vector<64x64xf32>
    %112 = arith.mulf %107, %111 : vector<64x64xf32>
    %113 = arith.truncf %112 : vector<64x64xf32> to vector<64x64xbf16>
    %114 = arith.truncf %96 : vector<64x8xf32> to vector<64x8xbf16>
    %cst_43 = arith.constant dense<0.000000e+00> : vector<64x8xf32>
    %115 = tpu.matmul %113, %114, %cst_43 {dimension_numbers = #tpu.dot_dimension_numbers<[1], [0], [0], [1], [0, 0, 1, 1], [], []>} : vector<64x64xbf16>, vector<64x8xbf16>, vector<64x8xf32> -> vector<64x8xf32>
    %116 = tpu.concatenate %49, %71, %93, %115 in 1 : vector<64x8xf32>, vector<64x8xf32>, vector<64x8xf32>, vector<64x8xf32> -> vector<64x32xf32>
    %c0_44 = arith.constant 0 : index
    %c0_45 = arith.constant 0 : index
    %c0_46 = arith.constant 0 : index
    %117 = vector.load %arg6[%c0_44, %c0_45, %c0_46] : memref<2x32x32xf32, #tpu.memory_space<vmem>>, vector<1x32x32xf32>
    %118 = vector.shape_cast %117 : vector<1x32x32xf32> to vector<32x32xf32>
    %119 = arith.truncf %116 : vector<64x32xf32> to vector<64x32xbf16>
    %120 = arith.truncf %118 : vector<32x32xf32> to vector<32x32xbf16>
    %cst_47 = arith.constant dense<0.000000e+00> : vector<64x32xf32>
    %121 = tpu.matmul %119, %120, %cst_47 {dimension_numbers = #tpu.dot_dimension_numbers<[1], [0], [0], [1], [0, 0, 1, 1], [], []>} : vector<64x32xbf16>, vector<32x32xbf16>, vector<64x32xf32> -> vector<64x32xf32>
    %122 = arith.addf %1, %121 : vector<64x32xf32>
    %c0_48 = arith.constant 0 : index
    %c0_49 = arith.constant 0 : index
    %c0_50 = arith.constant 0 : index
    %123 = vector.load %arg7[%c0_48, %c0_49, %c0_50] : memref<2x1x32xf32, #tpu.memory_space<vmem>>, vector<1x1x32xf32>
    %124 = vector.shape_cast %123 : vector<1x1x32xf32> to vector<1x32xf32>
    %125 = vector.broadcast %124 : vector<1x32xf32> to vector<64x32xf32>
    %126 = arith.addf %122, %125 : vector<64x32xf32>
    %cst_51 = arith.constant dense<0.000000e+00> : vector<64xf32>
    %127 = vector.multi_reduction <add>, %126, %cst_51 [1] : vector<64x32xf32> to vector<64xf32>
    %128 = vector.shape_cast %127 : vector<64xf32> to vector<64x1xf32>
    %cst_52 = arith.constant 3.200000e+01 : f32
    %129 = vector.broadcast %cst_52 : f32 to vector<64x1xf32>
    %130 = arith.divf %128, %129 : vector<64x1xf32>
    %131 = vector.broadcast %130 : vector<64x1xf32> to vector<64x32xf32>
    %132 = arith.subf %126, %131 : vector<64x32xf32>
    %133 = arith.mulf %132, %132 : vector<64x32xf32>
    %cst_53 = arith.constant dense<0.000000e+00> : vector<64xf32>
    %134 = vector.multi_reduction <add>, %133, %cst_53 [1] : vector<64x32xf32> to vector<64xf32>
    %135 = vector.shape_cast %134 : vector<64xf32> to vector<64x1xf32>
    %cst_54 = arith.constant 3.200000e+01 : f32
    %136 = vector.broadcast %cst_54 : f32 to vector<64x1xf32>
    %137 = arith.divf %135, %136 : vector<64x1xf32>
    %cst_55 = arith.constant 9.99999974E-6 : f32
    %138 = vector.broadcast %cst_55 : f32 to vector<64x1xf32>
    %139 = arith.addf %137, %138 : vector<64x1xf32>
    %140 = math.rsqrt %139 : vector<64x1xf32>
    %141 = vector.broadcast %140 : vector<64x1xf32> to vector<64x32xf32>
    %142 = arith.mulf %132, %141 : vector<64x32xf32>
    %c0_56 = arith.constant 0 : index
    %c0_57 = arith.constant 0 : index
    %c0_58 = arith.constant 0 : index
    %143 = vector.load %arg8[%c0_56, %c0_57, %c0_58] : memref<2x32x128xf32, #tpu.memory_space<vmem>>, vector<1x32x128xf32>
    %144 = vector.shape_cast %143 : vector<1x32x128xf32> to vector<32x128xf32>
    %145 = arith.truncf %142 : vector<64x32xf32> to vector<64x32xbf16>
    %146 = arith.truncf %144 : vector<32x128xf32> to vector<32x128xbf16>
    %cst_59 = arith.constant dense<0.000000e+00> : vector<64x128xf32>
    %147 = tpu.matmul %145, %146, %cst_59 {dimension_numbers = #tpu.dot_dimension_numbers<[1], [0], [0], [1], [0, 0, 1, 1], [], []>} : vector<64x32xbf16>, vector<32x128xbf16>, vector<64x128xf32> -> vector<64x128xf32>
    %c0_60 = arith.constant 0 : index
    %c0_61 = arith.constant 0 : index
    %c0_62 = arith.constant 0 : index
    %148 = vector.load %arg9[%c0_60, %c0_61, %c0_62] : memref<2x1x128xf32, #tpu.memory_space<vmem>>, vector<1x1x128xf32>
    %149 = vector.shape_cast %148 : vector<1x1x128xf32> to vector<1x128xf32>
    %150 = vector.broadcast %149 : vector<1x128xf32> to vector<64x128xf32>
    %151 = arith.addf %147, %150 : vector<64x128xf32>
    %cst_63 = arith.constant 5.000000e-01 : f32
    %152 = vector.broadcast %cst_63 : f32 to vector<64x128xf32>
    %153 = arith.mulf %152, %151 : vector<64x128xf32>
    %cst_64 = arith.constant 0.707106769 : f32
    %154 = vector.broadcast %cst_64 : f32 to vector<64x128xf32>
    %155 = arith.mulf %151, %154 : vector<64x128xf32>
    %cst_65 = arith.constant 0.000000e+00 : f32
    %156 = vector.broadcast %cst_65 : f32 to vector<64x128xf32>
    %157 = arith.cmpf oge, %155, %156 : vector<64x128xf32>
    %cst_66 = arith.constant 1.000000e+00 : f32
    %cst_67 = arith.constant -1.000000e+00 : f32
    %158 = vector.broadcast %cst_66 : f32 to vector<64x128xf32>
    %159 = vector.broadcast %cst_67 : f32 to vector<64x128xf32>
    %160 = arith.select %157, %158, %159 : vector<64x128xi1>, vector<64x128xf32>
    %161 = math.absf %155 : vector<64x128xf32>
    %cst_68 = arith.constant 0.327591091 : f32
    %162 = vector.broadcast %cst_68 : f32 to vector<64x128xf32>
    %163 = arith.mulf %162, %161 : vector<64x128xf32>
    %cst_69 = arith.constant 1.000000e+00 : f32
    %164 = vector.broadcast %cst_69 : f32 to vector<64x128xf32>
    %165 = arith.addf %164, %163 : vector<64x128xf32>
    %166 = tpu.reciprocal %165 : vector<64x128xf32> -> vector<64x128xf32>
    %cst_70 = arith.constant 1.06140542 : f32
    %167 = vector.broadcast %cst_70 : f32 to vector<64x128xf32>
    %168 = arith.mulf %167, %166 : vector<64x128xf32>
    %cst_71 = arith.constant -1.45315206 : f32
    %169 = vector.broadcast %cst_71 : f32 to vector<64x128xf32>
    %170 = arith.addf %168, %169 : vector<64x128xf32>
    %171 = arith.mulf %170, %166 : vector<64x128xf32>
    %cst_72 = arith.constant 1.42141378 : f32
    %172 = vector.broadcast %cst_72 : f32 to vector<64x128xf32>
    %173 = arith.addf %171, %172 : vector<64x128xf32>
    %174 = arith.mulf %173, %166 : vector<64x128xf32>
    %cst_73 = arith.constant -0.284496725 : f32
    %175 = vector.broadcast %cst_73 : f32 to vector<64x128xf32>
    %176 = arith.addf %174, %175 : vector<64x128xf32>
    %177 = arith.mulf %176, %166 : vector<64x128xf32>
    %cst_74 = arith.constant 0.254829586 : f32
    %178 = vector.broadcast %cst_74 : f32 to vector<64x128xf32>
    %179 = arith.addf %177, %178 : vector<64x128xf32>
    %180 = arith.mulf %179, %166 : vector<64x128xf32>
    %cst_75 = arith.constant 0.000000e+00 : f32
    %181 = vector.broadcast %cst_75 : f32 to vector<64x128xf32>
    %182 = arith.subf %181, %161 : vector<64x128xf32>
    %183 = arith.mulf %182, %161 : vector<64x128xf32>
    %184 = math.exp %183 : vector<64x128xf32>
    %185 = arith.mulf %180, %184 : vector<64x128xf32>
    %cst_76 = arith.constant 1.000000e+00 : f32
    %186 = vector.broadcast %cst_76 : f32 to vector<64x128xf32>
    %187 = arith.subf %186, %185 : vector<64x128xf32>
    %188 = arith.mulf %160, %187 : vector<64x128xf32>
    %cst_77 = arith.constant 1.000000e+00 : f32
    %189 = vector.broadcast %cst_77 : f32 to vector<64x128xf32>
    %190 = arith.addf %189, %188 : vector<64x128xf32>
    %191 = arith.mulf %153, %190 : vector<64x128xf32>
    %c0_78 = arith.constant 0 : index
    %c0_79 = arith.constant 0 : index
    %c0_80 = arith.constant 0 : index
    %c0_81 = arith.constant 0 : index
    %192 = vector.load %arg10[%c0_78, %c0_79, %c0_80, %c0_81] : memref<2x3x3x128xf32, #tpu.memory_space<vmem>>, vector<1x3x3x128xf32>
    %193 = vector.shape_cast %192 : vector<1x3x3x128xf32> to vector<3x3x128xf32>
    %c0_82 = arith.constant 0 : index
    %c0_83 = arith.constant 0 : index
    %c0_84 = arith.constant 0 : index
    %194 = vector.load %arg11[%c0_82, %c0_83, %c0_84] : memref<2x1x128xf32, #tpu.memory_space<vmem>>, vector<1x1x128xf32>
    %195 = vector.shape_cast %194 : vector<1x1x128xf32> to vector<1x128xf32>
    %196 = vector.extract_strided_slice %193 {offsets = [1, 1, 0], sizes = [1, 1, 128], strides = [1, 1, 1]} : vector<3x3x128xf32> to vector<1x1x128xf32>
    %197 = vector.shape_cast %196 : vector<1x1x128xf32> to vector<128xf32>
    %198 = vector.shape_cast %197 : vector<128xf32> to vector<1x128xf32>
    %199 = vector.broadcast %198 : vector<1x128xf32> to vector<64x128xf32>
    %200 = arith.mulf %191, %199 : vector<64x128xf32>
    %c9_i32 = arith.constant 9 : i32
    %201 = tpu.dynamic_rotate %191 by %c9_i32 dim 0 : vector<64x128xf32>, i32 -> vector<64x128xf32>
    %202 = vector.extract_strided_slice %2 {offsets = [0, 0], sizes = [64, 1], strides = [1, 1]} : vector<64x9xf32> to vector<64x1xf32>
    %203 = vector.broadcast %202 : vector<64x1xf32> to vector<64x128xf32>
    %204 = arith.mulf %201, %203 : vector<64x128xf32>
    %205 = vector.extract_strided_slice %193 {offsets = [0, 0, 0], sizes = [1, 1, 128], strides = [1, 1, 1]} : vector<3x3x128xf32> to vector<1x1x128xf32>
    %206 = vector.shape_cast %205 : vector<1x1x128xf32> to vector<128xf32>
    %207 = vector.shape_cast %206 : vector<128xf32> to vector<1x128xf32>
    %208 = vector.broadcast %207 : vector<1x128xf32> to vector<64x128xf32>
    %209 = arith.mulf %204, %208 : vector<64x128xf32>
    %210 = arith.addf %200, %209 : vector<64x128xf32>
    %c8_i32 = arith.constant 8 : i32
    %211 = tpu.dynamic_rotate %191 by %c8_i32 dim 0 : vector<64x128xf32>, i32 -> vector<64x128xf32>
    %212 = vector.extract_strided_slice %2 {offsets = [0, 1], sizes = [64, 1], strides = [1, 1]} : vector<64x9xf32> to vector<64x1xf32>
    %213 = vector.broadcast %212 : vector<64x1xf32> to vector<64x128xf32>
    %214 = arith.mulf %211, %213 : vector<64x128xf32>
    %215 = vector.extract_strided_slice %193 {offsets = [0, 1, 0], sizes = [1, 1, 128], strides = [1, 1, 1]} : vector<3x3x128xf32> to vector<1x1x128xf32>
    %216 = vector.shape_cast %215 : vector<1x1x128xf32> to vector<128xf32>
    %217 = vector.shape_cast %216 : vector<128xf32> to vector<1x128xf32>
    %218 = vector.broadcast %217 : vector<1x128xf32> to vector<64x128xf32>
    %219 = arith.mulf %214, %218 : vector<64x128xf32>
    %220 = arith.addf %210, %219 : vector<64x128xf32>
    %c7_i32 = arith.constant 7 : i32
    %221 = tpu.dynamic_rotate %191 by %c7_i32 dim 0 : vector<64x128xf32>, i32 -> vector<64x128xf32>
    %222 = vector.extract_strided_slice %2 {offsets = [0, 2], sizes = [64, 1], strides = [1, 1]} : vector<64x9xf32> to vector<64x1xf32>
    %223 = vector.broadcast %222 : vector<64x1xf32> to vector<64x128xf32>
    %224 = arith.mulf %221, %223 : vector<64x128xf32>
    %225 = vector.extract_strided_slice %193 {offsets = [0, 2, 0], sizes = [1, 1, 128], strides = [1, 1, 1]} : vector<3x3x128xf32> to vector<1x1x128xf32>
    %226 = vector.shape_cast %225 : vector<1x1x128xf32> to vector<128xf32>
    %227 = vector.shape_cast %226 : vector<128xf32> to vector<1x128xf32>
    %228 = vector.broadcast %227 : vector<1x128xf32> to vector<64x128xf32>
    %229 = arith.mulf %224, %228 : vector<64x128xf32>
    %230 = arith.addf %220, %229 : vector<64x128xf32>
    %c1_i32 = arith.constant 1 : i32
    %231 = tpu.dynamic_rotate %191 by %c1_i32 dim 0 : vector<64x128xf32>, i32 -> vector<64x128xf32>
    %232 = vector.extract_strided_slice %2 {offsets = [0, 3], sizes = [64, 1], strides = [1, 1]} : vector<64x9xf32> to vector<64x1xf32>
    %233 = vector.broadcast %232 : vector<64x1xf32> to vector<64x128xf32>
    %234 = arith.mulf %231, %233 : vector<64x128xf32>
    %235 = vector.extract_strided_slice %193 {offsets = [1, 0, 0], sizes = [1, 1, 128], strides = [1, 1, 1]} : vector<3x3x128xf32> to vector<1x1x128xf32>
    %236 = vector.shape_cast %235 : vector<1x1x128xf32> to vector<128xf32>
    %237 = vector.shape_cast %236 : vector<128xf32> to vector<1x128xf32>
    %238 = vector.broadcast %237 : vector<1x128xf32> to vector<64x128xf32>
    %239 = arith.mulf %234, %238 : vector<64x128xf32>
    %240 = arith.addf %230, %239 : vector<64x128xf32>
    %c63_i32 = arith.constant 63 : i32
    %241 = tpu.dynamic_rotate %191 by %c63_i32 dim 0 : vector<64x128xf32>, i32 -> vector<64x128xf32>
    %242 = vector.extract_strided_slice %2 {offsets = [0, 5], sizes = [64, 1], strides = [1, 1]} : vector<64x9xf32> to vector<64x1xf32>
    %243 = vector.broadcast %242 : vector<64x1xf32> to vector<64x128xf32>
    %244 = arith.mulf %241, %243 : vector<64x128xf32>
    %245 = vector.extract_strided_slice %193 {offsets = [1, 2, 0], sizes = [1, 1, 128], strides = [1, 1, 1]} : vector<3x3x128xf32> to vector<1x1x128xf32>
    %246 = vector.shape_cast %245 : vector<1x1x128xf32> to vector<128xf32>
    %247 = vector.shape_cast %246 : vector<128xf32> to vector<1x128xf32>
    %248 = vector.broadcast %247 : vector<1x128xf32> to vector<64x128xf32>
    %249 = arith.mulf %244, %248 : vector<64x128xf32>
    %250 = arith.addf %240, %249 : vector<64x128xf32>
    %c57_i32 = arith.constant 57 : i32
    %251 = tpu.dynamic_rotate %191 by %c57_i32 dim 0 : vector<64x128xf32>, i32 -> vector<64x128xf32>
    %252 = vector.extract_strided_slice %2 {offsets = [0, 6], sizes = [64, 1], strides = [1, 1]} : vector<64x9xf32> to vector<64x1xf32>
    %253 = vector.broadcast %252 : vector<64x1xf32> to vector<64x128xf32>
    %254 = arith.mulf %251, %253 : vector<64x128xf32>
    %255 = vector.extract_strided_slice %193 {offsets = [2, 0, 0], sizes = [1, 1, 128], strides = [1, 1, 1]} : vector<3x3x128xf32> to vector<1x1x128xf32>
    %256 = vector.shape_cast %255 : vector<1x1x128xf32> to vector<128xf32>
    %257 = vector.shape_cast %256 : vector<128xf32> to vector<1x128xf32>
    %258 = vector.broadcast %257 : vector<1x128xf32> to vector<64x128xf32>
    %259 = arith.mulf %254, %258 : vector<64x128xf32>
    %260 = arith.addf %250, %259 : vector<64x128xf32>
    %c56_i32 = arith.constant 56 : i32
    %261 = tpu.dynamic_rotate %191 by %c56_i32 dim 0 : vector<64x128xf32>, i32 -> vector<64x128xf32>
    %262 = vector.extract_strided_slice %2 {offsets = [0, 7], sizes = [64, 1], strides = [1, 1]} : vector<64x9xf32> to vector<64x1xf32>
    %263 = vector.broadcast %262 : vector<64x1xf32> to vector<64x128xf32>
    %264 = arith.mulf %261, %263 : vector<64x128xf32>
    %265 = vector.extract_strided_slice %193 {offsets = [2, 1, 0], sizes = [1, 1, 128], strides = [1, 1, 1]} : vector<3x3x128xf32> to vector<1x1x128xf32>
    %266 = vector.shape_cast %265 : vector<1x1x128xf32> to vector<128xf32>
    %267 = vector.shape_cast %266 : vector<128xf32> to vector<1x128xf32>
    %268 = vector.broadcast %267 : vector<1x128xf32> to vector<64x128xf32>
    %269 = arith.mulf %264, %268 : vector<64x128xf32>
    %270 = arith.addf %260, %269 : vector<64x128xf32>
    %c55_i32 = arith.constant 55 : i32
    %271 = tpu.dynamic_rotate %191 by %c55_i32 dim 0 : vector<64x128xf32>, i32 -> vector<64x128xf32>
    %272 = vector.extract_strided_slice %2 {offsets = [0, 8], sizes = [64, 1], strides = [1, 1]} : vector<64x9xf32> to vector<64x1xf32>
    %273 = vector.broadcast %272 : vector<64x1xf32> to vector<64x128xf32>
    %274 = arith.mulf %271, %273 : vector<64x128xf32>
    %275 = vector.extract_strided_slice %193 {offsets = [2, 2, 0], sizes = [1, 1, 128], strides = [1, 1, 1]} : vector<3x3x128xf32> to vector<1x1x128xf32>
    %276 = vector.shape_cast %275 : vector<1x1x128xf32> to vector<128xf32>
    %277 = vector.shape_cast %276 : vector<128xf32> to vector<1x128xf32>
    %278 = vector.broadcast %277 : vector<1x128xf32> to vector<64x128xf32>
    %279 = arith.mulf %274, %278 : vector<64x128xf32>
    %280 = arith.addf %270, %279 : vector<64x128xf32>
    %281 = vector.broadcast %195 : vector<1x128xf32> to vector<64x128xf32>
    %282 = arith.addf %280, %281 : vector<64x128xf32>
    %cst_85 = arith.constant 5.000000e-01 : f32
    %283 = vector.broadcast %cst_85 : f32 to vector<64x128xf32>
    %284 = arith.mulf %283, %282 : vector<64x128xf32>
    %cst_86 = arith.constant 0.707106769 : f32
    %285 = vector.broadcast %cst_86 : f32 to vector<64x128xf32>
    %286 = arith.mulf %282, %285 : vector<64x128xf32>
    %cst_87 = arith.constant 0.000000e+00 : f32
    %287 = vector.broadcast %cst_87 : f32 to vector<64x128xf32>
    %288 = arith.cmpf oge, %286, %287 : vector<64x128xf32>
    %cst_88 = arith.constant 1.000000e+00 : f32
    %cst_89 = arith.constant -1.000000e+00 : f32
    %289 = vector.broadcast %cst_88 : f32 to vector<64x128xf32>
    %290 = vector.broadcast %cst_89 : f32 to vector<64x128xf32>
    %291 = arith.select %288, %289, %290 : vector<64x128xi1>, vector<64x128xf32>
    %292 = math.absf %286 : vector<64x128xf32>
    %cst_90 = arith.constant 0.327591091 : f32
    %293 = vector.broadcast %cst_90 : f32 to vector<64x128xf32>
    %294 = arith.mulf %293, %292 : vector<64x128xf32>
    %cst_91 = arith.constant 1.000000e+00 : f32
    %295 = vector.broadcast %cst_91 : f32 to vector<64x128xf32>
    %296 = arith.addf %295, %294 : vector<64x128xf32>
    %297 = tpu.reciprocal %296 : vector<64x128xf32> -> vector<64x128xf32>
    %cst_92 = arith.constant 1.06140542 : f32
    %298 = vector.broadcast %cst_92 : f32 to vector<64x128xf32>
    %299 = arith.mulf %298, %297 : vector<64x128xf32>
    %cst_93 = arith.constant -1.45315206 : f32
    %300 = vector.broadcast %cst_93 : f32 to vector<64x128xf32>
    %301 = arith.addf %299, %300 : vector<64x128xf32>
    %302 = arith.mulf %301, %297 : vector<64x128xf32>
    %cst_94 = arith.constant 1.42141378 : f32
    %303 = vector.broadcast %cst_94 : f32 to vector<64x128xf32>
    %304 = arith.addf %302, %303 : vector<64x128xf32>
    %305 = arith.mulf %304, %297 : vector<64x128xf32>
    %cst_95 = arith.constant -0.284496725 : f32
    %306 = vector.broadcast %cst_95 : f32 to vector<64x128xf32>
    %307 = arith.addf %305, %306 : vector<64x128xf32>
    %308 = arith.mulf %307, %297 : vector<64x128xf32>
    %cst_96 = arith.constant 0.254829586 : f32
    %309 = vector.broadcast %cst_96 : f32 to vector<64x128xf32>
    %310 = arith.addf %308, %309 : vector<64x128xf32>
    %311 = arith.mulf %310, %297 : vector<64x128xf32>
    %cst_97 = arith.constant 0.000000e+00 : f32
    %312 = vector.broadcast %cst_97 : f32 to vector<64x128xf32>
    %313 = arith.subf %312, %292 : vector<64x128xf32>
    %314 = arith.mulf %313, %292 : vector<64x128xf32>
    %315 = math.exp %314 : vector<64x128xf32>
    %316 = arith.mulf %311, %315 : vector<64x128xf32>
    %cst_98 = arith.constant 1.000000e+00 : f32
    %317 = vector.broadcast %cst_98 : f32 to vector<64x128xf32>
    %318 = arith.subf %317, %316 : vector<64x128xf32>
    %319 = arith.mulf %291, %318 : vector<64x128xf32>
    %cst_99 = arith.constant 1.000000e+00 : f32
    %320 = vector.broadcast %cst_99 : f32 to vector<64x128xf32>
    %321 = arith.addf %320, %319 : vector<64x128xf32>
    %322 = arith.mulf %284, %321 : vector<64x128xf32>
    %c0_100 = arith.constant 0 : index
    %c0_101 = arith.constant 0 : index
    %c0_102 = arith.constant 0 : index
    %323 = vector.load %arg12[%c0_100, %c0_101, %c0_102] : memref<2x128x32xf32, #tpu.memory_space<vmem>>, vector<1x128x32xf32>
    %324 = vector.shape_cast %323 : vector<1x128x32xf32> to vector<128x32xf32>
    %325 = arith.truncf %322 : vector<64x128xf32> to vector<64x128xbf16>
    %326 = arith.truncf %324 : vector<128x32xf32> to vector<128x32xbf16>
    %cst_103 = arith.constant dense<0.000000e+00> : vector<64x32xf32>
    %327 = tpu.matmul %325, %326, %cst_103 {dimension_numbers = #tpu.dot_dimension_numbers<[1], [0], [0], [1], [0, 0, 1, 1], [], []>} : vector<64x128xbf16>, vector<128x32xbf16>, vector<64x32xf32> -> vector<64x32xf32>
    %328 = arith.addf %126, %327 : vector<64x32xf32>
    %c0_104 = arith.constant 0 : index
    %c0_105 = arith.constant 0 : index
    %c0_106 = arith.constant 0 : index
    %329 = vector.load %arg13[%c0_104, %c0_105, %c0_106] : memref<2x1x32xf32, #tpu.memory_space<vmem>>, vector<1x1x32xf32>
    %330 = vector.shape_cast %329 : vector<1x1x32xf32> to vector<1x32xf32>
    %331 = vector.broadcast %330 : vector<1x32xf32> to vector<64x32xf32>
    %332 = arith.addf %328, %331 : vector<64x32xf32>
    %cst_107 = arith.constant dense<0.000000e+00> : vector<64xf32>
    %333 = vector.multi_reduction <add>, %332, %cst_107 [1] : vector<64x32xf32> to vector<64xf32>
    %334 = vector.shape_cast %333 : vector<64xf32> to vector<64x1xf32>
    %cst_108 = arith.constant 3.200000e+01 : f32
    %335 = vector.broadcast %cst_108 : f32 to vector<64x1xf32>
    %336 = arith.divf %334, %335 : vector<64x1xf32>
    %337 = vector.broadcast %336 : vector<64x1xf32> to vector<64x32xf32>
    %338 = arith.subf %332, %337 : vector<64x32xf32>
    %339 = arith.mulf %338, %338 : vector<64x32xf32>
    %cst_109 = arith.constant dense<0.000000e+00> : vector<64xf32>
    %340 = vector.multi_reduction <add>, %339, %cst_109 [1] : vector<64x32xf32> to vector<64xf32>
    %341 = vector.shape_cast %340 : vector<64xf32> to vector<64x1xf32>
    %cst_110 = arith.constant 3.200000e+01 : f32
    %342 = vector.broadcast %cst_110 : f32 to vector<64x1xf32>
    %343 = arith.divf %341, %342 : vector<64x1xf32>
    %cst_111 = arith.constant 9.99999974E-6 : f32
    %344 = vector.broadcast %cst_111 : f32 to vector<64x1xf32>
    %345 = arith.addf %343, %344 : vector<64x1xf32>
    %346 = math.rsqrt %345 : vector<64x1xf32>
    %347 = vector.broadcast %346 : vector<64x1xf32> to vector<64x32xf32>
    %348 = arith.mulf %338, %347 : vector<64x32xf32>
    %c1_112 = arith.constant 1 : index
    %c0_113 = arith.constant 0 : index
    %c0_114 = arith.constant 0 : index
    %349 = vector.load %arg3[%c1_112, %c0_113, %c0_114] : memref<2x32x96xf32, #tpu.memory_space<vmem>>, vector<1x32x96xf32>
    %350 = vector.shape_cast %349 : vector<1x32x96xf32> to vector<32x96xf32>
    %351 = arith.truncf %348 : vector<64x32xf32> to vector<64x32xbf16>
    %352 = arith.truncf %350 : vector<32x96xf32> to vector<32x96xbf16>
    %cst_115 = arith.constant dense<0.000000e+00> : vector<64x96xf32>
    %353 = tpu.matmul %351, %352, %cst_115 {dimension_numbers = #tpu.dot_dimension_numbers<[1], [0], [0], [1], [0, 0, 1, 1], [], []>} : vector<64x32xbf16>, vector<32x96xbf16>, vector<64x96xf32> -> vector<64x96xf32>
    %c1_116 = arith.constant 1 : index
    %c0_117 = arith.constant 0 : index
    %c0_118 = arith.constant 0 : index
    %354 = vector.load %arg4[%c1_116, %c0_117, %c0_118] : memref<2x1x96xf32, #tpu.memory_space<vmem>>, vector<1x1x96xf32>
    %355 = vector.shape_cast %354 : vector<1x1x96xf32> to vector<1x96xf32>
    %356 = vector.broadcast %355 : vector<1x96xf32> to vector<64x96xf32>
    %357 = arith.addf %353, %356 : vector<64x96xf32>
    %358 = vector.extract_strided_slice %357 {offsets = [0, 0], sizes = [64, 8], strides = [1, 1]} : vector<64x96xf32> to vector<64x8xf32>
    %359 = vector.extract_strided_slice %357 {offsets = [0, 32], sizes = [64, 8], strides = [1, 1]} : vector<64x96xf32> to vector<64x8xf32>
    %360 = vector.extract_strided_slice %357 {offsets = [0, 64], sizes = [64, 8], strides = [1, 1]} : vector<64x96xf32> to vector<64x8xf32>
    %361 = arith.truncf %358 : vector<64x8xf32> to vector<64x8xbf16>
    %362 = arith.truncf %359 : vector<64x8xf32> to vector<64x8xbf16>
    %cst_119 = arith.constant dense<0.000000e+00> : vector<64x64xf32>
    %363 = tpu.matmul %361, %362, %cst_119 {dimension_numbers = #tpu.dot_dimension_numbers<[1], [1], [0], [0], [0, 0, 1, 0], [], []>} : vector<64x8xbf16>, vector<64x8xbf16>, vector<64x64xf32> -> vector<64x64xf32>
    %c1_120 = arith.constant 1 : index
    %c0_121 = arith.constant 0 : index
    %c0_122 = arith.constant 0 : index
    %c0_123 = arith.constant 0 : index
    %364 = vector.load %arg5[%c1_120, %c0_121, %c0_122, %c0_123] : memref<2x4x64x64xf32, #tpu.memory_space<vmem>>, vector<1x1x64x64xf32>
    %365 = vector.shape_cast %364 : vector<1x1x64x64xf32> to vector<64x64xf32>
    %366 = arith.addf %363, %365 : vector<64x64xf32>
    %cst_124 = arith.constant dense<0xFF800000> : vector<64xf32>
    %367 = vector.multi_reduction <maximumf>, %366, %cst_124 [1] : vector<64x64xf32> to vector<64xf32>
    %368 = vector.shape_cast %367 : vector<64xf32> to vector<64x1xf32>
    %369 = vector.broadcast %368 : vector<64x1xf32> to vector<64x64xf32>
    %370 = arith.subf %366, %369 : vector<64x64xf32>
    %371 = math.exp %370 : vector<64x64xf32>
    %cst_125 = arith.constant dense<0.000000e+00> : vector<64xf32>
    %372 = vector.multi_reduction <add>, %371, %cst_125 [1] : vector<64x64xf32> to vector<64xf32>
    %373 = vector.shape_cast %372 : vector<64xf32> to vector<64x1xf32>
    %374 = tpu.reciprocal %373 {approx = true} : vector<64x1xf32> -> vector<64x1xf32>
    %375 = vector.broadcast %374 : vector<64x1xf32> to vector<64x64xf32>
    %376 = arith.mulf %371, %375 : vector<64x64xf32>
    %377 = arith.truncf %376 : vector<64x64xf32> to vector<64x64xbf16>
    %378 = arith.truncf %360 : vector<64x8xf32> to vector<64x8xbf16>
    %cst_126 = arith.constant dense<0.000000e+00> : vector<64x8xf32>
    %379 = tpu.matmul %377, %378, %cst_126 {dimension_numbers = #tpu.dot_dimension_numbers<[1], [0], [0], [1], [0, 0, 1, 1], [], []>} : vector<64x64xbf16>, vector<64x8xbf16>, vector<64x8xf32> -> vector<64x8xf32>
    %380 = vector.extract_strided_slice %357 {offsets = [0, 8], sizes = [64, 8], strides = [1, 1]} : vector<64x96xf32> to vector<64x8xf32>
    %381 = vector.extract_strided_slice %357 {offsets = [0, 40], sizes = [64, 8], strides = [1, 1]} : vector<64x96xf32> to vector<64x8xf32>
    %382 = vector.extract_strided_slice %357 {offsets = [0, 72], sizes = [64, 8], strides = [1, 1]} : vector<64x96xf32> to vector<64x8xf32>
    %383 = arith.truncf %380 : vector<64x8xf32> to vector<64x8xbf16>
    %384 = arith.truncf %381 : vector<64x8xf32> to vector<64x8xbf16>
    %cst_127 = arith.constant dense<0.000000e+00> : vector<64x64xf32>
    %385 = tpu.matmul %383, %384, %cst_127 {dimension_numbers = #tpu.dot_dimension_numbers<[1], [1], [0], [0], [0, 0, 1, 0], [], []>} : vector<64x8xbf16>, vector<64x8xbf16>, vector<64x64xf32> -> vector<64x64xf32>
    %c1_128 = arith.constant 1 : index
    %c1_129 = arith.constant 1 : index
    %c0_130 = arith.constant 0 : index
    %c0_131 = arith.constant 0 : index
    %386 = vector.load %arg5[%c1_128, %c1_129, %c0_130, %c0_131] : memref<2x4x64x64xf32, #tpu.memory_space<vmem>>, vector<1x1x64x64xf32>
    %387 = vector.shape_cast %386 : vector<1x1x64x64xf32> to vector<64x64xf32>
    %388 = arith.addf %385, %387 : vector<64x64xf32>
    %cst_132 = arith.constant dense<0xFF800000> : vector<64xf32>
    %389 = vector.multi_reduction <maximumf>, %388, %cst_132 [1] : vector<64x64xf32> to vector<64xf32>
    %390 = vector.shape_cast %389 : vector<64xf32> to vector<64x1xf32>
    %391 = vector.broadcast %390 : vector<64x1xf32> to vector<64x64xf32>
    %392 = arith.subf %388, %391 : vector<64x64xf32>
    %393 = math.exp %392 : vector<64x64xf32>
    %cst_133 = arith.constant dense<0.000000e+00> : vector<64xf32>
    %394 = vector.multi_reduction <add>, %393, %cst_133 [1] : vector<64x64xf32> to vector<64xf32>
    %395 = vector.shape_cast %394 : vector<64xf32> to vector<64x1xf32>
    %396 = tpu.reciprocal %395 {approx = true} : vector<64x1xf32> -> vector<64x1xf32>
    %397 = vector.broadcast %396 : vector<64x1xf32> to vector<64x64xf32>
    %398 = arith.mulf %393, %397 : vector<64x64xf32>
    %399 = arith.truncf %398 : vector<64x64xf32> to vector<64x64xbf16>
    %400 = arith.truncf %382 : vector<64x8xf32> to vector<64x8xbf16>
    %cst_134 = arith.constant dense<0.000000e+00> : vector<64x8xf32>
    %401 = tpu.matmul %399, %400, %cst_134 {dimension_numbers = #tpu.dot_dimension_numbers<[1], [0], [0], [1], [0, 0, 1, 1], [], []>} : vector<64x64xbf16>, vector<64x8xbf16>, vector<64x8xf32> -> vector<64x8xf32>
    %402 = vector.extract_strided_slice %357 {offsets = [0, 16], sizes = [64, 8], strides = [1, 1]} : vector<64x96xf32> to vector<64x8xf32>
    %403 = vector.extract_strided_slice %357 {offsets = [0, 48], sizes = [64, 8], strides = [1, 1]} : vector<64x96xf32> to vector<64x8xf32>
    %404 = vector.extract_strided_slice %357 {offsets = [0, 80], sizes = [64, 8], strides = [1, 1]} : vector<64x96xf32> to vector<64x8xf32>
    %405 = arith.truncf %402 : vector<64x8xf32> to vector<64x8xbf16>
    %406 = arith.truncf %403 : vector<64x8xf32> to vector<64x8xbf16>
    %cst_135 = arith.constant dense<0.000000e+00> : vector<64x64xf32>
    %407 = tpu.matmul %405, %406, %cst_135 {dimension_numbers = #tpu.dot_dimension_numbers<[1], [1], [0], [0], [0, 0, 1, 0], [], []>} : vector<64x8xbf16>, vector<64x8xbf16>, vector<64x64xf32> -> vector<64x64xf32>
    %c1_136 = arith.constant 1 : index
    %c2_137 = arith.constant 2 : index
    %c0_138 = arith.constant 0 : index
    %c0_139 = arith.constant 0 : index
    %408 = vector.load %arg5[%c1_136, %c2_137, %c0_138, %c0_139] : memref<2x4x64x64xf32, #tpu.memory_space<vmem>>, vector<1x1x64x64xf32>
    %409 = vector.shape_cast %408 : vector<1x1x64x64xf32> to vector<64x64xf32>
    %410 = arith.addf %407, %409 : vector<64x64xf32>
    %cst_140 = arith.constant dense<0xFF800000> : vector<64xf32>
    %411 = vector.multi_reduction <maximumf>, %410, %cst_140 [1] : vector<64x64xf32> to vector<64xf32>
    %412 = vector.shape_cast %411 : vector<64xf32> to vector<64x1xf32>
    %413 = vector.broadcast %412 : vector<64x1xf32> to vector<64x64xf32>
    %414 = arith.subf %410, %413 : vector<64x64xf32>
    %415 = math.exp %414 : vector<64x64xf32>
    %cst_141 = arith.constant dense<0.000000e+00> : vector<64xf32>
    %416 = vector.multi_reduction <add>, %415, %cst_141 [1] : vector<64x64xf32> to vector<64xf32>
    %417 = vector.shape_cast %416 : vector<64xf32> to vector<64x1xf32>
    %418 = tpu.reciprocal %417 {approx = true} : vector<64x1xf32> -> vector<64x1xf32>
    %419 = vector.broadcast %418 : vector<64x1xf32> to vector<64x64xf32>
    %420 = arith.mulf %415, %419 : vector<64x64xf32>
    %421 = arith.truncf %420 : vector<64x64xf32> to vector<64x64xbf16>
    %422 = arith.truncf %404 : vector<64x8xf32> to vector<64x8xbf16>
    %cst_142 = arith.constant dense<0.000000e+00> : vector<64x8xf32>
    %423 = tpu.matmul %421, %422, %cst_142 {dimension_numbers = #tpu.dot_dimension_numbers<[1], [0], [0], [1], [0, 0, 1, 1], [], []>} : vector<64x64xbf16>, vector<64x8xbf16>, vector<64x8xf32> -> vector<64x8xf32>
    %424 = vector.extract_strided_slice %357 {offsets = [0, 24], sizes = [64, 8], strides = [1, 1]} : vector<64x96xf32> to vector<64x8xf32>
    %425 = vector.extract_strided_slice %357 {offsets = [0, 56], sizes = [64, 8], strides = [1, 1]} : vector<64x96xf32> to vector<64x8xf32>
    %426 = vector.extract_strided_slice %357 {offsets = [0, 88], sizes = [64, 8], strides = [1, 1]} : vector<64x96xf32> to vector<64x8xf32>
    %427 = arith.truncf %424 : vector<64x8xf32> to vector<64x8xbf16>
    %428 = arith.truncf %425 : vector<64x8xf32> to vector<64x8xbf16>
    %cst_143 = arith.constant dense<0.000000e+00> : vector<64x64xf32>
    %429 = tpu.matmul %427, %428, %cst_143 {dimension_numbers = #tpu.dot_dimension_numbers<[1], [1], [0], [0], [0, 0, 1, 0], [], []>} : vector<64x8xbf16>, vector<64x8xbf16>, vector<64x64xf32> -> vector<64x64xf32>
    %c1_144 = arith.constant 1 : index
    %c3_145 = arith.constant 3 : index
    %c0_146 = arith.constant 0 : index
    %c0_147 = arith.constant 0 : index
    %430 = vector.load %arg5[%c1_144, %c3_145, %c0_146, %c0_147] : memref<2x4x64x64xf32, #tpu.memory_space<vmem>>, vector<1x1x64x64xf32>
    %431 = vector.shape_cast %430 : vector<1x1x64x64xf32> to vector<64x64xf32>
    %432 = arith.addf %429, %431 : vector<64x64xf32>
    %cst_148 = arith.constant dense<0xFF800000> : vector<64xf32>
    %433 = vector.multi_reduction <maximumf>, %432, %cst_148 [1] : vector<64x64xf32> to vector<64xf32>
    %434 = vector.shape_cast %433 : vector<64xf32> to vector<64x1xf32>
    %435 = vector.broadcast %434 : vector<64x1xf32> to vector<64x64xf32>
    %436 = arith.subf %432, %435 : vector<64x64xf32>
    %437 = math.exp %436 : vector<64x64xf32>
    %cst_149 = arith.constant dense<0.000000e+00> : vector<64xf32>
    %438 = vector.multi_reduction <add>, %437, %cst_149 [1] : vector<64x64xf32> to vector<64xf32>
    %439 = vector.shape_cast %438 : vector<64xf32> to vector<64x1xf32>
    %440 = tpu.reciprocal %439 {approx = true} : vector<64x1xf32> -> vector<64x1xf32>
    %441 = vector.broadcast %440 : vector<64x1xf32> to vector<64x64xf32>
    %442 = arith.mulf %437, %441 : vector<64x64xf32>
    %443 = arith.truncf %442 : vector<64x64xf32> to vector<64x64xbf16>
    %444 = arith.truncf %426 : vector<64x8xf32> to vector<64x8xbf16>
    %cst_150 = arith.constant dense<0.000000e+00> : vector<64x8xf32>
    %445 = tpu.matmul %443, %444, %cst_150 {dimension_numbers = #tpu.dot_dimension_numbers<[1], [0], [0], [1], [0, 0, 1, 1], [], []>} : vector<64x64xbf16>, vector<64x8xbf16>, vector<64x8xf32> -> vector<64x8xf32>
    %446 = tpu.concatenate %379, %401, %423, %445 in 1 : vector<64x8xf32>, vector<64x8xf32>, vector<64x8xf32>, vector<64x8xf32> -> vector<64x32xf32>
    %c1_151 = arith.constant 1 : index
    %c0_152 = arith.constant 0 : index
    %c0_153 = arith.constant 0 : index
    %447 = vector.load %arg6[%c1_151, %c0_152, %c0_153] : memref<2x32x32xf32, #tpu.memory_space<vmem>>, vector<1x32x32xf32>
    %448 = vector.shape_cast %447 : vector<1x32x32xf32> to vector<32x32xf32>
    %449 = arith.truncf %446 : vector<64x32xf32> to vector<64x32xbf16>
    %450 = arith.truncf %448 : vector<32x32xf32> to vector<32x32xbf16>
    %cst_154 = arith.constant dense<0.000000e+00> : vector<64x32xf32>
    %451 = tpu.matmul %449, %450, %cst_154 {dimension_numbers = #tpu.dot_dimension_numbers<[1], [0], [0], [1], [0, 0, 1, 1], [], []>} : vector<64x32xbf16>, vector<32x32xbf16>, vector<64x32xf32> -> vector<64x32xf32>
    %452 = arith.addf %332, %451 : vector<64x32xf32>
    %c1_155 = arith.constant 1 : index
    %c0_156 = arith.constant 0 : index
    %c0_157 = arith.constant 0 : index
    %453 = vector.load %arg7[%c1_155, %c0_156, %c0_157] : memref<2x1x32xf32, #tpu.memory_space<vmem>>, vector<1x1x32xf32>
    %454 = vector.shape_cast %453 : vector<1x1x32xf32> to vector<1x32xf32>
    %455 = vector.broadcast %454 : vector<1x32xf32> to vector<64x32xf32>
    %456 = arith.addf %452, %455 : vector<64x32xf32>
    %cst_158 = arith.constant dense<0.000000e+00> : vector<64xf32>
    %457 = vector.multi_reduction <add>, %456, %cst_158 [1] : vector<64x32xf32> to vector<64xf32>
    %458 = vector.shape_cast %457 : vector<64xf32> to vector<64x1xf32>
    %cst_159 = arith.constant 3.200000e+01 : f32
    %459 = vector.broadcast %cst_159 : f32 to vector<64x1xf32>
    %460 = arith.divf %458, %459 : vector<64x1xf32>
    %461 = vector.broadcast %460 : vector<64x1xf32> to vector<64x32xf32>
    %462 = arith.subf %456, %461 : vector<64x32xf32>
    %463 = arith.mulf %462, %462 : vector<64x32xf32>
    %cst_160 = arith.constant dense<0.000000e+00> : vector<64xf32>
    %464 = vector.multi_reduction <add>, %463, %cst_160 [1] : vector<64x32xf32> to vector<64xf32>
    %465 = vector.shape_cast %464 : vector<64xf32> to vector<64x1xf32>
    %cst_161 = arith.constant 3.200000e+01 : f32
    %466 = vector.broadcast %cst_161 : f32 to vector<64x1xf32>
    %467 = arith.divf %465, %466 : vector<64x1xf32>
    %cst_162 = arith.constant 9.99999974E-6 : f32
    %468 = vector.broadcast %cst_162 : f32 to vector<64x1xf32>
    %469 = arith.addf %467, %468 : vector<64x1xf32>
    %470 = math.rsqrt %469 : vector<64x1xf32>
    %471 = vector.broadcast %470 : vector<64x1xf32> to vector<64x32xf32>
    %472 = arith.mulf %462, %471 : vector<64x32xf32>
    %c1_163 = arith.constant 1 : index
    %c0_164 = arith.constant 0 : index
    %c0_165 = arith.constant 0 : index
    %473 = vector.load %arg8[%c1_163, %c0_164, %c0_165] : memref<2x32x128xf32, #tpu.memory_space<vmem>>, vector<1x32x128xf32>
    %474 = vector.shape_cast %473 : vector<1x32x128xf32> to vector<32x128xf32>
    %475 = arith.truncf %472 : vector<64x32xf32> to vector<64x32xbf16>
    %476 = arith.truncf %474 : vector<32x128xf32> to vector<32x128xbf16>
    %cst_166 = arith.constant dense<0.000000e+00> : vector<64x128xf32>
    %477 = tpu.matmul %475, %476, %cst_166 {dimension_numbers = #tpu.dot_dimension_numbers<[1], [0], [0], [1], [0, 0, 1, 1], [], []>} : vector<64x32xbf16>, vector<32x128xbf16>, vector<64x128xf32> -> vector<64x128xf32>
    %c1_167 = arith.constant 1 : index
    %c0_168 = arith.constant 0 : index
    %c0_169 = arith.constant 0 : index
    %478 = vector.load %arg9[%c1_167, %c0_168, %c0_169] : memref<2x1x128xf32, #tpu.memory_space<vmem>>, vector<1x1x128xf32>
    %479 = vector.shape_cast %478 : vector<1x1x128xf32> to vector<1x128xf32>
    %480 = vector.broadcast %479 : vector<1x128xf32> to vector<64x128xf32>
    %481 = arith.addf %477, %480 : vector<64x128xf32>
    %cst_170 = arith.constant 5.000000e-01 : f32
    %482 = vector.broadcast %cst_170 : f32 to vector<64x128xf32>
    %483 = arith.mulf %482, %481 : vector<64x128xf32>
    %cst_171 = arith.constant 0.707106769 : f32
    %484 = vector.broadcast %cst_171 : f32 to vector<64x128xf32>
    %485 = arith.mulf %481, %484 : vector<64x128xf32>
    %cst_172 = arith.constant 0.000000e+00 : f32
    %486 = vector.broadcast %cst_172 : f32 to vector<64x128xf32>
    %487 = arith.cmpf oge, %485, %486 : vector<64x128xf32>
    %cst_173 = arith.constant 1.000000e+00 : f32
    %cst_174 = arith.constant -1.000000e+00 : f32
    %488 = vector.broadcast %cst_173 : f32 to vector<64x128xf32>
    %489 = vector.broadcast %cst_174 : f32 to vector<64x128xf32>
    %490 = arith.select %487, %488, %489 : vector<64x128xi1>, vector<64x128xf32>
    %491 = math.absf %485 : vector<64x128xf32>
    %cst_175 = arith.constant 0.327591091 : f32
    %492 = vector.broadcast %cst_175 : f32 to vector<64x128xf32>
    %493 = arith.mulf %492, %491 : vector<64x128xf32>
    %cst_176 = arith.constant 1.000000e+00 : f32
    %494 = vector.broadcast %cst_176 : f32 to vector<64x128xf32>
    %495 = arith.addf %494, %493 : vector<64x128xf32>
    %496 = tpu.reciprocal %495 : vector<64x128xf32> -> vector<64x128xf32>
    %cst_177 = arith.constant 1.06140542 : f32
    %497 = vector.broadcast %cst_177 : f32 to vector<64x128xf32>
    %498 = arith.mulf %497, %496 : vector<64x128xf32>
    %cst_178 = arith.constant -1.45315206 : f32
    %499 = vector.broadcast %cst_178 : f32 to vector<64x128xf32>
    %500 = arith.addf %498, %499 : vector<64x128xf32>
    %501 = arith.mulf %500, %496 : vector<64x128xf32>
    %cst_179 = arith.constant 1.42141378 : f32
    %502 = vector.broadcast %cst_179 : f32 to vector<64x128xf32>
    %503 = arith.addf %501, %502 : vector<64x128xf32>
    %504 = arith.mulf %503, %496 : vector<64x128xf32>
    %cst_180 = arith.constant -0.284496725 : f32
    %505 = vector.broadcast %cst_180 : f32 to vector<64x128xf32>
    %506 = arith.addf %504, %505 : vector<64x128xf32>
    %507 = arith.mulf %506, %496 : vector<64x128xf32>
    %cst_181 = arith.constant 0.254829586 : f32
    %508 = vector.broadcast %cst_181 : f32 to vector<64x128xf32>
    %509 = arith.addf %507, %508 : vector<64x128xf32>
    %510 = arith.mulf %509, %496 : vector<64x128xf32>
    %cst_182 = arith.constant 0.000000e+00 : f32
    %511 = vector.broadcast %cst_182 : f32 to vector<64x128xf32>
    %512 = arith.subf %511, %491 : vector<64x128xf32>
    %513 = arith.mulf %512, %491 : vector<64x128xf32>
    %514 = math.exp %513 : vector<64x128xf32>
    %515 = arith.mulf %510, %514 : vector<64x128xf32>
    %cst_183 = arith.constant 1.000000e+00 : f32
    %516 = vector.broadcast %cst_183 : f32 to vector<64x128xf32>
    %517 = arith.subf %516, %515 : vector<64x128xf32>
    %518 = arith.mulf %490, %517 : vector<64x128xf32>
    %cst_184 = arith.constant 1.000000e+00 : f32
    %519 = vector.broadcast %cst_184 : f32 to vector<64x128xf32>
    %520 = arith.addf %519, %518 : vector<64x128xf32>
    %521 = arith.mulf %483, %520 : vector<64x128xf32>
    %c1_185 = arith.constant 1 : index
    %c0_186 = arith.constant 0 : index
    %c0_187 = arith.constant 0 : index
    %c0_188 = arith.constant 0 : index
    %522 = vector.load %arg10[%c1_185, %c0_186, %c0_187, %c0_188] : memref<2x3x3x128xf32, #tpu.memory_space<vmem>>, vector<1x3x3x128xf32>
    %523 = vector.shape_cast %522 : vector<1x3x3x128xf32> to vector<3x3x128xf32>
    %c1_189 = arith.constant 1 : index
    %c0_190 = arith.constant 0 : index
    %c0_191 = arith.constant 0 : index
    %524 = vector.load %arg11[%c1_189, %c0_190, %c0_191] : memref<2x1x128xf32, #tpu.memory_space<vmem>>, vector<1x1x128xf32>
    %525 = vector.shape_cast %524 : vector<1x1x128xf32> to vector<1x128xf32>
    %526 = vector.extract_strided_slice %523 {offsets = [1, 1, 0], sizes = [1, 1, 128], strides = [1, 1, 1]} : vector<3x3x128xf32> to vector<1x1x128xf32>
    %527 = vector.shape_cast %526 : vector<1x1x128xf32> to vector<128xf32>
    %528 = vector.shape_cast %527 : vector<128xf32> to vector<1x128xf32>
    %529 = vector.broadcast %528 : vector<1x128xf32> to vector<64x128xf32>
    %530 = arith.mulf %521, %529 : vector<64x128xf32>
    %c9_i32_192 = arith.constant 9 : i32
    %531 = tpu.dynamic_rotate %521 by %c9_i32_192 dim 0 : vector<64x128xf32>, i32 -> vector<64x128xf32>
    %532 = vector.extract_strided_slice %2 {offsets = [0, 0], sizes = [64, 1], strides = [1, 1]} : vector<64x9xf32> to vector<64x1xf32>
    %533 = vector.broadcast %532 : vector<64x1xf32> to vector<64x128xf32>
    %534 = arith.mulf %531, %533 : vector<64x128xf32>
    %535 = vector.extract_strided_slice %523 {offsets = [0, 0, 0], sizes = [1, 1, 128], strides = [1, 1, 1]} : vector<3x3x128xf32> to vector<1x1x128xf32>
    %536 = vector.shape_cast %535 : vector<1x1x128xf32> to vector<128xf32>
    %537 = vector.shape_cast %536 : vector<128xf32> to vector<1x128xf32>
    %538 = vector.broadcast %537 : vector<1x128xf32> to vector<64x128xf32>
    %539 = arith.mulf %534, %538 : vector<64x128xf32>
    %540 = arith.addf %530, %539 : vector<64x128xf32>
    %c8_i32_193 = arith.constant 8 : i32
    %541 = tpu.dynamic_rotate %521 by %c8_i32_193 dim 0 : vector<64x128xf32>, i32 -> vector<64x128xf32>
    %542 = vector.extract_strided_slice %2 {offsets = [0, 1], sizes = [64, 1], strides = [1, 1]} : vector<64x9xf32> to vector<64x1xf32>
    %543 = vector.broadcast %542 : vector<64x1xf32> to vector<64x128xf32>
    %544 = arith.mulf %541, %543 : vector<64x128xf32>
    %545 = vector.extract_strided_slice %523 {offsets = [0, 1, 0], sizes = [1, 1, 128], strides = [1, 1, 1]} : vector<3x3x128xf32> to vector<1x1x128xf32>
    %546 = vector.shape_cast %545 : vector<1x1x128xf32> to vector<128xf32>
    %547 = vector.shape_cast %546 : vector<128xf32> to vector<1x128xf32>
    %548 = vector.broadcast %547 : vector<1x128xf32> to vector<64x128xf32>
    %549 = arith.mulf %544, %548 : vector<64x128xf32>
    %550 = arith.addf %540, %549 : vector<64x128xf32>
    %c7_i32_194 = arith.constant 7 : i32
    %551 = tpu.dynamic_rotate %521 by %c7_i32_194 dim 0 : vector<64x128xf32>, i32 -> vector<64x128xf32>
    %552 = vector.extract_strided_slice %2 {offsets = [0, 2], sizes = [64, 1], strides = [1, 1]} : vector<64x9xf32> to vector<64x1xf32>
    %553 = vector.broadcast %552 : vector<64x1xf32> to vector<64x128xf32>
    %554 = arith.mulf %551, %553 : vector<64x128xf32>
    %555 = vector.extract_strided_slice %523 {offsets = [0, 2, 0], sizes = [1, 1, 128], strides = [1, 1, 1]} : vector<3x3x128xf32> to vector<1x1x128xf32>
    %556 = vector.shape_cast %555 : vector<1x1x128xf32> to vector<128xf32>
    %557 = vector.shape_cast %556 : vector<128xf32> to vector<1x128xf32>
    %558 = vector.broadcast %557 : vector<1x128xf32> to vector<64x128xf32>
    %559 = arith.mulf %554, %558 : vector<64x128xf32>
    %560 = arith.addf %550, %559 : vector<64x128xf32>
    %c1_i32_195 = arith.constant 1 : i32
    %561 = tpu.dynamic_rotate %521 by %c1_i32_195 dim 0 : vector<64x128xf32>, i32 -> vector<64x128xf32>
    %562 = vector.extract_strided_slice %2 {offsets = [0, 3], sizes = [64, 1], strides = [1, 1]} : vector<64x9xf32> to vector<64x1xf32>
    %563 = vector.broadcast %562 : vector<64x1xf32> to vector<64x128xf32>
    %564 = arith.mulf %561, %563 : vector<64x128xf32>
    %565 = vector.extract_strided_slice %523 {offsets = [1, 0, 0], sizes = [1, 1, 128], strides = [1, 1, 1]} : vector<3x3x128xf32> to vector<1x1x128xf32>
    %566 = vector.shape_cast %565 : vector<1x1x128xf32> to vector<128xf32>
    %567 = vector.shape_cast %566 : vector<128xf32> to vector<1x128xf32>
    %568 = vector.broadcast %567 : vector<1x128xf32> to vector<64x128xf32>
    %569 = arith.mulf %564, %568 : vector<64x128xf32>
    %570 = arith.addf %560, %569 : vector<64x128xf32>
    %c63_i32_196 = arith.constant 63 : i32
    %571 = tpu.dynamic_rotate %521 by %c63_i32_196 dim 0 : vector<64x128xf32>, i32 -> vector<64x128xf32>
    %572 = vector.extract_strided_slice %2 {offsets = [0, 5], sizes = [64, 1], strides = [1, 1]} : vector<64x9xf32> to vector<64x1xf32>
    %573 = vector.broadcast %572 : vector<64x1xf32> to vector<64x128xf32>
    %574 = arith.mulf %571, %573 : vector<64x128xf32>
    %575 = vector.extract_strided_slice %523 {offsets = [1, 2, 0], sizes = [1, 1, 128], strides = [1, 1, 1]} : vector<3x3x128xf32> to vector<1x1x128xf32>
    %576 = vector.shape_cast %575 : vector<1x1x128xf32> to vector<128xf32>
    %577 = vector.shape_cast %576 : vector<128xf32> to vector<1x128xf32>
    %578 = vector.broadcast %577 : vector<1x128xf32> to vector<64x128xf32>
    %579 = arith.mulf %574, %578 : vector<64x128xf32>
    %580 = arith.addf %570, %579 : vector<64x128xf32>
    %c57_i32_197 = arith.constant 57 : i32
    %581 = tpu.dynamic_rotate %521 by %c57_i32_197 dim 0 : vector<64x128xf32>, i32 -> vector<64x128xf32>
    %582 = vector.extract_strided_slice %2 {offsets = [0, 6], sizes = [64, 1], strides = [1, 1]} : vector<64x9xf32> to vector<64x1xf32>
    %583 = vector.broadcast %582 : vector<64x1xf32> to vector<64x128xf32>
    %584 = arith.mulf %581, %583 : vector<64x128xf32>
    %585 = vector.extract_strided_slice %523 {offsets = [2, 0, 0], sizes = [1, 1, 128], strides = [1, 1, 1]} : vector<3x3x128xf32> to vector<1x1x128xf32>
    %586 = vector.shape_cast %585 : vector<1x1x128xf32> to vector<128xf32>
    %587 = vector.shape_cast %586 : vector<128xf32> to vector<1x128xf32>
    %588 = vector.broadcast %587 : vector<1x128xf32> to vector<64x128xf32>
    %589 = arith.mulf %584, %588 : vector<64x128xf32>
    %590 = arith.addf %580, %589 : vector<64x128xf32>
    %c56_i32_198 = arith.constant 56 : i32
    %591 = tpu.dynamic_rotate %521 by %c56_i32_198 dim 0 : vector<64x128xf32>, i32 -> vector<64x128xf32>
    %592 = vector.extract_strided_slice %2 {offsets = [0, 7], sizes = [64, 1], strides = [1, 1]} : vector<64x9xf32> to vector<64x1xf32>
    %593 = vector.broadcast %592 : vector<64x1xf32> to vector<64x128xf32>
    %594 = arith.mulf %591, %593 : vector<64x128xf32>
    %595 = vector.extract_strided_slice %523 {offsets = [2, 1, 0], sizes = [1, 1, 128], strides = [1, 1, 1]} : vector<3x3x128xf32> to vector<1x1x128xf32>
    %596 = vector.shape_cast %595 : vector<1x1x128xf32> to vector<128xf32>
    %597 = vector.shape_cast %596 : vector<128xf32> to vector<1x128xf32>
    %598 = vector.broadcast %597 : vector<1x128xf32> to vector<64x128xf32>
    %599 = arith.mulf %594, %598 : vector<64x128xf32>
    %600 = arith.addf %590, %599 : vector<64x128xf32>
    %c55_i32_199 = arith.constant 55 : i32
    %601 = tpu.dynamic_rotate %521 by %c55_i32_199 dim 0 : vector<64x128xf32>, i32 -> vector<64x128xf32>
    %602 = vector.extract_strided_slice %2 {offsets = [0, 8], sizes = [64, 1], strides = [1, 1]} : vector<64x9xf32> to vector<64x1xf32>
    %603 = vector.broadcast %602 : vector<64x1xf32> to vector<64x128xf32>
    %604 = arith.mulf %601, %603 : vector<64x128xf32>
    %605 = vector.extract_strided_slice %523 {offsets = [2, 2, 0], sizes = [1, 1, 128], strides = [1, 1, 1]} : vector<3x3x128xf32> to vector<1x1x128xf32>
    %606 = vector.shape_cast %605 : vector<1x1x128xf32> to vector<128xf32>
    %607 = vector.shape_cast %606 : vector<128xf32> to vector<1x128xf32>
    %608 = vector.broadcast %607 : vector<1x128xf32> to vector<64x128xf32>
    %609 = arith.mulf %604, %608 : vector<64x128xf32>
    %610 = arith.addf %600, %609 : vector<64x128xf32>
    %611 = vector.broadcast %525 : vector<1x128xf32> to vector<64x128xf32>
    %612 = arith.addf %610, %611 : vector<64x128xf32>
    %cst_200 = arith.constant 5.000000e-01 : f32
    %613 = vector.broadcast %cst_200 : f32 to vector<64x128xf32>
    %614 = arith.mulf %613, %612 : vector<64x128xf32>
    %cst_201 = arith.constant 0.707106769 : f32
    %615 = vector.broadcast %cst_201 : f32 to vector<64x128xf32>
    %616 = arith.mulf %612, %615 : vector<64x128xf32>
    %cst_202 = arith.constant 0.000000e+00 : f32
    %617 = vector.broadcast %cst_202 : f32 to vector<64x128xf32>
    %618 = arith.cmpf oge, %616, %617 : vector<64x128xf32>
    %cst_203 = arith.constant 1.000000e+00 : f32
    %cst_204 = arith.constant -1.000000e+00 : f32
    %619 = vector.broadcast %cst_203 : f32 to vector<64x128xf32>
    %620 = vector.broadcast %cst_204 : f32 to vector<64x128xf32>
    %621 = arith.select %618, %619, %620 : vector<64x128xi1>, vector<64x128xf32>
    %622 = math.absf %616 : vector<64x128xf32>
    %cst_205 = arith.constant 0.327591091 : f32
    %623 = vector.broadcast %cst_205 : f32 to vector<64x128xf32>
    %624 = arith.mulf %623, %622 : vector<64x128xf32>
    %cst_206 = arith.constant 1.000000e+00 : f32
    %625 = vector.broadcast %cst_206 : f32 to vector<64x128xf32>
    %626 = arith.addf %625, %624 : vector<64x128xf32>
    %627 = tpu.reciprocal %626 : vector<64x128xf32> -> vector<64x128xf32>
    %cst_207 = arith.constant 1.06140542 : f32
    %628 = vector.broadcast %cst_207 : f32 to vector<64x128xf32>
    %629 = arith.mulf %628, %627 : vector<64x128xf32>
    %cst_208 = arith.constant -1.45315206 : f32
    %630 = vector.broadcast %cst_208 : f32 to vector<64x128xf32>
    %631 = arith.addf %629, %630 : vector<64x128xf32>
    %632 = arith.mulf %631, %627 : vector<64x128xf32>
    %cst_209 = arith.constant 1.42141378 : f32
    %633 = vector.broadcast %cst_209 : f32 to vector<64x128xf32>
    %634 = arith.addf %632, %633 : vector<64x128xf32>
    %635 = arith.mulf %634, %627 : vector<64x128xf32>
    %cst_210 = arith.constant -0.284496725 : f32
    %636 = vector.broadcast %cst_210 : f32 to vector<64x128xf32>
    %637 = arith.addf %635, %636 : vector<64x128xf32>
    %638 = arith.mulf %637, %627 : vector<64x128xf32>
    %cst_211 = arith.constant 0.254829586 : f32
    %639 = vector.broadcast %cst_211 : f32 to vector<64x128xf32>
    %640 = arith.addf %638, %639 : vector<64x128xf32>
    %641 = arith.mulf %640, %627 : vector<64x128xf32>
    %cst_212 = arith.constant 0.000000e+00 : f32
    %642 = vector.broadcast %cst_212 : f32 to vector<64x128xf32>
    %643 = arith.subf %642, %622 : vector<64x128xf32>
    %644 = arith.mulf %643, %622 : vector<64x128xf32>
    %645 = math.exp %644 : vector<64x128xf32>
    %646 = arith.mulf %641, %645 : vector<64x128xf32>
    %cst_213 = arith.constant 1.000000e+00 : f32
    %647 = vector.broadcast %cst_213 : f32 to vector<64x128xf32>
    %648 = arith.subf %647, %646 : vector<64x128xf32>
    %649 = arith.mulf %621, %648 : vector<64x128xf32>
    %cst_214 = arith.constant 1.000000e+00 : f32
    %650 = vector.broadcast %cst_214 : f32 to vector<64x128xf32>
    %651 = arith.addf %650, %649 : vector<64x128xf32>
    %652 = arith.mulf %614, %651 : vector<64x128xf32>
    %c1_215 = arith.constant 1 : index
    %c0_216 = arith.constant 0 : index
    %c0_217 = arith.constant 0 : index
    %653 = vector.load %arg12[%c1_215, %c0_216, %c0_217] : memref<2x128x32xf32, #tpu.memory_space<vmem>>, vector<1x128x32xf32>
    %654 = vector.shape_cast %653 : vector<1x128x32xf32> to vector<128x32xf32>
    %655 = arith.truncf %652 : vector<64x128xf32> to vector<64x128xbf16>
    %656 = arith.truncf %654 : vector<128x32xf32> to vector<128x32xbf16>
    %cst_218 = arith.constant dense<0.000000e+00> : vector<64x32xf32>
    %657 = tpu.matmul %655, %656, %cst_218 {dimension_numbers = #tpu.dot_dimension_numbers<[1], [0], [0], [1], [0, 0, 1, 1], [], []>} : vector<64x128xbf16>, vector<128x32xbf16>, vector<64x32xf32> -> vector<64x32xf32>
    %658 = arith.addf %456, %657 : vector<64x32xf32>
    %c1_219 = arith.constant 1 : index
    %c0_220 = arith.constant 0 : index
    %c0_221 = arith.constant 0 : index
    %659 = vector.load %arg13[%c1_219, %c0_220, %c0_221] : memref<2x1x32xf32, #tpu.memory_space<vmem>>, vector<1x1x32xf32>
    %660 = vector.shape_cast %659 : vector<1x1x32xf32> to vector<1x32xf32>
    %661 = vector.broadcast %660 : vector<1x32xf32> to vector<64x32xf32>
    %662 = arith.addf %658, %661 : vector<64x32xf32>
    %c0_222 = arith.constant 0 : index
    %c0_223 = arith.constant 0 : index
    %c0_224 = arith.constant 0 : index
    %663 = vector.load %arg14[%c0_222, %c0_223, %c0_224] : memref<1x64x32xf32, #tpu.memory_space<vmem>>, vector<1x64x32xf32>
    %664 = vector.shape_cast %663 : vector<1x64x32xf32> to vector<64x32xf32>
    %665 = vector.shape_cast %662 : vector<64x32xf32> to vector<1x64x32xf32>
    tpu.vector_store %arg14[%c0_222, %c0_223, %c0_224], %665 {strides = array<i32>} : memref<1x64x32xf32, #tpu.memory_space<vmem>>, vector<1x64x32xf32>,
    return
  }
  func.func @transform_0(%arg0: i32) -> (i32, i32, i32) {
    %c0_i32 = arith.constant 0 : i32
    %c0_i32_0 = arith.constant 0 : i32
    %c0_i32_1 = arith.constant 0 : i32
    return %arg0, %c0_i32, %c0_i32_0 : i32, i32, i32
  }
  func.func @transform_1(%arg0: i32) -> (i32, i32) {
    %c0_i32 = arith.constant 0 : i32
    %c0_i32_0 = arith.constant 0 : i32
    %c0_i32_1 = arith.constant 0 : i32
    return %c0_i32, %c0_i32_0 : i32, i32
  }
  func.func @transform_2(%arg0: i32) -> (i32, i32, i32) {
    %c0_i32 = arith.constant 0 : i32
    %c0_i32_0 = arith.constant 0 : i32
    %c0_i32_1 = arith.constant 0 : i32
    %c0_i32_2 = arith.constant 0 : i32
    return %c0_i32, %c0_i32_0, %c0_i32_1 : i32, i32, i32
  }
  func.func @transform_3(%arg0: i32) -> (i32, i32, i32) {
    %c0_i32 = arith.constant 0 : i32
    %c0_i32_0 = arith.constant 0 : i32
    %c0_i32_1 = arith.constant 0 : i32
    %c0_i32_2 = arith.constant 0 : i32
    return %c0_i32, %c0_i32_0, %c0_i32_1 : i32, i32, i32
  }
  func.func @transform_4(%arg0: i32) -> (i32, i32, i32, i32) {
    %c0_i32 = arith.constant 0 : i32
    %c0_i32_0 = arith.constant 0 : i32
    %c0_i32_1 = arith.constant 0 : i32
    %c0_i32_2 = arith.constant 0 : i32
    %c0_i32_3 = arith.constant 0 : i32
    return %c0_i32, %c0_i32_0, %c0_i32_1, %c0_i32_2 : i32, i32, i32, i32
  }
  func.func @transform_5(%arg0: i32) -> (i32, i32, i32) {
    %c0_i32 = arith.constant 0 : i32
    %c0_i32_0 = arith.constant 0 : i32
    %c0_i32_1 = arith.constant 0 : i32
    %c0_i32_2 = arith.constant 0 : i32
    return %c0_i32, %c0_i32_0, %c0_i32_1 : i32, i32, i32
  }
  func.func @transform_6(%arg0: i32) -> (i32, i32, i32) {
    %c0_i32 = arith.constant 0 : i32
    %c0_i32_0 = arith.constant 0 : i32
    %c0_i32_1 = arith.constant 0 : i32
    %c0_i32_2 = arith.constant 0 : i32
    return %c0_i32, %c0_i32_0, %c0_i32_1 : i32, i32, i32
  }
  func.func @transform_7(%arg0: i32) -> (i32, i32, i32) {
    %c0_i32 = arith.constant 0 : i32
    %c0_i32_0 = arith.constant 0 : i32
    %c0_i32_1 = arith.constant 0 : i32
    %c0_i32_2 = arith.constant 0 : i32
    return %c0_i32, %c0_i32_0, %c0_i32_1 : i32, i32, i32
  }
  func.func @transform_8(%arg0: i32) -> (i32, i32, i32) {
    %c0_i32 = arith.constant 0 : i32
    %c0_i32_0 = arith.constant 0 : i32
    %c0_i32_1 = arith.constant 0 : i32
    %c0_i32_2 = arith.constant 0 : i32
    return %c0_i32, %c0_i32_0, %c0_i32_1 : i32, i32, i32
  }
  func.func @transform_9(%arg0: i32) -> (i32, i32, i32, i32) {
    %c0_i32 = arith.constant 0 : i32
    %c0_i32_0 = arith.constant 0 : i32
    %c0_i32_1 = arith.constant 0 : i32
    %c0_i32_2 = arith.constant 0 : i32
    %c0_i32_3 = arith.constant 0 : i32
    return %c0_i32, %c0_i32_0, %c0_i32_1, %c0_i32_2 : i32, i32, i32, i32
  }
  func.func @transform_10(%arg0: i32) -> (i32, i32, i32) {
    %c0_i32 = arith.constant 0 : i32
    %c0_i32_0 = arith.constant 0 : i32
    %c0_i32_1 = arith.constant 0 : i32
    %c0_i32_2 = arith.constant 0 : i32
    return %c0_i32, %c0_i32_0, %c0_i32_1 : i32, i32, i32
  }
  func.func @transform_11(%arg0: i32) -> (i32, i32, i32) {
    %c0_i32 = arith.constant 0 : i32
    %c0_i32_0 = arith.constant 0 : i32
    %c0_i32_1 = arith.constant 0 : i32
    %c0_i32_2 = arith.constant 0 : i32
    return %c0_i32, %c0_i32_0, %c0_i32_1 : i32, i32, i32
  }
  func.func @transform_12(%arg0: i32) -> (i32, i32, i32) {
    %c0_i32 = arith.constant 0 : i32
    %c0_i32_0 = arith.constant 0 : i32
    %c0_i32_1 = arith.constant 0 : i32
    %c0_i32_2 = arith.constant 0 : i32
    return %c0_i32, %c0_i32_0, %c0_i32_1 : i32, i32, i32
  }
  func.func @transform_13(%arg0: i32) -> (i32, i32, i32) {
    %c0_i32 = arith.constant 0 : i32
    %c0_i32_0 = arith.constant 0 : i32
    %c0_i32_1 = arith.constant 0 : i32
    return %arg0, %c0_i32, %c0_i32_0 : i32, i32, i32
  }
}

</mosaic_0001>

<bundles_post_ra>
// kernel: guideformer_layer_forward.1
= control target key start
LH: loop header
LB: loop body
LE: loop exit
PB: predicated region body
PF: predicated region fallthrough
CT: control target
= control target key end

     0   :  { %s11373_s0 = inlined_call_operand.vmem [shape: f32[2,64,32], index: 0, kind: input, shape index: {}]   ;;  %s11374_s1 = inlined_call_operand.vmem [shape: f32[64,9], index: 1, kind: input, shape index: {}]   ;;  %s11375_s2 = inlined_call_operand.vmem [shape: f32[2,32,96], index: 2, kind: input, shape index: {}]   ;;  %s11376_s3 = inlined_call_operand.vmem [shape: f32[2,1,96], index: 3, kind: input, shape index: {}]   ;;  %s11377_s4 = inlined_call_operand.vmem [shape: f32[2,4,64,64], index: 4, kind: input, shape index: {}]   ;;  %s11378_s5 = inlined_call_operand.hbm [shape: f32[2,32,32], index: 5, kind: input, shape index: {}]   ;;  %s11379_s6 = inlined_call_operand.vmem [shape: f32[2,1,32], index: 6, kind: input, shape index: {}]   ;;  %s11380_s7 = inlined_call_operand.hbm [shape: f32[2,32,128], index: 7, kind: input, shape index: {}]   ;;  %s11381_s8 = inlined_call_operand.hbm [shape: f32[2,1,128], index: 8, kind: input, shape index: {}]   ;;  %s11382_s9 = inlined_call_operand.vmem [shape: f32[2,3,3,128], index: 9, kind: input, shape index: {}]   ;;  %s11383_s10 = inlined_call_operand.vmem [shape: f32[2,1,128], index: 10, kind: input, shape index: {}]   ;;  %s11384_s11 = inlined_call_operand.vmem [shape: f32[2,128,32], index: 11, kind: input, shape index: {}]   ;;  %s11385_s12 = inlined_call_operand.hbm [shape: f32[2,1,32], index: 12, kind: input, shape index: {}]   ;;  %s11386_s13 = inlined_call_operand.vmem [shape: f32[2,64,32], index: 13, kind: output, shape index: {}]  }
   0x1   :  { %11522 = sst [smem:[#allocation96_spill]] %s11386_s13 }
   0x2   :  { %18 = vsyncpa [#allocation3], 0 }
   0x3   :  { %19 = vsyncpa [#allocation5], 0 }
   0x4   :  { %20 = vsyncpa [#allocation8], 0  ;;  %s7860_s25 = smov 0  }
   0x5 LB: > { %11523 = sst [smem:[#allocation12_spill]] %s7757_s25  ;;  %s7866_s26 = sadd.s32 4294967295, %s7757_s25   ;;  %s7757_s25 = sphi %s7860_s25, %s26_s25  }
   0x6   : > { %p6154_p0 = scmp.ge.s32.totalorder %s7757_s25, 1  ;;  %p335_p1 = scmp.lt.s32.totalorder %s7757_s25, 3 }
   0x7   : > { %p11388_p2 = scmp.eq.s32.totalorder %s7866_s26, 0  ;;  %s7759_s28 = smov [#allocation4]  }
   0x8   : > { %p7871_p3 = pnand %p6154_p0, %p335_p1  ;;  %s375_s29 = sshll.u32 %s7759_s28, 4  ;;  %s7875_s29 = int_to_ptr.vmem [resolvable:$true] %s375_s29 }
   0x9   : > { %s7760_s30 = smov [#allocation2]   ;;  %s7761_s16 = smov [#allocation6]  }
   0xa   : > { %s11524_s27 = scalar_select %p7871_p3, 1, 0 }
   0xb   : > { %p6965_p4 = pneg %p7871_p3  ;;  %s359_s14 = sshll.u32 %s7760_s30, 4  ;;  %s7879_s14 = int_to_ptr.vmem [resolvable:$true] %s359_s14 }
   0xc   : > { %s388_s17 = sshll.u32 %s7761_s16, 4  ;;  %s7627_s20 = scalar_lea.hbm %s11380_s7, 1024  ;;  %s7887_s17 = int_to_ptr.vmem [resolvable:$true] %s388_s17 }
   0xd   : > { %p7883_p5 = pnand %p11388_p2, %p6965_p4  ;;  %p7628_p6 = scmp.ne.s32.totalorder %s11380_s7, %s7627_s20 }
   0xe   : > { %p7634_p10 = scmp.lt.u32.totalorder %s7627_s20, %s11380_s7 }
   0xf   : > { %p7897_p7 = pneg %p7883_p5 }
  0x11   : > { %p7630_p8 = pnand %p7897_p7, %p7628_p6 }
  0x13   : > { %p7631_p9 = pneg %p7630_p8 }
  0x15   : > { %p7636_p11 = pnand %p7634_p10, %p7631_p9 }
  0x17   : > { %7639 = shalt.err (!%p7636_p11)
}
  0x18   : > { %s7640_s30 = scalar_lea.vmem %s7875_s29, 1024  ;;  %p7648_p1 = scmp.lt.s32.totalorder %s7875_s29, %s7875_s29 }
  0x19   : > { %p7641_p12 = scmp.ne.s32.totalorder %s7875_s29, %s7640_s30  ;;  %p7649_p4 = scmp.lt.s32.totalorder %s7640_s30, %s7640_s30 }
  0x1b   : > { %p7643_p13 = pnand %p7641_p12, %p7897_p7  ;;  %p7650_p6 = por %p7649_p4, %p7648_p1 }
  0x1d   : > { %p7644_p0 = pneg %p7643_p13 }
  0x1f   : > { %p7651_p8 = pnand %p7650_p6, %p7644_p0 }
  0x21   : > { %7654 = shalt.err (!%p7651_p8)
}
  0x22   : > { %s7762_s16 = smov 128   ;;  %s7763_s18 = smov 8  }
  0x23   : > { %6971 = dma.hbm_to_vmem [thread:$0]  (!%p7883_p5), %s11380_s7, 1024, %s7875_s29, [#allocation5], %s7762_s16, %s7762_s16, %s7763_s18  }
  0x24   : > { %s7655_s24 = scalar_lea.hbm %s11378_s5, 1024 }
  0x25   : > { %p7656_p9 = scmp.ne.s32.totalorder %s11378_s5, %s7655_s24  ;;  %p7662_p12 = scmp.lt.u32.totalorder %s7655_s24, %s11378_s5 }
  0x27   : > { %p7658_p10 = pnand %p7656_p9, %p7897_p7 }
  0x29   : > { %p7659_p11 = pneg %p7658_p10 }
  0x2b   : > { %p7664_p13 = pnand %p7662_p12, %p7659_p11 }
  0x2d   : > { %7667 = shalt.err (!%p7664_p13)
}
  0x2e   : > { %s7668_s29 = scalar_lea.vmem %s7879_s14, 1024  ;;  %p7676_p6 = scmp.lt.s32.totalorder %s7879_s14, %s7879_s14 }
  0x2f   : > { %p7669_p0 = scmp.ne.s32.totalorder %s7879_s14, %s7668_s29  ;;  %p7677_p8 = scmp.lt.s32.totalorder %s7668_s29, %s7668_s29 }
  0x31   : > { %p7671_p1 = pnand %p7669_p0, %p7897_p7  ;;  %p7678_p9 = por %p7677_p8, %p7676_p6 }
  0x33   : > { %p7672_p4 = pneg %p7671_p1 }
  0x35   : > { %p7679_p10 = pnand %p7678_p9, %p7672_p4 }
  0x37   : > { %7682 = shalt.err (!%p7679_p10)
}
  0x38   : > { %6968 = dma.hbm_to_vmem [thread:$0]  (!%p7883_p5), %s11378_s5, 1024, %s7879_s14, [#allocation3], %s7762_s16, %s7762_s16, %s7763_s18  }
  0x39   : > { %s7683_s21 = scalar_lea.hbm %s11381_s8, 32 }
  0x3a   : > { %p7684_p11 = scmp.ne.s32.totalorder %s11381_s8, %s7683_s21  ;;  %p7690_p0 = scmp.lt.u32.totalorder %s7683_s21, %s11381_s8 }
  0x3c   : > { %p7686_p12 = pnand %p7684_p11, %p7897_p7 }
  0x3e   : > { %p7687_p13 = pneg %p7686_p12 }
  0x40   : > { %p7692_p1 = pnand %p7690_p0, %p7687_p13 }
  0x42   : > { %7695 = shalt.err (!%p7692_p1)
}
  0x43   : > { %s7696_s14 = scalar_lea.vmem %s7887_s17, 32  ;;  %p7704_p9 = scmp.lt.s32.totalorder %s7887_s17, %s7887_s17 }
  0x44   : > { %p7697_p4 = scmp.ne.s32.totalorder %s7887_s17, %s7696_s14  ;;  %p7705_p10 = scmp.lt.s32.totalorder %s7696_s14, %s7696_s14 }
  0x46   : > { %p7699_p6 = pnand %p7697_p4, %p7897_p7  ;;  %p7706_p11 = por %p7705_p10, %p7704_p9 }
  0x48   : > { %p7700_p8 = pneg %p7699_p6 }
  0x4a   : > { %p7707_p12 = pnand %p7706_p11, %p7700_p8 }
  0x4c   : > { %7710 = shalt.err (!%p7707_p12)
}
  0x4d   : > { %s7764_s16 = smov 16   ;;  %s7765_s18 = smov 1  }
  0x4e   : > { %6974 = dma.hbm_to_vmem [thread:$0]  (!%p7883_p5), %s11381_s8, 32, %s7887_s17, [#allocation5], %s7764_s16, %s7764_s16, %s7765_s18  }
  0x4f   : > { %s7766_s25 = smov [#allocation7]   ;;  %s7711_s22 = scalar_lea.hbm %s11385_s12, 32 }
  0x50   : > { %s410_s19 = sshll.u32 %s7766_s25, 4  ;;  %p7712_p13 = scmp.ne.s32.totalorder %s11385_s12, %s7711_s22  ;;  %s411_s19 = int_to_ptr.vmem [resolvable:$true] %s410_s19 }
  0x51   : > { %p7718_p4 = scmp.lt.u32.totalorder %s7711_s22, %s11385_s12 }
  0x52   : > { %p7714_p0 = pnand %p7712_p13, %p7897_p7 }
  0x54   : > { %p7715_p1 = pneg %p7714_p0 }
  0x56   : > { %p7720_p6 = pnand %p7718_p4, %p7715_p1 }
  0x58   : > { %7723 = shalt.err (!%p7720_p6)
}
  0x59   : > { %s7724_s17 = scalar_lea.vmem %s411_s19, 32  ;;  %p7732_p11 = scmp.lt.s32.totalorder %s411_s19, %s411_s19 }
  0x5a   : > { %p7725_p8 = scmp.ne.s32.totalorder %s411_s19, %s7724_s17  ;;  %p7733_p12 = scmp.lt.s32.totalorder %s7724_s17, %s7724_s17 }
  0x5c   : > { %p7727_p9 = pnand %p7725_p8, %p7897_p7  ;;  %p7734_p2 = por %p7733_p12, %p7732_p11 }
  0x5e   : > { %p7728_p10 = pneg %p7727_p9 }
  0x60   : > { %p7735_p3 = pnand %p7734_p2, %p7728_p10 }
  0x62   : > { %7738 = shalt.err (!%p7735_p3)
}
  0x63   : > { %6977 = dma.hbm_to_vmem [thread:$0]  (!%p7883_p5), %s11385_s12, 32, %s411_s19, [#allocation8], %s7764_s16, %s7764_s16, %s7765_s18  }
  0x64   : > { %p11527_p13 = scmp.ne.s32.totalorder %s11524_s27, 0 }
  0x66   : > { %434 = sbr.rel (%p11527_p13) target bundleno = 9275 (0x243b), region = 72 }
  0x6d   : > { %p11528_p0 = scmp.eq.s32.totalorder %s7866_s26, 0 }
  0x6f   : > { %7744 = dma.done.wait (%p11528_p0), [#allocation3], 1024   ;;  %p11529_p7 = pmov %p11528_p0 }
  0x70   : > { %p11530_p1 = pmov %p11528_p0 }
  0x71   : > { %7746 = vsyncadd (%p11529_p7), [#allocation3], 4294966272 }
  0x72   : > { %7748 = dma.done.wait (%p11530_p1), [#allocation5], 1056   ;;  %p11531_p2 = pmov %p11528_p0 }
  0x73   : > { %p11532_p3 = pmov %p11528_p0 }
  0x74   : > { %7750 = vsyncadd (%p11531_p2), [#allocation5], 4294966240 }
  0x75   : > { %7752 = dma.done.wait (%p11532_p3), [#allocation8], 32   ;;  %p11533_p5 = pmov %p11528_p0 }
  0x76   : > { %p490_p4 = scmp.lt.s32.totalorder %s7866_s26, 1  ;;  %vm517_vm0 = vcmask 261120   ;;  %v623_v56 = vld [vmem:[%s11375_s2] sm:$0xff]  ;;  %v624_v57 = vld [vmem:[%s11375_s2 + $0x8] sm:$0xff]  ;;  %v625_v59 = vld [vmem:[%s11375_s2 + $0x10] sm:$0xff]  ;;  %vm741_vm1 = vcmask 64512  }
  0x77   : > { %7754 = vsyncadd (%p11533_p5), [#allocation8], 4294967264  ;;  %v631_v58 = vpack.c.bf16 %v624_v57, %v623_v56  ;;  %v626_v60 = vld [vmem:[%s11375_s2 + $0x18] sm:$0xff]  ;;  %s7767_s17 = smov 96   ;;  %vm831_vm2 = vcmask 523264   ;;  %s7768_s30 = smov 64  }
  0x78   : > { %s11808_s26 = smov (!%p490_p4, %s7866_s26), 1  ;;  %v632_v61 = vpack.c.bf16 %v626_v60, %v625_v59  ;;  %s7769_s23 = smov 88   ;;  %vm2002_vm3 = vcmask 130048   ;;  %vm2011_vm4 = vcmask 195584  }
  0x79   : > { %s11390_s27 = sshll.u32 %s11808_s26, 6  ;;  %6541 = vmatprep.subr.bf16.mxu1 %v631_v58  ;;  %s7770_s18 = smov 120  }
  0x7a   : > { %s8006_s16 = scalar_lea.vmem %s11373_s0, %s11390_s27  ;;  %6542 = vmatpush3.bf16.msra.mxu1 %v631_v58  ;;  %s7771_s19 = smov 56  }
  0x7b   : > { %v501_v0 = vld [vmem:[%s8006_s16] sm:$0xff]  ;;  %v503_v1 = vld [vmem:[%s8006_s16 + $0x10] sm:$0xff]  ;;  %v502_v2 = vld [vmem:[%s8006_s16 + $0x8] sm:$0xff]  ;;  %6543 = vmatprep.subr.bf16.mxu1 %v632_v61  ;;  %s7772_s28 = smov 80   ;;  %s7773_s14 = smov 112  }
  0x7c   : > { %v518_v3 = vsel %vm517_vm0, %v501_v0, 0.0  ;;  %v524_v4 = vsel %vm517_vm0, %v503_v1, 0.0  ;;  %v504_v5 = vld [vmem:[%s8006_s16 + $0x18] sm:$0xff]  ;;  %v521_v6 = vsel %vm517_vm0, %v502_v2, 0.0  ;;  %v505_v8 = vld [vmem:[%s8006_s16 + $0x20] sm:$0xff]  ;;  %v506_v9 = vld [vmem:[%s8006_s16 + $0x28] sm:$0xff] }
  0x7d   : > { %519 = vadd.xlane.f32.xlu0 %v518_v3  ;;  %525 = vadd.xlane.f32.xlu1 %v524_v4  ;;  %v527_v7 = vsel %vm517_vm0, %v504_v5, 0.0  ;;  %v530_v10 = vsel %vm517_vm0, %v505_v8, 0.0  ;;  %v533_v11 = vsel %vm517_vm0, %v506_v9, 0.0  ;;  %v507_v12 = vld [vmem:[%s8006_s16 + $0x30] sm:$0xff]  ;;  %v508_v13 = vld [vmem:[%s8006_s16 + $0x38] sm:$0xff]  ;;  %s7774_s20 = smov 48  }
  0x7e   : > { %v536_v14 = vsel %vm517_vm0, %v507_v12, 0.0  ;;  %v539_v15 = vsel %vm517_vm0, %v508_v13, 0.0  ;;  %6544 = vmatpush3.bf16.msra.mxu1 %v632_v61  ;;  %s11393_s13 = smov 72   ;;  %s11391_s15 = smov 104  }
  0x7f   : > { %s11496_s27 = smov 8   ;;  %s11433_s21 = smov 16  }
  0x80   : > { %s11395_s22 = smov 24   ;;  %s11700_s29 = smov 16  }
  0x81   : > { %522 = vadd.xlane.f32.xlu0 %v521_v6  ;;  %528 = vadd.xlane.f32.xlu1 %v527_v7 }
  0x85   : > { %531 = vadd.xlane.f32.xlu0 %v530_v10  ;;  %534 = vadd.xlane.f32.xlu1 %v533_v11 }
  0x89   : > { %537 = vadd.xlane.f32.xlu0 %v536_v14  ;;  %540 = vadd.xlane.f32.xlu1 %v539_v15 }
 0x10a   : > { %v520_v16 = vpop.xlane.xlu0 %519  ;;  %v526_v17 = vpop.xlane.xlu1 %525 }
 0x10b   : > { %v543_v18 = vmul.f32 0.03125, %v520_v16  ;;  %v545_v19 = vmul.f32 0.03125, %v526_v17 }
 0x10d   : > { %v8024_v20 = vsub.f32 %v501_v0, %v543_v18  ;;  %v8026_v21 = vsub.f32 %v503_v1, %v545_v19 }
 0x10e   : > { %v523_v22 = vpop.xlane.xlu0 %522  ;;  %v529_v23 = vpop.xlane.xlu1 %528 }
 0x10f   : > { %v544_v24 = vmul.f32 0.03125, %v523_v22  ;;  %v546_v25 = vmul.f32 0.03125, %v529_v23  ;;  %v559_v26 = vmul.f32 %v8024_v20, %v8024_v20  ;;  %v561_v27 = vmul.f32 %v8026_v21, %v8026_v21 }
 0x111   : > { %v8032_v28 = vsub.f32 %v502_v2, %v544_v24  ;;  %v8034_v29 = vsub.f32 %v504_v5, %v546_v25  ;;  %v567_v30 = vsel %vm517_vm0, %v559_v26, 0.0  ;;  %v573_v33 = vsel %vm517_vm0, %v561_v27, 0.0 }
 0x112   : > { %568 = vadd.xlane.f32.xlu0 %v567_v30  ;;  %v532_v31 = vpop.xlane.xlu0 %531  ;;  %v535_v32 = vpop.xlane.xlu1 %534 }
 0x113   : > { %v547_v34 = vmul.f32 0.03125, %v532_v31  ;;  %v548_v35 = vmul.f32 0.03125, %v535_v32  ;;  %v560_v36 = vmul.f32 %v8032_v28, %v8032_v28  ;;  %v562_v37 = vmul.f32 %v8034_v29, %v8034_v29 }
 0x115   : > { %v8042_v38 = vsub.f32 %v505_v8, %v547_v34  ;;  %v8044_v39 = vsub.f32 %v506_v9, %v548_v35  ;;  %v570_v40 = vsel %vm517_vm0, %v560_v36, 0.0  ;;  %v576_v43 = vsel %vm517_vm0, %v562_v37, 0.0 }
 0x116   : > { %574 = vadd.xlane.f32.xlu0 %v573_v33  ;;  %571 = vadd.xlane.f32.xlu1 %v570_v40  ;;  %v538_v41 = vpop.xlane.xlu0 %537  ;;  %v541_v42 = vpop.xlane.xlu1 %540 }
 0x117   : > { %v549_v44 = vmul.f32 0.03125, %v538_v41  ;;  %v550_v45 = vmul.f32 0.03125, %v541_v42  ;;  %v563_v46 = vmul.f32 %v8042_v38, %v8042_v38  ;;  %v564_v47 = vmul.f32 %v8044_v39, %v8044_v39 }
 0x119   : > { %v8052_v48 = vsub.f32 %v507_v12, %v549_v44  ;;  %v8054_v49 = vsub.f32 %v508_v13, %v550_v45  ;;  %v579_v50 = vsel %vm517_vm0, %v563_v46, 0.0  ;;  %v582_v51 = vsel %vm517_vm0, %v564_v47, 0.0  ;;  %v6169_v45 = vld [vmem:[%s11376_s3] ss:$0 sm:$0xff] }
 0x11a   : > { %577 = vadd.xlane.f32.xlu1 %v576_v43  ;;  %580 = vadd.xlane.f32.xlu0 %v579_v50 }
 0x11b   : > { %v565_v52 = vmul.f32 %v8052_v48, %v8052_v48  ;;  %v566_v53 = vmul.f32 %v8054_v49, %v8054_v49 }
 0x11d   : > { %v585_v54 = vsel %vm517_vm0, %v565_v52, 0.0  ;;  %v588_v55 = vsel %vm517_vm0, %v566_v53, 0.0 }
 0x11e   : > { %583 = vadd.xlane.f32.xlu1 %v582_v51  ;;  %586 = vadd.xlane.f32.xlu0 %v585_v54 }
 0x122   : > { %589 = vadd.xlane.f32.xlu1 %v588_v55 }
 0x19f   : > { %v569_v62 = vpop.xlane.xlu0 %568 }
 0x1a0   : > { %v591_v63 = vmul.f32 0.03125, %v569_v62 }
 0x1a2   : > { %v599_v0 = vadd.f32 1e-05, %v591_v63 }
 0x1a3   : > { %v572_v1 = vpop.xlane.xlu1 %571  ;;  %v575_v2 = vpop.xlane.xlu0 %574 }
 0x1a4   : > { %v592_v3 = vmul.f32 0.03125, %v572_v1  ;;  %v593_v4 = vmul.f32 0.03125, %v575_v2  ;;  %7171 = vrsqrt.f32 %v599_v0 }
 0x1a6   : > { %v600_v5 = vadd.f32 1e-05, %v592_v3  ;;  %v601_v6 = vadd.f32 1e-05, %v593_v4 }
 0x1a7   : > { %v578_v7 = vpop.xlane.xlu1 %577  ;;  %v581_v8 = vpop.xlane.xlu0 %580 }
 0x1a8   : > { %7173 = vrsqrt.f32 %v600_v5  ;;  %v594_v9 = vmul.f32 0.03125, %v578_v7  ;;  %v595_v10 = vmul.f32 0.03125, %v581_v8  ;;  %v723_v7 = vld [vmem:[%s11377_s4 + $0x10] sm:$0xff] }
 0x1a9   : > { %7175 = vrsqrt.f32 %v601_v6 }
 0x1aa   : > { %v602_v11 = vadd.f32 1e-05, %v594_v9  ;;  %v603_v12 = vadd.f32 1e-05, %v595_v10  ;;  %v721_v9 = vld [vmem:[%s11377_s4] sm:$0xff] }
 0x1ab   : > { %v584_v13 = vpop.xlane.xlu1 %583  ;;  %v587_v14 = vpop.xlane.xlu0 %586 }
 0x1ac   : > { %7177 = vrsqrt.f32 %v602_v11  ;;  %v596_v15 = vmul.f32 0.03125, %v584_v13  ;;  %v597_v16 = vmul.f32 0.03125, %v587_v14 }
 0x1ad   : > { %7179 = vrsqrt.f32 %v603_v12  ;;  %v722_v12 = vld [vmem:[%s11377_s4 + $0x8] sm:$0xff] }
 0x1ae   : > { %v604_v17 = vadd.f32 1e-05, %v596_v15  ;;  %v605_v18 = vadd.f32 1e-05, %v597_v16  ;;  %v7172_v22 = vpop.eup %7171 }
 0x1af   : > { %v590_v19 = vpop.xlane.xlu1 %589  ;;  %v615_v26 = vmul.f32 %v7172_v22, %v8024_v20 }
 0x1b0   : > { %7181 = vrsqrt.f32 %v604_v17  ;;  %v598_v23 = vmul.f32 0.03125, %v590_v19  ;;  %v724_v17 = vld [vmem:[%s11377_s4 + $0x18] sm:$0xff] }
 0x1b1   : > { %7183 = vrsqrt.f32 %v605_v18 }
 0x1b2   : > { %v7174_v24 = vpop.eup %7173  ;;  %v606_v25 = vadd.f32 1e-05, %v598_v23 }
 0x1b3   : > { %v616_v27 = vmul.f32 %v7174_v24, %v8032_v28  ;;  %v7176_v30 = vpop.eup %7175  ;;  %v727_v24 = vld [vmem:[%s11377_s4 + $0x30] sm:$0xff] }
 0x1b4   : > { %7185 = vrsqrt.f32 %v606_v25  ;;  %v617_v33 = vmul.f32 %v7176_v30, %v8026_v21 }
 0x1b5   : > { %v627_v31 = vpack.c.bf16 %v616_v27, %v615_v26 }
 0x1b6   : > { %v7178_v32 = vpop.eup %7177 }
 0x1b7   : > { %6545 = vmatprep.mubr.msk.bf16.mxu1 %vm517_vm0, %v627_v31  ;;  %v618_v34 = vmul.f32 %v7178_v32, %v8034_v29  ;;  %v7180_v35 = vpop.eup %7179 }
 0x1b8   : > { %v619_v40 = vmul.f32 %v7180_v35, %v8042_v38 }
 0x1b9   : > { %v628_v36 = vpack.c.bf16 %v618_v34, %v617_v33  ;;  %v725_v33 = vld [vmem:[%s11377_s4 + $0x20] sm:$0xff] }
 0x1ba   : > { %v7182_v37 = vpop.eup %7181 }
 0x1bb   : > { %6546 = vmatmul.mubr.msk.bf16.vlgmr.msra.gmra.mrb[0].mxu1 %vm517_vm0, %v628_v36  ;;  %v620_v20 = vmul.f32 %v7182_v37, %v8044_v39  ;;  %v7184_v28 = vpop.eup %7183  ;;  %v728_v37 = vld [vmem:[%s11377_s4 + $0x38] sm:$0xff] }
 0x1bc   : > { %v621_v43 = vmul.f32 %v7184_v28, %v8052_v48 }
 0x1bd   : > { %v629_v41 = vpack.c.bf16 %v620_v20, %v619_v40  ;;  %v726_v20 = vld [vmem:[%s11377_s4 + $0x28] sm:$0xff] }
 0x1be   : > { %v7186_v42 = vpop.eup %7185 }
 0x1bf   : > { %6549 = vmatprep.mubr.msk.bf16.mxu1 %vm517_vm0, %v629_v41  ;;  %v622_v21 = vmul.f32 %v7186_v42, %v8054_v49 }
 0x1c1   : > { %v630_v44 = vpack.c.bf16 %v622_v21, %v621_v43 }
 0x1c3   : > { %6550 = vmatmul.mubr.msk.bf16.gmra.mrb[4].mxu1 %vm517_vm0, %v630_v44 }
 0x28e   : > { %v6547_v29 = vpop.f32.mrb[0].mxu1 }
 0x28f   : > { %v686_v38 = vpop.f32.mrb[1].mxu1  ;;  %v695_v39 = vadd.f32 %v6547_v29, %v6169_v45 }
 0x290   : > { %v6548_v46 = vpop.f32.mrb[2].mxu1  ;;  %v687_v51 = vadd.f32 %v6169_v45, %v686_v38 }
 0x291   : > { %v698_v47 = vadd.f32 %v6548_v46, %v6169_v45  ;;  %v689_v50 = vpop.f32.mrb[3].mxu1 }
 0x292   : > { %v690_v52 = vadd.f32 %v6169_v45, %v689_v50 }
 0x293   : > { %v8091_v53 = vpack.c.bf16 %v698_v47, %v695_v39 }
 0x294   : > { %v8093_v48 = vpack.c.bf16 %v690_v52, %v687_v51 }
 0x295   : > { %735 = vrot.lane.b32.xlu1 %v8091_v53, %s7767_s17 }
 0x296   : > { %733 = vrot.lane.b32.xlu0 %v8093_v48, %s7767_s17  ;;  %v6551_v49 = vpop.f32.mrb[4].mxu1  ;;  %6561 = vmatprep.mubr.msk.bf16.mxu1 %vm741_vm1, %v8093_v48 }
 0x297   : > { %v702_v54 = vpop.f32.mrb[5].mxu1  ;;  %v711_v56 = vadd.f32 %v6551_v49, %v6169_v45 }
 0x298   : > { %v6552_v55 = vpop.f32.mrb[6].mxu1  ;;  %v703_v59 = vadd.f32 %v6169_v45, %v702_v54 }
 0x299   : > { %v714_v57 = vadd.f32 %v6552_v55, %v6169_v45  ;;  %v705_v58 = vpop.f32.mrb[7].mxu1 }
 0x29a   : > { %v706_v60 = vadd.f32 %v6169_v45, %v705_v58 }
 0x29b   : > { %v8101_v61 = vpack.c.bf16 %v714_v57, %v711_v56 }
 0x29c   : > { %v8103_v62 = vpack.c.bf16 %v706_v60, %v703_v59 }
 0x29e   : > { %737 = vrot.lane.b32.xlu1 %v8103_v62, %s7767_s17 }
 0x2a2   : > { %739 = vrot.lane.b32.xlu1 %v8101_v61, %s7767_s17 }
 0x307   : > { %v736_v1 = vpop.permute.xlu1 %735 }
 0x308   : > { %v734_v63 = vpop.permute.xlu0 %733  ;;  %v758_v2 = vsel %vm741_vm1, %v736_v1, 0 }
 0x309   : > { %6917 = vmatprep.subr.msk.bf16.mxu1 %vm741_vm1, %v734_v63  ;;  %v755_v0 = vsel %vm741_vm1, %v734_v63, 0 }
 0x30a   : > { %6554 = vmatpush3.bf16.xpose.msra.mxu1 %v755_v0 }
 0x30b   : > { %6918 = vmatprep.subr.msk.bf16.mxu1 %vm741_vm1, %v736_v1 }
 0x310   : > { %v738_v3 = vpop.permute.xlu1 %737 }
 0x311   : > { %v761_v4 = vsel %vm741_vm1, %v738_v3, 0 }
 0x312   : > { %6556 = vmatpush3.bf16.xpose.msra.mxu1 %v758_v2 }
 0x313   : > { %6919 = vmatprep.subr.msk.bf16.mxu1 %vm741_vm1, %v738_v3 }
 0x314   : > { %v740_v5 = vpop.permute.xlu1 %739 }
 0x315   : > { %v764_v6 = vsel %vm741_vm1, %v740_v5, 0 }
 0x31a   : > { %6558 = vmatpush3.bf16.xpose.msra.mxu1 %v761_v4 }
 0x31b   : > { %6920 = vmatprep.subr.msk.bf16.mxu1 %vm741_vm1, %v740_v5 }
 0x322   : > { %6560 = vmatpush3.bf16.xpose.msra.mxu1 %v764_v6 }
 0x329   : > { %6562 = vmatmul.mubr.msk.bf16.vlgmr.msra.gmra.mrb[8].mxu1 %vm741_vm1, %v8091_v53 }
 0x32a   : > { %6565 = vmatprep.mubr.msk.bf16.mxu1 %vm741_vm1, %v8103_v62 }
 0x331   : > { %6566 = vmatmul.mubr.msk.bf16.gmra.mrb[12].mxu1 %vm741_vm1, %v8101_v61 }
 0x3fc   : > { %v6563_v8 = vpop.f32.mrb[8].mxu1 }
 0x3fd   : > { %v809_v10 = vadd.f32 %v6563_v8, %v723_v7  ;;  %v800_v11 = vpop.f32.mrb[9].mxu1 }
 0x3fe   : > { %v6564_v13 = vpop.f32.mrb[10].mxu1  ;;  %v801_v14 = vadd.f32 %v800_v11, %v721_v9 }
 0x3ff   : > { %v803_v15 = vpop.f32.mrb[11].mxu1  ;;  %v838_v16 = vsel %vm831_vm2, %v809_v10, -inf  ;;  %v812_v22 = vadd.f32 %v6564_v13, %v724_v17 }
 0x400   : > { %v804_v18 = vadd.f32 %v803_v15, %v722_v12  ;;  %839 = vmax.xlane.f32.xlu0 %v838_v16  ;;  %v832_v23 = vsel %vm831_vm2, %v801_v14, -inf }
 0x401   : > { %v841_v32 = vsel %vm831_vm2, %v812_v22, -inf }
 0x402   : > { %v835_v19 = vsel %vm831_vm2, %v804_v18, -inf }
 0x403   : > { %836 = vmax.xlane.f32.xlu1 %v835_v19 }
 0x404   : > { %v6567_v25 = vpop.f32.mrb[12].mxu1  ;;  %833 = vmax.xlane.f32.xlu0 %v832_v23 }
 0x405   : > { %v816_v26 = vpop.f32.mrb[13].mxu1  ;;  %v825_v30 = vadd.f32 %v6567_v25, %v727_v24 }
 0x406   : > { %v6568_v27 = vpop.f32.mrb[14].mxu1  ;;  %v817_v34 = vadd.f32 %v816_v26, %v725_v33 }
 0x407   : > { %v819_v31 = vpop.f32.mrb[15].mxu1  ;;  %v850_v35 = vsel %vm831_vm2, %v825_v30, -inf  ;;  %v8156_v40 = vadd.f32 %v6568_v27, %v728_v37 }
 0x408   : > { %842 = vmax.xlane.f32.xlu0 %v841_v32  ;;  %v844_v36 = vsel %vm831_vm2, %v817_v34, -inf  ;;  %v8161_v28 = vadd.f32 %v819_v31, %v726_v20 }
 0x409   : > { %v853_v41 = vsel %vm831_vm2, %v8156_v40, -inf }
 0x40a   : > { %v847_v42 = vsel %vm831_vm2, %v8161_v28, -inf }
 0x40c   : > { %851 = vmax.xlane.f32.xlu0 %v850_v35 }
 0x410   : > { %845 = vmax.xlane.f32.xlu0 %v844_v36 }
 0x414   : > { %926 = vrot.lane.b32.xlu1 %v8091_v53, %s7768_s30 }
 0x418   : > { %928 = vrot.lane.b32.xlu1 %v8103_v62, %s7768_s30 }
 0x426   : > { %924 = vrot.lane.b32.xlu0 %v8093_v48, %s7768_s30 }
 0x43c   : > { %854 = vmax.xlane.f32.xlu1 %v853_v41 }
 0x440   : > { %848 = vmax.xlane.f32.xlu1 %v847_v42 }
 0x451   : > { %930 = vrot.lane.b32.xlu1 %v8101_v61, %s7768_s30 }
 0x48d   : > { %v840_v43 = vpop.xlane.xlu0 %839 }
 0x48e   : > { %v858_v21 = vsub.f32 %v809_v10, %v840_v43 }
 0x490   : > { %v868_v44 = vmul.f32 1.442695, %v858_v21  ;;  %v837_v29 = vpop.xlane.xlu1 %836 }
 0x491   : > { %v834_v45 = vpop.xlane.xlu0 %833  ;;  %v857_v46 = vsub.f32 %v804_v18, %v837_v29 }
 0x492   : > { %7187 = vpow2.f32 %v868_v44  ;;  %v856_v38 = vsub.f32 %v801_v14, %v834_v45 }
 0x493   : > { %v866_v51 = vmul.f32 1.442695, %v857_v46 }
 0x494   : > { %v864_v39 = vmul.f32 1.442695, %v856_v38  ;;  %v927_v0 = vpop.permute.xlu1 %926 }
 0x495   : > { %v843_v47 = vpop.xlane.xlu0 %842 }
 0x496   : > { %7189 = vpow2.f32 %v864_v39  ;;  %v859_v50 = vsub.f32 %v812_v22, %v843_v47 }
 0x498   : > { %v870_v52 = vmul.f32 1.442695, %v859_v50  ;;  %v929_v6 = vpop.permute.xlu1 %928 }
 0x499   : > { %v852_v49 = vpop.xlane.xlu0 %851 }
 0x49a   : > { %7191 = vpow2.f32 %v870_v52  ;;  %v862_v54 = vsub.f32 %v825_v30, %v852_v49 }
 0x49b   : > { %7193 = vpow2.f32 %v866_v51 }
 0x49c   : > { %v8169_v55 = vpop.eup %7187  ;;  %v876_v56 = vmul.f32 1.442695, %v862_v54 }
 0x49d   : > { %v846_v57 = vpop.xlane.xlu0 %845  ;;  %v886_v58 = vsel %vm831_vm2, %v8169_v55, 0.0 }
 0x49e   : > { %7195 = vpow2.f32 %v876_v56  ;;  %v860_v59 = vsub.f32 %v817_v34, %v846_v57  ;;  %887 = vadd.xlane.f32.xlu0 %v886_v58 }
 0x4a0   : > { %v8173_v60 = vpop.eup %7189  ;;  %v872_v63 = vmul.f32 1.442695, %v860_v59 }
 0x4a1   : > { %v925_v1 = vpop.permute.xlu0 %924  ;;  %v880_v2 = vsel %vm831_vm2, %v8173_v60, 0.0 }
 0x4a2   : > { %7197 = vpow2.f32 %v872_v63  ;;  %881 = vadd.xlane.f32.xlu0 %v880_v2  ;;  %6569 = vmatprep.subr.bf16.mxu0 %v925_v1 }
 0x4a3   : > { %6570 = vmatpush3.bf16.msra.mxu0 %v925_v1 }
 0x4a4   : > { %v7192_v3 = vpop.eup %7191  ;;  %6571 = vmatprep.subr.bf16.mxu0 %v927_v0 }
 0x4a5   : > { %v889_v4 = vsel %vm831_vm2, %v7192_v3, 0.0  ;;  %v7194_v5 = vpop.eup %7193 }
 0x4a6   : > { %890 = vadd.xlane.f32.xlu1 %v889_v4  ;;  %v883_v8 = vsel %vm831_vm2, %v7194_v5, 0.0 }
 0x4a7   : > { %6572 = vmatpush3.bf16.msra.mxu0 %v927_v0 }
 0x4a8   : > { %v8178_v7 = vpop.eup %7195  ;;  %6573 = vmatprep.subr.bf16.mxu0 %v929_v6 }
 0x4a9   : > { %v898_v9 = vsel %vm831_vm2, %v8178_v7, 0.0 }
 0x4aa   : > { %884 = vadd.xlane.f32.xlu1 %v883_v8  ;;  %899 = vadd.xlane.f32.xlu0 %v898_v9 }
 0x4ab   : > { %6574 = vmatpush3.bf16.msra.mxu0 %v929_v6 }
 0x4ac   : > { %v8183_v10 = vpop.eup %7197 }
 0x4ad   : > { %v892_v11 = vsel %vm831_vm2, %v8183_v10, 0.0 }
 0x4ae   : > { %893 = vadd.xlane.f32.xlu0 %v892_v11  ;;  %v6184_v11 = vld [vmem:[%s11377_s4 + $0x50] sm:$0xff] }
 0x4bb   : > { %1032 = vrot.lane.b32.xlu1 %v8091_v53, %s7769_s23 }
 0x4bf   : > { %1034 = vrot.lane.b32.xlu1 %v8103_v62, %s7769_s23 }
 0x4c9   : > { %v855_v12 = vpop.xlane.xlu1 %854 }
 0x4ca   : > { %v863_v13 = vsub.f32 %v8156_v40, %v855_v12 }
 0x4cc   : > { %v878_v14 = vmul.f32 1.442695, %v863_v13  ;;  %v6182_v13 = vld [vmem:[%s11377_s4 + $0x40] sm:$0xff] }
 0x4cd   : > { %v849_v15 = vpop.xlane.xlu1 %848 }
 0x4ce   : > { %7199 = vpow2.f32 %v878_v14  ;;  %v861_v16 = vsub.f32 %v8161_v28, %v849_v15 }
 0x4d0   : > { %v874_v17 = vmul.f32 1.442695, %v861_v16  ;;  %v6183_v16 = vld [vmem:[%s11377_s4 + $0x48] sm:$0xff] }
 0x4d1   : > { %v931_v18 = vpop.permute.xlu1 %930 }
 0x4d2   : > { %6575 = vmatprep.subr.bf16.mxu0 %v931_v18  ;;  %7201 = vpow2.f32 %v874_v17 }
 0x4d3   : > { %6576 = vmatpush3.bf16.msra.mxu0 %v931_v18 }
 0x4d8   : > { %v7200_v19 = vpop.eup %7199 }
 0x4d9   : > { %v901_v22 = vsel %vm831_vm2, %v7200_v19, 0.0 }
 0x4da   : > { %902 = vadd.xlane.f32.xlu0 %v901_v22 }
 0x4dc   : > { %v7202_v23 = vpop.eup %7201 }
 0x4dd   : > { %v895_v24 = vsel %vm831_vm2, %v7202_v23, 0.0 }
 0x4e3   : > { %896 = vadd.xlane.f32.xlu1 %v895_v24 }
 0x4f0   : > { %1030 = vrot.lane.b32.xlu0 %v8093_v48, %s7769_s23 }
 0x4f4   : > { %1036 = vrot.lane.b32.xlu1 %v8101_v61, %s7769_s23  ;;  %1022 = vrot.lane.b32.xlu0 %v8093_v48, %s7770_s18 }
 0x4f8   : > { %1024 = vrot.lane.b32.xlu1 %v8091_v53, %s7770_s18  ;;  %1026 = vrot.lane.b32.xlu0 %v8103_v62, %s7770_s18 }
 0x4fc   : > { %1028 = vrot.lane.b32.xlu1 %v8101_v61, %s7770_s18 }
 0x52b   : > { %v888_v25 = vpop.xlane.xlu0 %887 }
 0x52f   : > { %v882_v26 = vpop.xlane.xlu0 %881 }
 0x533   : > { %v891_v27 = vpop.xlane.xlu1 %890 }
 0x534   : > { %7203 = vrcp.f32 %v891_v27 }
 0x535   : > { %7205 = vrcp.f32 %v882_v26 }
 0x536   : > { %7207 = vrcp.f32 %v888_v25 }
 0x537   : > { %v885_v30 = vpop.xlane.xlu1 %884  ;;  %v900_v41 = vpop.xlane.xlu0 %899 }
 0x538   : > { %7209 = vrcp.f32 %v885_v30  ;;  %v6188_v30 = vld [vmem:[%s11377_s4 + $0x70] sm:$0xff] }
 0x53b   : > { %v894_v42 = vpop.xlane.xlu0 %893  ;;  %v1033_v43 = vpop.permute.xlu1 %1032 }
 0x53c   : > { %v1054_v46 = vsel %vm741_vm1, %v1033_v43, 0 }
 0x53e   : > { %v7204_v31 = vpop.eup %7203 }
 0x53f   : > { %v7206_v32 = vpop.eup %7205  ;;  %v915_v35 = vmul.f32 %v7204_v31, %v7192_v3  ;;  %v1035_v29 = vpop.permute.xlu1 %1034 }
 0x540   : > { %v7208_v33 = vpop.eup %7207  ;;  %v912_v36 = vmul.f32 %v7206_v32, %v8173_v60  ;;  %v1057_v49 = vsel %vm741_vm1, %v1035_v29, 0 }
 0x541   : > { %v914_v40 = vmul.f32 %v7208_v33, %v8169_v55 }
 0x542   : > { %v7210_v34 = vpop.eup %7209 }
 0x543   : > { %v913_v37 = vmul.f32 %v7210_v34, %v7194_v5  ;;  %v921_v28 = vpack.c.bf16 %v915_v35, %v914_v40 }
 0x545   : > { %v920_v20 = vpack.c.bf16 %v913_v37, %v912_v36  ;;  %v6186_v37 = vld [vmem:[%s11377_s4 + $0x60] sm:$0xff] }
 0x547   : > { %6577 = vmatprep.mubr.msk.bf16.mxu0 %vm831_vm2, %v920_v20 }
 0x548   : > { %6578 = vmatmul.mubr.msk.bf16.vlgmr.msra.gmra.mrb[0].mxu0 %vm831_vm2, %v921_v28 }
 0x567   : > { %v903_v21 = vpop.xlane.xlu0 %902 }
 0x568   : > { %7211 = vrcp.f32 %v903_v21 }
 0x569   : > { %7213 = vrcp.f32 %v894_v42 }
 0x56a   : > { %7215 = vrcp.f32 %v900_v41  ;;  %v6189_v41 = vld [vmem:[%s11377_s4 + $0x78] sm:$0xff] }
 0x56b   : > { %v1031_v44 = vpop.permute.xlu0 %1030 }
 0x56c   : > { %6921 = vmatprep.subr.msk.bf16.mxu0 %vm741_vm1, %v1031_v44  ;;  %v1051_v45 = vsel %vm741_vm1, %v1031_v44, 0 }
 0x56d   : > { %6586 = vmatpush3.bf16.xpose.msra.mxu0 %v1051_v45 }
 0x56e   : > { %6922 = vmatprep.subr.msk.bf16.mxu0 %vm741_vm1, %v1033_v43  ;;  %v6187_v43 = vld [vmem:[%s11377_s4 + $0x68] sm:$0xff] }
 0x56f   : > { %v1023_v60 = vpop.permute.xlu0 %1022 }
 0x570   : > { %v897_v38 = vpop.xlane.xlu1 %896 }
 0x571   : > { %7217 = vrcp.f32 %v897_v38 }
 0x572   : > { %v7212_v39 = vpop.eup %7211 }
 0x573   : > { %v7214_v47 = vpop.eup %7213  ;;  %v919_v52 = vmul.f32 %v7212_v39, %v7200_v19  ;;  %v1027_v1 = vpop.permute.xlu0 %1026 }
 0x574   : > { %v7216_v50 = vpop.eup %7215  ;;  %v916_v54 = vmul.f32 %v7214_v47, %v8183_v10  ;;  %v1037_v56 = vpop.permute.xlu1 %1036 }
 0x575   : > { %6588 = vmatpush3.bf16.xpose.msra.mxu0 %v1054_v46  ;;  %v918_v57 = vmul.f32 %v7216_v50, %v8178_v7  ;;  %v1060_v63 = vsel %vm741_vm1, %v1037_v56, 0 }
 0x576   : > { %6923 = vmatprep.subr.msk.bf16.mxu0 %vm741_vm1, %v1035_v29 }
 0x577   : > { %v923_v59 = vpack.c.bf16 %v919_v52, %v918_v57 }
 0x578   : > { %v1025_v0 = vpop.permute.xlu1 %1024 }
 0x57b   : > { %v7218_v51 = vpop.eup %7217 }
 0x57c   : > { %v917_v55 = vmul.f32 %v7218_v51, %v7202_v23  ;;  %v1029_v2 = vpop.permute.xlu1 %1028  ;;  %v6185_v23 = vld [vmem:[%s11377_s4 + $0x58] sm:$0xff] }
 0x57d   : > { %6590 = vmatpush3.bf16.xpose.msra.mxu0 %v1057_v49 }
 0x57e   : > { %6924 = vmatprep.subr.msk.bf16.mxu0 %vm741_vm1, %v1037_v56  ;;  %v922_v58 = vpack.c.bf16 %v917_v55, %v916_v54 }
 0x580   : > { %6581 = vmatprep.mubr.msk.bf16.mxu0 %vm831_vm2, %v922_v58 }
 0x581   : > { %6582 = vmatmul.mubr.msk.bf16.gmra.mrb[4].mxu0 %vm831_vm2, %v923_v59 }
 0x582   : > { %6593 = vmatprep.mubr.msk.bf16.mxu0 %vm741_vm1, %v1023_v60 }
 0x585   : > { %6592 = vmatpush3.bf16.xpose.msra.mxu0 %v1060_v63 }
 0x58c   : > { %6594 = vmatmul.mubr.msk.bf16.vlgmr.msra.gmra.mrb[8].mxu0 %vm741_vm1, %v1025_v0 }
 0x58d   : > { %6597 = vmatprep.mubr.msk.bf16.mxu0 %vm741_vm1, %v1027_v1 }
 0x594   : > { %6598 = vmatmul.mubr.msk.bf16.gmra.mrb[12].mxu0 %vm741_vm1, %v1029_v2 }
 0x61b   : > { %v8227_v3 = vpop.f32.mrb[0].mxu0 }
 0x61c   : > { %v8229_v4 = vpop.f32.mrb[1].mxu0 }
 0x61d   : > { %v8231_v5 = vpop.f32.mrb[2].mxu0 }
 0x61e   : > { %v8233_v6 = vpop.f32.mrb[3].mxu0 }
 0x654   : > { %v8235_v7 = vpop.f32.mrb[4].mxu0 }
 0x655   : > { %v8237_v8 = vpop.f32.mrb[5].mxu0 }
 0x656   : > { %v8239_v9 = vpop.f32.mrb[6].mxu0 }
 0x657   : > { %v8241_v10 = vpop.f32.mrb[7].mxu0 }
 0x65f   : > { %v6595_v12 = vpop.f32.mrb[8].mxu0 }
 0x660   : > { %v1105_v14 = vadd.f32 %v6595_v12, %v6184_v11  ;;  %v1096_v15 = vpop.f32.mrb[9].mxu0 }
 0x661   : > { %v6596_v17 = vpop.f32.mrb[10].mxu0  ;;  %v1097_v18 = vadd.f32 %v6182_v13, %v1096_v15 }
 0x662   : > { %v1099_v19 = vpop.f32.mrb[11].mxu0  ;;  %v1133_v22 = vsel %vm831_vm2, %v1105_v14, -inf  ;;  %v1108_v26 = vadd.f32 %v6596_v17, %v6185_v23 }
 0x663   : > { %v1100_v24 = vadd.f32 %v6183_v16, %v1099_v19  ;;  %1134 = vmax.xlane.f32.xlu0 %v1133_v22  ;;  %v1127_v27 = vsel %vm831_vm2, %v1097_v18, -inf }
 0x664   : > { %v1136_v36 = vsel %vm831_vm2, %v1108_v26, -inf }
 0x665   : > { %v1130_v25 = vsel %vm831_vm2, %v1100_v24, -inf }
 0x666   : > { %1131 = vmax.xlane.f32.xlu1 %v1130_v25 }
 0x667   : > { %1128 = vmax.xlane.f32.xlu0 %v1127_v27  ;;  %v6599_v31 = vpop.f32.mrb[12].mxu0 }
 0x668   : > { %v1112_v32 = vpop.f32.mrb[13].mxu0  ;;  %v1121_v34 = vadd.f32 %v6599_v31, %v6188_v30 }
 0x669   : > { %v6600_v33 = vpop.f32.mrb[14].mxu0  ;;  %v1113_v40 = vadd.f32 %v6186_v37, %v1112_v32 }
 0x66a   : > { %v1115_v35 = vpop.f32.mrb[15].mxu0  ;;  %v1145_v20 = vsel %vm831_vm2, %v1121_v34, -inf  ;;  %v8276_v42 = vadd.f32 %v6600_v33, %v6189_v41 }
 0x66b   : > { %1137 = vmax.xlane.f32.xlu0 %v1136_v36  ;;  %v1139_v28 = vsel %vm831_vm2, %v1113_v40, -inf  ;;  %v8281_v21 = vadd.f32 %v6187_v43, %v1115_v35 }
 0x66c   : > { %v1148_v44 = vsel %vm831_vm2, %v8276_v42, -inf }
 0x66d   : > { %v1142_v29 = vsel %vm831_vm2, %v8281_v21, -inf }
 0x66f   : > { %1146 = vmax.xlane.f32.xlu0 %v1145_v20 }
 0x673   : > { %1140 = vmax.xlane.f32.xlu0 %v1139_v28 }
 0x677   : > { %1221 = vrot.lane.b32.xlu1 %v8091_v53, %s7771_s19 }
 0x67b   : > { %1223 = vrot.lane.b32.xlu1 %v8103_v62, %s7771_s19 }
 0x689   : > { %1219 = vrot.lane.b32.xlu0 %v8093_v48, %s7771_s19 }
 0x69f   : > { %1149 = vmax.xlane.f32.xlu1 %v1148_v44 }
 0x6a3   : > { %1143 = vmax.xlane.f32.xlu1 %v1142_v29 }
 0x6b4   : > { %1225 = vrot.lane.b32.xlu1 %v8101_v61, %s7771_s19 }
 0x6f0   : > { %v1135_v45 = vpop.xlane.xlu0 %1134 }
 0x6f1   : > { %v1153_v38 = vsub.f32 %v1105_v14, %v1135_v45 }
 0x6f3   : > { %v1163_v46 = vmul.f32 1.442695, %v1153_v38  ;;  %v1132_v39 = vpop.xlane.xlu1 %1131 }
 0x6f4   : > { %v1129_v47 = vpop.xlane.xlu0 %1128  ;;  %v1152_v51 = vsub.f32 %v1100_v24, %v1132_v39 }
 0x6f5   : > { %7219 = vpow2.f32 %v1163_v46  ;;  %v1151_v50 = vsub.f32 %v1097_v18, %v1129_v47 }
 0x6f6   : > { %v1161_v55 = vmul.f32 1.442695, %v1152_v51 }
 0x6f7   : > { %v1159_v52 = vmul.f32 1.442695, %v1151_v50  ;;  %v1222_v12 = vpop.permute.xlu1 %1221 }
 0x6f8   : > { %v1138_v49 = vpop.xlane.xlu0 %1137 }
 0x6f9   : > { %7221 = vpow2.f32 %v1159_v52  ;;  %v1154_v54 = vsub.f32 %v1108_v26, %v1138_v49 }
 0x6fb   : > { %v1165_v56 = vmul.f32 1.442695, %v1154_v54  ;;  %v1224_v18 = vpop.permute.xlu1 %1223 }
 0x6fc   : > { %v1147_v57 = vpop.xlane.xlu0 %1146 }
 0x6fd   : > { %7223 = vpow2.f32 %v1165_v56  ;;  %v1157_v58 = vsub.f32 %v1121_v34, %v1147_v57 }
 0x6fe   : > { %7225 = vpow2.f32 %v1161_v55 }
 0x6ff   : > { %v8289_v59 = vpop.eup %7219  ;;  %v1171_v60 = vmul.f32 1.442695, %v1157_v58 }
 0x700   : > { %v1141_v63 = vpop.xlane.xlu0 %1140  ;;  %v1181_v0 = vsel %vm831_vm2, %v8289_v59, 0.0 }
 0x701   : > { %7227 = vpow2.f32 %v1171_v60  ;;  %v1155_v1 = vsub.f32 %v1113_v40, %v1141_v63  ;;  %1182 = vadd.xlane.f32.xlu0 %v1181_v0 }
 0x703   : > { %v8293_v2 = vpop.eup %7221  ;;  %v1167_v11 = vmul.f32 1.442695, %v1155_v1 }
 0x704   : > { %v1220_v13 = vpop.permute.xlu0 %1219  ;;  %v1175_v14 = vsel %vm831_vm2, %v8293_v2, 0.0 }
 0x705   : > { %7229 = vpow2.f32 %v1167_v11  ;;  %1176 = vadd.xlane.f32.xlu0 %v1175_v14  ;;  %6601 = vmatprep.subr.bf16.mxu1 %v1220_v13 }
 0x706   : > { %6602 = vmatpush3.bf16.msra.mxu1 %v1220_v13 }
 0x707   : > { %v7224_v15 = vpop.eup %7223  ;;  %6603 = vmatprep.subr.bf16.mxu1 %v1222_v12 }
 0x708   : > { %v1184_v16 = vsel %vm831_vm2, %v7224_v15, 0.0  ;;  %v7226_v17 = vpop.eup %7225 }
 0x709   : > { %1185 = vadd.xlane.f32.xlu1 %v1184_v16  ;;  %v1178_v22 = vsel %vm831_vm2, %v7226_v17, 0.0 }
 0x70a   : > { %6604 = vmatpush3.bf16.msra.mxu1 %v1222_v12 }
 0x70b   : > { %v8298_v19 = vpop.eup %7227  ;;  %6605 = vmatprep.subr.bf16.mxu1 %v1224_v18 }
 0x70c   : > { %v1193_v23 = vsel %vm831_vm2, %v8298_v19, 0.0 }
 0x70d   : > { %1179 = vadd.xlane.f32.xlu1 %v1178_v22  ;;  %1194 = vadd.xlane.f32.xlu0 %v1193_v23 }
 0x70e   : > { %6606 = vmatpush3.bf16.msra.mxu1 %v1224_v18 }
 0x70f   : > { %v8303_v24 = vpop.eup %7229 }
 0x710   : > { %v1187_v25 = vsel %vm831_vm2, %v8303_v24, 0.0 }
 0x711   : > { %1188 = vadd.xlane.f32.xlu0 %v1187_v25 }
 0x71e   : > { %1327 = vrot.lane.b32.xlu1 %v8091_v53, %s7772_s28 }
 0x722   : > { %1329 = vrot.lane.b32.xlu1 %v8103_v62, %s7772_s28 }
 0x72c   : > { %v1150_v26 = vpop.xlane.xlu1 %1149 }
 0x72d   : > { %v1158_v27 = vsub.f32 %v8276_v42, %v1150_v26 }
 0x72f   : > { %v1173_v30 = vmul.f32 1.442695, %v1158_v27 }
 0x730   : > { %v1144_v31 = vpop.xlane.xlu1 %1143 }
 0x731   : > { %7231 = vpow2.f32 %v1173_v30  ;;  %v1156_v32 = vsub.f32 %v8281_v21, %v1144_v31 }
 0x733   : > { %v1169_v33 = vmul.f32 1.442695, %v1156_v32 }
 0x734   : > { %v1226_v34 = vpop.permute.xlu1 %1225 }
 0x735   : > { %6607 = vmatprep.subr.bf16.mxu1 %v1226_v34  ;;  %7233 = vpow2.f32 %v1169_v33 }
 0x736   : > { %6608 = vmatpush3.bf16.msra.mxu1 %v1226_v34 }
 0x73b   : > { %v7232_v35 = vpop.eup %7231 }
 0x73c   : > { %v1196_v36 = vsel %vm831_vm2, %v7232_v35, 0.0 }
 0x73d   : > { %1197 = vadd.xlane.f32.xlu0 %v1196_v36 }
 0x73f   : > { %v7234_v37 = vpop.eup %7233 }
 0x740   : > { %v1190_v40 = vsel %vm831_vm2, %v7234_v37, 0.0 }
 0x746   : > { %1191 = vadd.xlane.f32.xlu1 %v1190_v40 }
 0x753   : > { %1325 = vrot.lane.b32.xlu0 %v8093_v48, %s7772_s28 }
 0x757   : > { %1331 = vrot.lane.b32.xlu1 %v8101_v61, %s7772_s28  ;;  %1317 = vrot.lane.b32.xlu0 %v8093_v48, %s7773_s14 }
 0x75b   : > { %1319 = vrot.lane.b32.xlu1 %v8091_v53, %s7773_s14  ;;  %1321 = vrot.lane.b32.xlu0 %v8103_v62, %s7773_s14 }
 0x75f   : > { %1323 = vrot.lane.b32.xlu1 %v8101_v61, %s7773_s14 }
 0x78e   : > { %v1183_v20 = vpop.xlane.xlu0 %1182 }
 0x792   : > { %v1177_v28 = vpop.xlane.xlu0 %1176 }
 0x796   : > { %v1186_v41 = vpop.xlane.xlu1 %1185 }
 0x797   : > { %7235 = vrcp.f32 %v1186_v41  ;;  %v6198_v41 = vld [vmem:[%s11377_s4 + $0x80] sm:$0xff] }
 0x798   : > { %7237 = vrcp.f32 %v1177_v28 }
 0x799   : > { %7239 = vrcp.f32 %v1183_v20  ;;  %v6200_v20 = vld [vmem:[%s11377_s4 + $0x90] sm:$0xff] }
 0x79a   : > { %v1180_v42 = vpop.xlane.xlu1 %1179  ;;  %v1195_v51 = vpop.xlane.xlu0 %1194 }
 0x79b   : > { %7241 = vrcp.f32 %v1180_v42 }
 0x79e   : > { %v1189_v52 = vpop.xlane.xlu0 %1188  ;;  %v1328_v49 = vpop.permute.xlu1 %1327 }
 0x7a1   : > { %v7236_v43 = vpop.eup %7235 }
 0x7a2   : > { %v7238_v21 = vpop.eup %7237  ;;  %v1210_v45 = vmul.f32 %v7236_v43, %v7224_v15  ;;  %v1330_v56 = vpop.permute.xlu1 %1329 }
 0x7a3   : > { %v7240_v44 = vpop.eup %7239  ;;  %v1207_v38 = vmul.f32 %v7238_v21, %v8293_v2  ;;  %v1352_v11 = vsel %vm741_vm1, %v1330_v56, 0  ;;  %v6199_v21 = vld [vmem:[%s11377_s4 + $0x88] sm:$0xff] }
 0x7a4   : > { %v1209_v39 = vmul.f32 %v7240_v44, %v8289_v59  ;;  %v1349_v59 = vsel %vm741_vm1, %v1328_v49, 0 }
 0x7a5   : > { %v7242_v29 = vpop.eup %7241 }
 0x7a6   : > { %v1208_v46 = vmul.f32 %v7242_v29, %v7226_v17  ;;  %v1216_v50 = vpack.c.bf16 %v1210_v45, %v1209_v39 }
 0x7a8   : > { %v1215_v47 = vpack.c.bf16 %v1208_v46, %v1207_v38  ;;  %v6201_v46 = vld [vmem:[%s11377_s4 + $0x98] sm:$0xff] }
 0x7aa   : > { %6609 = vmatprep.mubr.msk.bf16.mxu1 %vm831_vm2, %v1215_v47 }
 0x7ab   : > { %6610 = vmatmul.mubr.msk.bf16.vlgmr.msra.gmra.mrb[16].mxu1 %vm831_vm2, %v1216_v50 }
 0x7ca   : > { %v1198_v54 = vpop.xlane.xlu0 %1197 }
 0x7cb   : > { %7243 = vrcp.f32 %v1198_v54 }
 0x7cc   : > { %7245 = vrcp.f32 %v1189_v52  ;;  %v6204_v52 = vld [vmem:[%s11377_s4 + $0xb0] sm:$0xff] }
 0x7cd   : > { %7247 = vrcp.f32 %v1195_v51 }
 0x7ce   : > { %v1326_v55 = vpop.permute.xlu0 %1325 }
 0x7cf   : > { %6925 = vmatprep.subr.msk.bf16.mxu1 %vm741_vm1, %v1326_v55  ;;  %v1346_v57 = vsel %vm741_vm1, %v1326_v55, 0 }
 0x7d0   : > { %6618 = vmatpush3.bf16.xpose.msra.mxu1 %v1346_v57 }
 0x7d1   : > { %6926 = vmatprep.subr.msk.bf16.mxu1 %vm741_vm1, %v1328_v49 }
 0x7d2   : > { %v1318_v18 = vpop.permute.xlu0 %1317 }
 0x7d3   : > { %v1192_v58 = vpop.xlane.xlu1 %1191 }
 0x7d4   : > { %7249 = vrcp.f32 %v1192_v58 }
 0x7d5   : > { %v7244_v60 = vpop.eup %7243 }
 0x7d6   : > { %v7246_v63 = vpop.eup %7245  ;;  %v1214_v2 = vmul.f32 %v7244_v60, %v7232_v35 }
 0x7d7   : > { %v7248_v0 = vpop.eup %7247  ;;  %v1211_v12 = vmul.f32 %v7246_v63, %v8303_v24  ;;  %v1332_v14 = vpop.permute.xlu1 %1331 }
 0x7d8   : > { %6620 = vmatpush3.bf16.xpose.msra.mxu1 %v1349_v59  ;;  %v1213_v15 = vmul.f32 %v7248_v0, %v8298_v19  ;;  %v1355_v22 = vsel %vm741_vm1, %v1332_v14, 0  ;;  %v1322_v24 = vpop.permute.xlu0 %1321  ;;  %v6202_v59 = vld [vmem:[%s11377_s4 + $0xa0] sm:$0xff] }
 0x7d9   : > { %6927 = vmatprep.subr.msk.bf16.mxu1 %vm741_vm1, %v1330_v56 }
 0x7da   : > { %v1218_v17 = vpack.c.bf16 %v1214_v2, %v1213_v15 }
 0x7db   : > { %v1320_v23 = vpop.permute.xlu1 %1319 }
 0x7de   : > { %v7250_v1 = vpop.eup %7249 }
 0x7df   : > { %v1212_v13 = vmul.f32 %v7250_v1, %v7234_v37  ;;  %v1324_v19 = vpop.permute.xlu1 %1323  ;;  %v6205_v1 = vld [vmem:[%s11377_s4 + $0xb8] sm:$0xff] }
 0x7e0   : > { %6622 = vmatpush3.bf16.xpose.msra.mxu1 %v1352_v11  ;;  %v6203_v11 = vld [vmem:[%s11377_s4 + $0xa8] sm:$0xff] }
 0x7e1   : > { %6928 = vmatprep.subr.msk.bf16.mxu1 %vm741_vm1, %v1332_v14  ;;  %v1217_v16 = vpack.c.bf16 %v1212_v13, %v1211_v12 }
 0x7e3   : > { %6613 = vmatprep.mubr.msk.bf16.mxu1 %vm831_vm2, %v1217_v16 }
 0x7e4   : > { %6614 = vmatmul.mubr.msk.bf16.gmra.mrb[20].mxu1 %vm831_vm2, %v1218_v17 }
 0x7e5   : > { %6625 = vmatprep.mubr.msk.bf16.mxu1 %vm741_vm1, %v1318_v18 }
 0x7e8   : > { %6624 = vmatpush3.bf16.xpose.msra.mxu1 %v1355_v22 }
 0x7ef   : > { %6626 = vmatmul.mubr.msk.bf16.vlgmr.msra.gmra.mrb[24].mxu1 %vm741_vm1, %v1320_v23 }
 0x7f0   : > { %6629 = vmatprep.mubr.msk.bf16.mxu1 %vm741_vm1, %v1322_v24 }
 0x7f7   : > { %6630 = vmatmul.mubr.msk.bf16.gmra.mrb[28].mxu1 %vm741_vm1, %v1324_v19 }
 0x87e   : > { %v8347_v25 = vpop.f32.mrb[16].mxu1 }
 0x87f   : > { %v8349_v26 = vpop.f32.mrb[17].mxu1 }
 0x880   : > { %v8351_v27 = vpop.f32.mrb[18].mxu1 }
 0x881   : > { %v7030_v30 = vpack.i.bf16 %v8351_v27, %v8347_v25  ;;  %v8355_v31 = vpop.f32.mrb[19].mxu1 }
 0x882   : > { %v7025_v32 = vpack.i.bf16 %v8355_v31, %v8349_v26 }
 0x8b7   : > { %v8359_v33 = vpop.f32.mrb[20].mxu1 }
 0x8b8   : > { %v8361_v34 = vpop.f32.mrb[21].mxu1 }
 0x8b9   : > { %v8363_v35 = vpop.f32.mrb[22].mxu1 }
 0x8ba   : > { %v7050_v36 = vpack.i.bf16 %v8363_v35, %v8359_v33  ;;  %v8367_v37 = vpop.f32.mrb[23].mxu1 }
 0x8bb   : > { %v7045_v40 = vpack.i.bf16 %v8367_v37, %v8361_v34 }
 0x8c2   : > { %v6627_v28 = vpop.f32.mrb[24].mxu1 }
 0x8c3   : > { %v1400_v42 = vadd.f32 %v6627_v28, %v6200_v20  ;;  %v1391_v43 = vpop.f32.mrb[25].mxu1 }
 0x8c4   : > { %v6628_v44 = vpop.f32.mrb[26].mxu1  ;;  %v1392_v29 = vadd.f32 %v6198_v41, %v1391_v43 }
 0x8c5   : > { %v1394_v45 = vpop.f32.mrb[27].mxu1  ;;  %v1428_v38 = vsel %vm831_vm2, %v1400_v42, -inf  ;;  %v1403_v50 = vadd.f32 %v6628_v44, %v6201_v46 }
 0x8c6   : > { %v1395_v39 = vadd.f32 %v6199_v21, %v1394_v45  ;;  %1429 = vmax.xlane.f32.xlu0 %v1428_v38  ;;  %v1422_v51 = vsel %vm831_vm2, %v1392_v29, -inf }
 0x8c7   : > { %v1431_v58 = vsel %vm831_vm2, %v1403_v50, -inf }
 0x8c8   : > { %v1425_v47 = vsel %vm831_vm2, %v1395_v39, -inf }
 0x8c9   : > { %1426 = vmax.xlane.f32.xlu1 %v1425_v47 }
 0x8ca   : > { %1423 = vmax.xlane.f32.xlu0 %v1422_v51  ;;  %v6631_v49 = vpop.f32.mrb[28].mxu1 }
 0x8cb   : > { %v1407_v54 = vpop.f32.mrb[29].mxu1  ;;  %v1416_v56 = vadd.f32 %v6631_v49, %v6204_v52 }
 0x8cc   : > { %v6632_v55 = vpop.f32.mrb[30].mxu1  ;;  %v1408_v60 = vadd.f32 %v6202_v59, %v1407_v54 }
 0x8cd   : > { %v1410_v57 = vpop.f32.mrb[31].mxu1  ;;  %v1440_v63 = vsel %vm831_vm2, %v1416_v56, -inf  ;;  %v8404_v2 = vadd.f32 %v6632_v55, %v6205_v1 }
 0x8ce   : > { %1432 = vmax.xlane.f32.xlu0 %v1431_v58  ;;  %v1434_v0 = vsel %vm831_vm2, %v1408_v60, -inf  ;;  %v8409_v12 = vadd.f32 %v6203_v11, %v1410_v57 }
 0x8cf   : > { %v1443_v13 = vsel %vm831_vm2, %v8404_v2, -inf }
 0x8d0   : > { %v1437_v14 = vsel %vm831_vm2, %v8409_v12, -inf }
 0x8d2   : > { %1441 = vmax.xlane.f32.xlu0 %v1440_v63 }
 0x8d6   : > { %1435 = vmax.xlane.f32.xlu0 %v1434_v0 }
 0x8da   : > { %1516 = vrot.lane.b32.xlu1 %v8091_v53, %s7774_s20 }
 0x8de   : > { %1518 = vrot.lane.b32.xlu1 %v8103_v62, %s7774_s20 }
 0x8ec   : > { %1514 = vrot.lane.b32.xlu0 %v8093_v48, %s7774_s20 }
 0x902   : > { %1444 = vmax.xlane.f32.xlu1 %v1443_v13 }
 0x906   : > { %1438 = vmax.xlane.f32.xlu1 %v1437_v14 }
 0x917   : > { %1520 = vrot.lane.b32.xlu1 %v8101_v61, %s7774_s20 }
 0x953   : > { %v1430_v15 = vpop.xlane.xlu0 %1429 }
 0x954   : > { %v1448_v16 = vsub.f32 %v1400_v42, %v1430_v15 }
 0x956   : > { %v1458_v17 = vmul.f32 1.442695, %v1448_v16  ;;  %v1427_v18 = vpop.xlane.xlu1 %1426 }
 0x957   : > { %v1424_v22 = vpop.xlane.xlu0 %1423  ;;  %v1447_v24 = vsub.f32 %v1395_v39, %v1427_v18 }
 0x958   : > { %7251 = vpow2.f32 %v1458_v17  ;;  %v1446_v23 = vsub.f32 %v1392_v29, %v1424_v22 }
 0x959   : > { %v1456_v41 = vmul.f32 1.442695, %v1447_v24 }
 0x95a   : > { %v1454_v19 = vmul.f32 1.442695, %v1446_v23 }
 0x95b   : > { %v1433_v20 = vpop.xlane.xlu0 %1432 }
 0x95c   : > { %7253 = vpow2.f32 %v1454_v19  ;;  %v1449_v28 = vsub.f32 %v1403_v50, %v1433_v20  ;;  %v1517_v50 = vpop.permute.xlu1 %1516 }
 0x95e   : > { %v1460_v43 = vmul.f32 1.442695, %v1449_v28 }
 0x95f   : > { %v1442_v21 = vpop.xlane.xlu0 %1441 }
 0x960   : > { %7255 = vpow2.f32 %v1460_v43  ;;  %v1452_v44 = vsub.f32 %v1416_v56, %v1442_v21  ;;  %v1519_v56 = vpop.permute.xlu1 %1518 }
 0x961   : > { %7257 = vpow2.f32 %v1456_v41 }
 0x962   : > { %v8417_v45 = vpop.eup %7251  ;;  %v1466_v38 = vmul.f32 1.442695, %v1452_v44 }
 0x963   : > { %v1436_v42 = vpop.xlane.xlu0 %1435  ;;  %v1476_v46 = vsel %vm831_vm2, %v8417_v45, 0.0 }
 0x964   : > { %7259 = vpow2.f32 %v1466_v38  ;;  %v1450_v29 = vsub.f32 %v1408_v60, %v1436_v42  ;;  %1477 = vadd.xlane.f32.xlu0 %v1476_v46 }
 0x966   : > { %v8421_v39 = vpop.eup %7253  ;;  %v1462_v47 = vmul.f32 1.442695, %v1450_v29 }
 0x967   : > { %v1515_v51 = vpop.permute.xlu0 %1514  ;;  %v1470_v52 = vsel %vm831_vm2, %v8421_v39, 0.0 }
 0x968   : > { %7261 = vpow2.f32 %v1462_v47  ;;  %1471 = vadd.xlane.f32.xlu0 %v1470_v52  ;;  %6633 = vmatprep.subr.bf16.mxu0 %v1515_v51 }
 0x969   : > { %6634 = vmatpush3.bf16.msra.mxu0 %v1515_v51 }
 0x96a   : > { %v7256_v49 = vpop.eup %7255  ;;  %6635 = vmatprep.subr.bf16.mxu0 %v1517_v50 }
 0x96b   : > { %v1479_v54 = vsel %vm831_vm2, %v7256_v49, 0.0  ;;  %v7258_v55 = vpop.eup %7257 }
 0x96c   : > { %1480 = vadd.xlane.f32.xlu1 %v1479_v54  ;;  %v1473_v58 = vsel %vm831_vm2, %v7258_v55, 0.0 }
 0x96d   : > { %6636 = vmatpush3.bf16.msra.mxu0 %v1517_v50 }
 0x96e   : > { %v8426_v57 = vpop.eup %7259  ;;  %6637 = vmatprep.subr.bf16.mxu0 %v1519_v56 }
 0x96f   : > { %v1488_v59 = vsel %vm831_vm2, %v8426_v57, 0.0 }
 0x970   : > { %1474 = vadd.xlane.f32.xlu1 %v1473_v58  ;;  %1489 = vadd.xlane.f32.xlu0 %v1488_v59 }
 0x971   : > { %6638 = vmatpush3.bf16.msra.mxu0 %v1519_v56 }
 0x972   : > { %v8431_v60 = vpop.eup %7261 }
 0x973   : > { %v1482_v63 = vsel %vm831_vm2, %v8431_v60, 0.0 }
 0x974   : > { %1483 = vadd.xlane.f32.xlu0 %v1482_v63 }
 0x981   : > { %1622 = vrot.lane.b32.xlu1 %v8091_v53, %s11393_s13 }
 0x985   : > { %1624 = vrot.lane.b32.xlu1 %v8103_v62, %s11393_s13 }
 0x98f   : > { %v1445_v0 = vpop.xlane.xlu1 %1444 }
 0x990   : > { %v1453_v1 = vsub.f32 %v8404_v2, %v1445_v0 }
 0x992   : > { %v1468_v11 = vmul.f32 1.442695, %v1453_v1 }
 0x993   : > { %v1439_v13 = vpop.xlane.xlu1 %1438 }
 0x994   : > { %7263 = vpow2.f32 %v1468_v11  ;;  %v1451_v14 = vsub.f32 %v8409_v12, %v1439_v13 }
 0x996   : > { %v1464_v15 = vmul.f32 1.442695, %v1451_v14 }
 0x997   : > { %v1521_v16 = vpop.permute.xlu1 %1520 }
 0x998   : > { %6639 = vmatprep.subr.bf16.mxu0 %v1521_v16  ;;  %7265 = vpow2.f32 %v1464_v15 }
 0x999   : > { %6640 = vmatpush3.bf16.msra.mxu0 %v1521_v16 }
 0x99e   : > { %v7264_v17 = vpop.eup %7263 }
 0x99f   : > { %v1491_v18 = vsel %vm831_vm2, %v7264_v17, 0.0 }
 0x9a0   : > { %1492 = vadd.xlane.f32.xlu0 %v1491_v18 }
 0x9a2   : > { %v7266_v22 = vpop.eup %7265 }
 0x9a3   : > { %v1485_v23 = vsel %vm831_vm2, %v7266_v22, 0.0 }
 0x9a9   : > { %1486 = vadd.xlane.f32.xlu1 %v1485_v23 }
 0x9b6   : > { %1620 = vrot.lane.b32.xlu0 %v8093_v48, %s11393_s13 }
 0x9ba   : > { %1626 = vrot.lane.b32.xlu1 %v8101_v61, %s11393_s13  ;;  %1612 = vrot.lane.b32.xlu0 %v8093_v48, %s11391_s15  ;;  %s7777_s13 = smov 40  }
 0x9be   : > { %1614 = vrot.lane.b32.xlu1 %v8091_v53, %s11391_s15  ;;  %1616 = vrot.lane.b32.xlu0 %v8103_v62, %s11391_s15 }
 0x9c2   : > { %1618 = vrot.lane.b32.xlu1 %v8101_v61, %s11391_s15 }
 0x9f1   : > { %v1478_v2 = vpop.xlane.xlu0 %1477 }
 0x9f5   : > { %v1472_v12 = vpop.xlane.xlu0 %1471 }
 0x9f9   : > { %v1481_v24 = vpop.xlane.xlu1 %1480 }
 0x9fa   : > { %7267 = vrcp.f32 %v1481_v24 }
 0x9fb   : > { %7269 = vrcp.f32 %v1472_v12 }
 0x9fc   : > { %7271 = vrcp.f32 %v1478_v2 }
 0x9fd   : > { %v1475_v19 = vpop.xlane.xlu1 %1474  ;;  %v1490_v47 = vpop.xlane.xlu0 %1489 }
 0x9fe   : > { %7273 = vrcp.f32 %v1475_v19 }
 0xa01   : > { %v1484_v50 = vpop.xlane.xlu0 %1483  ;;  %v1623_v51 = vpop.permute.xlu1 %1622 }
 0xa04   : > { %v7268_v20 = vpop.eup %7267 }
 0xa05   : > { %v7270_v28 = vpop.eup %7269  ;;  %v1505_v21 = vmul.f32 %v7268_v20, %v7256_v49  ;;  %v1625_v56 = vpop.permute.xlu1 %1624 }
 0xa06   : > { %v7272_v41 = vpop.eup %7271  ;;  %v1502_v44 = vmul.f32 %v7270_v28, %v8421_v39  ;;  %v1644_v39 = vsel %vm741_vm1, %v1623_v51, 0  ;;  %v1647_v1 = vsel %vm741_vm1, %v1625_v56, 0 }
 0xa07   : > { %v1504_v42 = vmul.f32 %v7272_v41, %v8417_v45 }
 0xa08   : > { %v7274_v43 = vpop.eup %7273 }
 0xa09   : > { %v1503_v38 = vmul.f32 %v7274_v43, %v7258_v55  ;;  %v1511_v29 = vpack.c.bf16 %v1505_v21, %v1504_v42 }
 0xa0b   : > { %v1510_v46 = vpack.c.bf16 %v1503_v38, %v1502_v44 }
 0xa0d   : > { %6641 = vmatprep.mubr.msk.bf16.mxu0 %vm831_vm2, %v1510_v46  ;;  %v6214_v46 = vld [vmem:[%s11377_s4 + $0xc0] sm:$0xff] }
 0xa0e   : > { %6642 = vmatmul.mubr.msk.bf16.vlgmr.msra.gmra.mrb[16].mxu0 %vm831_vm2, %v1511_v29 }
 0xa2d   : > { %v1493_v52 = vpop.xlane.xlu0 %1492 }
 0xa2e   : > { %7275 = vrcp.f32 %v1493_v52 }
 0xa2f   : > { %7277 = vrcp.f32 %v1484_v50 }
 0xa30   : > { %7279 = vrcp.f32 %v1490_v47  ;;  %v6216_v47 = vld [vmem:[%s11377_s4 + $0xd0] sm:$0xff] }
 0xa31   : > { %v1621_v54 = vpop.permute.xlu0 %1620 }
 0xa32   : > { %6929 = vmatprep.subr.msk.bf16.mxu0 %vm741_vm1, %v1621_v54  ;;  %v1641_v49 = vsel %vm741_vm1, %v1621_v54, 0 }
 0xa33   : > { %6650 = vmatpush3.bf16.xpose.msra.mxu0 %v1641_v49 }
 0xa34   : > { %6930 = vmatprep.subr.msk.bf16.mxu0 %vm741_vm1, %v1623_v51  ;;  %v6215_v51 = vld [vmem:[%s11377_s4 + $0xc8] sm:$0xff] }
 0xa35   : > { %v1613_v23 = vpop.permute.xlu0 %1612 }
 0xa36   : > { %v1487_v45 = vpop.xlane.xlu1 %1486 }
 0xa37   : > { %7281 = vrcp.f32 %v1487_v45 }
 0xa38   : > { %v7276_v55 = vpop.eup %7275 }
 0xa39   : > { %v7278_v58 = vpop.eup %7277  ;;  %v1509_v0 = vmul.f32 %v7276_v55, %v7264_v17  ;;  %v6217_v55 = vld [vmem:[%s11377_s4 + $0xd8] sm:$0xff] }
 0xa3a   : > { %v7280_v59 = vpop.eup %7279  ;;  %v1506_v11 = vmul.f32 %v7278_v58, %v8431_v60  ;;  %v1627_v14 = vpop.permute.xlu1 %1626 }
 0xa3b   : > { %6652 = vmatpush3.bf16.xpose.msra.mxu0 %v1644_v39  ;;  %v1508_v15 = vmul.f32 %v7280_v59, %v8426_v57  ;;  %v1650_v17 = vsel %vm741_vm1, %v1627_v14, 0 }
 0xa3c   : > { %6931 = vmatprep.subr.msk.bf16.mxu0 %vm741_vm1, %v1625_v56 }
 0xa3d   : > { %v1513_v18 = vpack.c.bf16 %v1509_v0, %v1508_v15  ;;  %v6221_v15 = vld [vmem:[%s11377_s4 + $0xf8] sm:$0xff] }
 0xa3e   : > { %v1615_v60 = vpop.permute.xlu1 %1614 }
 0xa41   : > { %v7282_v63 = vpop.eup %7281 }
 0xa42   : > { %v1507_v13 = vmul.f32 %v7282_v63, %v7266_v22  ;;  %v1617_v22 = vpop.permute.xlu0 %1616  ;;  %v1619_v57 = vpop.permute.xlu1 %1618 }
 0xa43   : > { %6654 = vmatpush3.bf16.xpose.msra.mxu0 %v1647_v1 }
 0xa44   : > { %6932 = vmatprep.subr.msk.bf16.mxu0 %vm741_vm1, %v1627_v14  ;;  %v1512_v16 = vpack.c.bf16 %v1507_v13, %v1506_v11  ;;  %v6218_v11 = vld [vmem:[%s11377_s4 + $0xe0] sm:$0xff]  ;;  %v6219_v13 = vld [vmem:[%s11377_s4 + $0xe8] sm:$0xff] }
 0xa46   : > { %6645 = vmatprep.mubr.msk.bf16.mxu0 %vm831_vm2, %v1512_v16 }
 0xa47   : > { %6646 = vmatmul.mubr.msk.bf16.gmra.mrb[20].mxu0 %vm831_vm2, %v1513_v18 }
 0xa48   : > { %6657 = vmatprep.mubr.msk.bf16.mxu0 %vm741_vm1, %v1613_v23 }
 0xa4b   : > { %6656 = vmatpush3.bf16.xpose.msra.mxu0 %v1650_v17 }
 0xa52   : > { %6658 = vmatmul.mubr.msk.bf16.vlgmr.msra.gmra.mrb[24].mxu0 %vm741_vm1, %v1615_v60  ;;  %v6220_v60 = vld [vmem:[%s11377_s4 + $0xf0] sm:$0xff] }
 0xa53   : > { %6661 = vmatprep.mubr.msk.bf16.mxu0 %vm741_vm1, %v1617_v22 }
 0xa5a   : > { %6662 = vmatmul.mubr.msk.bf16.gmra.mrb[28].mxu0 %vm741_vm1, %v1619_v57 }
 0xae1   : > { %v8475_v2 = vpop.f32.mrb[16].mxu0 }
 0xae2   : > { %v8477_v12 = vpop.f32.mrb[17].mxu0 }
 0xae3   : > { %v8479_v24 = vpop.f32.mrb[18].mxu0 }
 0xae4   : > { %v7040_v19 = vpack.i.bf16 %v8479_v24, %v8475_v2  ;;  %v8483_v20 = vpop.f32.mrb[19].mxu0 }
 0xae5   : > { %v7035_v28 = vpack.i.bf16 %v8483_v20, %v8477_v12 }
 0xb1a   : > { %v8487_v41 = vpop.f32.mrb[20].mxu0 }
 0xb1b   : > { %v8489_v43 = vpop.f32.mrb[21].mxu0 }
 0xb1c   : > { %v8491_v21 = vpop.f32.mrb[22].mxu0 }
 0xb1d   : > { %v7070_v44 = vpack.i.bf16 %v8491_v21, %v8487_v41  ;;  %v8495_v38 = vpop.f32.mrb[23].mxu0 }
 0xb1e   : > { %v7065_v42 = vpack.i.bf16 %v8495_v38, %v8489_v43 }
 0xb25   : > { %v6659_v29 = vpop.f32.mrb[24].mxu0 }
 0xb26   : > { %v1686_v50 = vpop.f32.mrb[25].mxu0  ;;  %v1695_v49 = vadd.f32 %v6659_v29, %v6216_v47 }
 0xb27   : > { %v1687_v52 = vadd.f32 %v6214_v46, %v1686_v50  ;;  %v6660_v54 = vpop.f32.mrb[26].mxu0 }
 0xb28   : > { %v1689_v56 = vpop.f32.mrb[27].mxu0  ;;  %v1698_v59 = vadd.f32 %v6660_v54, %v6217_v55  ;;  %v1723_v0 = vsel %vm831_vm2, %v1695_v49, -inf }
 0xb29   : > { %v1690_v45 = vadd.f32 %v6215_v51, %v1689_v56  ;;  %v1717_v39 = vsel %vm831_vm2, %v1687_v52, -inf }
 0xb2a   : > { %1718 = vmax.xlane.f32.xlu0 %v1717_v39  ;;  %v1726_v17 = vsel %vm831_vm2, %v1698_v59, -inf }
 0xb2b   : > { %v1720_v58 = vsel %vm831_vm2, %v1690_v45, -inf }
 0xb2c   : > { %1721 = vmax.xlane.f32.xlu1 %v1720_v58 }
 0xb2d   : > { %v6663_v63 = vpop.f32.mrb[28].mxu0 }
 0xb2e   : > { %1724 = vmax.xlane.f32.xlu0 %v1723_v0  ;;  %v1702_v1 = vpop.f32.mrb[29].mxu0  ;;  %v1711_v46 = vadd.f32 %v6663_v63, %v6220_v60 }
 0xb2f   : > { %v6664_v14 = vpop.f32.mrb[30].mxu0  ;;  %v1703_v18 = vadd.f32 %v6218_v11, %v1702_v1 }
 0xb30   : > { %v1705_v16 = vpop.f32.mrb[31].mxu0  ;;  %v8529_v22 = vadd.f32 %v6664_v14, %v6221_v15  ;;  %v1735_v50 = vsel %vm831_vm2, %v1711_v46, -inf }
 0xb31   : > { %v8523_v23 = vadd.f32 %v6219_v13, %v1705_v16  ;;  %v1729_v29 = vsel %vm831_vm2, %v1703_v18, -inf }
 0xb32   : > { %1727 = vmax.xlane.f32.xlu0 %v1726_v17  ;;  %v1738_v47 = vsel %vm831_vm2, %v8529_v22, -inf }
 0xb33   : > { %v1732_v57 = vsel %vm831_vm2, %v8523_v23, -inf }
 0xb34   : > { %1733 = vmax.xlane.f32.xlu1 %v1732_v57 }
 0xb36   : > { %1730 = vmax.xlane.f32.xlu0 %v1729_v29 }
 0xb38   : > { %1739 = vmax.xlane.f32.xlu1 %v1738_v47 }
 0xb3a   : > { %1736 = vmax.xlane.f32.xlu0 %v1735_v50 }
 0xbb7   : > { %v1719_v51 = vpop.xlane.xlu0 %1718 }
 0xbb8   : > { %v1741_v54 = vsub.f32 %v1687_v52, %v1719_v51 }
 0xbb9   : > { %v1722_v56 = vpop.xlane.xlu1 %1721 }
 0xbba   : > { %v1749_v58 = vmul.f32 1.442695, %v1741_v54  ;;  %v1742_v0 = vsub.f32 %v1690_v45, %v1722_v56 }
 0xbbb   : > { %v1725_v39 = vpop.xlane.xlu0 %1724 }
 0xbbc   : > { %v1743_v55 = vsub.f32 %v1695_v49, %v1725_v39  ;;  %v1751_v13 = vmul.f32 1.442695, %v1742_v0 }
 0xbbe   : > { %v1753_v1 = vmul.f32 1.442695, %v1743_v55 }
 0xbbf   : > { %v1728_v11 = vpop.xlane.xlu0 %1727 }
 0xbc0   : > { %7283 = vpow2.f32 %v1753_v1  ;;  %v1744_v63 = vsub.f32 %v1698_v59, %v1728_v11 }
 0xbc1   : > { %7285 = vpow2.f32 %v1749_v58  ;;  %v1734_v55 = vpop.xlane.xlu1 %1733 }
 0xbc2   : > { %v1755_v14 = vmul.f32 1.442695, %v1744_v63 }
 0xbc3   : > { %v1731_v15 = vpop.xlane.xlu0 %1730 }
 0xbc4   : > { %7287 = vpow2.f32 %v1755_v14  ;;  %v1745_v16 = vsub.f32 %v1703_v18, %v1731_v15 }
 0xbc5   : > { %7289 = vpow2.f32 %v1751_v13  ;;  %v1740_v58 = vpop.xlane.xlu1 %1739 }
 0xbc6   : > { %v1757_v52 = vmul.f32 1.442695, %v1745_v16  ;;  %v1748_v0 = vsub.f32 %v8529_v22, %v1740_v58 }
 0xbc7   : > { %v1737_v17 = vpop.xlane.xlu0 %1736 }
 0xbc8   : > { %v1747_v60 = vsub.f32 %v1711_v46, %v1737_v17 }
 0xbca   : > { %v8537_v57 = vpop.eup %7283  ;;  %v1761_v29 = vmul.f32 1.442695, %v1747_v60 }
 0xbcb   : > { %v1771_v49 = vsel %vm831_vm2, %v8537_v57, 0.0  ;;  %v7286_v45 = vpop.eup %7285 }
 0xbcc   : > { %7291 = vpow2.f32 %v1761_v29  ;;  %1772 = vadd.xlane.f32.xlu0 %v1771_v49  ;;  %v1765_v47 = vsel %vm831_vm2, %v7286_v45, 0.0 }
 0xbcd   : > { %7293 = vpow2.f32 %v1757_v52 }
 0xbce   : > { %v8541_v59 = vpop.eup %7287 }
 0xbcf   : > { %v1774_v18 = vsel %vm831_vm2, %v8541_v59, 0.0  ;;  %v7290_v50 = vpop.eup %7289 }
 0xbd0   : > { %1766 = vadd.xlane.f32.xlu0 %v1765_v47  ;;  %1775 = vadd.xlane.f32.xlu1 %v1774_v18  ;;  %v1768_v46 = vsel %vm831_vm2, %v7290_v50, 0.0  ;;  %v2021_v18 = vld [vmem:[#allocation2 + $0x8] sm:$0xff] }
 0xbd4   : > { %1769 = vadd.xlane.f32.xlu1 %v1768_v46 }
 0xbd6   : > { %v8547_v51 = vpop.eup %7291 }
 0xbd7   : > { %v1783_v54 = vsel %vm831_vm2, %v8547_v51, 0.0  ;;  %v8551_v56 = vpop.eup %7293 }
 0xbd8   : > { %1784 = vadd.xlane.f32.xlu0 %v1783_v54  ;;  %v1777_v39 = vsel %vm831_vm2, %v8551_v56, 0.0  ;;  %v2023_v54 = vld [vmem:[#allocation2 + $0x18] sm:$0xff] }
 0xbdc   : > { %1778 = vadd.xlane.f32.xlu0 %v1777_v39 }
 0xbe5   : > { %1811 = vrot.lane.b32.xlu1 %v8091_v53, %s7777_s13  ;;  %v1746_v53 = vsub.f32 %v8523_v23, %v1734_v55 }
 0xbe9   : > { %1813 = vrot.lane.b32.xlu1 %v8103_v62, %s7777_s13  ;;  %v1763_v62 = vmul.f32 1.442695, %v1748_v0 }
 0xbeb   : > { %7295 = vpow2.f32 %v1763_v62 }
 0xbf2   : > { %1809 = vrot.lane.b32.xlu0 %v8093_v48, %s7777_s13  ;;  %v1759_v48 = vmul.f32 1.442695, %v1746_v53 }
 0xbf4   : > { %7297 = vpow2.f32 %v1759_v48 }
 0xbf5   : > { %v7296_v26 = vpop.eup %7295 }
 0xbf6   : > { %7026 = vrot.lane.b32.xlu0 %v7025_v32, %s11496_s27  ;;  %v1786_v31 = vsel %vm831_vm2, %v7296_v26, 0.0 }
 0xbfa   : > { %7036 = vrot.lane.b32.xlu0 %v7035_v28, %s11433_s21 }
 0xbfe   : > { %7046 = vrot.lane.b32.xlu0 %v7045_v40, %s11496_s27  ;;  %v7298_v32 = vpop.eup %7297 }
 0xbff   : > { %v1780_v22 = vsel %vm831_vm2, %v7298_v32, 0.0 }
 0xc0d   : > { %1787 = vadd.xlane.f32.xlu1 %v1786_v31 }
 0xc11   : > { %1781 = vadd.xlane.f32.xlu1 %v1780_v22 }
 0xc22   : > { %1815 = vrot.lane.b32.xlu1 %v8101_v61, %s7777_s13 }
 0xc26   : > { %7031 = vrot.lane.b32.xlu1 %v7030_v30, %s11496_s27 }
 0xc2a   : > { %7041 = vrot.lane.b32.xlu1 %v7040_v19, %s11433_s21 }
 0xc2e   : > { %7051 = vrot.lane.b32.xlu1 %v7050_v36, %s11496_s27 }
 0xc59   : > { %v1773_v34 = vpop.xlane.xlu0 %1772 }
 0xc5d   : > { %v1776_v37 = vpop.xlane.xlu1 %1775  ;;  %v1767_v40 = vpop.xlane.xlu0 %1766 }
 0xc5e   : > { %7299 = vrcp.f32 %v1767_v40 }
 0xc61   : > { %v1770_v61 = vpop.xlane.xlu1 %1769 }
 0xc62   : > { %7301 = vrcp.f32 %v1770_v61 }
 0xc63   : > { %7303 = vrcp.f32 %v1776_v37 }
 0xc64   : > { %7305 = vrcp.f32 %v1773_v34 }
 0xc65   : > { %v1785_v12 = vpop.xlane.xlu0 %1784  ;;  %v1812_v30 = vpop.permute.xlu1 %1811 }
 0xc68   : > { %v7300_v25 = vpop.eup %7299 }
 0xc69   : > { %v1779_v20 = vpop.xlane.xlu0 %1778  ;;  %v1797_v23 = vmul.f32 %v7300_v25, %v7286_v45  ;;  %v1814_v33 = vpop.permute.xlu1 %1813 }
 0xc6c   : > { %v7302_v27 = vpop.eup %7301 }
 0xc6d   : > { %v1810_v28 = vpop.permute.xlu0 %1809  ;;  %v1798_v2 = vmul.f32 %v7302_v27, %v7290_v50  ;;  %v7304_v36 = vpop.eup %7303  ;;  %v2022_v50 = vld [vmem:[#allocation2 + $0x10] sm:$0xff] }
 0xc6e   : > { %6665 = vmatprep.subr.bf16.mxu1 %v1810_v28  ;;  %v7306_v1 = vpop.eup %7305  ;;  %v1800_v11 = vmul.f32 %v7304_v36, %v8541_v59  ;;  %v2029_v39 = vpack.c.bf16 %v2023_v54, %v2022_v50 }
 0xc6f   : > { %6666 = vmatpush3.bf16.msra.mxu1 %v1810_v28  ;;  %v1805_v24 = vpack.c.bf16 %v1798_v2, %v1797_v23  ;;  %v1799_v13 = vmul.f32 %v7306_v1, %v8537_v57  ;;  %v2020_v57 = vld [vmem:[#allocation2] sm:$0xff] }
 0xc70   : > { %6667 = vmatprep.subr.bf16.mxu1 %v1812_v30  ;;  %v2028_v46 = vpack.c.bf16 %v2021_v18, %v2020_v57 }
 0xc71   : > { %6673 = vmatprep.mubr.msk.bf16.mxu1 %vm831_vm2, %v1805_v24  ;;  %v1806_v14 = vpack.c.bf16 %v1800_v11, %v1799_v13  ;;  %v7027_v37 = vpop.permute.xlu0 %7026 }
 0xc72   : > { %v7028_v41 = vunpack.i.l.bf16 %v7027_v37  ;;  %v7029_v21 = vunpack.i.h.bf16 %v7027_v37  ;;  %v6234_v37 = vld [vmem:[%s11379_s6] ss:$0 sm:$0xff] }
 0xc73   : > { %6668 = vmatpush3.bf16.msra.mxu1 %v1812_v30 }
 0xc74   : > { %6669 = vmatprep.subr.bf16.mxu1 %v1814_v33  ;;  %v1994_v27 = vsel %vm741_vm1, %v8229_v4, %v7028_v41  ;;  %v1995_v28 = vsel %vm741_vm1, %v8233_v6, %v7029_v21  ;;  %v7620_v21 = vld [vmem:[%s8006_s16] sm:$0xff] }
 0xc75   : > { %v7037_v61 = vpop.permute.xlu0 %7036 }
 0xc76   : > { %v7039_v30 = vunpack.i.h.bf16 %v7037_v61 }
 0xc77   : > { %6670 = vmatpush3.bf16.msra.mxu1 %v1814_v33 }
 0xc78   : > { %v2004_v6 = vsel %vm2002_vm3, %v1995_v28, %v7039_v30 }
 0xc9a   : > { %v1788_v35 = vpop.xlane.xlu1 %1787 }
 0xc9b   : > { %7307 = vrcp.f32 %v1788_v35 }
 0xc9c   : > { %7309 = vrcp.f32 %v1779_v20  ;;  %v7047_v20 = vpop.permute.xlu0 %7046 }
 0xc9d   : > { %7311 = vrcp.f32 %v1785_v12  ;;  %v7049_v13 = vunpack.i.h.bf16 %v7047_v20 }
 0xc9e   : > { %v1782_v19 = vpop.xlane.xlu1 %1781 }
 0xc9f   : > { %7313 = vrcp.f32 %v1782_v19  ;;  %v1999_v50 = vsel %vm741_vm1, %v8241_v10, %v7049_v13  ;;  %v7625_v13 = vld [vmem:[%s8006_s16 + $0x28] sm:$0xff] }
 0xca2   : > { %v1816_v63 = vpop.permute.xlu1 %1815 }
 0xca3   : > { %6671 = vmatprep.subr.bf16.mxu1 %v1816_v63 }
 0xca4   : > { %6672 = vmatpush3.bf16.msra.mxu1 %v1816_v63 }
 0xca5   : > { %v7308_v15 = vpop.eup %7307  ;;  %6681 = vmatprep.subr.bf16.mxu1 %v2028_v46 }
 0xca6   : > { %v7310_v16 = vpop.eup %7309  ;;  %v1804_v52 = vmul.f32 %v7308_v15, %v7296_v26  ;;  %v7032_v34 = vpop.permute.xlu1 %7031 }
 0xca7   : > { %6674 = vmatmul.mubr.msk.bf16.vlgmr.msra.gmra.mrb[32].mxu1 %vm831_vm2, %v1806_v14  ;;  %v7312_v17 = vpop.eup %7311  ;;  %v1801_v29 = vmul.f32 %v7310_v16, %v8551_v56  ;;  %v7034_v43 = vunpack.i.h.bf16 %v7032_v34  ;;  %v7033_v38 = vunpack.i.l.bf16 %v7032_v34 }
 0xca8   : > { %v1803_v45 = vmul.f32 %v7312_v17, %v8547_v51  ;;  %6682 = vmatpush3.bf16.msra.mxu1 %v2028_v46 }
 0xca9   : > { %v7314_v60 = vpop.eup %7313  ;;  %6683 = vmatprep.subr.bf16.mxu1 %v2029_v39  ;;  %v1997_v24 = vsel %vm741_vm1, %v8231_v5, %v7034_v43  ;;  %v1996_v33 = vsel %vm741_vm1, %v8227_v3, %v7033_v38  ;;  %v7048_v5 = vunpack.i.l.bf16 %v7047_v20  ;;  %v7621_v38 = vld [vmem:[%s8006_s16 + $0x8] sm:$0xff] }
 0xcaa   : > { %v1802_v49 = vmul.f32 %v7314_v60, %v7298_v32  ;;  %v1808_v59 = vpack.c.bf16 %v1804_v52, %v1803_v45  ;;  %v7042_v40 = vpop.permute.xlu1 %7041 }
 0xcab   : > { %v7043_v25 = vunpack.i.l.bf16 %v7042_v40  ;;  %v1998_v46 = vsel %vm741_vm1, %v8237_v8, %v7048_v5 }
 0xcac   : > { %v1807_v47 = vpack.c.bf16 %v1802_v49, %v1801_v29  ;;  %6684 = vmatpush3.bf16.msra.mxu1 %v2029_v39 }
 0xcad   : > { %v2005_v1 = vsel %vm2002_vm3, %v1996_v33, %v7043_v25 }
 0xcae   : > { %6677 = vmatprep.mubr.msk.bf16.mxu1 %vm831_vm2, %v1807_v47  ;;  %v7052_v12 = vpop.permute.xlu1 %7051 }
 0xcaf   : > { %6678 = vmatmul.mubr.msk.bf16.gmra.mrb[36].mxu1 %vm831_vm2, %v1808_v59  ;;  %v7054_v52 = vunpack.i.h.bf16 %v7052_v12  ;;  %v7053_v29 = vunpack.i.l.bf16 %v7052_v12 }
 0xcb1   : > { %v2001_v39 = vsel %vm741_vm1, %v8239_v9, %v7054_v52 }
 0xd7a   : > { %v6675_v56 = vpop.f32.mrb[32].mxu1 }
 0xd7b   : > { %v1867_v55 = vpop.f32.mrb[33].mxu1 }
 0xd7c   : > { %v6676_v58 = vpop.f32.mrb[34].mxu1 }
 0xd7d   : > { %v7055_v51 = vpack.i.bf16 %v6676_v58, %v6675_v56  ;;  %v1870_v0 = vpop.f32.mrb[35].mxu1  ;;  %v2000_v56 = vsel %vm741_vm1, %v8235_v7, %v7053_v29 }
 0xd7e   : > { %v7060_v53 = vpack.i.bf16 %v1870_v0, %v1867_v55 }
 0xd7f   : > { %7056 = vrot.lane.b32.xlu1 %v7055_v51, %s11395_s22 }
 0xd80   : > { %7061 = vrot.lane.b32.xlu0 %v7060_v53, %s11395_s22 }
 0xd82   : > { %v6679_v62 = vpop.f32.mrb[36].mxu1 }
 0xd83   : > { %7071 = vrot.lane.b32.xlu1 %v7070_v44, %s11433_s21  ;;  %v1883_v48 = vpop.f32.mrb[37].mxu1  ;;  %v7038_v44 = vunpack.i.l.bf16 %v7037_v61  ;;  %v7619_v61 = vld [vmem:[%s8006_s16 + $0x10] sm:$0xff] }
 0xd84   : > { %7066 = vrot.lane.b32.xlu0 %v7065_v42, %s11433_s21  ;;  %v6680_v26 = vpop.f32.mrb[38].mxu1  ;;  %v7044_v42 = vunpack.i.h.bf16 %v7042_v40 }
 0xd85   : > { %v7080_v31 = vpack.i.bf16 %v6680_v26, %v6679_v62  ;;  %v1886_v32 = vpop.f32.mrb[39].mxu1  ;;  %v2003_v23 = vsel %vm2002_vm3, %v1994_v27, %v7038_v44  ;;  %v7622_v27 = vld [vmem:[%s8006_s16 + $0x18] sm:$0xff] }
 0xd86   : > { %v7075_v22 = vpack.i.bf16 %v1886_v32, %v1883_v48  ;;  %v2006_v4 = vsel %vm2002_vm3, %v1997_v24, %v7044_v42 }
 0xd87   : > { %7081 = vrot.lane.b32.xlu1 %v7080_v31, %s11395_s22 }
 0xd88   : > { %7076 = vrot.lane.b32.xlu0 %v7075_v22, %s11395_s22 }
 0xdf1   : > { %v7057_v2 = vpop.permute.xlu1 %7056 }
 0xdf2   : > { %v7059_v35 = vunpack.i.h.bf16 %v7057_v2  ;;  %v7058_v36 = vunpack.i.l.bf16 %v7057_v2  ;;  %v7062_v19 = vpop.permute.xlu0 %7061 }
 0xdf3   : > { %v7064_v11 = vunpack.i.h.bf16 %v7062_v19  ;;  %v7063_v63 = vunpack.i.l.bf16 %v7062_v19 }
 0xdf4   : > { %v2015_v14 = vsel %vm2011_vm4, %v2006_v4, %v7059_v35  ;;  %v2014_v15 = vsel %vm2011_vm4, %v2005_v1, %v7058_v36  ;;  %v7623_v36 = vld [vmem:[%s8006_s16 + $0x20] sm:$0xff] }
 0xdf5   : > { %v2025_v16 = vpack.c.bf16 %v2015_v14, %v2014_v15  ;;  %v2012_v3 = vsel %vm2011_vm4, %v2003_v23, %v7063_v63  ;;  %v2013_v17 = vsel %vm2011_vm4, %v2004_v6, %v7064_v11  ;;  %v7072_v60 = vpop.permute.xlu1 %7071  ;;  %v7624_v63 = vld [vmem:[%s8006_s16 + $0x38] sm:$0xff]  ;;  %v7626_v15 = vld [vmem:[%s8006_s16 + $0x30] sm:$0xff] }
 0xdf6   : > { %v7067_v49 = vpop.permute.xlu0 %7066  ;;  %v2024_v45 = vpack.c.bf16 %v2013_v17, %v2012_v3  ;;  %v7074_v47 = vunpack.i.h.bf16 %v7072_v60  ;;  %v7073_v59 = vunpack.i.l.bf16 %v7072_v60 }
 0xdf7   : > { %v7069_v57 = vunpack.i.h.bf16 %v7067_v49  ;;  %v7068_v18 = vunpack.i.l.bf16 %v7067_v49 }
 0xdf8   : > { %6685 = vmatprep.mubr.msk.bf16.mxu1 %vm517_vm0, %v2024_v45  ;;  %v2010_v0 = vsel %vm2002_vm3, %v2001_v39, %v7074_v47  ;;  %v2009_v53 = vsel %vm2002_vm3, %v2000_v56, %v7073_v59  ;;  %v7781_v59 = vmov 0  }
 0xdf9   : > { %v7082_v54 = vpop.permute.xlu1 %7081  ;;  %6686 = vmatmul.mubr.msk.bf16.vlgmr.msra.gmra.mrb[40].mxu1 %vm517_vm0, %v2025_v16  ;;  %v2007_v8 = vsel %vm2002_vm3, %v1998_v46, %v7068_v18  ;;  %v2008_v48 = vsel %vm2002_vm3, %v1999_v50, %v7069_v57  ;;  %7085 = vset.pattern.permute.xlu1 %v7781_v59 }
 0xdfa   : > { %v7084_v55 = vunpack.i.h.bf16 %v7082_v54  ;;  %v7083_v58 = vunpack.i.l.bf16 %v7082_v54  ;;  %v7077_v51 = vpop.permute.xlu0 %7076 }
 0xdfb   : > { %v7079_v10 = vunpack.i.h.bf16 %v7077_v51  ;;  %v7078_v62 = vunpack.i.l.bf16 %v7077_v51 }
 0xdfc   : > { %v2019_v9 = vsel %vm2011_vm4, %v2010_v0, %v7084_v55  ;;  %v2018_v26 = vsel %vm2011_vm4, %v2009_v53, %v7083_v58 }
 0xdfd   : > { %v2016_v7 = vsel %vm2011_vm4, %v2007_v8, %v7078_v62  ;;  %v2017_v31 = vsel %vm2011_vm4, %v2008_v48, %v7079_v10  ;;  %v2027_v32 = vpack.c.bf16 %v2019_v9, %v2018_v26 }
 0xdfe   : > { %v2026_v22 = vpack.c.bf16 %v2017_v31, %v2016_v7 }
 0xe00   : > { %6689 = vmatprep.mubr.msk.bf16.mxu1 %vm517_vm0, %v2026_v22 }
 0xe01   : > { %6690 = vmatmul.mubr.msk.bf16.gmra.mrb[44].mxu1 %vm517_vm0, %v2027_v32 }
 0xecc   : > { %v6687_v34 = vpop.f32.mrb[40].mxu1 }
 0xecd   : > { %v2076_v40 = vpop.f32.mrb[41].mxu1  ;;  %v2109_v41 = vadd.f32 %v7619_v61, %v6687_v34 }
 0xece   : > { %v2107_v44 = vadd.f32 %v7620_v21, %v2076_v40  ;;  %v6688_v12 = vpop.f32.mrb[42].mxu1 }
 0xecf   : > { %v2079_v20 = vpop.f32.mrb[43].mxu1  ;;  %v8655_v25 = vadd.f32 %v6234_v37, %v2109_v41  ;;  %v2110_v30 = vadd.f32 %v7622_v27, %v6688_v12 }
 0xed0   : > { %v8652_v43 = vadd.f32 %v6234_v37, %v2107_v44  ;;  %v2108_v42 = vadd.f32 %v7621_v38, %v2079_v20 }
 0xed1   : > { %11535 = vst [vmem:[#allocation14_spill] sm:$0xff] %v8655_v25  ;;  %v8664_v35 = vadd.f32 %v6234_v37, %v2110_v30  ;;  %v2136_v4 = vsel %vm517_vm0, %v8655_v25, 0.0 }
 0xed2   : > { %11534 = vst [vmem:[#allocation13_spill] sm:$0xff] %v8652_v43  ;;  %v8658_v28 = vadd.f32 %v6234_v37, %v2108_v42  ;;  %v2130_v23 = vsel %vm517_vm0, %v8652_v43, 0.0 }
 0xed3   : > { %2131 = vadd.xlane.f32.xlu0 %v2130_v23  ;;  %11537 = vst [vmem:[#allocation16_spill] sm:$0xff] %v8664_v35  ;;  %v2139_v17 = vsel %vm517_vm0, %v8664_v35, 0.0 }
 0xed4   : > { %11536 = vst [vmem:[#allocation15_spill] sm:$0xff] %v8658_v28  ;;  %v6691_v2 = vpop.f32.mrb[44].mxu1  ;;  %v2133_v24 = vsel %vm517_vm0, %v8658_v28, 0.0 }
 0xed5   : > { %2134 = vadd.xlane.f32.xlu1 %v2133_v24  ;;  %v2092_v33 = vpop.f32.mrb[45].mxu1  ;;  %v2113_v5 = vadd.f32 %v7626_v15, %v6691_v2  ;;  %v8754_v15 = vld [vmem:[%s11374_s1 + $0x18] sm:$0xff] }
 0xed6   : > { %v2111_v19 = vadd.f32 %v7623_v36, %v2092_v33  ;;  %v6692_v1 = vpop.f32.mrb[46].mxu1 }
 0xed7   : > { %2137 = vadd.xlane.f32.xlu0 %v2136_v4  ;;  %v2095_v11 = vpop.f32.mrb[47].mxu1  ;;  %v2114_v6 = vadd.f32 %v7624_v63, %v6692_v1  ;;  %v8682_v29 = vadd.f32 %v6234_v37, %v2113_v5  ;;  %v2234_v1 = vld [vmem:[#allocation4] sm:$0xff]  ;;  %v2235_v4 = vld [vmem:[#allocation4 + $0x8] sm:$0xff]  ;;  %v8748_v63 = vld [vmem:[%s11374_s1 + $0x10] sm:$0xff] }
 0xed8   : > { %v2112_v14 = vadd.f32 %v7625_v13, %v2095_v11  ;;  %v8672_v16 = vadd.f32 %v6234_v37, %v2111_v19  ;;  %v8742_v19 = vld [vmem:[%s11374_s1 + $0x8] sm:$0xff]  ;;  %v2242_v11 = vpack.c.bf16 %v2235_v4, %v2234_v1  ;;  %v2237_v13 = vld [vmem:[#allocation4 + $0x18] sm:$0xff]  ;;  %v509_v5 = vld [vmem:[%s11374_s1] sm:$0xff] }
 0xed9   : > { %v8678_v60 = vadd.f32 %v6234_v37, %v2114_v6  ;;  %11541 = vst [vmem:[#allocation20_spill] sm:$0xff] %v8682_v29  ;;  %v2148_v47 = vsel %vm517_vm0, %v8682_v29, 0.0  ;;  %v2236_v6 = vld [vmem:[#allocation4 + $0x10] sm:$0xff] }
 0xeda   : > { %11538 = vst [vmem:[#allocation17_spill] sm:$0xff] %v8672_v16  ;;  %v8674_v3 = vadd.f32 %v6234_v37, %v2112_v14  ;;  %v2142_v49 = vsel %vm517_vm0, %v8672_v16, 0.0  ;;  %6693 = vmatprep.subr.bf16.mxu0 %v2242_v11  ;;  %v2243_v14 = vpack.c.bf16 %v2237_v13, %v2236_v6 }
 0xedb   : > { %2140 = vadd.xlane.f32.xlu0 %v2139_v17  ;;  %11540 = vst [vmem:[#allocation19_spill] sm:$0xff] %v8678_v60  ;;  %v2151_v45 = vsel %vm517_vm0, %v8678_v60, 0.0  ;;  %6694 = vmatpush3.bf16.msra.mxu0 %v2242_v11  ;;  %v7782_v17 = vmov 1  }
 0xedc   : > { %11539 = vst [vmem:[#allocation18_spill] sm:$0xff] %v8674_v3  ;;  %v2145_v52 = vsel %vm517_vm0, %v8674_v3, 0.0  ;;  %6695 = vmatprep.subr.bf16.mxu0 %v2243_v14 }
 0xedd   : > { %2146 = vadd.xlane.f32.xlu1 %v2145_v52  ;;  %v7783_v52 = vmov 7  }
 0xede   : > { %7092 = vset.pattern.permute.xlu0 %v7783_v52 }
 0xedf   : > { %2143 = vadd.xlane.f32.xlu0 %v2142_v49  ;;  %6696 = vmatpush3.bf16.msra.mxu0 %v2243_v14  ;;  %v7784_v49 = vmov 8  }
 0xee1   : > { %2152 = vadd.xlane.f32.xlu1 %v2151_v45  ;;  %v7785_v45 = vmov 2  }
 0xee3   : > { %2149 = vadd.xlane.f32.xlu0 %v2148_v47  ;;  %v8774_v47 = vld [vmem:[%s11374_s1 + $0x28] sm:$0xff] }
 0xf60   : > { %v2132_v57 = vpop.xlane.xlu0 %2131 }
 0xf61   : > { %v2154_v18 = vmul.f32 0.03125, %v2132_v57  ;;  %v8781_v57 = vld [vmem:[%s11374_s1 + $0x20] sm:$0xff] }
 0xf62   : > { %v2135_v50 = vpop.xlane.xlu1 %2134 }
 0xf63   : > { %v8692_v46 = vsub.f32 %v8652_v43, %v2154_v18  ;;  %v2155_v54 = vmul.f32 0.03125, %v2135_v50  ;;  %v7786_v18 = vmov 3   ;;  %v8790_v50 = vld [vmem:[%s11374_s1 + $0x38] sm:$0xff] }
 0xf64   : > { %v2138_v39 = vpop.xlane.xlu0 %2137 }
 0xf65   : > { %v8695_v56 = vsub.f32 %v8658_v28, %v2155_v54  ;;  %v2156_v55 = vmul.f32 0.03125, %v2138_v39  ;;  %v2170_v58 = vmul.f32 %v8692_v46, %v8692_v46  ;;  %v7787_v54 = vmov 5  }
 0xf66   : > { %v7788_v39 = vmov 6  }
 0xf67   : > { %v8700_v51 = vsub.f32 %v8655_v25, %v2156_v55  ;;  %v2178_v0 = vsel %vm517_vm0, %v2170_v58, 0.0  ;;  %v2171_v53 = vmul.f32 %v8695_v56, %v8695_v56  ;;  %v8824_v55 = vld [vmem:[%s11374_s1 + $0x30] sm:$0xff] }
 0xf68   : > { %v2141_v10 = vpop.xlane.xlu0 %2140  ;;  %2179 = vadd.xlane.f32.xlu0 %v2178_v0 }
 0xf69   : > { %v2157_v62 = vmul.f32 0.03125, %v2141_v10  ;;  %v2181_v8 = vsel %vm517_vm0, %v2171_v53, 0.0  ;;  %v2172_v48 = vmul.f32 %v8700_v51, %v8700_v51 }
 0xf6a   : > { %2182 = vadd.xlane.f32.xlu1 %v2181_v8  ;;  %v2147_v9 = vpop.xlane.xlu1 %2146 }
 0xf6b   : > { %v8709_v26 = vsub.f32 %v8664_v35, %v2157_v62  ;;  %v2159_v7 = vmul.f32 0.03125, %v2147_v9  ;;  %v2184_v31 = vsel %vm517_vm0, %v2172_v48, 0.0 }
 0xf6c   : > { %2185 = vadd.xlane.f32.xlu0 %v2184_v31  ;;  %v2144_v32 = vpop.xlane.xlu0 %2143 }
 0xf6d   : > { %v8713_v22 = vsub.f32 %v8674_v3, %v2159_v7  ;;  %v2158_v34 = vmul.f32 0.03125, %v2144_v32  ;;  %v2173_v37 = vmul.f32 %v8709_v26, %v8709_v26 }
 0xf6e   : > { %v2153_v40 = vpop.xlane.xlu1 %2152 }
 0xf6f   : > { %v8718_v61 = vsub.f32 %v8672_v16, %v2158_v34  ;;  %v2161_v41 = vmul.f32 0.03125, %v2153_v40  ;;  %v2187_v21 = vsel %vm517_vm0, %v2173_v37, 0.0  ;;  %v2175_v44 = vmul.f32 %v8713_v22, %v8713_v22 }
 0xf70   : > { %v2150_v12 = vpop.xlane.xlu0 %2149  ;;  %2188 = vadd.xlane.f32.xlu1 %v2187_v21 }
 0xf71   : > { %v8724_v20 = vsub.f32 %v8678_v60, %v2161_v41  ;;  %v2160_v38 = vmul.f32 0.03125, %v2150_v12  ;;  %v2174_v42 = vmul.f32 %v8718_v61, %v8718_v61  ;;  %v2193_v23 = vsel %vm517_vm0, %v2175_v44, 0.0 }
 0xf73   : > { %v8729_v27 = vsub.f32 %v8682_v29, %v2160_v38  ;;  %v2190_v30 = vsel %vm517_vm0, %v2174_v42, 0.0  ;;  %v2177_v2 = vmul.f32 %v8724_v20, %v8724_v20 }
 0xf74   : > { %2191 = vadd.xlane.f32.xlu0 %v2190_v30  ;;  %2194 = vadd.xlane.f32.xlu1 %v2193_v23 }
 0xf75   : > { %v2176_v24 = vmul.f32 %v8729_v27, %v8729_v27  ;;  %v2199_v36 = vsel %vm517_vm0, %v2177_v2, 0.0 }
 0xf77   : > { %v2196_v33 = vsel %vm517_vm0, %v2176_v24, 0.0 }
 0xf78   : > { %2197 = vadd.xlane.f32.xlu0 %v2196_v33  ;;  %2200 = vadd.xlane.f32.xlu1 %v2199_v36 }
 0xf89   : > { %2578 = vperm.xlu1 %7085, %v8742_v19  }
 0xf8d   : > { %2583 = vperm.xlu1 %7085, %v8748_v63  }
 0xf8e   : > { %2961 = vperm.xlu0 %7092, %v8742_v19  }
 0xf91   : > { %2588 = vperm.xlu1 %7085, %v8754_v15  }
 0xf92   : > { %7093 = vset.pattern.permute.xlu0 %v7784_v49 }
 0xf93   : > { %3017 = vperm.xlu0 %7093, %v509_v5  }
 0xf95   : > { %7086 = vset.pattern.permute.xlu1 %v7782_v17 }
 0xf96   : > { %2640 = vperm.xlu1 %7086, %v509_v5  }
 0xf97   : > { %3029 = vperm.xlu0 %7093, %v8754_v15  }
 0xf9a   : > { %2644 = vperm.xlu1 %7086, %v8742_v19  }
 0xf9b   : > { %7095 = vset.pattern.permute.xlu0 %v7781_v59 }
 0xf9c   : > { %2573 = vperm.xlu0 %7095, %v509_v5  }
 0xf9e   : > { %2648 = vperm.xlu1 %7086, %v8748_v63  }
 0xfa0   : > { %2598 = vperm.xlu0 %7095, %v8774_v47  }
 0xfa2   : > { %2652 = vperm.xlu1 %7086, %v8754_v15  }
 0xfa4   : > { %7097 = vset.pattern.permute.xlu0 %v7782_v17 }
 0xfa5   : > { %2656 = vperm.xlu0 %7097, %v8781_v57  }
 0xfa6   : > { %7087 = vset.pattern.permute.xlu1 %v7785_v45 }
 0xfa7   : > { %2717 = vperm.xlu1 %7087, %v509_v5  }
 0xfa9   : > { %2668 = vperm.xlu0 %7097, %v8790_v50  }
 0xfab   : > { %2725 = vperm.xlu1 %7087, %v8748_v63  }
 0xfad   : > { %7099 = vset.pattern.permute.xlu0 %v7785_v45 }
 0xfae   : > { %2721 = vperm.xlu0 %7099, %v8742_v19  }
 0xfaf   : > { %2729 = vperm.xlu1 %7087, %v8754_v15  }
 0xfb2   : > { %2737 = vperm.xlu0 %7099, %v8774_v47  }
 0xfb3   : > { %7088 = vset.pattern.permute.xlu1 %v7786_v18 }
 0xfb4   : > { %2781 = vperm.xlu1 %7088, %v8742_v19  }
 0xfb6   : > { %7101 = vset.pattern.permute.xlu0 %v7786_v18 }
 0xfb7   : > { %2777 = vperm.xlu0 %7101, %v509_v5  }
 0xfb8   : > { %2785 = vperm.xlu1 %7088, %v8748_v63  }
 0xfbb   : > { %2789 = vperm.xlu0 %7101, %v8754_v15  }
 0xfbc   : > { %7089 = vset.pattern.permute.xlu1 %v7787_v54 }
 0xfbd   : > { %2837 = vperm.xlu1 %7089, %v509_v5  }
 0xfbf   : > { %2793 = vperm.xlu0 %7101, %v8781_v57  }
 0xfc1   : > { %2845 = vperm.xlu1 %7089, %v8748_v63  }
 0xfc3   : > { %2805 = vperm.xlu0 %7101, %v8790_v50  }
 0xfc5   : > { %2849 = vperm.xlu1 %7089, %v8754_v15  }
 0xfc7   : > { %7103 = vset.pattern.permute.xlu0 %v7787_v54 }
 0xfc8   : > { %2841 = vperm.xlu0 %7103, %v8742_v19  }
 0xfc9   : > { %7090 = vset.pattern.permute.xlu1 %v7788_v39 }
 0xfca   : > { %2901 = vperm.xlu1 %7090, %v8742_v19  }
 0xfcc   : > { %2857 = vperm.xlu0 %7103, %v8774_v47  }
 0xfce   : > { %2905 = vperm.xlu1 %7090, %v8748_v63  }
 0xfd0   : > { %7105 = vset.pattern.permute.xlu0 %v7788_v39 }
 0xfd1   : > { %2897 = vperm.xlu0 %7105, %v509_v5  }
 0xfd2   : > { %7091 = vset.pattern.permute.xlu1 %v7783_v52 }
 0xfd3   : > { %2957 = vperm.xlu1 %7091, %v509_v5  }
 0xfd5   : > { %2909 = vperm.xlu0 %7105, %v8754_v15  }
 0xfd7   : > { %2965 = vperm.xlu1 %7091, %v8748_v63  }
 0xfd9   : > { %2913 = vperm.xlu0 %7105, %v8781_v57  }
 0xfdb   : > { %2969 = vperm.xlu1 %7091, %v8754_v15  }
 0xfdd   : > { %2925 = vperm.xlu0 %7105, %v8790_v50  }
 0xfdf   : > { %7094 = vset.pattern.permute.xlu1 %v7784_v49 }
 0xfe0   : > { %3021 = vperm.xlu1 %7094, %v8742_v19  }
 0xfe1   : > { %7108 = vset.pattern.permute.xlu0 %v7783_v52 }
 0xfe2   : > { %2977 = vperm.xlu0 %7108, %v8774_v47  }
 0xfe4   : > { %3025 = vperm.xlu1 %7094, %v8748_v63  }
 0xfe6   : > { %7109 = vset.pattern.permute.xlu0 %v7784_v49 }
 0xfe7   : > { %3033 = vperm.xlu0 %7109, %v8781_v57  }
 0xfe8   : > { %7096 = vset.pattern.permute.xlu1 %v7781_v59 }
 0xfe9   : > { %2593 = vperm.xlu1 %7096, %v8781_v57  }
 0xfeb   : > { %3045 = vperm.xlu0 %7109, %v8790_v50  }
 0xfed   : > { %2603 = vperm.xlu1 %7096, %v8824_v55  }
 0xff1   : > { %2608 = vperm.xlu1 %7096, %v8790_v50  }
 0xff5   : > { %v2180_v59 = vpop.xlane.xlu0 %2179  ;;  %7098 = vset.pattern.permute.xlu1 %v7782_v17 }
 0xff6   : > { %v2202_v58 = vmul.f32 0.03125, %v2180_v59  ;;  %2660 = vperm.xlu1 %7098, %v8774_v47  }
 0xff7   : > { %v2183_v0 = vpop.xlane.xlu1 %2182 }
 0xff8   : > { %v2210_v53 = vadd.f32 1e-05, %v2202_v58  ;;  %v2203_v10 = vmul.f32 0.03125, %v2183_v0 }
 0xff9   : > { %v2186_v62 = vpop.xlane.xlu0 %2185 }
 0xffa   : > { %7315 = vrsqrt.f32 %v2210_v53  ;;  %v2211_v8 = vadd.f32 1e-05, %v2203_v10  ;;  %v2204_v48 = vmul.f32 0.03125, %v2186_v62  ;;  %2664 = vperm.xlu1 %7098, %v8824_v55  }
 0xffc   : > { %7317 = vrsqrt.f32 %v2211_v8  ;;  %v2212_v9 = vadd.f32 1e-05, %v2204_v48 }
 0xffd   : > { %v2189_v7 = vpop.xlane.xlu1 %2188 }
 0xffe   : > { %v2205_v31 = vmul.f32 0.03125, %v2189_v7  ;;  %7100 = vset.pattern.permute.xlu1 %v7785_v45  ;;  %7319 = vrsqrt.f32 %v2212_v9 }
 0xfff   : > { %2733 = vperm.xlu1 %7100, %v8781_v57  }
0x1000   : > { %v2213_v32 = vadd.f32 1e-05, %v2205_v31 }
0x1001   : > { %v2192_v34 = vpop.xlane.xlu0 %2191  ;;  %v2195_v37 = vpop.xlane.xlu1 %2194 }
0x1002   : > { %7321 = vrsqrt.f32 %v2213_v32  ;;  %v2206_v40 = vmul.f32 0.03125, %v2192_v34  ;;  %v2207_v41 = vmul.f32 0.03125, %v2195_v37  ;;  %v2540_v34 = vlaneseq }
0x1003   : > { %2741 = vperm.xlu1 %7100, %v8824_v55  }
0x1004   : > { %v7316_v21 = vpop.eup %7315  ;;  %v2214_v44 = vadd.f32 1e-05, %v2206_v40  ;;  %v2215_v12 = vadd.f32 1e-05, %v2207_v41  ;;  %v8920_v40 = vld [vmem:[#allocation6] ss:$0 sm:$0xff] }
0x1005   : > { %v2198_v38 = vpop.xlane.xlu0 %2197  ;;  %v2201_v42 = vpop.xlane.xlu1 %2200  ;;  %v2226_v24 = vmul.f32 %v7316_v21, %v8692_v46  ;;  %v8924_v21 = vshrl.u32 %v2540_v34, 7 }
0x1006   : > { %v7318_v30 = vpop.eup %7317  ;;  %7323 = vrsqrt.f32 %v2214_v44  ;;  %v2208_v23 = vmul.f32 0.03125, %v2198_v38  ;;  %v2209_v2 = vmul.f32 0.03125, %v2201_v42 }
0x1007   : > { %7325 = vrsqrt.f32 %v2215_v12  ;;  %v2227_v33 = vmul.f32 %v7318_v30, %v8695_v56  ;;  %2745 = vperm.xlu1 %7100, %v8790_v50   ;;  %vm2562_vm11 = vcmp.lt.s32.totalorder %v8924_v21, 1  ;;  %vm2707_vm12 = vcmp.lt.s32.totalorder %v8924_v21, 7 }
0x1008   : > { %v2216_v36 = vadd.f32 1e-05, %v2208_v23  ;;  %v2217_v19 = vadd.f32 1e-05, %v2209_v2  ;;  %v7320_v4 = vpop.eup %7319 }
0x1009   : > { %v2238_v1 = vpack.c.bf16 %v2227_v33, %v2226_v24  ;;  %v2228_v63 = vmul.f32 %v7320_v4, %v8700_v51  ;;  %v8936_v33 = vld [vmem:[%s11382_s9 + $0x8] sm:$0x7]  ;;  %v2536_v4 = vld [vmem:[%s11382_s9] sm:$0x7] }
0x100a   : > { %7327 = vrsqrt.f32 %v2216_v36  ;;  %v8939_v36 = vsub.s32 1, %v8924_v21 }
0x100b   : > { %7329 = vrsqrt.f32 %v2217_v19  ;;  %6697 = vmatprep.mubr.msk.bf16.mxu0 %vm517_vm0, %v2238_v1  ;;  %7102 = vset.pattern.permute.xlu1 %v7786_v18 }
0x100c   : > { %v7322_v11 = vpop.eup %7321  ;;  %2797 = vperm.xlu1 %7102, %v8774_v47   ;;  %11569 = vst [vmem:[#allocation48_spill] sm:$0xff] %v8939_v36 }
0x100d   : > { %v2229_v46 = vmul.f32 %v7322_v11, %v8709_v26  ;;  %v8910_v9 = vpop.permute.xlu0 %2961  ;;  %v2537_v11 = vld [vmem:[%s11382_s9 + $0x4] sm:$0x7] }
0x100e   : > { %11562 = vst [vmem:[#allocation41_spill] sm:$0xff] %v8910_v9 }
0x100f   : > { %v2239_v56 = vpack.c.bf16 %v2229_v46, %v2228_v63 }
0x1010   : > { %v7324_v6 = vpop.eup %7323  ;;  %2801 = vperm.xlu1 %7102, %v8824_v55  }
0x1011   : > { %v7326_v13 = vpop.eup %7325  ;;  %6698 = vmatmul.mubr.msk.bf16.vlgmr.msra.gmra.mrb[32].mxu0 %vm517_vm0, %v2239_v56  ;;  %v2230_v14 = vmul.f32 %v7324_v6, %v8718_v61 }
0x1012   : > { %v2231_v15 = vmul.f32 %v7326_v13, %v8713_v22  ;;  %v8870_v22 = vpop.permute.xlu1 %2578  ;;  %v8914_v31 = vpop.permute.xlu0 %3017  ;;  %v8958_v13 = vsub.s32 2, %v8924_v21 }
0x1013   : > { %11542 = vst [vmem:[#allocation21_spill] sm:$0xff] %v8870_v22  ;;  %11564 = vst [vmem:[#allocation43_spill] sm:$0xff] %v8914_v31 }
0x1014   : > { %v7328_v5 = vpop.eup %7327  ;;  %v2240_v17 = vpack.c.bf16 %v2231_v15, %v2230_v14  ;;  %7104 = vset.pattern.permute.xlu1 %v7787_v54  ;;  %11571 = vst [vmem:[#allocation50_spill] sm:$0xff] %v8958_v13  ;;  %v8962_v15 = vsub.s32 0, %v8924_v21  ;;  %v8987_v16 = vrot.slane %v2536_v4, %v8958_v13 }
0x1015   : > { %v7330_v45 = vpop.eup %7329  ;;  %v2232_v51 = vmul.f32 %v7328_v5, %v8729_v27  ;;  %2853 = vperm.xlu1 %7104, %v8781_v57   ;;  %v3298_v5 = vld [vmem:[%s11384_s11] sm:$0xff] }
0x1016   : > { %6701 = vmatprep.mubr.msk.bf16.mxu0 %vm517_vm0, %v2240_v17  ;;  %v2233_v26 = vmul.f32 %v7330_v45, %v8724_v20  ;;  %v8872_v61 = vpop.permute.xlu1 %2583  ;;  %v8918_v37 = vpop.permute.xlu0 %3029  ;;  %11572 = vst [vmem:[#allocation51_spill] sm:$0xff] %v8962_v15  ;;  %11575 = vst [vmem:[#allocation54_spill] sm:$0xff] %v8987_v16  ;;  %v8996_v22 = vrot.slane %v2537_v11, %v8962_v15 }
0x1017   : > { %11543 = vst [vmem:[#allocation22_spill] sm:$0xff] %v8872_v61  ;;  %11566 = vst [vmem:[#allocation45_spill] sm:$0xff] %v8918_v37 }
0x1018   : > { %v2241_v18 = vpack.c.bf16 %v2233_v26, %v2232_v51  ;;  %v8969_v51 = vrot.slane %v8936_v33, %v8939_v36  ;;  %v8972_v26 = vrot.slane %v2537_v11, %v8939_v36  ;;  %11577 = vst [vmem:[#allocation56_spill] sm:$0xff] %v8996_v22 }
0x1019   : > { %2861 = vperm.xlu1 %7104, %v8824_v55  }
0x101a   : > { %6702 = vmatmul.mubr.msk.bf16.gmra.mrb[36].mxu0 %vm517_vm0, %v2241_v18  ;;  %v8874_v20 = vpop.permute.xlu1 %2588  ;;  %11573 = vst [vmem:[#allocation52_spill] sm:$0xff] %v8969_v51  ;;  %v3299_v18 = vld [vmem:[%s11384_s11 + $0x8] sm:$0xff] }
0x101b   : > { %11544 = vst [vmem:[#allocation23_spill] sm:$0xff] %v8874_v20  ;;  %v8927_v42 = vpop.permute.xlu0 %2573  ;;  %v3318_v28 = vpack.c.bf16 %v3299_v18, %v3298_v5 }
0x101c   : > { %11568 = vst [vmem:[#allocation47_spill] sm:$0xff] %v8927_v42 }
0x101d   : > { %2865 = vperm.xlu1 %7104, %v8790_v50   ;;  %6705 = vmatprep.subr.bf16.mxu1 %v3318_v28 }
0x101e   : > { %v8876_v27 = vpop.permute.xlu1 %2640  ;;  %6706 = vmatpush3.bf16.msra.mxu1 %v3318_v28 }
0x101f   : > { %11545 = vst [vmem:[#allocation24_spill] sm:$0xff] %v8876_v27  ;;  %v8977_v34 = vpop.permute.xlu0 %2598 }
0x1020   : > { %11574 = vst [vmem:[#allocation53_spill] sm:$0xff] %v8977_v34 }
0x1021   : > { %7106 = vset.pattern.permute.xlu1 %v7788_v39 }
0x1022   : > { %2917 = vperm.xlu1 %7106, %v8774_v47  }
0x1026   : > { %2921 = vperm.xlu1 %7106, %v8824_v55  }
0x102a   : > { %7107 = vset.pattern.permute.xlu1 %v7783_v52  ;;  %v8878_v52 = vpop.permute.xlu1 %2644 }
0x102b   : > { %2973 = vperm.xlu1 %7107, %v8781_v57   ;;  %11546 = vst [vmem:[#allocation25_spill] sm:$0xff] %v8878_v52 }
0x102e   : > { %v8880_v57 = vpop.permute.xlu1 %2648 }
0x102f   : > { %2981 = vperm.xlu1 %7107, %v8824_v55   ;;  %11547 = vst [vmem:[#allocation26_spill] sm:$0xff] %v8880_v57 }
0x1032   : > { %v8882_v54 = vpop.permute.xlu1 %2652 }
0x1033   : > { %2985 = vperm.xlu1 %7107, %v8790_v50   ;;  %11548 = vst [vmem:[#allocation27_spill] sm:$0xff] %v8882_v54 }
0x1036   : > { %v8884_v50 = vpop.permute.xlu1 %2717 }
0x1037   : > { %7110 = vset.pattern.permute.xlu1 %v7784_v49  ;;  %11549 = vst [vmem:[#allocation28_spill] sm:$0xff] %v8884_v50 }
0x1038   : > { %3037 = vperm.xlu1 %7110, %v8774_v47  }
0x103a   : > { %v8886_v49 = vpop.permute.xlu1 %2725 }
0x103b   : > { %11550 = vst [vmem:[#allocation29_spill] sm:$0xff] %v8886_v49 }
0x103c   : > { %3041 = vperm.xlu1 %7110, %v8824_v55  }
0x103e   : > { %v8888_v47 = vpop.permute.xlu1 %2729 }
0x103f   : > { %11551 = vst [vmem:[#allocation30_spill] sm:$0xff] %v8888_v47 }
0x1042   : > { %v8890_v39 = vpop.permute.xlu1 %2781 }
0x1043   : > { %11552 = vst [vmem:[#allocation31_spill] sm:$0xff] %v8890_v39 }
0x1046   : > { %v8892_v55 = vpop.permute.xlu1 %2785 }
0x1047   : > { %11553 = vst [vmem:[#allocation32_spill] sm:$0xff] %v8892_v55 }
0x104a   : > { %v8894_v59 = vpop.permute.xlu1 %2837 }
0x104b   : > { %11554 = vst [vmem:[#allocation33_spill] sm:$0xff] %v8894_v59  ;;  %v8990_v59 = vrot.slane %v2536_v4, %v8962_v15 }
0x104e   : > { %v8896_v58 = vpop.permute.xlu1 %2845 }
0x104f   : > { %11555 = vst [vmem:[#allocation34_spill] sm:$0xff] %v8896_v58 }
0x1052   : > { %v8898_v0 = vpop.permute.xlu1 %2849 }
0x1053   : > { %11556 = vst [vmem:[#allocation35_spill] sm:$0xff] %v8898_v0 }
0x1056   : > { %v8900_v53 = vpop.permute.xlu1 %2901 }
0x1057   : > { %11557 = vst [vmem:[#allocation36_spill] sm:$0xff] %v8900_v53 }
0x105a   : > { %v8902_v10 = vpop.permute.xlu1 %2905 }
0x105b   : > { %11558 = vst [vmem:[#allocation37_spill] sm:$0xff] %v8902_v10 }
0x105e   : > { %v8904_v62 = vpop.permute.xlu1 %2957 }
0x105f   : > { %11559 = vst [vmem:[#allocation38_spill] sm:$0xff] %v8904_v62 }
0x1062   : > { %v8906_v8 = vpop.permute.xlu1 %2965 }
0x1063   : > { %11560 = vst [vmem:[#allocation39_spill] sm:$0xff] %v8906_v8 }
0x1066   : > { %v8908_v48 = vpop.permute.xlu1 %2969 }
0x1067   : > { %11561 = vst [vmem:[#allocation40_spill] sm:$0xff] %v8908_v48 }
0x106a   : > { %v8912_v7 = vpop.permute.xlu1 %3021 }
0x106b   : > { %11563 = vst [vmem:[#allocation42_spill] sm:$0xff] %v8912_v7 }
0x106e   : > { %v8916_v32 = vpop.permute.xlu1 %3025 }
0x106f   : > { %11565 = vst [vmem:[#allocation44_spill] sm:$0xff] %v8916_v32 }
0x1072   : > { %v8922_v41 = vpop.permute.xlu1 %2593 }
0x1073   : > { %11567 = vst [vmem:[#allocation46_spill] sm:$0xff] %v8922_v41 }
0x1076   : > { %v8949_v63 = vpop.permute.xlu1 %2603 }
0x1077   : > { %11570 = vst [vmem:[#allocation49_spill] sm:$0xff] %v8949_v63 }
0x107a   : > { %v8992_v39 = vpop.permute.xlu1 %2608 }
0x107b   : > { %11576 = vst [vmem:[#allocation55_spill] sm:$0xff] %v8992_v39 }
0x10e4   : > { %v6699_v44 = vpop.f32.mrb[32].mxu0 }
0x10e5   : > { %v2306_v12 = vadd.f32 %v6699_v44, %v8920_v40  ;;  %v2297_v38 = vpop.f32.mrb[33].mxu0 }
0x10e6   : > { %v2298_v30 = vadd.f32 %v8920_v40, %v2297_v38  ;;  %v6700_v23 = vpop.f32.mrb[34].mxu0 }
0x10e7   : > { %v8930_v2 = vmul.f32 0.70710677, %v2306_v12  ;;  %v2309_v24 = vadd.f32 %v6700_v23, %v8920_v40  ;;  %v2300_v19 = vpop.f32.mrb[35].mxu0 }
0x10e8   : > { %v8941_v1 = vmul.f32 0.70710677, %v2298_v30  ;;  %v8955_v6 = vadd.f32 %v8920_v40, %v2300_v19  ;;  %v8981_v19 = vrot.slane %v2536_v4, %v8939_v36  ;;  %v9001_v4 = vmul.f32 0.5, %v2306_v12 }
0x10e9   : > { %v2362_v46 = vand.u32 2147483647, %v8930_v2  ;;  %v8952_v56 = vmul.f32 0.70710677, %v2309_v24  ;;  %v9003_v39 = vmul.f32 0.5, %v2298_v30  ;;  %vm2346_vm5 = vcmp.ge.f32.partialorder %v8930_v2, 0.0  ;;  %v9024_v2 = vpop.permute.xlu1 %2660 }
0x10ea   : > { %v2360_v14 = vand.u32 2147483647, %v8941_v1  ;;  %v8984_v60 = vmul.f32 0.70710677, %v8955_v6  ;;  %vm2344_vm6 = vcmp.ge.f32.partialorder %v8941_v1, 0.0  ;;  %11581 = vst [vmem:[#allocation60_spill] sm:$0xff] %v9024_v2 }
0x10eb   : > { %v2370_v17 = vmul.f32 0.3275911, %v2362_v46  ;;  %v2466_v45 = vsub.f32 0.0, %v2362_v46  ;;  %v2363_v23 = vand.u32 2147483647, %v8952_v56  ;;  %vm2347_vm7 = vcmp.ge.f32.partialorder %v8952_v56, 0.0 }
0x10ec   : > { %v2368_v44 = vmul.f32 0.3275911, %v2360_v14  ;;  %v2464_v38 = vsub.f32 0.0, %v2360_v14  ;;  %vm2345_vm8 = vcmp.ge.f32.partialorder %v8984_v60, 0.0 }
0x10ed   : > { %v2378_v3 = vadd.f32 1.0, %v2370_v17  ;;  %v6703_v29 = vpop.f32.mrb[36].mxu0  ;;  %v2371_v25 = vmul.f32 0.3275911, %v2363_v23  ;;  %v2467_v43 = vsub.f32 0.0, %v2363_v23  ;;  %v2474_v36 = vmul.f32 %v2466_v45, %v2362_v46  ;;  %v9009_v45 = vpop.permute.xlu0 %2656 }
0x10ee   : > { %v2376_v35 = vadd.f32 1.0, %v2368_v44  ;;  %v2313_v7 = vpop.f32.mrb[37].mxu0  ;;  %v2361_v17 = vand.u32 2147483647, %v8984_v60  ;;  %v2472_v5 = vmul.f32 %v2464_v38, %v2360_v14  ;;  %v8999_v44 = vrot.slane %v2537_v11, %v8958_v13  ;;  %11580 = vst [vmem:[#allocation59_spill] sm:$0xff] %v9009_v45  ;;  %v9059_v61 = vpop.permute.xlu1 %2664 }
0x10ef   : > { %7331 = vrcp.f32 %v2378_v3  ;;  %v6704_v31 = vpop.f32.mrb[38].mxu0  ;;  %v2379_v18 = vadd.f32 1.0, %v2371_v25  ;;  %v9007_v46 = vrot.slane %v8936_v33, %v8962_v15  ;;  %v2322_v25 = vadd.f32 %v6703_v29, %v8920_v40  ;;  %11584 = vst [vmem:[#allocation63_spill] sm:$0xff] %v9059_v61 }
0x10f0   : > { %7333 = vrcp.f32 %v2376_v35  ;;  %11578 = vst [vmem:[#allocation57_spill] sm:$0xff] %v8999_v44  ;;  %v2316_v37 = vpop.f32.mrb[39].mxu0  ;;  %v2369_v3 = vmul.f32 0.3275911, %v2361_v17  ;;  %v2475_v35 = vmul.f32 %v2467_v43, %v2363_v23  ;;  %v9014_v11 = vadd.f32 %v8920_v40, %v2313_v7 }
0x10f1   : > { %11579 = vst [vmem:[#allocation58_spill] sm:$0xff] %v9007_v46  ;;  %v2484_v28 = vmul.f32 1.442695, %v2474_v36  ;;  %7335 = vrcp.f32 %v2379_v18  ;;  %v9017_v30 = vadd.f32 %v6704_v31, %v8920_v40  ;;  %v2480_v14 = vmul.f32 1.442695, %v2472_v5  ;;  %v3302_v46 = vld [vmem:[%s11384_s11 + $0x20] sm:$0xff] }
0x10f2   : > { %v2377_v12 = vadd.f32 1.0, %v2369_v3  ;;  %v9020_v38 = vmul.f32 0.5, %v2309_v24  ;;  %v9022_v15 = vmul.f32 0.70710677, %v2322_v25  ;;  %v11419_v43 = vmov -1.0  }
0x10f3   : > { %v9027_v29 = vsel %vm2346_vm5, 1.0, %v11419_v43  ;;  %v2465_v7 = vsub.f32 0.0, %v2361_v17  ;;  %v9030_v36 = vmul.f32 0.70710677, %v9014_v11  ;;  %v2486_v31 = vmul.f32 1.442695, %v2475_v35 }
0x10f4   : > { %7337 = vrcp.f32 %v2377_v12  ;;  %v2366_v23 = vand.u32 2147483647, %v9022_v15  ;;  %v9034_v1 = vmul.f32 0.70710677, %v9017_v30  ;;  %v9038_v24 = vrot.slane %v8936_v33, %v8958_v13  ;;  %v9047_v12 = vpop.permute.xlu0 %2668 }
0x10f5   : > { %7339 = vpow2.f32 %v2484_v28  ;;  %v9041_v5 = vsel %vm2344_vm6, 1.0, %v11419_v43  ;;  %v9044_v18 = vmul.f32 0.5, %v8955_v6  ;;  %v2364_v3 = vand.u32 2147483647, %v9030_v36  ;;  %11583 = vst [vmem:[#allocation62_spill] sm:$0xff] %v9047_v12 }
0x10f6   : > { %11582 = vst [vmem:[#allocation61_spill] sm:$0xff] %v9038_v24  ;;  %7341 = vpow2.f32 %v2480_v14  ;;  %v2374_v35 = vmul.f32 0.3275911, %v2366_v23  ;;  %v2473_v33 = vmul.f32 %v2465_v7, %v2361_v17  ;;  %v2470_v28 = vsub.f32 0.0, %v2366_v23 }
0x10f7   : > { %v2372_v13 = vmul.f32 0.3275911, %v2364_v3  ;;  %v9054_v43 = vand.u32 2147483647, %v9034_v1  ;;  %7343 = vpow2.f32 %v2486_v31  ;;  %v2468_v14 = vsub.f32 0.0, %v2364_v3 }
0x10f8   : > { %v2382_v48 = vadd.f32 1.0, %v2374_v35  ;;  %v9064_v17 = vadd.f32 %v8920_v40, %v2316_v37  ;;  %v11585_v12 = vmov -1.0   ;;  %v3301_v37 = vld [vmem:[%s11384_s11 + $0x18] sm:$0xff]  ;;  %v2478_v56 = vmul.f32 %v2470_v28, %v2366_v23  ;;  %v9084_v61 = vpop.permute.xlu0 %2721 }
0x10f9   : > { %v9051_v63 = vpop.eup %7331  ;;  %v2380_v50 = vadd.f32 1.0, %v2372_v13  ;;  %v2375_v49 = vmul.f32 0.3275911, %v9054_v43  ;;  %v9069_v42 = vsel %vm2347_vm7, 1.0, %v11585_v12  ;;  %v9074_v31 = vsel %vm2345_vm8, 1.0, %v11585_v12  ;;  %v3300_v13 = vld [vmem:[%s11384_s11 + $0x10] sm:$0xff] }
0x10fa   : > { %v9056_v6 = vpop.eup %7333  ;;  %v2394_v24 = vmul.f32 1.0614054, %v9051_v63  ;;  %7345 = vrcp.f32 %v2382_v48  ;;  %11586 = vst [vmem:[#allocation64_spill] sm:$0xff] %v9084_v61  ;;  %v9088_v32 = vmul.f32 0.5, %v2322_v25  ;;  %v2476_v27 = vmul.f32 %v2468_v14, %v2364_v3  ;;  %v3304_v25 = vld [vmem:[%s11384_s11 + $0x30] sm:$0xff]  ;;  %v3305_v3 = vld [vmem:[%s11384_s11 + $0x38] sm:$0xff] }
0x10fb   : > { %v2392_v0 = vmul.f32 1.0614054, %v9056_v6  ;;  %v9082_v40 = vpop.eup %7335  ;;  %7347 = vrcp.f32 %v2380_v50  ;;  %v2383_v35 = vadd.f32 1.0, %v2375_v49  ;;  %v2482_v49 = vmul.f32 1.442695, %v2473_v33 }
0x10fc   : > { %v2402_v7 = vadd.f32 -1.4531521, %v2394_v24  ;;  %v2395_v48 = vmul.f32 1.0614054, %v9082_v40  ;;  %v9100_v28 = vmul.f32 0.70710677, %v9064_v17  ;;  %v3321_v57 = vpack.c.bf16 %v3305_v3, %v3304_v25 }
0x10fd   : > { %v2400_v24 = vadd.f32 -1.4531521, %v2392_v0  ;;  %v3303_v0 = vld [vmem:[%s11384_s11 + $0x28] sm:$0xff]  ;;  %7349 = vrcp.f32 %v2383_v35  ;;  %v2492_v53 = vmul.f32 1.442695, %v2478_v56  ;;  %vm2350_vm9 = vcmp.ge.f32.partialorder %v9022_v15, 0.0 }
0x10fe   : > { %v2410_v60 = vmul.f32 %v9051_v63, %v2402_v7  ;;  %v9096_v23 = vpop.eup %7337  ;;  %v3319_v7 = vpack.c.bf16 %v3301_v37, %v3300_v13  ;;  %v2403_v61 = vadd.f32 -1.4531521, %v2395_v48  ;;  %v2471_v13 = vsub.f32 0.0, %v9054_v43 }
0x10ff   : > { %v2408_v50 = vmul.f32 %v9056_v6, %v2400_v24  ;;  %v2393_v34 = vmul.f32 1.0614054, %v9096_v23  ;;  %v9109_v2 = vpop.eup %7339  ;;  %v9111_v24 = vpop.permute.xlu1 %2733  ;;  %v3320_v37 = vpack.c.bf16 %v3303_v0, %v3302_v46  ;;  %v2488_v62 = vmul.f32 1.442695, %v2476_v27  ;;  %v3306_v27 = vld [vmem:[%s11384_s11 + $0x40] sm:$0xff] }
0x1100   : > { %v2418_v14 = vadd.f32 1.4214138, %v2410_v60  ;;  %11587 = vst [vmem:[#allocation65_spill] sm:$0xff] %v9111_v24  ;;  %6707 = vmatprep.subr.bf16.mxu1 %v3319_v7  ;;  %v9114_v44 = vpop.eup %7341  ;;  %v2411_v60 = vmul.f32 %v9082_v40, %v2403_v61  ;;  %v9123_v56 = vand.u32 2147483647, %v9100_v28  ;;  %7351 = vpow2.f32 %v2482_v49 }
0x1101   : > { %v2416_v33 = vadd.f32 1.4214138, %v2408_v50  ;;  %v2401_v48 = vadd.f32 -1.4531521, %v2393_v34  ;;  %6708 = vmatpush3.bf16.msra.mxu1 %v3319_v7  ;;  %v9120_v50 = vmul.f32 0.5, %v9014_v11  ;;  %v9125_v46 = vpop.eup %7343  ;;  %v3307_v34 = vld [vmem:[%s11384_s11 + $0x48] sm:$0xff]  ;;  %7353 = vpow2.f32 %v2492_v53 }
0x1102   : > { %v2426_v10 = vmul.f32 %v9051_v63, %v2418_v14  ;;  %6709 = vmatprep.subr.bf16.mxu1 %v3320_v37  ;;  %v2419_v24 = vadd.f32 1.4214138, %v2411_v60  ;;  %v9127_v14 = vpop.permute.xlu0 %2737  ;;  %v9137_v7 = vmul.f32 0.5, %v9017_v30  ;;  %7355 = vpow2.f32 %v2488_v62  ;;  %v3308_v60 = vld [vmem:[%s11384_s11 + $0x50] sm:$0xff]  ;;  %v3309_v53 = vld [vmem:[%s11384_s11 + $0x58] sm:$0xff] }
0x1103   : > { %v2424_v35 = vmul.f32 %v9056_v6, %v2416_v33  ;;  %11588 = vst [vmem:[#allocation66_spill] sm:$0xff] %v9127_v14  ;;  %v2409_v61 = vmul.f32 %v9096_v23, %v2401_v48  ;;  %v3322_v62 = vpack.c.bf16 %v3307_v34, %v3306_v27  ;;  %vm2348_vm10 = vcmp.ge.f32.partialorder %v9030_v36, 0.0 }
0x1104   : > { %v2434_v0 = vadd.f32 -0.28449672, %v2426_v10  ;;  %v2479_v10 = vmul.f32 %v2471_v13, %v9054_v43  ;;  %v9140_v25 = vpop.eup %7345  ;;  %v2427_v49 = vmul.f32 %v9082_v40, %v2419_v24  ;;  %v9153_v13 = vpop.permute.xlu1 %2741  ;;  %v2373_v24 = vmul.f32 0.3275911, %v9123_v56 }
0x1105   : > { %v2432_v11 = vadd.f32 -0.28449672, %v2424_v35  ;;  %v2417_v33 = vadd.f32 1.4214138, %v2409_v61  ;;  %6710 = vmatpush3.bf16.msra.mxu1 %v3320_v37  ;;  %v9150_v30 = vpop.eup %7347  ;;  %11589 = vst [vmem:[#allocation67_spill] sm:$0xff] %v9153_v13  ;;  %vm2351_vm13 = vcmp.ge.f32.partialorder %v9034_v1, 0.0 }
0x1106   : > { %v2442_v3 = vmul.f32 %v9051_v63, %v2434_v0  ;;  %v2398_v48 = vmul.f32 1.0614054, %v9140_v25  ;;  %6711 = vmatprep.subr.bf16.mxu1 %v3321_v57  ;;  %v2435_v35 = vadd.f32 -0.28449672, %v2427_v49  ;;  %v2396_v61 = vmul.f32 1.0614054, %v9150_v30  ;;  %v9164_v27 = vpop.permute.xlu0 %2777 }
0x1107   : > { %v2440_v43 = vmul.f32 %v9056_v6, %v2432_v11  ;;  %v2425_v0 = vmul.f32 %v9096_v23, %v2417_v33  ;;  %v2494_v45 = vmul.f32 1.442695, %v2479_v10  ;;  %v3323_v11 = vpack.c.bf16 %v3309_v53, %v3308_v60  ;;  %v9160_v58 = vpop.eup %7349  ;;  %11590 = vst [vmem:[#allocation68_spill] sm:$0xff] %v9164_v27 }
0x1108   : > { %v2450_v37 = vadd.f32 0.2548296, %v2442_v3  ;;  %v2406_v51 = vadd.f32 -1.4531521, %v2398_v48  ;;  %v2443_v22 = vmul.f32 %v9082_v40, %v2435_v35  ;;  %v2404_v34 = vadd.f32 -1.4531521, %v2396_v61 }
0x1109   : > { %v2448_v14 = vadd.f32 0.2548296, %v2440_v43  ;;  %v2433_v16 = vadd.f32 -0.28449672, %v2425_v0  ;;  %6712 = vmatpush3.bf16.msra.mxu1 %v3321_v57  ;;  %v2399_v10 = vmul.f32 1.0614054, %v9160_v58  ;;  %7357 = vpow2.f32 %v2494_v45 }
0x110a   : > { %v2458_v13 = vmul.f32 %v9051_v63, %v2450_v37  ;;  %v2414_v49 = vmul.f32 %v9140_v25, %v2406_v51  ;;  %v2381_v33 = vadd.f32 1.0, %v2373_v24  ;;  %6713 = vmatprep.subr.bf16.mxu1 %v3322_v62  ;;  %v2451_v63 = vadd.f32 0.2548296, %v2443_v22  ;;  %v3310_v48 = vld [vmem:[%s11384_s11 + $0x60] sm:$0xff]  ;;  %v3311_v57 = vld [vmem:[%s11384_s11 + $0x68] sm:$0xff]  ;;  %v9180_v24 = vpop.permute.xlu1 %2745  ;;  %v7352_v22 = vpop.eup %7351 }
0x110b   : > { %v2456_v3 = vmul.f32 %v9056_v6, %v2448_v14  ;;  %v2441_v53 = vmul.f32 %v9096_v23, %v2433_v16  ;;  %v2412_v43 = vmul.f32 %v9150_v30, %v2404_v34  ;;  %v2407_v14 = vadd.f32 -1.4531521, %v2399_v10  ;;  %11591 = vst [vmem:[#allocation69_spill] sm:$0xff] %v9180_v24  ;;  %v7354_v35 = vpop.eup %7353  ;;  %v9189_v10 = vpop.permute.xlu0 %2789 }
0x110c   : > { %v2498_v60 = vmul.f32 %v9109_v2, %v2458_v13  ;;  %v2422_v6 = vadd.f32 1.4214138, %v2414_v49  ;;  %v2459_v16 = vmul.f32 %v9082_v40, %v2451_v63  ;;  %7359 = vrcp.f32 %v2381_v33  ;;  %v7356_v34 = vpop.eup %7355  ;;  %11592 = vst [vmem:[#allocation70_spill] sm:$0xff] %v9189_v10  ;;  %v3313_v33 = vld [vmem:[%s11384_s11 + $0x78] sm:$0xff] }
0x110d   : > { %v2496_v51 = vmul.f32 %v9114_v44, %v2456_v3  ;;  %v2449_v13 = vadd.f32 0.2548296, %v2441_v53  ;;  %v2420_v37 = vadd.f32 1.4214138, %v2412_v43  ;;  %6714 = vmatpush3.bf16.msra.mxu1 %v3322_v62  ;;  %v2415_v61 = vmul.f32 %v9160_v58, %v2407_v14  ;;  %v3312_v62 = vld [vmem:[%s11384_s11 + $0x70] sm:$0xff] }
0x110e   : > { %v2506_v2 = vsub.f32 1.0, %v2498_v60  ;;  %v2430_v0 = vmul.f32 %v9140_v25, %v2422_v6  ;;  %6715 = vmatprep.subr.bf16.mxu1 %v3323_v11  ;;  %v3324_v44 = vpack.c.bf16 %v3311_v57, %v3310_v48  ;;  %v2499_v3 = vmul.f32 %v9125_v46, %v2459_v16 }
0x110f   : > { %v2457_v49 = vmul.f32 %v9096_v23, %v2449_v13  ;;  %v2428_v40 = vmul.f32 %v9150_v30, %v2420_v37  ;;  %v2504_v60 = vsub.f32 1.0, %v2496_v51  ;;  %v2423_v53 = vadd.f32 1.4214138, %v2415_v61  ;;  %v9205_v51 = vpop.permute.xlu1 %2797 }
0x1110   : > { %v2514_v45 = vmul.f32 %v2506_v2, %v9027_v29  ;;  %v2438_v63 = vadd.f32 -0.28449672, %v2430_v0  ;;  %v2469_v29 = vsub.f32 0.0, %v9123_v56  ;;  %v2507_v43 = vsub.f32 1.0, %v2499_v3  ;;  %11593 = vst [vmem:[#allocation71_spill] sm:$0xff] %v9205_v51 }
0x1111   : > { %v2497_v23 = vmul.f32 %v7352_v22, %v2457_v49  ;;  %v2436_v48 = vadd.f32 -0.28449672, %v2428_v40  ;;  %6716 = vmatpush3.bf16.msra.mxu1 %v3323_v11  ;;  %v2358_v57 = vsel %vm2350_vm9, 1.0, %v11585_v12  ;;  %v2431_v14 = vmul.f32 %v9160_v58, %v2423_v53  ;;  %v9219_v49 = vpop.permute.xlu0 %2793 }
0x1112   : > { %v2522_v46 = vadd.f32 1.0, %v2514_v45  ;;  %v2446_v6 = vmul.f32 %v9140_v25, %v2438_v63  ;;  %6717 = vmatprep.subr.bf16.mxu1 %v3324_v44  ;;  %v3325_v2 = vpack.c.bf16 %v3313_v33, %v3312_v62  ;;  %v2515_v22 = vmul.f32 %v2507_v43, %v9069_v42  ;;  %11594 = vst [vmem:[#allocation72_spill] sm:$0xff] %v9219_v49 }
0x1113   : > { %v2505_v16 = vsub.f32 1.0, %v2497_v23  ;;  %v2444_v13 = vmul.f32 %v9150_v30, %v2436_v48  ;;  %v2356_v15 = vsel %vm2348_vm10, 1.0, %v11585_v12  ;;  %v2439_v37 = vadd.f32 -0.28449672, %v2431_v14  ;;  %v7358_v1 = vpop.eup %7357  ;;  %v9234_v53 = vpop.permute.xlu1 %2801 }
0x1114   : > { %v2454_v11 = vadd.f32 0.2548296, %v2446_v6  ;;  %v2477_v0 = vmul.f32 %v2469_v29, %v9123_v56  ;;  %v9215_v61 = vmul.f32 %v2522_v46, %v9001_v4  ;;  %v2512_v45 = vmul.f32 %v2504_v60, %v9041_v5  ;;  %11595 = vst [vmem:[#allocation73_spill] sm:$0xff] %v9234_v53 }
0x1115   : > { %v2523_v3 = vadd.f32 1.0, %v2515_v22  ;;  %v2513_v42 = vmul.f32 %v2505_v16, %v9074_v31  ;;  %6718 = vmatpush3.bf16.msra.mxu1 %v3324_v44  ;;  %v2452_v62 = vadd.f32 0.2548296, %v2444_v13  ;;  %v2359_v36 = vsel %vm2351_vm13, 1.0, %v11585_v12  ;;  %v9251_v22 = vpop.permute.xlu0 %2805 }
0x1116   : > { %v2462_v40 = vmul.f32 %v9140_v25, %v2454_v11  ;;  %v2447_v33 = vmul.f32 %v9160_v58, %v2439_v37  ;;  %6719 = vmatprep.subr.bf16.mxu1 %v3325_v2  ;;  %v9228_v5 = vmul.f32 0.5, %v9064_v17  ;;  %vm2349_vm14 = vcmp.ge.f32.partialorder %v9100_v28, 0.0  ;;  %v9231_v31 = vpop.eup %7359  ;;  %11596 = vst [vmem:[#allocation74_spill] sm:$0xff] %v9251_v22 }
0x1117   : > { %v9225_v4 = vmul.f32 %v2523_v3, %v9020_v38  ;;  %v2521_v56 = vadd.f32 1.0, %v2513_v42  ;;  %v2460_v25 = vmul.f32 %v9150_v30, %v2452_v62  ;;  %v2490_v63 = vmul.f32 1.442695, %v2477_v0 }
0x1118   : > { %v2502_v44 = vmul.f32 %v7354_v35, %v2462_v40  ;;  %v2455_v60 = vadd.f32 0.2548296, %v2447_v33  ;;  %v2520_v29 = vadd.f32 1.0, %v2512_v45  ;;  %v2554_v17 = vrot.slane %v9215_v61, 7  ;;  %v9274_v45 = vpop.permute.xlu1 %2853 }
0x1119   : > { %v11453_v46 = vrot.slane %v9225_v4, 1  ;;  %v9238_v38 = vmul.f32 %v2521_v56, %v9044_v18  ;;  %6720 = vmatpush3.bf16.msra.mxu1 %v3325_v2  ;;  %v2500_v23 = vmul.f32 %v7356_v34, %v2460_v25  ;;  %v2555_v35 = vrot.slane %v9225_v4, 7  ;;  %11598 = vst [vmem:[#allocation76_spill] sm:$0xff] %v9274_v45 }
0x111a   : > { %v2510_v43 = vsub.f32 1.0, %v2502_v44  ;;  %v2463_v48 = vmul.f32 %v9160_v58, %v2455_v60  ;;  %v11452_v30 = vrot.slane %v9215_v61, 1  ;;  %v9248_v14 = vsel %vm2349_vm14, 1.0, %v11585_v12 }
0x111b   : > { %v11451_v6 = vrot.slane %v9238_v38, 7  ;;  %v2397_v18 = vmul.f32 1.0614054, %v9231_v31  ;;  %v2508_v16 = vsub.f32 1.0, %v2500_v23  ;;  %v2567_v58 = vsel %vm2562_vm11, %v2554_v17, %v2555_v35 }
0x111c   : > { %v2518_v2 = vmul.f32 %v2510_v43, %v2358_v57  ;;  %v2503_v34 = vmul.f32 %v7358_v1, %v2463_v48  ;;  %v9256_v13 = vmul.f32 %v2520_v29, %v9003_v39  ;;  %v9270_v57 = vsel %vm2707_vm12, %v11452_v30, %v11453_v46  ;;  %v9295_v29 = vpop.permute.xlu0 %2841  ;;  %v11606_v46 = vld [vmem:[#allocation59_spill] sm:$0xff] }
0x111d   : > { %v9262_v28 = vsel %vm2562_vm11, %v11451_v6, %v2554_v17  ;;  %11597 = vst [vmem:[#allocation75_spill] sm:$0xff] %v9270_v57  ;;  %7361 = vpow2.f32 %v2490_v63  ;;  %v2516_v37 = vmul.f32 %v2508_v16, %v2356_v15  ;;  %v2547_v3 = vmul.f32 %v8972_v26, %v9225_v4  ;;  %11601 = vst [vmem:[#allocation79_spill] sm:$0xff] %v9295_v29 }
0x111e   : > { %v2526_v11 = vadd.f32 1.0, %v2518_v2  ;;  %v2511_v0 = vsub.f32 1.0, %v2503_v34  ;;  %v2614_v39 = vmul.f32 %v8874_v20, %v9262_v28  ;;  %v2615_v42 = vmul.f32 %v8922_v41, %v2567_v58 }
0x111f   : > { %v2674_v1 = vmul.f32 %v8882_v54, %v9215_v61  ;;  %v2405_v40 = vadd.f32 -1.4531521, %v2397_v18  ;;  %v2524_v62 = vadd.f32 1.0, %v2516_v37  ;;  %v2751_v15 = vmul.f32 %v8888_v47, %v9270_v57 }
0x1120   : > { %v2519_v33 = vmul.f32 %v2511_v0, %v2359_v36  ;;  %v2626_v56 = vmul.f32 %v8990_v59, %v2614_v39  ;;  %v9286_v44 = vmul.f32 %v8910_v9, %v9215_v61  ;;  %v9290_v25 = vmul.f32 %v8878_v52, %v9256_v13  ;;  %v9315_v0 = vpop.permute.xlu1 %2861 }
0x1121   : > { %v2990_v60 = vmul.f32 %v8906_v8, %v9225_v4  ;;  %v2811_v63 = vmul.f32 %v9189_v10, %v2567_v58  ;;  %v9298_v36 = vmul.f32 %v2526_v11, %v9088_v32  ;;  %v9301_v17 = vmul.f32 %v2524_v62, %v9120_v50  ;;  %v11602_v50 = vld [vmem:[#allocation54_spill] sm:$0xff]  ;;  %v11619_v8 = vld [vmem:[#allocation57_spill] sm:$0xff] }
0x1122   : > { %11599 = vst [vmem:[#allocation77_spill] sm:$0xff] %v9286_v44  ;;  %11600 = vst [vmem:[#allocation78_spill] sm:$0xff] %v9290_v25  ;;  %v2527_v43 = vadd.f32 1.0, %v2519_v33  ;;  %v2634_v23 = vadd.f32 %v2626_v56, %v2547_v3  ;;  %v2627_v48 = vmul.f32 %v8990_v59, %v2615_v42  ;;  %v2686_v18 = vmul.f32 %v8981_v19, %v2674_v1  ;;  %v11604_v3 = vld [vmem:[#allocation56_spill] sm:$0xff]  ;;  %v11605_v1 = vld [vmem:[#allocation34_spill] sm:$0xff] }
0x1123   : > { %v2810_v2 = vmul.f32 %v8892_v55, %v9262_v28  ;;  %v2413_v16 = vmul.f32 %v9231_v31, %v2405_v40  ;;  %v11454_v34 = vrot.slane %v9301_v17, 1  ;;  %v2548_v32 = vmul.f32 %v8972_v26, %v9301_v17  ;;  %11603 = vst [vmem:[#allocation54_spill] sm:$0xff] %v9315_v0  ;;  %v11609_v40 = vld [vmem:[#allocation52_spill] sm:$0xff]  ;;  %v11654_v25 = vld [vmem:[#allocation45_spill] sm:$0xff] }
0x1124   : > { %v9310_v37 = vmul.f32 %v2527_v43, %v9137_v7  ;;  %v2763_v11 = vmul.f32 %v11602_v50, %v2751_v15  ;;  %v2694_v39 = vadd.f32 %v2686_v18, %v2634_v23  ;;  %v2823_v42 = vmul.f32 %v11604_v3, %v2811_v63 }
0x1125   : > { %v2870_v62 = vmul.f32 %v11605_v1, %v9270_v57  ;;  %v2421_v33 = vadd.f32 1.4214138, %v2413_v16  ;;  %v2635_v7 = vadd.f32 %v2627_v48, %v2548_v32  ;;  %v11460_v43 = vrot.slane %v9301_v17, 7  ;;  %v9332_v16 = vpop.permute.xlu0 %2857  ;;  %v11634_v57 = vld [vmem:[#allocation29_spill] sm:$0xff] }
0x1126   : > { %v11457_v56 = vrot.slane %v9310_v37, 1  ;;  %v2771_v30 = vadd.f32 %v2763_v11, %v2694_v39  ;;  %v2675_v23 = vmul.f32 %v11606_v46, %v9225_v4  ;;  %v11607_v63 = vrot.slane %v9225_v4, 1  ;;  %11608 = vst [vmem:[#allocation56_spill] sm:$0xff] %v9332_v16  ;;  %v11613_v39 = vld [vmem:[#allocation65_spill] sm:$0xff] }
0x1127   : > { %v7362_v6 = vpop.eup %7361  ;;  %v2429_v15 = vmul.f32 %v9231_v31, %v2421_v33  ;;  %v9335_v48 = vmul.f32 %v11609_v40, %v2990_v60  ;;  %v11611_v32 = vrot.slane %v9298_v36, 1  ;;  %v2566_v4 = vsel %vm2562_vm11, %v2555_v35, %v11460_v43  ;;  %v11615_v60 = vld [vmem:[#allocation38_spill] sm:$0xff]  ;;  %v9364_v43 = vpop.permute.xlu1 %2865 }
0x1128   : > { %v2711_v18 = vsel %vm2707_vm12, %v11607_v63, %v11454_v34  ;;  %v11614_v63 = vld [vmem:[#allocation26_spill] sm:$0xff]  ;;  %v9356_v1 = vmul.f32 %v11615_v60, %v9238_v38  ;;  %v9358_v47 = vadd.f32 %v2823_v42, %v2771_v30  ;;  %v2687_v10 = vmul.f32 %v8981_v19, %v2675_v23  ;;  %11618 = vst [vmem:[#allocation82_spill] sm:$0xff] %v9364_v43  ;;  %v11620_v30 = vld [vmem:[#allocation36_spill] sm:$0xff] }
0x1129   : > { %11610 = vst [vmem:[#allocation52_spill] sm:$0xff] %v9335_v48  ;;  %v9343_v11 = vsel %vm2707_vm12, %v11611_v32, %v11457_v56  ;;  %v2752_v33 = vmul.f32 %v11613_v39, %v2711_v18  ;;  %v9352_v34 = vmul.f32 %v11614_v63, %v9238_v38  ;;  %v2437_v55 = vadd.f32 -0.28449672, %v2429_v15  ;;  %v11617_v32 = vld [vmem:[#allocation37_spill] sm:$0xff]  ;;  %v11622_v15 = vld [vmem:[#allocation60_spill] sm:$0xff] }
0x112a   : > { %11612 = vst [vmem:[#allocation80_spill] sm:$0xff] %v9343_v11  ;;  %11616 = vst [vmem:[#allocation81_spill] sm:$0xff] %v9356_v1  ;;  %v2930_v56 = vmul.f32 %v11617_v32, %v2567_v58  ;;  %v2812_v35 = vmul.f32 %v9219_v49, %v2566_v4  ;;  %v9367_v39 = vmul.f32 %v11604_v3, %v2810_v2  ;;  %v11623_v49 = vld [vmem:[#allocation53_spill] sm:$0xff]  ;;  %v11469_v63 = vrot.slane %v9298_v36, 7 }
0x112b   : > { %v2764_v41 = vmul.f32 %v11602_v50, %v2752_v33  ;;  %v9370_v20 = vmul.f32 %v11619_v8, %v2870_v62  ;;  %v9374_v42 = vmul.f32 %v11620_v30, %v9262_v28  ;;  %v2445_v58 = vmul.f32 %v9231_v31, %v2437_v55  ;;  %v9385_v28 = vpop.permute.xlu0 %2897  ;;  %v11625_v30 = vld [vmem:[#allocation58_spill] sm:$0xff]  ;;  %v9421_v54 = vpop.permute.xlu1 %2917 }
0x112c   : > { %v2676_v23 = vmul.f32 %v11622_v15, %v9301_v17  ;;  %v2755_v33 = vmul.f32 %v9180_v24, %v9343_v11  ;;  %v2616_v60 = vmul.f32 %v11623_v49, %v2566_v4  ;;  %v2695_v32 = vadd.f32 %v2687_v10, %v2635_v7  ;;  %11624 = vst [vmem:[#allocation83_spill] sm:$0xff] %v9385_v28  ;;  %v11626_v10 = vld [vmem:[#allocation24_spill] sm:$0xff] }
0x112d   : > { %11621 = vst [vmem:[#allocation57_spill] sm:$0xff] %v9374_v42  ;;  %v2453_v2 = vadd.f32 0.2548296, %v2445_v58  ;;  %v11468_v62 = vrot.slane %v9310_v37, 7  ;;  %v9388_v55 = vmul.f32 %v11625_v30, %v2930_v56  ;;  %v9392_v15 = vmul.f32 %v8972_v26, %v9298_v36  ;;  %11631 = vst [vmem:[#allocation58_spill] sm:$0xff] %v9421_v54 }
0x112e   : > { %v2772_v24 = vadd.f32 %v2764_v41, %v2695_v32  ;;  %v2824_v49 = vmul.f32 %v11604_v3, %v2812_v35  ;;  %v2671_v7 = vmul.f32 %v11626_v10, %v9310_v37  ;;  %v11627_v46 = vrot.slane %v9215_v61, 1  ;;  %v11630_v10 = vld [vmem:[#allocation47_spill] sm:$0xff] }
0x112f   : > { %v2461_v58 = vmul.f32 %v9231_v31, %v2453_v2  ;;  %v2563_v56 = vsel %vm2562_vm11, %v11469_v63, %v11468_v62  ;;  %v11628_v9 = vrot.slane %v9238_v38, 1  ;;  %v9413_v32 = vmul.f32 %v11602_v50, %v2755_v33  ;;  %v11629_v31 = vld [vmem:[#allocation44_spill] sm:$0xff]  ;;  %v9439_v44 = vpop.permute.xlu0 %2909 }
0x1130   : > { %v9415_v35 = vadd.f32 %v2824_v49, %v2772_v24  ;;  %v9418_v2 = vmul.f32 %v11629_v31, %v2711_v18  ;;  %v2611_v52 = vmul.f32 %v11630_v10, %v2563_v56  ;;  %v2628_v63 = vmul.f32 %v8990_v59, %v2616_v60  ;;  %11633 = vst [vmem:[#allocation84_spill] sm:$0xff] %v9439_v44 }
0x1131   : > { %v9410_v41 = vsel %vm2707_vm12, %v11628_v9, %v11627_v46  ;;  %v2501_v62 = vmul.f32 %v7362_v6, %v2461_v58  ;;  %v9426_v12 = vmul.f32 %v8972_v26, %v9310_v37  ;;  %v11632_v9 = vld [vmem:[#allocation62_spill] sm:$0xff]  ;;  %v2544_v24 = vmul.f32 %v8972_v26, %v9256_v13 }
0x1132   : > { %v2678_v46 = vmul.f32 %v11632_v9, %v9298_v36  ;;  %v2623_v49 = vmul.f32 %v8990_v59, %v2611_v52  ;;  %v2874_v33 = vmul.f32 %v9315_v0, %v9343_v11  ;;  %v11475_v10 = vrot.slane %v9256_v13, 1 }
0x1133   : > { %v2509_v6 = vsub.f32 1.0, %v2501_v62  ;;  %v2815_v60 = vmul.f32 %v9251_v22, %v2563_v56  ;;  %v2688_v58 = vmul.f32 %v8981_v19, %v2676_v23  ;;  %v2683_v31 = vmul.f32 %v8981_v19, %v2671_v7  ;;  %v11638_v22 = vld [vmem:[#allocation35_spill] sm:$0xff] }
0x1134   : > { %v2631_v9 = vadd.f32 %v2623_v49, %v2544_v24  ;;  %v2750_v42 = vmul.f32 %v11634_v57, %v9410_v41  ;;  %v11635_v52 = vrot.slane %v9310_v37, 1  ;;  %v11477_v62 = vrot.slane %v9256_v13, 7  ;;  %v11637_v24 = vld [vmem:[#allocation28_spill] sm:$0xff] }
0x1135   : > { %v2517_v23 = vmul.f32 %v2509_v6, %v9248_v14  ;;  %v9454_v7 = vmul.f32 %v8981_v19, %v2678_v46  ;;  %v2871_v57 = vmul.f32 %v11638_v22, %v2711_v18  ;;  %v11639_v28 = vrot.slane %v9238_v38, 7  ;;  %v9470_v46 = vpop.permute.xlu1 %2921  ;;  %v11642_v18 = vld [vmem:[#allocation22_spill] sm:$0xff] }
0x1136   : > { %v9449_v0 = vsel %vm2707_vm12, %v11635_v52, %v11475_v10  ;;  %v2691_v1 = vadd.f32 %v2683_v31, %v2631_v9  ;;  %v2931_v14 = vmul.f32 %v9439_v44, %v2566_v4  ;;  %11641 = vst [vmem:[#allocation87_spill] sm:$0xff] %v9470_v46  ;;  %v11643_v9 = vld [vmem:[#allocation40_spill] sm:$0xff]  ;;  %v2762_v22 = vmul.f32 %v11602_v50, %v2750_v42 }
0x1137   : > { %11636 = vst [vmem:[#allocation85_spill] sm:$0xff] %v9449_v0  ;;  %v2748_v49 = vmul.f32 %v11637_v24, %v9449_v0  ;;  %v2875_v48 = vmul.f32 %v9364_v43, %v9449_v0  ;;  %v9467_v52 = vsel %vm2562_vm11, %v11477_v62, %v11639_v28  ;;  %v2525_v6 = vadd.f32 1.0, %v2517_v23 }
0x1138   : > { %11640 = vst [vmem:[#allocation86_spill] sm:$0xff] %v9467_v52  ;;  %v2613_v31 = vmul.f32 %v11642_v18, %v9467_v52  ;;  %v2991_v43 = vmul.f32 %v11643_v9, %v9301_v17  ;;  %v9478_v24 = vmul.f32 %v11604_v3, %v2815_v60  ;;  %v9482_v28 = vmul.f32 %v11619_v8, %v2874_v33  ;;  %v9491_v9 = vpop.permute.xlu0 %2913 }
0x1139   : > { %v2760_v10 = vmul.f32 %v11602_v50, %v2748_v49  ;;  %v2883_v4 = vmul.f32 %v11619_v8, %v2871_v57  ;;  %v2533_v23 = vmul.f32 %v2525_v6, %v9228_v5  ;;  %v2546_v49 = vmul.f32 %v8972_v26, %v9215_v61  ;;  %11645 = vst [vmem:[#allocation89_spill] sm:$0xff] %v9491_v9  ;;  %v11646_v6 = vld [vmem:[#allocation63_spill] sm:$0xff]  ;;  %v9506_v52 = vpop.permute.xlu1 %2973 }
0x113a   : > { %v2625_v44 = vmul.f32 %v8990_v59, %v2613_v31  ;;  %v9494_v60 = vmul.f32 %v11619_v8, %v2875_v48  ;;  %v2685_v42 = vmul.f32 %v8981_v19, %v9352_v34  ;;  %v2943_v57 = vmul.f32 %v11625_v30, %v2931_v14  ;;  %11647 = vst [vmem:[#allocation90_spill] sm:$0xff] %v9506_v52 }
0x113b   : > { %v9486_v62 = vadd.f32 %v2760_v10, %v2691_v1  ;;  %v2891_v33 = vadd.f32 %v2883_v4, %v9358_v47  ;;  %v2557_v5 = vrot.slane %v2533_v23, 7  ;;  %v2549_v1 = vmul.f32 %v8972_v26, %v2533_v23 }
0x113c   : > { %v2704_v10 = vrot.slane %v2533_v23, 1  ;;  %v3003_v61 = vmul.f32 %v11609_v40, %v2991_v43  ;;  %v2677_v31 = vmul.f32 %v11646_v6, %v2533_v23  ;;  %v2633_v18 = vadd.f32 %v2625_v44, %v2546_v49 }
0x113d   : > { %11644 = vst [vmem:[#allocation88_spill] sm:$0xff] %v9486_v62  ;;  %v2951_v0 = vadd.f32 %v2943_v57, %v2891_v33  ;;  %v9504_v48 = vmul.f32 %v9470_v46, %v2563_v56  ;;  %v11648_v34 = vrot.slane %v9301_v17, 7  ;;  %v2636_v14 = vadd.f32 %v2628_v63, %v2549_v1  ;;  %v11651_v56 = vld [vmem:[#allocation49_spill] sm:$0xff]  ;;  %v11652_v57 = vld [vmem:[#allocation55_spill] sm:$0xff]  ;;  %v11653_v1 = vld [vmem:[#allocation66_spill] sm:$0xff] }
0x113e   : > { %v11649_v4 = vrot.slane %v9298_v36, 7  ;;  %v11650_v6 = vrot.slane %v9301_v17, 1  ;;  %v2992_v11 = vmul.f32 %v9506_v52, %v2533_v23  ;;  %v9528_v17 = vpop.permute.xlu0 %2925  ;;  %v11656_v52 = vld [vmem:[#allocation61_spill] sm:$0xff] }
0x113f   : > { %v2565_v47 = vsel %vm2562_vm11, %v11648_v34, %v2557_v5  ;;  %11655 = vst [vmem:[#allocation91_spill] sm:$0xff] %v9528_v17 }
0x1140   : > { %v2564_v43 = vsel %vm2562_vm11, %v2557_v5, %v11649_v4  ;;  %v2710_v44 = vsel %vm2707_vm12, %v11650_v6, %v2704_v10  ;;  %v2617_v49 = vmul.f32 %v11651_v56, %v2565_v47  ;;  %v2813_v33 = vmul.f32 %v9205_v51, %v2565_v47 }
0x1141   : > { %v2618_v46 = vmul.f32 %v11652_v57, %v2564_v43  ;;  %v2814_v63 = vmul.f32 %v9234_v53, %v2564_v43  ;;  %v2753_v34 = vmul.f32 %v11653_v1, %v2710_v44  ;;  %v3051_v62 = vmul.f32 %v11654_v25, %v2710_v44 }
0x1142   : > { %v2872_v5 = vmul.f32 %v9274_v45, %v2710_v44  ;;  %v2629_v6 = vmul.f32 %v8990_v59, %v2617_v49  ;;  %v2825_v4 = vmul.f32 %v11604_v3, %v2813_v33  ;;  %v2689_v57 = vmul.f32 %v8981_v19, %v2677_v31  ;;  %v9545_v33 = vpop.permute.xlu1 %2981 }
0x1143   : > { %v2630_v51 = vmul.f32 %v8990_v59, %v2618_v46  ;;  %v2765_v23 = vmul.f32 %v11602_v50, %v2753_v34  ;;  %v3063_v53 = vmul.f32 %v11656_v52, %v3051_v62  ;;  %v2696_v56 = vadd.f32 %v2688_v58, %v2636_v14  ;;  %11658 = vst [vmem:[#allocation61_spill] sm:$0xff] %v9545_v33  ;;  %v11659_v62 = vld [vmem:[#allocation67_spill] sm:$0xff] }
0x1144   : > { %v2884_v1 = vmul.f32 %v11619_v8, %v2872_v5  ;;  %v2637_v25 = vadd.f32 %v2629_v6, %v9392_v15  ;;  %v11657_v45 = vrot.slane %v9298_v36, 1  ;;  %v2693_v46 = vadd.f32 %v2685_v42, %v2633_v18 }
0x1145   : > { %v2638_v44 = vadd.f32 %v2630_v51, %v9426_v12  ;;  %v2773_v5 = vadd.f32 %v2765_v23, %v2696_v56  ;;  %v2933_v14 = vmul.f32 %v9421_v54, %v2564_v43 }
0x1146   : > { %v9543_v49 = vsel %vm2707_vm12, %v2704_v10, %v11657_v45  ;;  %v2892_v31 = vadd.f32 %v2884_v1, %v9415_v35  ;;  %v2697_v51 = vadd.f32 %v2689_v57, %v2637_v25  ;;  %v2770_v58 = vadd.f32 %v2762_v22, %v2693_v46  ;;  %v9556_v35 = vpop.permute.xlu0 %2977  ;;  %v9564_v22 = vld [vmem:[%s11383_s10] ss:$0 sm:$0xff] }
0x1147   : > { %v2754_v34 = vmul.f32 %v11659_v62, %v9543_v49  ;;  %v2873_v15 = vmul.f32 %v9332_v16, %v9543_v49  ;;  %v2698_v12 = vadd.f32 %v9454_v7, %v2638_v44  ;;  %v2833_v18 = vadd.f32 %v2825_v4, %v2773_v5  ;;  %11660 = vst [vmem:[#allocation92_spill] sm:$0xff] %v9556_v35  ;;  %v9572_v4 = vpop.permute.xlu1 %2985  ;;  %v11664_v5 = vld [vmem:[#allocation21_spill] sm:$0xff] }
0x1148   : > { %v3011_v10 = vadd.f32 %v3003_v61, %v2951_v0  ;;  %v2826_v1 = vmul.f32 %v11604_v3, %v2814_v63  ;;  %v2830_v6 = vadd.f32 %v9367_v39, %v2770_v58  ;;  %v2932_v25 = vmul.f32 %v9491_v9, %v2565_v47  ;;  %11661 = vst [vmem:[#allocation93_spill] sm:$0xff] %v9572_v4 }
0x1149   : > { %v2766_v45 = vmul.f32 %v11602_v50, %v2754_v34  ;;  %v2885_v42 = vmul.f32 %v11619_v8, %v2873_v15  ;;  %v2775_v56 = vadd.f32 %v9413_v32, %v2698_v12  ;;  %v2945_v57 = vmul.f32 %v11625_v30, %v2933_v14 }
0x114a   : > { %v3071_v0 = vadd.f32 %v3063_v53, %v3011_v10  ;;  %v2890_v63 = vadd.f32 %v9370_v20, %v2830_v6  ;;  %v2944_v32 = vmul.f32 %v11625_v30, %v2932_v25  ;;  %v3004_v39 = vmul.f32 %v11609_v40, %v2992_v11  ;;  %v11667_v25 = vld [vmem:[#allocation43_spill] sm:$0xff] }
0x114b   : > { %v2774_v7 = vadd.f32 %v2766_v45, %v2697_v51  ;;  %v2893_v43 = vadd.f32 %v2885_v42, %v2833_v18  ;;  %v2835_v61 = vadd.f32 %v9478_v24, %v2775_v56  ;;  %v11662_v46 = vrot.slane %v9256_v13, 7  ;;  %v9594_v45 = vpop.permute.xlu0 %3033  ;;  %v9600_v42 = vpop.permute.xlu1 %3037 }
0x114c   : > { %v9575_v44 = vadd.f32 %v9564_v22, %v3071_v0  ;;  %v11663_v34 = vrot.slane %v9310_v37, 7  ;;  %v9585_v24 = vadd.f32 %v9388_v55, %v2890_v63  ;;  %v2952_v11 = vadd.f32 %v2944_v32, %v2892_v31  ;;  %11665 = vst [vmem:[#allocation94_spill] sm:$0xff] %v9594_v45  ;;  %11666 = vst [vmem:[#allocation95_spill] sm:$0xff] %v9600_v42 }
0x114d   : > { %v2953_v23 = vadd.f32 %v2945_v57, %v2893_v43  ;;  %v2834_v47 = vadd.f32 %v2826_v1, %v2774_v7  ;;  %v2895_v20 = vadd.f32 %v9494_v60, %v2835_v61  ;;  %v2946_v51 = vmul.f32 %v11625_v30, %v9504_v48  ;;  %v11668_v43 = vld [vmem:[#allocation88_spill] sm:$0xff] }
0x114e   : > { %v2570_v53 = vsel %vm2562_vm11, %v11663_v34, %v11662_v46  ;;  %v2545_v58 = vmul.f32 %v8972_v26, %v9238_v38  ;;  %v3012_v18 = vadd.f32 %v3004_v39, %v2952_v11  ;;  %v2994_v31 = vmul.f32 %v9545_v33, %v9310_v37  ;;  %v11670_v46 = vld [vmem:[#allocation78_spill] sm:$0xff] }
0x114f   : > { %v2612_v15 = vmul.f32 %v11664_v5, %v2570_v53  ;;  %v2894_v12 = vadd.f32 %v9482_v28, %v2834_v47  ;;  %v2808_v14 = vmul.f32 %v9164_v27, %v2570_v53  ;;  %v2935_v55 = vmul.f32 %v9528_v17, %v2570_v53 }
0x1150   : > { %v2869_v28 = vmul.f32 %v9295_v29, %v9410_v41  ;;  %v9605_v48 = vmul.f32 0.70710677, %v9575_v44  ;;  %v2993_v6 = vmul.f32 %v9556_v35, %v9298_v36  ;;  %v3062_v37 = vmul.f32 %v11656_v52, %v9418_v2 }
0x1151   : > { %v2624_v60 = vmul.f32 %v8990_v59, %v2612_v15  ;;  %v2954_v26 = vadd.f32 %v2946_v51, %v2894_v12  ;;  %v2820_v10 = vmul.f32 %v11604_v3, %v2808_v14  ;;  %v2947_v56 = vmul.f32 %v11625_v30, %v2935_v55  ;;  %v11673_v12 = vld [vmem:[#allocation80_spill] sm:$0xff]  ;;  %v11675_v14 = vld [vmem:[#allocation86_spill] sm:$0xff] }
0x1152   : > { %v3006_v59 = vmul.f32 %v11609_v40, %v2994_v31  ;;  %v3048_v7 = vmul.f32 %v11667_v25, %v9410_v41  ;;  %v2995_v0 = vmul.f32 %v9572_v4, %v9256_v13  ;;  %v3005_v32 = vmul.f32 %v11609_v40, %v2993_v6  ;;  %v9627_v41 = vpop.permute.xlu0 %3045 }
0x1153   : > { %v2632_v1 = vadd.f32 %v2624_v60, %v2545_v58  ;;  %v2828_v57 = vadd.f32 %v2820_v10, %v11668_v43  ;;  %v2955_v61 = vadd.f32 %v2947_v56, %v2895_v20  ;;  %v3052_v39 = vmul.f32 %v9594_v45, %v9543_v49  ;;  %11669 = vst [vmem:[#allocation88_spill] sm:$0xff] %v9627_v41  ;;  %v9640_v58 = vpop.permute.xlu1 %3041  ;;  %v11676_v60 = vld [vmem:[#allocation31_spill] sm:$0xff] }
0x1154   : > { %v3014_v63 = vadd.f32 %v3006_v59, %v2954_v26  ;;  %v2881_v36 = vmul.f32 %v11619_v8, %v2869_v28  ;;  %v9624_v47 = vand.u32 2147483647, %v9605_v48  ;;  %v3007_v2 = vmul.f32 %v11609_v40, %v2995_v0  ;;  %11674 = vst [vmem:[#allocation78_spill] sm:$0xff] %v9640_v58 }
0x1155   : > { %v2684_v34 = vmul.f32 %v8981_v19, %v11670_v46  ;;  %v3013_v53 = vadd.f32 %v3005_v32, %v2953_v23  ;;  %v3064_v20 = vmul.f32 %v11656_v52, %v3052_v39  ;;  %v11671_v11 = vrot.slane %v9238_v38, 1  ;;  %v11677_v19 = vld [vmem:[#allocation83_spill] sm:$0xff]  ;;  %v11678_v38 = vld [vmem:[#allocation64_spill] sm:$0xff]  ;;  %v11680_v32 = vld [vmem:[#allocation85_spill] sm:$0xff] }
0x1156   : > { %v11672_v15 = vrot.slane %v9256_v13, 1  ;;  %v3053_v51 = vmul.f32 %v9600_v42, %v11673_v12  ;;  %v2809_v55 = vmul.f32 %v11676_v60, %v11675_v14  ;;  %v2928_v23 = vmul.f32 %v11677_v19, %v11675_v14  ;;  %v11679_v13 = vld [vmem:[#allocation33_spill] sm:$0xff]  ;;  %v11681_v14 = vld [vmem:[#allocation52_spill] sm:$0xff] }
0x1157   : > { %v3015_v31 = vadd.f32 %v3007_v2, %v2955_v61  ;;  %v2692_v28 = vadd.f32 %v2684_v34, %v2632_v1  ;;  %v3072_v26 = vadd.f32 %v3064_v20, %v3012_v18  ;;  %v3060_v6 = vmul.f32 %v11656_v52, %v3048_v7 }
0x1158   : > { %v2714_v49 = vsel %vm2707_vm12, %v11672_v15, %v11671_v11  ;;  %v3133_v43 = vmul.f32 0.3275911, %v9624_v47  ;;  %v3065_v0 = vmul.f32 %v11656_v52, %v3053_v51  ;;  %v3054_v39 = vmul.f32 %v9640_v58, %v11680_v32 }
0x1159   : > { %v2749_v10 = vmul.f32 %v11678_v38, %v2714_v49  ;;  %v2868_v56 = vmul.f32 %v11679_v13, %v2714_v49  ;;  %v3055_v59 = vmul.f32 %v9627_v41, %v2714_v49  ;;  %v9655_v46 = vadd.f32 %v9564_v22, %v3072_v26 }
0x115a   : > { %v2821_v2 = vmul.f32 %v11604_v3, %v2809_v55  ;;  %v2940_v7 = vmul.f32 %v11625_v30, %v2928_v23  ;;  %v3073_v34 = vadd.f32 %v3065_v0, %v3013_v53  ;;  %v3066_v20 = vmul.f32 %v11656_v52, %v3054_v39 }
0x115b   : > { %v2761_v18 = vmul.f32 %v11602_v50, %v2749_v10  ;;  %v2880_v1 = vmul.f32 %v11619_v8, %v2868_v56  ;;  %v3067_v61 = vmul.f32 %v11656_v52, %v3055_v59  ;;  %v9664_v11 = vmul.f32 0.70710677, %v9655_v46 }
0x115c   : > { %v3141_v51 = vadd.f32 1.0, %v3133_v43  ;;  %v9667_v50 = vadd.f32 %v9564_v22, %v3073_v34  ;;  %v3074_v8 = vadd.f32 %v3066_v20, %v3014_v63  ;;  %v3010_v26 = vadd.f32 %v11681_v14, %v9585_v24  ;;  %v11683_v43 = vld [vmem:[#allocation57_spill] sm:$0xff] }
0x115d   : > { %v2769_v15 = vadd.f32 %v2761_v18, %v2692_v28  ;;  %v2888_v49 = vadd.f32 %v2880_v1, %v2828_v57  ;;  %v3075_v12 = vadd.f32 %v3067_v61, %v3015_v31  ;;  %v3126_v3 = vand.u32 2147483647, %v9664_v11  ;;  %v11682_v31 = vld [vmem:[#allocation81_spill] sm:$0xff] }
0x115e   : > { %v9676_v10 = vmul.f32 0.70710677, %v9667_v50  ;;  %v9679_v57 = vadd.f32 %v9564_v22, %v3074_v8  ;;  %v3000_v28 = vmul.f32 %v11609_v40, %v11682_v31  ;;  %v3070_v63 = vadd.f32 %v3062_v37, %v3010_v26 }
0x115f   : > { %v2829_v55 = vadd.f32 %v2821_v2, %v2769_v15  ;;  %v2948_v53 = vadd.f32 %v2940_v7, %v2888_v49  ;;  %v9673_v23 = vadd.f32 %v9564_v22, %v3075_v12  ;;  %v3134_v56 = vmul.f32 0.3275911, %v3126_v3  ;;  %v11684_v2 = vld [vmem:[#allocation75_spill] sm:$0xff] }
0x1160   : > { %v2941_v0 = vmul.f32 %v11625_v30, %v11683_v43  ;;  %7363 = vrcp.f32 %v3141_v51  ;;  %v3127_v32 = vand.u32 2147483647, %v9676_v10  ;;  %v9690_v39 = vmul.f32 0.70710677, %v9679_v57  ;;  %v11686_v51 = vld [vmem:[#allocation77_spill] sm:$0xff] }
0x1161   : > { %v2889_v59 = vadd.f32 %v2881_v36, %v2829_v55  ;;  %v9684_v24 = vmul.f32 0.70710677, %v9673_v23  ;;  %v3008_v18 = vadd.f32 %v3000_v28, %v2948_v53  ;;  %v3229_v1 = vsub.f32 0.0, %v9624_v47  ;;  %v11685_v36 = vld [vmem:[#allocation42_spill] sm:$0xff] }
0x1162   : > { %v3049_v7 = vmul.f32 %v11685_v36, %v11684_v2  ;;  %v3230_v34 = vsub.f32 0.0, %v3126_v3  ;;  %v3135_v20 = vmul.f32 0.3275911, %v3127_v32  ;;  %v3128_v15 = vand.u32 2147483647, %v9690_v39 }
0x1163   : > { %v3129_v61 = vand.u32 2147483647, %v9684_v24  ;;  %v2949_v37 = vadd.f32 %v2941_v0, %v2889_v59  ;;  %v3068_v30 = vadd.f32 %v3060_v6, %v3008_v18  ;;  %v3142_v49 = vadd.f32 1.0, %v3134_v56 }
0x1164   : > { %v3001_v8 = vmul.f32 %v11609_v40, %v11686_v51  ;;  %v3143_v14 = vadd.f32 1.0, %v3135_v20  ;;  %v3231_v26 = vsub.f32 0.0, %v3127_v32  ;;  %v3136_v55 = vmul.f32 0.3275911, %v3128_v15 }
0x1165   : > { %v3137_v12 = vmul.f32 0.3275911, %v3129_v61  ;;  %v3084_v53 = vadd.f32 %v9564_v22, %v3070_v63  ;;  %v3061_v28 = vmul.f32 %v11656_v52, %v3049_v7  ;;  %v3237_v59 = vmul.f32 %v3229_v1, %v9624_v47 }
0x1166   : > { %v3009_v31 = vadd.f32 %v3001_v8, %v2949_v37  ;;  %v3238_v43 = vmul.f32 %v3230_v34, %v3126_v3  ;;  %7365 = vrcp.f32 %v3142_v49  ;;  %v3144_v2 = vadd.f32 1.0, %v3136_v55 }
0x1167   : > { %v3145_v0 = vadd.f32 1.0, %v3137_v12  ;;  %v9703_v56 = vadd.f32 %v9564_v22, %v3068_v30  ;;  %v3233_v18 = vsub.f32 0.0, %v3129_v61  ;;  %7367 = vrcp.f32 %v3143_v14 }
0x1168   : > { %v3069_v6 = vadd.f32 %v3061_v28, %v3009_v31  ;;  %v3239_v40 = vmul.f32 %v3231_v26, %v3127_v32  ;;  %v3100_v20 = vmul.f32 0.70710677, %v3084_v53  ;;  %v3248_v47 = vmul.f32 1.442695, %v3237_v59 }
0x1169   : > { %v9709_v63 = vmul.f32 0.70710677, %v9703_v56  ;;  %7369 = vrcp.f32 %v3145_v0  ;;  %v3250_v1 = vmul.f32 1.442695, %v3238_v43  ;;  %v3232_v37 = vsub.f32 0.0, %v3128_v15 }
0x116a   : > { %v9706_v51 = vadd.f32 %v9564_v22, %v3069_v6  ;;  %v9711_v52 = vpop.eup %7363  ;;  %v3124_v3 = vand.u32 2147483647, %v3100_v20  ;;  %7371 = vrcp.f32 %v3144_v2  ;;  %v3241_v34 = vmul.f32 %v3233_v18, %v3129_v61 }
0x116b   : > { %v3252_v32 = vmul.f32 1.442695, %v3239_v40  ;;  %v3122_v30 = vand.u32 2147483647, %v9709_v63  ;;  %v3157_v12 = vmul.f32 1.0614054, %v9711_v52  ;;  %7373 = vpow2.f32 %v3248_v47 }
0x116c   : > { %v9714_v7 = vmul.f32 0.70710677, %v9706_v51  ;;  %v3132_v22 = vmul.f32 0.3275911, %v3124_v3  ;;  %v3228_v8 = vsub.f32 0.0, %v3124_v3  ;;  %7375 = vpow2.f32 %v3250_v1 }
0x116d   : > { %v3130_v14 = vmul.f32 0.3275911, %v3122_v30  ;;  %v3226_v26 = vsub.f32 0.0, %v3122_v30  ;;  %v3240_v31 = vmul.f32 %v3232_v37, %v3128_v15  ;;  %v3165_v59 = vadd.f32 -1.4531521, %v3157_v12 }
0x116e   : > { %v3123_v49 = vand.u32 2147483647, %v9714_v7  ;;  %v3140_v55 = vadd.f32 1.0, %v3132_v22  ;;  %v3256_v43 = vmul.f32 1.442695, %v3241_v34  ;;  %v3236_v40 = vmul.f32 %v3228_v8, %v3124_v3 }
0x116f   : > { %v3138_v0 = vadd.f32 1.0, %v3130_v14  ;;  %v3173_v18 = vmul.f32 %v9711_v52, %v3165_v59  ;;  %v9725_v47 = vmul.f32 0.5, %v9575_v44  ;;  %vm3109_vm15 = vcmp.ge.f32.partialorder %v9605_v48, 0.0 }
0x1170   : > { %v3131_v28 = vmul.f32 0.3275911, %v3123_v49  ;;  %v3227_v61 = vsub.f32 0.0, %v3123_v49  ;;  %7377 = vrcp.f32 %v3140_v55  ;;  %v9719_v2 = vpop.eup %7365  ;;  %v3234_v15 = vmul.f32 %v3226_v26, %v3122_v30 }
0x1171   : > { %7379 = vpow2.f32 %v3252_v32  ;;  %v9722_v41 = vpop.eup %7367  ;;  %v3254_v1 = vmul.f32 1.442695, %v3240_v31  ;;  %vm3108_vm5 = vcmp.ge.f32.partialorder %v3100_v20, 0.0  ;;  %v3181_v37 = vadd.f32 1.4214138, %v3173_v18 }
0x1172   : > { %v3139_v6 = vadd.f32 1.0, %v3131_v28  ;;  %7381 = vrcp.f32 %v3138_v0  ;;  %v3235_v32 = vmul.f32 %v3227_v61, %v3123_v49  ;;  %v9730_v22 = vmul.f32 0.5, %v3084_v53 }
0x1173   : > { %v9728_v34 = vpop.eup %7369  ;;  %v3158_v3 = vmul.f32 1.0614054, %v9719_v2  ;;  %v11687_v44 = vmov -1.0   ;;  %v3189_v48 = vmul.f32 %v9711_v52, %v3181_v37  ;;  %v3246_v30 = vmul.f32 1.442695, %v3236_v40 }
0x1174   : > { %7383 = vrcp.f32 %v3139_v6  ;;  %v9733_v12 = vpop.eup %7371  ;;  %v9736_v8 = vsel %vm3109_vm15, 1.0, %v11687_v44  ;;  %v3159_v14 = vmul.f32 1.0614054, %v9722_v41  ;;  %v3242_v20 = vmul.f32 1.442695, %v3234_v15 }
0x1175   : > { %7385 = vpow2.f32 %v3256_v43  ;;  %v9741_v26 = vsel %vm3108_vm5, 1.0, %v11687_v44  ;;  %vm3110_vm6 = vcmp.ge.f32.partialorder %v9664_v11, 0.0  ;;  %v3166_v53 = vadd.f32 -1.4531521, %v3158_v3  ;;  %v7374_v59 = vpop.eup %7373 }
0x1176   : > { %v3197_v49 = vadd.f32 -0.28449672, %v3189_v48  ;;  %v9745_v55 = vmul.f32 0.5, %v9655_v46  ;;  %v9748_v31 = vmul.f32 0.5, %v9667_v50  ;;  %v3167_v28 = vadd.f32 -1.4531521, %v3159_v14  ;;  %v7376_v18 = vpop.eup %7375 }
0x1177   : > { %v3244_v43 = vmul.f32 1.442695, %v3235_v32  ;;  %v3174_v0 = vmul.f32 %v9719_v2, %v3166_v53  ;;  %v3160_v61 = vmul.f32 1.0614054, %v9733_v12  ;;  %v3161_v6 = vmul.f32 1.0614054, %v9728_v34 }
0x1178   : > { %v3205_v11 = vmul.f32 %v9711_v52, %v3197_v49  ;;  %vm3111_vm7 = vcmp.ge.f32.partialorder %v9676_v10, 0.0  ;;  %v9756_v46 = vsel %vm3110_vm6, 1.0, %v11687_v44  ;;  %v3175_v50 = vmul.f32 %v9722_v41, %v3167_v28 }
0x1179   : > { %7387 = vpow2.f32 %v3254_v1  ;;  %v3182_v15 = vadd.f32 1.4214138, %v3174_v0  ;;  %v3168_v37 = vadd.f32 -1.4531521, %v3160_v61  ;;  %v3169_v32 = vadd.f32 -1.4531521, %v3161_v6 }
0x117a   : > { %v9759_v40 = vpop.eup %7377  ;;  %7389 = vpow2.f32 %v3242_v20  ;;  %v3213_v14 = vadd.f32 0.2548296, %v3205_v11  ;;  %v3183_v53 = vadd.f32 1.4214138, %v3175_v50  ;;  %v9765_v10 = vsel %vm3111_vm7, 1.0, %v11687_v44 }
0x117b   : > { %v7380_v3 = vpop.eup %7379  ;;  %v3156_v48 = vmul.f32 1.0614054, %v9759_v40  ;;  %v3190_v58 = vmul.f32 %v9719_v2, %v3182_v15  ;;  %v3176_v28 = vmul.f32 %v9733_v12, %v3168_v37  ;;  %v3177_v1 = vmul.f32 %v9728_v34, %v3169_v32 }
0x117c   : > { %v9762_v49 = vpop.eup %7381  ;;  %v3221_v6 = vmul.f32 %v9711_v52, %v3213_v14  ;;  %v3191_v11 = vmul.f32 %v9722_v41, %v3183_v53  ;;  %7391 = vpow2.f32 %v3244_v43  ;;  %vm3112_vm8 = vcmp.ge.f32.partialorder %v9690_v39, 0.0 }
0x117d   : > { %v3154_v61 = vmul.f32 1.0614054, %v9762_v49  ;;  %v3164_v20 = vadd.f32 -1.4531521, %v3156_v48  ;;  %v3198_v42 = vadd.f32 -0.28449672, %v3190_v58  ;;  %7393 = vpow2.f32 %v3246_v30 }
0x117e   : > { %v9770_v0 = vpop.eup %7383  ;;  %v3184_v15 = vadd.f32 1.4214138, %v3176_v28  ;;  %v3199_v32 = vadd.f32 -0.28449672, %v3191_v11  ;;  %v3185_v48 = vadd.f32 1.4214138, %v3177_v1  ;;  %v3261_v16 = vmul.f32 %v7374_v59, %v3221_v6 }
0x117f   : > { %v9775_v50 = vpop.eup %7385  ;;  %v3155_v17 = vmul.f32 1.0614054, %v9770_v0  ;;  %v3162_v45 = vadd.f32 -1.4531521, %v3154_v61  ;;  %v3172_v37 = vmul.f32 %v9759_v40, %v3164_v20  ;;  %v3206_v9 = vmul.f32 %v9719_v2, %v3198_v42 }
0x1180   : > { %v3192_v52 = vmul.f32 %v9733_v12, %v3184_v15  ;;  %v3207_v62 = vmul.f32 %v9722_v41, %v3199_v32  ;;  %v3193_v28 = vmul.f32 %v9728_v34, %v3185_v48  ;;  %v3269_v15 = vsub.f32 1.0, %v3261_v16 }
0x1181   : > { %v3163_v54 = vadd.f32 -1.4531521, %v3155_v17  ;;  %v3170_v14 = vmul.f32 %v9762_v49, %v3162_v45  ;;  %v3180_v53 = vadd.f32 1.4214138, %v3172_v37  ;;  %v3214_v43 = vadd.f32 0.2548296, %v3206_v9 }
0x1182   : > { %v3200_v61 = vadd.f32 -0.28449672, %v3192_v52  ;;  %v3215_v20 = vadd.f32 0.2548296, %v3207_v62  ;;  %v3201_v11 = vadd.f32 -0.28449672, %v3193_v28 }
0x1183   : > { %v3171_v58 = vmul.f32 %v9770_v0, %v3163_v54  ;;  %v3178_v30 = vadd.f32 1.4214138, %v3170_v14  ;;  %v3188_v17 = vmul.f32 %v9759_v40, %v3180_v53  ;;  %v7388_v42 = vpop.eup %7387  ;;  %v3222_v45 = vmul.f32 %v9719_v2, %v3214_v43 }
0x1184   : > { %v3208_v59 = vmul.f32 %v9733_v12, %v3200_v61  ;;  %v7390_v6 = vpop.eup %7389  ;;  %v3223_v37 = vmul.f32 %v9722_v41, %v3215_v20  ;;  %vm3106_vm9 = vcmp.ge.f32.partialorder %v9709_v63, 0.0  ;;  %v3209_v48 = vmul.f32 %v9728_v34, %v3201_v11 }
0x1185   : > { %v3179_v1 = vadd.f32 1.4214138, %v3171_v58  ;;  %v3186_v54 = vmul.f32 %v9762_v49, %v3178_v30  ;;  %v3196_v9 = vadd.f32 -0.28449672, %v3188_v17  ;;  %v3262_v32 = vmul.f32 %v7376_v18, %v3222_v45 }
0x1186   : > { %v3216_v52 = vadd.f32 0.2548296, %v3208_v59  ;;  %v3263_v53 = vmul.f32 %v7380_v3, %v3223_v37  ;;  %vm3113_vm10 = vcmp.ge.f32.partialorder %v9684_v24, 0.0  ;;  %v7392_v58 = vpop.eup %7391  ;;  %vm3107_vm13 = vcmp.ge.f32.partialorder %v9714_v7, 0.0 }
0x1187   : > { %v3187_v62 = vmul.f32 %v9770_v0, %v3179_v1  ;;  %v3194_v14 = vadd.f32 -0.28449672, %v3186_v54  ;;  %v3204_v2 = vmul.f32 %v9759_v40, %v3196_v9  ;;  %v3270_v43 = vsub.f32 1.0, %v3262_v32  ;;  %v7394_v61 = vpop.eup %7393 }
0x1188   : > { %v3217_v41 = vadd.f32 0.2548296, %v3209_v48  ;;  %v3224_v28 = vmul.f32 %v9733_v12, %v3216_v52  ;;  %v3277_v17 = vmul.f32 %v3269_v15, %v9736_v8  ;;  %v3271_v20 = vsub.f32 1.0, %v3263_v53 }
0x1189   : > { %v3195_v16 = vadd.f32 -0.28449672, %v3187_v62  ;;  %v3202_v18 = vmul.f32 %v9762_v49, %v3194_v14  ;;  %v3212_v30 = vadd.f32 0.2548296, %v3204_v2  ;;  %v3278_v3 = vmul.f32 %v3270_v43, %v9756_v46 }
0x118a   : > { %v3225_v45 = vmul.f32 %v9728_v34, %v3217_v41  ;;  %v3264_v11 = vmul.f32 %v7388_v42, %v3224_v28  ;;  %v3279_v9 = vmul.f32 %v3271_v20, %v9765_v10  ;;  %v3120_v12 = vsel %vm3112_vm8, 1.0, %v11687_v44 }
0x118b   : > { %v3203_v1 = vmul.f32 %v9770_v0, %v3195_v16  ;;  %v3210_v59 = vadd.f32 0.2548296, %v3202_v18  ;;  %v3220_v54 = vmul.f32 %v9759_v40, %v3212_v30  ;;  %v3286_v62 = vadd.f32 1.0, %v3278_v3 }
0x118c   : > { %v3265_v8 = vmul.f32 %v9775_v50, %v3225_v45  ;;  %v3272_v15 = vsub.f32 1.0, %v3264_v11  ;;  %v3287_v48 = vadd.f32 1.0, %v3279_v9  ;;  %v3121_v34 = vsel %vm3113_vm10, 1.0, %v11687_v44  ;;  %v6241_v9 = vld [vmem:[#allocation7] ss:$0 sm:$0xff] }
0x118d   : > { %v3211_v37 = vadd.f32 0.2548296, %v3203_v1  ;;  %v3218_v32 = vmul.f32 %v9762_v49, %v3210_v59  ;;  %v3260_v46 = vmul.f32 %v7394_v61, %v3220_v54  ;;  %v3285_v10 = vadd.f32 1.0, %v3277_v17 }
0x118e   : > { %v3273_v42 = vsub.f32 1.0, %v3265_v8  ;;  %v3280_v52 = vmul.f32 %v3272_v15, %v3120_v12  ;;  %v3294_v2 = vmul.f32 %v3286_v62, %v9745_v55  ;;  %v3295_v50 = vmul.f32 %v3287_v48, %v9748_v31  ;;  %v11689_v8 = vld [vmem:[#allocation14_spill] sm:$0xff]  ;;  %v11690_v15 = vld [vmem:[#allocation16_spill] sm:$0xff]  ;;  %v11691_v48 = vld [vmem:[#allocation15_spill] sm:$0xff] }
0x118f   : > { %v3219_v40 = vmul.f32 %v9770_v0, %v3211_v37  ;;  %v3258_v39 = vmul.f32 %v7390_v6, %v3218_v32  ;;  %v3268_v14 = vsub.f32 1.0, %v3260_v46  ;;  %v3096_v49 = vmul.f32 0.5, %v9679_v57  ;;  %v11688_v37 = vld [vmem:[#allocation13_spill] sm:$0xff] }
0x1190   : > { %v3281_v16 = vmul.f32 %v3273_v42, %v3121_v34  ;;  %v3288_v43 = vadd.f32 1.0, %v3280_v52  ;;  %v3114_v24 = vsel %vm3106_vm9, 1.0, %v11687_v44  ;;  %v3316_v28 = vpack.c.bf16 %v3295_v50, %v3294_v2  ;;  %v11692_v50 = vld [vmem:[#allocation17_spill] sm:$0xff] }
0x1191   : > { %v3259_v53 = vmul.f32 %v7392_v58, %v3219_v40  ;;  %v3266_v41 = vsub.f32 1.0, %v3258_v39  ;;  %v3276_v0 = vmul.f32 %v3268_v14, %v9741_v26  ;;  %v3097_v6 = vmul.f32 0.5, %v9673_v23 }
0x1192   : > { %v3289_v18 = vadd.f32 1.0, %v3281_v16  ;;  %v3296_v55 = vmul.f32 %v3288_v43, %v3096_v49  ;;  %v3115_v31 = vsel %vm3107_vm13, 1.0, %v11687_v44  ;;  %v3293_v30 = vmul.f32 %v3285_v10, %v9725_v47 }
0x1193   : > { %v3267_v61 = vsub.f32 1.0, %v3259_v53  ;;  %v3274_v57 = vmul.f32 %v3266_v41, %v3114_v24  ;;  %v3284_v58 = vadd.f32 1.0, %v3276_v0  ;;  %v3090_v20 = vmul.f32 0.5, %v9703_v56  ;;  %v11693_v41 = vld [vmem:[#allocation20_spill] sm:$0xff] }
0x1194   : > { %v3297_v63 = vmul.f32 %v3289_v18, %v3097_v6  ;;  %v3091_v3 = vmul.f32 0.5, %v9706_v51  ;;  %v11695_v18 = vld [vmem:[#allocation18_spill] sm:$0xff] }
0x1195   : > { %v3275_v17 = vmul.f32 %v3267_v61, %v3115_v31  ;;  %v3282_v1 = vadd.f32 1.0, %v3274_v57  ;;  %v3292_v26 = vmul.f32 %v3284_v58, %v9730_v22  ;;  %v11694_v61 = vld [vmem:[#allocation19_spill] sm:$0xff] }
0x1196   : > { %v3317_v45 = vpack.c.bf16 %v3297_v63, %v3296_v55 }
0x1197   : > { %v3283_v23 = vadd.f32 1.0, %v3275_v17  ;;  %v3290_v11 = vmul.f32 %v3282_v1, %v3090_v20  ;;  %v3315_v59 = vpack.c.bf16 %v3293_v30, %v3292_v26 }
0x1199   : > { %v3291_v54 = vmul.f32 %v3283_v23, %v3091_v3 }
0x119b   : > { %v3314_v7 = vpack.c.bf16 %v3291_v54, %v3290_v11 }
0x119d   : > { %6721 = vmatprep.mubr.bf16.mxu1 %v3314_v7 }
0x119e   : > { %6722 = vmatmul.mubr.bf16.vlgmr.msra.gmra.mrb[48].mxu1 %v3315_v59 }
0x119f   : > { %6725 = vmatprep.mubr.bf16.mxu1 %v3316_v28 }
0x11a6   : > { %6726 = vmatmul.mubr.bf16.gmra.mrb[52].mxu1 %v3317_v45 }
0x1271   : > { %v6723_v47 = vpop.f32.mrb[48].mxu1 }
0x1272   : > { %v3360_v12 = vpop.f32.mrb[49].mxu1  ;;  %v3393_v22 = vadd.f32 %v6723_v47, %v11689_v8 }
0x1273   : > { %v3391_v56 = vadd.f32 %v3360_v12, %v11688_v37  ;;  %v6724_v62 = vpop.f32.mrb[50].mxu1 }
0x1274   : > { %v3394_v51 = vadd.f32 %v6724_v62, %v11690_v15  ;;  %v3363_v32 = vpop.f32.mrb[51].mxu1  ;;  %v9841_v52 = vadd.f32 %v6241_v9, %v3393_v22 }
0x1275   : > { %v9832_v46 = vadd.f32 %v6241_v9, %v3391_v56  ;;  %v3392_v34 = vadd.f32 %v3363_v32, %v11691_v48 }
0x1276   : > { %v9835_v40 = vadd.f32 %v6241_v9, %v3394_v51  ;;  %v3420_v24 = vsel %vm517_vm0, %v9841_v52, 0.0 }
0x1277   : > { %v9837_v10 = vadd.f32 %v6241_v9, %v3392_v34  ;;  %v3414_v42 = vsel %vm517_vm0, %v9832_v46, 0.0 }
0x1278   : > { %3415 = vadd.xlane.f32.xlu1 %v3414_v42  ;;  %v3423_v16 = vsel %vm517_vm0, %v9835_v40, 0.0 }
0x1279   : > { %v6727_v39 = vpop.f32.mrb[52].mxu1  ;;  %v3417_v14 = vsel %vm517_vm0, %v9837_v10, 0.0 }
0x127a   : > { %3418 = vadd.xlane.f32.xlu0 %v3417_v14  ;;  %v3376_v2 = vpop.f32.mrb[53].mxu1  ;;  %v3397_v0 = vadd.f32 %v6727_v39, %v11693_v41 }
0x127b   : > { %v3395_v53 = vadd.f32 %v3376_v2, %v11692_v50  ;;  %v6728_v49 = vpop.f32.mrb[54].mxu1 }
0x127c   : > { %3424 = vadd.xlane.f32.xlu1 %v3423_v16  ;;  %v3379_v43 = vpop.f32.mrb[55].mxu1  ;;  %v3398_v6 = vadd.f32 %v6728_v49, %v11694_v61  ;;  %v9857_v57 = vadd.f32 %v6241_v9, %v3397_v0 }
0x127d   : > { %v9851_v28 = vadd.f32 %v6241_v9, %v3395_v53  ;;  %v3396_v55 = vadd.f32 %v3379_v43, %v11695_v18 }
0x127e   : > { %3421 = vadd.xlane.f32.xlu0 %v3420_v24  ;;  %v9859_v58 = vadd.f32 %v6241_v9, %v3398_v6  ;;  %v3432_v63 = vsel %vm517_vm0, %v9857_v57, 0.0 }
0x127f   : > { %v9855_v31 = vadd.f32 %v6241_v9, %v3396_v55  ;;  %v3426_v30 = vsel %vm517_vm0, %v9851_v28, 0.0 }
0x1280   : > { %v3435_v20 = vsel %vm517_vm0, %v9859_v58, 0.0 }
0x1281   : > { %v3429_v17 = vsel %vm517_vm0, %v9855_v31, 0.0 }
0x1282   : > { %3427 = vadd.xlane.f32.xlu0 %v3426_v30  ;;  %3430 = vadd.xlane.f32.xlu1 %v3429_v17 }
0x1286   : > { %3433 = vadd.xlane.f32.xlu0 %v3432_v63  ;;  %3436 = vadd.xlane.f32.xlu1 %v3435_v20  ;;  %v6242_v63 = vld [vmem:[%s11375_s2 + $0x20] sm:$0xff]  ;;  %v6243_v20 = vld [vmem:[%s11375_s2 + $0x28] sm:$0xff] }
0x1305   : > { %v3416_v1 = vpop.xlane.xlu1 %3415 }
0x1306   : > { %v3438_v26 = vmul.f32 0.03125, %v3416_v1  ;;  %v6244_v1 = vld [vmem:[%s11375_s2 + $0x30] sm:$0xff] }
0x1307   : > { %v3419_v3 = vpop.xlane.xlu0 %3418 }
0x1308   : > { %v9870_v23 = vsub.f32 %v9832_v46, %v3438_v26  ;;  %v3439_v45 = vmul.f32 0.03125, %v3419_v3  ;;  %v3527_v26 = vpack.c.bf16 %v6243_v20, %v6242_v63  ;;  %v6245_v3 = vld [vmem:[%s11375_s2 + $0x38] sm:$0xff] }
0x1309   : > { %v3425_v11 = vpop.xlane.xlu1 %3424 }
0x130a   : > { %v9873_v59 = vsub.f32 %v9837_v10, %v3439_v45  ;;  %v3441_v54 = vmul.f32 0.03125, %v3425_v11  ;;  %v3454_v7 = vmul.f32 %v9870_v23, %v9870_v23  ;;  %v3528_v45 = vpack.c.bf16 %v6245_v3, %v6244_v1  ;;  %6729 = vmatprep.subr.bf16.mxu0 %v3527_v26 }
0x130b   : > { %v3422_v47 = vpop.xlane.xlu0 %3421  ;;  %6730 = vmatpush3.bf16.msra.mxu0 %v3527_v26 }
0x130c   : > { %v9878_v9 = vsub.f32 %v9835_v40, %v3441_v54  ;;  %v3440_v12 = vmul.f32 0.03125, %v3422_v47  ;;  %v3462_v37 = vsel %vm517_vm0, %v3454_v7, 0.0  ;;  %v3455_v56 = vmul.f32 %v9873_v59, %v9873_v59  ;;  %6731 = vmatprep.subr.bf16.mxu0 %v3528_v45 }
0x130d   : > { %3463 = vadd.xlane.f32.xlu0 %v3462_v37 }
0x130e   : > { %v9884_v62 = vsub.f32 %v9841_v52, %v3440_v12  ;;  %v3465_v8 = vsel %vm517_vm0, %v3455_v56, 0.0  ;;  %v3457_v22 = vmul.f32 %v9878_v9, %v9878_v9 }
0x130f   : > { %v3428_v15 = vpop.xlane.xlu0 %3427  ;;  %3466 = vadd.xlane.f32.xlu1 %v3465_v8  ;;  %v3431_v51 = vpop.xlane.xlu1 %3430  ;;  %6732 = vmatpush3.bf16.msra.mxu0 %v3528_v45 }
0x1310   : > { %v3442_v32 = vmul.f32 0.03125, %v3428_v15  ;;  %v3443_v48 = vmul.f32 0.03125, %v3431_v51  ;;  %v3456_v34 = vmul.f32 %v9884_v62, %v9884_v62  ;;  %v3471_v2 = vsel %vm517_vm0, %v3457_v22, 0.0 }
0x1312   : > { %v9892_v42 = vsub.f32 %v9851_v28, %v3442_v32  ;;  %v9895_v39 = vsub.f32 %v9855_v31, %v3443_v48  ;;  %v3468_v14 = vsel %vm517_vm0, %v3456_v34, 0.0 }
0x1313   : > { %v3434_v50 = vpop.xlane.xlu0 %3433  ;;  %3469 = vadd.xlane.f32.xlu0 %v3468_v14  ;;  %3472 = vadd.xlane.f32.xlu1 %v3471_v2  ;;  %v3437_v53 = vpop.xlane.xlu1 %3436 }
0x1314   : > { %v3444_v49 = vmul.f32 0.03125, %v3434_v50  ;;  %v3445_v16 = vmul.f32 0.03125, %v3437_v53  ;;  %v3458_v43 = vmul.f32 %v9892_v42, %v9892_v42  ;;  %v3459_v24 = vmul.f32 %v9895_v39, %v9895_v39 }
0x1316   : > { %v9904_v41 = vsub.f32 %v9857_v57, %v3444_v49  ;;  %v9907_v0 = vsub.f32 %v9859_v58, %v3445_v16  ;;  %v3474_v61 = vsel %vm517_vm0, %v3458_v43, 0.0  ;;  %v3477_v6 = vsel %vm517_vm0, %v3459_v24, 0.0 }
0x1317   : > { %3475 = vadd.xlane.f32.xlu0 %v3474_v61  ;;  %3478 = vadd.xlane.f32.xlu1 %v3477_v6 }
0x1318   : > { %v3460_v18 = vmul.f32 %v9904_v41, %v9904_v41  ;;  %v3461_v55 = vmul.f32 %v9907_v0, %v9907_v0 }
0x131a   : > { %v3480_v30 = vsel %vm517_vm0, %v3460_v18, 0.0  ;;  %v3483_v17 = vsel %vm517_vm0, %v3461_v55, 0.0 }
0x131b   : > { %3481 = vadd.xlane.f32.xlu0 %v3480_v30  ;;  %3484 = vadd.xlane.f32.xlu1 %v3483_v17 }
0x139a   : > { %v3464_v11 = vpop.xlane.xlu0 %3463 }
0x139b   : > { %v3486_v54 = vmul.f32 0.03125, %v3464_v11 }
0x139c   : > { %v3467_v7 = vpop.xlane.xlu1 %3466 }
0x139d   : > { %v3494_v47 = vadd.f32 1e-05, %v3486_v54  ;;  %v3487_v12 = vmul.f32 0.03125, %v3467_v7 }
0x139f   : > { %7395 = vrsqrt.f32 %v3494_v47  ;;  %v3495_v37 = vadd.f32 1e-05, %v3487_v12 }
0x13a0   : > { %v3470_v56 = vpop.xlane.xlu0 %3469  ;;  %v3473_v8 = vpop.xlane.xlu1 %3472 }
0x13a1   : > { %7397 = vrsqrt.f32 %v3495_v37  ;;  %v3488_v22 = vmul.f32 0.03125, %v3470_v56  ;;  %v3489_v15 = vmul.f32 0.03125, %v3473_v8 }
0x13a3   : > { %v3496_v51 = vadd.f32 1e-05, %v3488_v22  ;;  %v3497_v32 = vadd.f32 1e-05, %v3489_v15 }
0x13a4   : > { %v3476_v48 = vpop.xlane.xlu0 %3475  ;;  %v3479_v34 = vpop.xlane.xlu1 %3478 }
0x13a5   : > { %7399 = vrsqrt.f32 %v3496_v51  ;;  %v3490_v14 = vmul.f32 0.03125, %v3476_v48  ;;  %v3491_v2 = vmul.f32 0.03125, %v3479_v34 }
0x13a6   : > { %7401 = vrsqrt.f32 %v3497_v32 }
0x13a7   : > { %v3498_v50 = vadd.f32 1e-05, %v3490_v14  ;;  %v3499_v53 = vadd.f32 1e-05, %v3491_v2 }
0x13a8   : > { %v3482_v49 = vpop.xlane.xlu0 %3481  ;;  %v3485_v16 = vpop.xlane.xlu1 %3484 }
0x13a9   : > { %v7396_v43 = vpop.eup %7395  ;;  %7403 = vrsqrt.f32 %v3498_v50  ;;  %v3492_v24 = vmul.f32 0.03125, %v3482_v49  ;;  %v3493_v61 = vmul.f32 0.03125, %v3485_v16 }
0x13aa   : > { %7405 = vrsqrt.f32 %v3499_v53  ;;  %v3510_v30 = vmul.f32 %v7396_v43, %v9870_v23 }
0x13ab   : > { %v7398_v6 = vpop.eup %7397  ;;  %v3500_v18 = vadd.f32 1e-05, %v3492_v24  ;;  %v3501_v55 = vadd.f32 1e-05, %v3493_v61 }
0x13ac   : > { %v3511_v17 = vmul.f32 %v7398_v6, %v9873_v59 }
0x13ad   : > { %7407 = vrsqrt.f32 %v3500_v18 }
0x13ae   : > { %7409 = vrsqrt.f32 %v3501_v55  ;;  %v3523_v63 = vpack.c.bf16 %v3511_v17, %v3510_v30 }
0x13af   : > { %v7400_v20 = vpop.eup %7399 }
0x13b0   : > { %v7402_v1 = vpop.eup %7401  ;;  %v3512_v26 = vmul.f32 %v7400_v20, %v9884_v62  ;;  %6733 = vmatprep.mubr.msk.bf16.mxu0 %vm517_vm0, %v3523_v63 }
0x13b1   : > { %v3513_v3 = vmul.f32 %v7402_v1, %v9878_v9 }
0x13b3   : > { %v7404_v45 = vpop.eup %7403  ;;  %v3524_v11 = vpack.c.bf16 %v3513_v3, %v3512_v26 }
0x13b4   : > { %v7406_v54 = vpop.eup %7405  ;;  %v3514_v7 = vmul.f32 %v7404_v45, %v9892_v42  ;;  %v6247_v42 = vld [vmem:[%s11376_s3 + $0x1] ss:$0 sm:$0xff] }
0x13b5   : > { %6734 = vmatmul.mubr.msk.bf16.vlgmr.msra.gmra.mrb[40].mxu0 %vm517_vm0, %v3524_v11  ;;  %v3515_v23 = vmul.f32 %v7406_v54, %v9895_v39  ;;  %v6254_v11 = vld [vmem:[%s11377_s4 + $0x110] sm:$0xff]  ;;  %v6252_v54 = vld [vmem:[%s11377_s4 + $0x100] sm:$0xff] }
0x13b7   : > { %v7408_v59 = vpop.eup %7407  ;;  %v3525_v47 = vpack.c.bf16 %v3515_v23, %v3514_v7 }
0x13b8   : > { %v7410_v12 = vpop.eup %7409  ;;  %v3516_v37 = vmul.f32 %v7408_v59, %v9904_v41 }
0x13b9   : > { %6737 = vmatprep.mubr.msk.bf16.mxu0 %vm517_vm0, %v3525_v47  ;;  %v3517_v62 = vmul.f32 %v7410_v12, %v9907_v0  ;;  %v6255_v47 = vld [vmem:[%s11377_s4 + $0x118] sm:$0xff]  ;;  %v6253_v12 = vld [vmem:[%s11377_s4 + $0x108] sm:$0xff] }
0x13bb   : > { %v3526_v56 = vpack.c.bf16 %v3517_v62, %v3516_v37 }
0x13bd   : > { %6738 = vmatmul.mubr.msk.bf16.gmra.mrb[44].mxu0 %vm517_vm0, %v3526_v56 }
0x1488   : > { %v6735_v9 = vpop.f32.mrb[40].mxu0 }
0x1489   : > { %v3583_v8 = vpop.f32.mrb[41].mxu0  ;;  %v3592_v39 = vadd.f32 %v6735_v9, %v6247_v42 }
0x148a   : > { %v6736_v22 = vpop.f32.mrb[42].mxu0  ;;  %v3584_v32 = vadd.f32 %v6247_v42, %v3583_v8 }
0x148b   : > { %v3595_v15 = vadd.f32 %v6736_v22, %v6247_v42  ;;  %v3586_v51 = vpop.f32.mrb[43].mxu0 }
0x148c   : > { %v3587_v48 = vadd.f32 %v6247_v42, %v3586_v51 }
0x148d   : > { %v9944_v41 = vpack.c.bf16 %v3595_v15, %v3592_v39  ;;  %v6258_v39 = vld [vmem:[%s11377_s4 + $0x130] sm:$0xff] }
0x148e   : > { %v9946_v34 = vpack.c.bf16 %v3587_v48, %v3584_v32  ;;  %v6256_v32 = vld [vmem:[%s11377_s4 + $0x120] sm:$0xff] }
0x148f   : > { %3633 = vrot.lane.b32.xlu1 %v9944_v41, %s7767_s17 }
0x1490   : > { %3631 = vrot.lane.b32.xlu0 %v9946_v34, %s7767_s17  ;;  %v6739_v0 = vpop.f32.mrb[44].mxu0  ;;  %6749 = vmatprep.mubr.msk.bf16.mxu0 %vm741_vm1, %v9946_v34 }
0x1491   : > { %v3599_v14 = vpop.f32.mrb[45].mxu0  ;;  %v3608_v50 = vadd.f32 %v6739_v0, %v6247_v42  ;;  %v6259_v0 = vld [vmem:[%s11377_s4 + $0x138] sm:$0xff] }
0x1492   : > { %v6740_v2 = vpop.f32.mrb[46].mxu0  ;;  %v3600_v16 = vadd.f32 %v6247_v42, %v3599_v14 }
0x1493   : > { %v3611_v53 = vadd.f32 %v6740_v2, %v6247_v42  ;;  %v3602_v49 = vpop.f32.mrb[47].mxu0 }
0x1494   : > { %v3603_v43 = vadd.f32 %v6247_v42, %v3602_v49 }
0x1495   : > { %v9954_v24 = vpack.c.bf16 %v3611_v53, %v3608_v50  ;;  %v6257_v53 = vld [vmem:[%s11377_s4 + $0x128] sm:$0xff] }
0x1496   : > { %v9956_v61 = vpack.c.bf16 %v3603_v43, %v3600_v16 }
0x1497   : > { %3637 = vrot.lane.b32.xlu0 %v9954_v24, %s7767_s17 }
0x1498   : > { %3635 = vrot.lane.b32.xlu1 %v9956_v61, %s7767_s17 }
0x149b   : > { %3820 = vrot.lane.b32.xlu0 %v9946_v34, %s7768_s30 }
0x149c   : > { %3822 = vrot.lane.b32.xlu1 %v9944_v41, %s7768_s30 }
0x14a0   : > { %3824 = vrot.lane.b32.xlu1 %v9956_v61, %s7768_s30 }
0x1501   : > { %v3634_v55 = vpop.permute.xlu1 %3633 }
0x1502   : > { %v3632_v6 = vpop.permute.xlu0 %3631  ;;  %v3655_v63 = vsel %vm741_vm1, %v3634_v55, 0 }
0x1503   : > { %6933 = vmatprep.subr.msk.bf16.mxu0 %vm741_vm1, %v3632_v6  ;;  %v3652_v18 = vsel %vm741_vm1, %v3632_v6, 0 }
0x1504   : > { %6742 = vmatpush3.bf16.xpose.msra.mxu0 %v3652_v18 }
0x1505   : > { %6934 = vmatprep.subr.msk.bf16.mxu0 %vm741_vm1, %v3634_v55 }
0x1509   : > { %v3638_v30 = vpop.permute.xlu0 %3637 }
0x150a   : > { %v3636_v17 = vpop.permute.xlu1 %3635  ;;  %v3661_v45 = vsel %vm741_vm1, %v3638_v30, 0 }
0x150b   : > { %v3658_v3 = vsel %vm741_vm1, %v3636_v17, 0 }
0x150c   : > { %6744 = vmatpush3.bf16.xpose.msra.mxu0 %v3655_v63 }
0x150d   : > { %v3821_v20 = vpop.permute.xlu0 %3820  ;;  %6935 = vmatprep.subr.msk.bf16.mxu0 %vm741_vm1, %v3636_v17 }
0x150e   : > { %6757 = vmatprep.subr.bf16.mxu1 %v3821_v20  ;;  %v3823_v1 = vpop.permute.xlu1 %3822 }
0x150f   : > { %6758 = vmatpush3.bf16.msra.mxu1 %v3821_v20 }
0x1510   : > { %6759 = vmatprep.subr.bf16.mxu1 %v3823_v1 }
0x1512   : > { %v3825_v26 = vpop.permute.xlu1 %3824 }
0x1513   : > { %6760 = vmatpush3.bf16.msra.mxu1 %v3823_v1 }
0x1514   : > { %6746 = vmatpush3.bf16.xpose.msra.mxu0 %v3658_v3  ;;  %6761 = vmatprep.subr.bf16.mxu1 %v3825_v26 }
0x1515   : > { %6936 = vmatprep.subr.msk.bf16.mxu0 %vm741_vm1, %v3638_v30 }
0x1517   : > { %6762 = vmatpush3.bf16.msra.mxu1 %v3825_v26 }
0x151c   : > { %6748 = vmatpush3.bf16.xpose.msra.mxu0 %v3661_v45 }
0x1523   : > { %6750 = vmatmul.mubr.msk.bf16.vlgmr.msra.gmra.mrb[48].mxu0 %vm741_vm1, %v9944_v41 }
0x1524   : > { %6753 = vmatprep.mubr.msk.bf16.mxu0 %vm741_vm1, %v9956_v61 }
0x152b   : > { %6754 = vmatmul.mubr.msk.bf16.gmra.mrb[52].mxu0 %vm741_vm1, %v9954_v24 }
0x15f6   : > { %v6751_v7 = vpop.f32.mrb[48].mxu0 }
0x15f7   : > { %v3706_v23 = vadd.f32 %v6751_v7, %v6254_v11  ;;  %v3697_v59 = vpop.f32.mrb[49].mxu0 }
0x15f8   : > { %v3698_v37 = vadd.f32 %v6252_v54, %v3697_v59  ;;  %v6752_v62 = vpop.f32.mrb[50].mxu0 }
0x15f9   : > { %v3700_v56 = vpop.f32.mrb[51].mxu0  ;;  %v3734_v9 = vsel %vm831_vm2, %v3706_v23, -inf  ;;  %v3709_v42 = vadd.f32 %v6752_v62, %v6255_v47 }
0x15fa   : > { %v3701_v8 = vadd.f32 %v6253_v12, %v3700_v56  ;;  %3735 = vmax.xlane.f32.xlu0 %v3734_v9  ;;  %v3728_v22 = vsel %vm831_vm2, %v3698_v37, -inf }
0x15fb   : > { %3729 = vmax.xlane.f32.xlu1 %v3728_v22  ;;  %v3737_v48 = vsel %vm831_vm2, %v3709_v42, -inf }
0x15fc   : > { %v3731_v15 = vsel %vm831_vm2, %v3701_v8, -inf }
0x15fe   : > { %v6755_v51 = vpop.f32.mrb[52].mxu0  ;;  %3732 = vmax.xlane.f32.xlu0 %v3731_v15 }
0x15ff   : > { %v3722_v14 = vadd.f32 %v6755_v51, %v6258_v39  ;;  %v3713_v2 = vpop.f32.mrb[53].mxu0  ;;  %3738 = vmax.xlane.f32.xlu1 %v3737_v48 }
0x1600   : > { %v6756_v50 = vpop.f32.mrb[54].mxu0  ;;  %v3714_v49 = vadd.f32 %v6256_v32, %v3713_v2 }
0x1601   : > { %v3725_v16 = vadd.f32 %v6756_v50, %v6259_v0  ;;  %v3716_v43 = vpop.f32.mrb[55].mxu0  ;;  %v3746_v6 = vsel %vm831_vm2, %v3722_v14, -inf }
0x1602   : > { %3747 = vmax.xlane.f32.xlu0 %v3746_v6  ;;  %v3717_v18 = vadd.f32 %v6257_v53, %v3716_v43  ;;  %v3740_v30 = vsel %vm831_vm2, %v3714_v49, -inf }
0x1603   : > { %v3749_v55 = vsel %vm831_vm2, %v3725_v16, -inf }
0x1604   : > { %3750 = vmax.xlane.f32.xlu1 %v3749_v55  ;;  %v3743_v17 = vsel %vm831_vm2, %v3717_v18, -inf }
0x1606   : > { %3741 = vmax.xlane.f32.xlu0 %v3740_v30 }
0x1608   : > { %3744 = vmax.xlane.f32.xlu1 %v3743_v17 }
0x1619   : > { %3928 = vrot.lane.b32.xlu1 %v9944_v41, %s7769_s23 }
0x161c   : > { %3826 = vrot.lane.b32.xlu0 %v9954_v24, %s7768_s30 }
0x1687   : > { %v3736_v63 = vpop.xlane.xlu0 %3735 }
0x1688   : > { %v3754_v20 = vsub.f32 %v3706_v23, %v3736_v63  ;;  %v3730_v1 = vpop.xlane.xlu1 %3729 }
0x1689   : > { %v3752_v26 = vsub.f32 %v3698_v37, %v3730_v1 }
0x168a   : > { %v3764_v3 = vmul.f32 1.442695, %v3754_v20 }
0x168b   : > { %v3760_v45 = vmul.f32 1.442695, %v3752_v26  ;;  %v3733_v11 = vpop.xlane.xlu0 %3732 }
0x168c   : > { %7411 = vpow2.f32 %v3764_v3  ;;  %v3753_v54 = vsub.f32 %v3701_v8, %v3733_v11  ;;  %v3739_v7 = vpop.xlane.xlu1 %3738 }
0x168d   : > { %v3755_v59 = vsub.f32 %v3709_v42, %v3739_v7  ;;  %7413 = vpow2.f32 %v3760_v45 }
0x168e   : > { %v3762_v47 = vmul.f32 1.442695, %v3753_v54 }
0x168f   : > { %v3766_v12 = vmul.f32 1.442695, %v3755_v59  ;;  %v3748_v62 = vpop.xlane.xlu0 %3747 }
0x1690   : > { %v3758_v48 = vsub.f32 %v3722_v14, %v3748_v62 }
0x1691   : > { %7415 = vpow2.f32 %v3766_v12  ;;  %v3751_v32 = vpop.xlane.xlu1 %3750 }
0x1692   : > { %7417 = vpow2.f32 %v3762_v47  ;;  %v3772_v2 = vmul.f32 1.442695, %v3758_v48  ;;  %v3759_v6 = vsub.f32 %v3725_v16, %v3751_v32 }
0x1693   : > { %v3742_v56 = vpop.xlane.xlu0 %3741 }
0x1694   : > { %v3756_v53 = vsub.f32 %v3714_v49, %v3742_v56  ;;  %7419 = vpow2.f32 %v3772_v2  ;;  %v3774_v30 = vmul.f32 1.442695, %v3759_v6 }
0x1695   : > { %v3745_v0 = vpop.xlane.xlu1 %3744 }
0x1696   : > { %v10018_v9 = vpop.eup %7411  ;;  %v3757_v50 = vsub.f32 %v3717_v18, %v3745_v0  ;;  %v3768_v55 = vmul.f32 1.442695, %v3756_v53 }
0x1697   : > { %v3827_v22 = vpop.permute.xlu0 %3826  ;;  %v3782_v23 = vsel %vm831_vm2, %v10018_v9, 0.0  ;;  %v10022_v37 = vpop.eup %7413 }
0x1698   : > { %3783 = vadd.xlane.f32.xlu0 %v3782_v23  ;;  %6763 = vmatprep.subr.bf16.mxu1 %v3827_v22  ;;  %v3776_v42 = vsel %vm831_vm2, %v10022_v37, 0.0  ;;  %v3770_v43 = vmul.f32 1.442695, %v3757_v50 }
0x1699   : > { %6764 = vmatpush3.bf16.msra.mxu1 %v3827_v22  ;;  %v3929_v3 = vpop.permute.xlu1 %3928 }
0x169a   : > { %7421 = vpow2.f32 %v3770_v43  ;;  %v3950_v48 = vsel %vm741_vm1, %v3929_v3, 0 }
0x169b   : > { %v7416_v8 = vpop.eup %7415  ;;  %7423 = vpow2.f32 %v3768_v55 }
0x169c   : > { %3777 = vadd.xlane.f32.xlu0 %v3776_v42  ;;  %v3785_v39 = vsel %vm831_vm2, %v7416_v8, 0.0  ;;  %v7418_v15 = vpop.eup %7417  ;;  %7425 = vpow2.f32 %v3774_v30 }
0x169d   : > { %3786 = vadd.xlane.f32.xlu1 %v3785_v39  ;;  %v3779_v51 = vsel %vm831_vm2, %v7418_v15, 0.0 }
0x169e   : > { %v10032_v17 = vpop.eup %7419 }
0x169f   : > { %v3794_v63 = vsel %vm831_vm2, %v10032_v17, 0.0 }
0x16a1   : > { %3780 = vadd.xlane.f32.xlu1 %v3779_v51 }
0x16a4   : > { %v10036_v20 = vpop.eup %7421 }
0x16a5   : > { %v10038_v14 = vpop.eup %7423  ;;  %v3791_v49 = vsel %vm831_vm2, %v10036_v20, 0.0 }
0x16a6   : > { %v3788_v16 = vsel %vm831_vm2, %v10038_v14, 0.0  ;;  %v10044_v18 = vpop.eup %7425 }
0x16a7   : > { %v3797_v1 = vsel %vm831_vm2, %v10044_v18, 0.0 }
0x16b2   : > { %3926 = vrot.lane.b32.xlu0 %v9946_v34, %s7769_s23  ;;  %3930 = vrot.lane.b32.xlu1 %v9956_v61, %s7769_s23 }
0x16d1   : > { %3795 = vadd.xlane.f32.xlu0 %v3794_v63 }
0x16d5   : > { %3792 = vadd.xlane.f32.xlu0 %v3791_v49 }
0x16d6   : > { %3789 = vadd.xlane.f32.xlu1 %v3788_v16 }
0x16da   : > { %3798 = vadd.xlane.f32.xlu1 %v3797_v1 }
0x16eb   : > { %3918 = vrot.lane.b32.xlu1 %v9946_v34, %s7770_s18  ;;  %3932 = vrot.lane.b32.xlu0 %v9954_v24, %s7769_s23  ;;  %s11797_s23 = sshll.u32 %s11808_s26, 6 }
0x16ef   : > { %3922 = vrot.lane.b32.xlu1 %v9956_v61, %s7770_s18  ;;  %3920 = vrot.lane.b32.xlu0 %v9944_v41, %s7770_s18 }
0x16f3   : > { %4117 = vrot.lane.b32.xlu1 %v9944_v41, %s7771_s19  ;;  %3924 = vrot.lane.b32.xlu0 %v9954_v24, %s7770_s18 }
0x16f7   : > { %4119 = vrot.lane.b32.xlu1 %v9956_v61, %s7771_s19  ;;  %4115 = vrot.lane.b32.xlu0 %v9946_v34, %s7771_s19 }
0x1725   : > { %v3784_v26 = vpop.xlane.xlu0 %3783 }
0x1729   : > { %v3778_v45 = vpop.xlane.xlu0 %3777 }
0x172a   : > { %v3787_v11 = vpop.xlane.xlu1 %3786 }
0x172b   : > { %7427 = vrcp.f32 %v3787_v11 }
0x172c   : > { %7429 = vrcp.f32 %v3778_v45 }
0x172d   : > { %v3927_v54 = vpop.permute.xlu0 %3926  ;;  %7431 = vrcp.f32 %v3784_v26 }
0x172e   : > { %6937 = vmatprep.subr.msk.bf16.mxu1 %vm741_vm1, %v3927_v54  ;;  %v3781_v7 = vpop.xlane.xlu1 %3780  ;;  %v3947_v32 = vsel %vm741_vm1, %v3927_v54, 0 }
0x172f   : > { %7433 = vrcp.f32 %v3781_v7 }
0x1732   : > { %v3931_v0 = vpop.permute.xlu1 %3930 }
0x1735   : > { %v7428_v59 = vpop.eup %7427 }
0x1736   : > { %v7430_v47 = vpop.eup %7429  ;;  %v3811_v56 = vmul.f32 %v7428_v59, %v7416_v8 }
0x1737   : > { %v7432_v12 = vpop.eup %7431  ;;  %v3808_v22 = vmul.f32 %v7430_v47, %v10022_v37  ;;  %v3953_v37 = vsel %vm741_vm1, %v3931_v0, 0 }
0x1738   : > { %v3810_v42 = vmul.f32 %v7432_v12, %v10018_v9 }
0x1739   : > { %v7434_v62 = vpop.eup %7433 }
0x173a   : > { %v3809_v23 = vmul.f32 %v7434_v62, %v7418_v15  ;;  %v3817_v51 = vpack.c.bf16 %v3811_v56, %v3810_v42  ;;  %v6270_v42 = vld [vmem:[%s11377_s4 + $0x150] sm:$0xff] }
0x173c   : > { %v3816_v39 = vpack.c.bf16 %v3809_v23, %v3808_v22 }
0x173e   : > { %6765 = vmatprep.mubr.msk.bf16.mxu1 %vm831_vm2, %v3816_v39  ;;  %v6268_v39 = vld [vmem:[%s11377_s4 + $0x140] sm:$0xff] }
0x173f   : > { %6766 = vmatmul.mubr.msk.bf16.vlgmr.msra.gmra.mrb[56].mxu1 %vm831_vm2, %v3817_v51 }
0x1740   : > { %6774 = vmatpush3.bf16.xpose.msra.mxu1 %v3947_v32 }
0x1741   : > { %6938 = vmatprep.subr.msk.bf16.mxu1 %vm741_vm1, %v3929_v3 }
0x1748   : > { %6776 = vmatpush3.bf16.xpose.msra.mxu1 %v3950_v48 }
0x1749   : > { %6939 = vmatprep.subr.msk.bf16.mxu1 %vm741_vm1, %v3931_v0  ;;  %v6271_v0 = vld [vmem:[%s11377_s4 + $0x158] sm:$0xff] }
0x1750   : > { %6778 = vmatpush3.bf16.xpose.msra.mxu1 %v3953_v37  ;;  %v6269_v37 = vld [vmem:[%s11377_s4 + $0x148] sm:$0xff] }
0x175e   : > { %v3796_v9 = vpop.xlane.xlu0 %3795 }
0x1762   : > { %v3793_v8 = vpop.xlane.xlu0 %3792 }
0x1763   : > { %7435 = vrcp.f32 %v3793_v8  ;;  %v3790_v15 = vpop.xlane.xlu1 %3789 }
0x1764   : > { %7437 = vrcp.f32 %v3790_v15 }
0x1765   : > { %7439 = vrcp.f32 %v3796_v9 }
0x1766   : > { %v3933_v2 = vpop.permute.xlu0 %3932 }
0x1767   : > { %6940 = vmatprep.subr.msk.bf16.mxu1 %vm741_vm1, %v3933_v2  ;;  %v3799_v50 = vpop.xlane.xlu1 %3798  ;;  %v3956_v53 = vsel %vm741_vm1, %v3933_v2, 0 }
0x1768   : > { %7441 = vrcp.f32 %v3799_v50  ;;  %6780 = vmatpush3.bf16.xpose.msra.mxu1 %v3956_v53 }
0x176a   : > { %v3921_v43 = vpop.permute.xlu0 %3920 }
0x176b   : > { %v3919_v6 = vpop.permute.xlu1 %3918 }
0x176d   : > { %v7436_v55 = vpop.eup %7435 }
0x176e   : > { %v7438_v30 = vpop.eup %7437  ;;  %v3925_v63 = vpop.permute.xlu0 %3924  ;;  %v3813_v49 = vmul.f32 %v7436_v55, %v10036_v20  ;;  %v6274_v55 = vld [vmem:[%s11377_s4 + $0x170] sm:$0xff] }
0x176f   : > { %v3923_v16 = vpop.permute.xlu1 %3922  ;;  %v3812_v1 = vmul.f32 %v7438_v30, %v10038_v14  ;;  %v7440_v26 = vpop.eup %7439 }
0x1770   : > { %v3814_v7 = vmul.f32 %v7440_v26, %v10032_v17 }
0x1771   : > { %v3818_v3 = vpack.c.bf16 %v3813_v49, %v3812_v1  ;;  %v6272_v49 = vld [vmem:[%s11377_s4 + $0x160] sm:$0xff] }
0x1772   : > { %v7442_v45 = vpop.eup %7441  ;;  %v4116_v11 = vpop.permute.xlu0 %4115 }
0x1773   : > { %6769 = vmatprep.mubr.msk.bf16.mxu1 %vm831_vm2, %v3818_v3  ;;  %6789 = vmatprep.subr.bf16.mxu0 %v4116_v11  ;;  %v4118_v54 = vpop.permute.xlu1 %4117  ;;  %v3815_v59 = vmul.f32 %v7442_v45, %v10044_v18  ;;  %v6273_v45 = vld [vmem:[%s11377_s4 + $0x168] sm:$0xff] }
0x1774   : > { %6790 = vmatpush3.bf16.msra.mxu0 %v4116_v11 }
0x1775   : > { %6791 = vmatprep.subr.bf16.mxu0 %v4118_v54  ;;  %v3819_v47 = vpack.c.bf16 %v3815_v59, %v3814_v7 }
0x1777   : > { %6770 = vmatmul.mubr.msk.bf16.gmra.mrb[60].mxu1 %vm831_vm2, %v3819_v47  ;;  %v4120_v20 = vpop.permute.xlu1 %4119 }
0x1778   : > { %6781 = vmatprep.mubr.msk.bf16.mxu1 %vm741_vm1, %v3919_v6  ;;  %6792 = vmatpush3.bf16.msra.mxu0 %v4118_v54 }
0x1779   : > { %6793 = vmatprep.subr.bf16.mxu0 %v4120_v20 }
0x177c   : > { %6794 = vmatpush3.bf16.msra.mxu0 %v4120_v20 }
0x177f   : > { %6782 = vmatmul.mubr.msk.bf16.vlgmr.msra.gmra.mrb[64].mxu1 %vm741_vm1, %v3921_v43 }
0x1780   : > { %6785 = vmatprep.mubr.msk.bf16.mxu1 %vm741_vm1, %v3923_v16  ;;  %v6275_v16 = vld [vmem:[%s11377_s4 + $0x178] sm:$0xff] }
0x1787   : > { %6786 = vmatmul.mubr.msk.bf16.gmra.mrb[68].mxu1 %vm741_vm1, %v3925_v63 }
0x1812   : > { %v10086_v17 = vpop.f32.mrb[56].mxu1 }
0x1813   : > { %v10088_v14 = vpop.f32.mrb[57].mxu1 }
0x1814   : > { %v10090_v18 = vpop.f32.mrb[58].mxu1 }
0x1815   : > { %v10092_v12 = vpop.f32.mrb[59].mxu1 }
0x184a   : > { %v10094_v62 = vpop.f32.mrb[60].mxu1 }
0x184b   : > { %v10096_v56 = vpop.f32.mrb[61].mxu1 }
0x184c   : > { %v10098_v22 = vpop.f32.mrb[62].mxu1 }
0x184d   : > { %v10100_v23 = vpop.f32.mrb[63].mxu1 }
0x1852   : > { %v6783_v51 = vpop.f32.mrb[64].mxu1 }
0x1853   : > { %v4001_v32 = vadd.f32 %v6783_v51, %v6270_v42  ;;  %v3992_v48 = vpop.f32.mrb[65].mxu1 }
0x1854   : > { %v3993_v9 = vadd.f32 %v6268_v39, %v3992_v48  ;;  %v6784_v8 = vpop.f32.mrb[66].mxu1 }
0x1855   : > { %v3995_v15 = vpop.f32.mrb[67].mxu1  ;;  %v4029_v2 = vsel %vm831_vm2, %v4001_v32, -inf  ;;  %v4004_v50 = vadd.f32 %v6784_v8, %v6271_v0 }
0x1856   : > { %v3996_v53 = vadd.f32 %v6269_v37, %v3995_v15  ;;  %4030 = vmax.xlane.f32.xlu0 %v4029_v2  ;;  %v4023_v43 = vsel %vm831_vm2, %v3993_v9, -inf }
0x1857   : > { %4024 = vmax.xlane.f32.xlu1 %v4023_v43  ;;  %v4032_v63 = vsel %vm831_vm2, %v4004_v50, -inf }
0x1858   : > { %v4026_v6 = vsel %vm831_vm2, %v3996_v53, -inf }
0x185a   : > { %4027 = vmax.xlane.f32.xlu0 %v4026_v6  ;;  %v6787_v30 = vpop.f32.mrb[68].mxu1 }
0x185b   : > { %v4017_v1 = vadd.f32 %v6787_v30, %v6274_v55  ;;  %4033 = vmax.xlane.f32.xlu1 %v4032_v63  ;;  %v4008_v26 = vpop.f32.mrb[69].mxu1 }
0x185c   : > { %v6788_v3 = vpop.f32.mrb[70].mxu1  ;;  %v4009_v11 = vadd.f32 %v6272_v49, %v4008_v26 }
0x185d   : > { %v4020_v54 = vadd.f32 %v6788_v3, %v6275_v16  ;;  %v4011_v7 = vpop.f32.mrb[71].mxu1  ;;  %v4041_v59 = vsel %vm831_vm2, %v4017_v1, -inf }
0x185e   : > { %4042 = vmax.xlane.f32.xlu0 %v4041_v59  ;;  %v4012_v47 = vadd.f32 %v6273_v45, %v4011_v7  ;;  %v4035_v42 = vsel %vm831_vm2, %v4009_v11, -inf }
0x185f   : > { %v4044_v20 = vsel %vm831_vm2, %v4020_v54, -inf }
0x1860   : > { %4045 = vmax.xlane.f32.xlu1 %v4044_v20  ;;  %v4038_v39 = vsel %vm831_vm2, %v4012_v47, -inf }
0x1862   : > { %4036 = vmax.xlane.f32.xlu0 %v4035_v42 }
0x1864   : > { %4039 = vmax.xlane.f32.xlu1 %v4038_v39 }
0x1875   : > { %4223 = vrot.lane.b32.xlu1 %v9944_v41, %s7772_s28 }
0x1878   : > { %4121 = vrot.lane.b32.xlu0 %v9954_v24, %s7771_s19  ;;  %s11798_s19 = sld [smem:[#allocation96_spill]] }
0x18e3   : > { %v4031_v51 = vpop.xlane.xlu0 %4030 }
0x18e4   : > { %v4049_v48 = vsub.f32 %v4001_v32, %v4031_v51  ;;  %v4025_v0 = vpop.xlane.xlu1 %4024 }
0x18e5   : > { %v4047_v37 = vsub.f32 %v3993_v9, %v4025_v0 }
0x18e6   : > { %v4059_v8 = vmul.f32 1.442695, %v4049_v48 }
0x18e7   : > { %v4055_v15 = vmul.f32 1.442695, %v4047_v37  ;;  %v4028_v2 = vpop.xlane.xlu0 %4027 }
0x18e8   : > { %7443 = vpow2.f32 %v4059_v8  ;;  %v4048_v43 = vsub.f32 %v3996_v53, %v4028_v2  ;;  %v4034_v6 = vpop.xlane.xlu1 %4033 }
0x18e9   : > { %v4050_v55 = vsub.f32 %v4004_v50, %v4034_v6  ;;  %7445 = vpow2.f32 %v4055_v15 }
0x18ea   : > { %v4057_v30 = vmul.f32 1.442695, %v4048_v43 }
0x18eb   : > { %v4061_v63 = vmul.f32 1.442695, %v4050_v55  ;;  %v4043_v49 = vpop.xlane.xlu0 %4042 }
0x18ec   : > { %v4053_v42 = vsub.f32 %v4017_v1, %v4043_v49 }
0x18ed   : > { %7447 = vpow2.f32 %v4061_v63  ;;  %v4046_v20 = vpop.xlane.xlu1 %4045 }
0x18ee   : > { %7449 = vpow2.f32 %v4057_v30  ;;  %v4067_v51 = vmul.f32 1.442695, %v4053_v42  ;;  %v4054_v8 = vsub.f32 %v4020_v54, %v4046_v20 }
0x18ef   : > { %v4037_v16 = vpop.xlane.xlu0 %4036 }
0x18f0   : > { %v4051_v0 = vsub.f32 %v4009_v11, %v4037_v16  ;;  %7451 = vpow2.f32 %v4067_v51  ;;  %v4069_v2 = vmul.f32 1.442695, %v4054_v8 }
0x18f1   : > { %v4040_v39 = vpop.xlane.xlu1 %4039 }
0x18f2   : > { %v10138_v26 = vpop.eup %7443  ;;  %v4052_v48 = vsub.f32 %v4012_v47, %v4040_v39  ;;  %v4063_v15 = vmul.f32 1.442695, %v4051_v0 }
0x18f3   : > { %v4122_v3 = vpop.permute.xlu0 %4121  ;;  %v4077_v32 = vsel %vm831_vm2, %v10138_v26, 0.0  ;;  %v10142_v9 = vpop.eup %7445 }
0x18f4   : > { %4078 = vadd.xlane.f32.xlu0 %v4077_v32  ;;  %6795 = vmatprep.subr.bf16.mxu0 %v4122_v3  ;;  %v4071_v50 = vsel %vm831_vm2, %v10142_v9, 0.0  ;;  %v4065_v37 = vmul.f32 1.442695, %v4052_v48 }
0x18f5   : > { %6796 = vmatpush3.bf16.msra.mxu0 %v4122_v3  ;;  %v4224_v49 = vpop.permute.xlu1 %4223 }
0x18f6   : > { %7453 = vpow2.f32 %v4065_v37 }
0x18f7   : > { %v7448_v53 = vpop.eup %7447  ;;  %7455 = vpow2.f32 %v4063_v15 }
0x18f8   : > { %4072 = vadd.xlane.f32.xlu0 %v4071_v50  ;;  %v4080_v45 = vsel %vm831_vm2, %v7448_v53, 0.0  ;;  %v7450_v7 = vpop.eup %7449  ;;  %7457 = vpow2.f32 %v4069_v2  ;;  %v4245_v2 = vsel %vm741_vm1, %v4224_v49, 0 }
0x18f9   : > { %4081 = vadd.xlane.f32.xlu1 %v4080_v45  ;;  %v4074_v59 = vsel %vm831_vm2, %v7450_v7, 0.0 }
0x18fa   : > { %v10152_v43 = vpop.eup %7451 }
0x18fb   : > { %v4089_v6 = vsel %vm831_vm2, %v10152_v43, 0.0 }
0x18fd   : > { %4075 = vadd.xlane.f32.xlu1 %v4074_v59 }
0x1900   : > { %v10156_v55 = vpop.eup %7453 }
0x1901   : > { %v10158_v1 = vpop.eup %7455  ;;  %v4086_v11 = vsel %vm831_vm2, %v10156_v55, 0.0 }
0x1902   : > { %v4083_v54 = vsel %vm831_vm2, %v10158_v1, 0.0  ;;  %v10164_v47 = vpop.eup %7457 }
0x1903   : > { %v4092_v30 = vsel %vm831_vm2, %v10164_v47, 0.0 }
0x190e   : > { %4221 = vrot.lane.b32.xlu0 %v9946_v34, %s7772_s28  ;;  %4225 = vrot.lane.b32.xlu1 %v9956_v61, %s7772_s28 }
0x192d   : > { %4090 = vadd.xlane.f32.xlu0 %v4089_v6 }
0x1931   : > { %4087 = vadd.xlane.f32.xlu0 %v4086_v11 }
0x1932   : > { %4084 = vadd.xlane.f32.xlu1 %v4083_v54 }
0x1936   : > { %4093 = vadd.xlane.f32.xlu1 %v4092_v30 }
0x1947   : > { %4213 = vrot.lane.b32.xlu1 %v9946_v34, %s7773_s14  ;;  %4227 = vrot.lane.b32.xlu0 %v9954_v24, %s7772_s28  ;;  %s11696_s28 = smov 72  }
0x194b   : > { %4217 = vrot.lane.b32.xlu1 %v9956_v61, %s7773_s14  ;;  %4215 = vrot.lane.b32.xlu0 %v9944_v41, %s7773_s14 }
0x194f   : > { %4412 = vrot.lane.b32.xlu1 %v9944_v41, %s7774_s20  ;;  %4219 = vrot.lane.b32.xlu0 %v9954_v24, %s7773_s14  ;;  %s11698_s14 = smov 8  }
0x1953   : > { %4414 = vrot.lane.b32.xlu1 %v9956_v61, %s7774_s20  ;;  %4410 = vrot.lane.b32.xlu0 %v9946_v34, %s7774_s20 }
0x1981   : > { %v4079_v63 = vpop.xlane.xlu0 %4078 }
0x1985   : > { %v4073_v16 = vpop.xlane.xlu0 %4072 }
0x1986   : > { %v4082_v3 = vpop.xlane.xlu1 %4081 }
0x1987   : > { %7459 = vrcp.f32 %v4082_v3 }
0x1988   : > { %7461 = vrcp.f32 %v4073_v16 }
0x1989   : > { %v4222_v32 = vpop.permute.xlu0 %4221  ;;  %7463 = vrcp.f32 %v4079_v63 }
0x198a   : > { %6941 = vmatprep.subr.msk.bf16.mxu0 %vm741_vm1, %v4222_v32  ;;  %v4076_v50 = vpop.xlane.xlu1 %4075  ;;  %v4242_v15 = vsel %vm741_vm1, %v4222_v32, 0 }
0x198b   : > { %7465 = vrcp.f32 %v4076_v50 }
0x198e   : > { %v4226_v6 = vpop.permute.xlu1 %4225 }
0x1991   : > { %v7460_v45 = vpop.eup %7459 }
0x1992   : > { %v7462_v59 = vpop.eup %7461  ;;  %v4106_v39 = vmul.f32 %v7460_v45, %v7448_v53 }
0x1993   : > { %v7464_v20 = vpop.eup %7463  ;;  %v4103_v51 = vmul.f32 %v7462_v59, %v10142_v9  ;;  %v4248_v9 = vsel %vm741_vm1, %v4226_v6, 0 }
0x1994   : > { %v4105_v0 = vmul.f32 %v7464_v20, %v10138_v26 }
0x1995   : > { %v7466_v42 = vpop.eup %7465 }
0x1996   : > { %v4104_v48 = vmul.f32 %v7466_v42, %v7450_v7  ;;  %v4112_v8 = vpack.c.bf16 %v4106_v39, %v4105_v0 }
0x1998   : > { %v4111_v37 = vpack.c.bf16 %v4104_v48, %v4103_v51 }
0x199a   : > { %6797 = vmatprep.mubr.msk.bf16.mxu0 %vm831_vm2, %v4111_v37 }
0x199b   : > { %6798 = vmatmul.mubr.msk.bf16.vlgmr.msra.gmra.mrb[56].mxu0 %vm831_vm2, %v4112_v8 }
0x199c   : > { %6806 = vmatpush3.bf16.xpose.msra.mxu0 %v4242_v15 }
0x199d   : > { %6942 = vmatprep.subr.msk.bf16.mxu0 %vm741_vm1, %v4224_v49 }
0x19a4   : > { %6808 = vmatpush3.bf16.xpose.msra.mxu0 %v4245_v2 }
0x19a5   : > { %6943 = vmatprep.subr.msk.bf16.mxu0 %vm741_vm1, %v4226_v6 }
0x19ac   : > { %6810 = vmatpush3.bf16.xpose.msra.mxu0 %v4248_v9 }
0x19ba   : > { %v4091_v26 = vpop.xlane.xlu0 %4090 }
0x19be   : > { %v4088_v53 = vpop.xlane.xlu0 %4087 }
0x19bf   : > { %7467 = vrcp.f32 %v4088_v53  ;;  %v4085_v7 = vpop.xlane.xlu1 %4084 }
0x19c0   : > { %7469 = vrcp.f32 %v4085_v7 }
0x19c1   : > { %7471 = vrcp.f32 %v4091_v26 }
0x19c2   : > { %v4228_v11 = vpop.permute.xlu0 %4227 }
0x19c3   : > { %v4251_v54 = vsel %vm741_vm1, %v4228_v11, 0  ;;  %6944 = vmatprep.subr.msk.bf16.mxu0 %vm741_vm1, %v4228_v11  ;;  %v4094_v30 = vpop.xlane.xlu1 %4093 }
0x19c4   : > { %7473 = vrcp.f32 %v4094_v30  ;;  %6812 = vmatpush3.bf16.xpose.msra.mxu0 %v4251_v54  ;;  %v6286_v30 = vld [vmem:[%s11377_s4 + $0x190] sm:$0xff] }
0x19c6   : > { %v4216_v63 = vpop.permute.xlu0 %4215 }
0x19c7   : > { %v4214_v49 = vpop.permute.xlu1 %4213 }
0x19c9   : > { %v7468_v16 = vpop.eup %7467 }
0x19ca   : > { %v7470_v3 = vpop.eup %7469  ;;  %v4220_v32 = vpop.permute.xlu0 %4219  ;;  %v4108_v50 = vmul.f32 %v7468_v16, %v10156_v55 }
0x19cb   : > { %v4218_v45 = vpop.permute.xlu1 %4217  ;;  %v4107_v59 = vmul.f32 %v7470_v3, %v10158_v1  ;;  %v7472_v20 = vpop.eup %7471 }
0x19cc   : > { %v4109_v0 = vmul.f32 %v7472_v20, %v10152_v43 }
0x19cd   : > { %v4113_v42 = vpack.c.bf16 %v4108_v50, %v4107_v59  ;;  %v6285_v50 = vld [vmem:[%s11377_s4 + $0x188] sm:$0xff] }
0x19ce   : > { %v7474_v39 = vpop.eup %7473  ;;  %v4411_v51 = vpop.permute.xlu0 %4410 }
0x19cf   : > { %6801 = vmatprep.mubr.msk.bf16.mxu0 %vm831_vm2, %v4113_v42  ;;  %6821 = vmatprep.subr.bf16.mxu1 %v4411_v51  ;;  %v4413_v48 = vpop.permute.xlu1 %4412  ;;  %v4110_v37 = vmul.f32 %v7474_v39, %v10164_v47 }
0x19d0   : > { %6822 = vmatpush3.bf16.msra.mxu1 %v4411_v51 }
0x19d1   : > { %6823 = vmatprep.subr.bf16.mxu1 %v4413_v48  ;;  %v4114_v8 = vpack.c.bf16 %v4110_v37, %v4109_v0  ;;  %v6290_v37 = vld [vmem:[%s11377_s4 + $0x1b0] sm:$0xff] }
0x19d3   : > { %6802 = vmatmul.mubr.msk.bf16.gmra.mrb[60].mxu0 %vm831_vm2, %v4114_v8  ;;  %v4415_v55 = vpop.permute.xlu1 %4414 }
0x19d4   : > { %6813 = vmatprep.mubr.msk.bf16.mxu0 %vm741_vm1, %v4214_v49  ;;  %6824 = vmatpush3.bf16.msra.mxu1 %v4413_v48 }
0x19d5   : > { %6825 = vmatprep.subr.bf16.mxu1 %v4415_v55 }
0x19d8   : > { %6826 = vmatpush3.bf16.msra.mxu1 %v4415_v55 }
0x19db   : > { %6814 = vmatmul.mubr.msk.bf16.vlgmr.msra.gmra.mrb[64].mxu0 %vm741_vm1, %v4216_v63  ;;  %v6284_v63 = vld [vmem:[%s11377_s4 + $0x180] sm:$0xff] }
0x19dc   : > { %6817 = vmatprep.mubr.msk.bf16.mxu0 %vm741_vm1, %v4218_v45 }
0x19e3   : > { %6818 = vmatmul.mubr.msk.bf16.gmra.mrb[68].mxu0 %vm741_vm1, %v4220_v32  ;;  %v6287_v32 = vld [vmem:[%s11377_s4 + $0x198] sm:$0xff] }
0x1a6e   : > { %v10206_v43 = vpop.f32.mrb[56].mxu0 }
0x1a6f   : > { %v10208_v1 = vpop.f32.mrb[57].mxu0 }
0x1a70   : > { %v10210_v47 = vpop.f32.mrb[58].mxu0 }
0x1a71   : > { %v10214_v2 = vpop.f32.mrb[59].mxu0 }
0x1aa6   : > { %v10218_v9 = vpop.f32.mrb[60].mxu0 }
0x1aa7   : > { %v10220_v26 = vpop.f32.mrb[61].mxu0 }
0x1aa8   : > { %v10222_v53 = vpop.f32.mrb[62].mxu0 }
0x1aa9   : > { %v10226_v11 = vpop.f32.mrb[63].mxu0 }
0x1aae   : > { %v6815_v49 = vpop.f32.mrb[64].mxu0 }
0x1aaf   : > { %v4296_v16 = vadd.f32 %v6815_v49, %v6286_v30  ;;  %v4287_v3 = vpop.f32.mrb[65].mxu0  ;;  %v6288_v30 = vld [vmem:[%s11377_s4 + $0x1a0] sm:$0xff] }
0x1ab0   : > { %v4288_v45 = vadd.f32 %v6284_v63, %v4287_v3  ;;  %v6816_v59 = vpop.f32.mrb[66].mxu0  ;;  %v6291_v63 = vld [vmem:[%s11377_s4 + $0x1b8] sm:$0xff] }
0x1ab1   : > { %v4290_v20 = vpop.f32.mrb[67].mxu0  ;;  %v4324_v42 = vsel %vm831_vm2, %v4296_v16, -inf  ;;  %v4299_v39 = vadd.f32 %v6816_v59, %v6287_v32 }
0x1ab2   : > { %v4291_v51 = vadd.f32 %v6285_v50, %v4290_v20  ;;  %4325 = vmax.xlane.f32.xlu0 %v4324_v42  ;;  %v4318_v48 = vsel %vm831_vm2, %v4288_v45, -inf  ;;  %v6289_v50 = vld [vmem:[%s11377_s4 + $0x1a8] sm:$0xff] }
0x1ab3   : > { %4319 = vmax.xlane.f32.xlu1 %v4318_v48  ;;  %v4327_v55 = vsel %vm831_vm2, %v4299_v39, -inf }
0x1ab4   : > { %v4321_v0 = vsel %vm831_vm2, %v4291_v51, -inf }
0x1ab6   : > { %4322 = vmax.xlane.f32.xlu0 %v4321_v0  ;;  %v6819_v8 = vpop.f32.mrb[68].mxu0 }
0x1ab7   : > { %v4312_v49 = vadd.f32 %v6819_v8, %v6290_v37  ;;  %4328 = vmax.xlane.f32.xlu1 %v4327_v55  ;;  %v4303_v3 = vpop.f32.mrb[69].mxu0 }
0x1ab8   : > { %v6820_v32 = vpop.f32.mrb[70].mxu0  ;;  %v4304_v59 = vadd.f32 %v6288_v30, %v4303_v3 }
0x1ab9   : > { %v4315_v20 = vadd.f32 %v6820_v32, %v6291_v63  ;;  %v4306_v42 = vpop.f32.mrb[71].mxu0  ;;  %v4336_v48 = vsel %vm831_vm2, %v4312_v49, -inf }
0x1aba   : > { %4337 = vmax.xlane.f32.xlu0 %v4336_v48  ;;  %v4307_v0 = vadd.f32 %v6289_v50, %v4306_v42  ;;  %v4330_v54 = vsel %vm831_vm2, %v4304_v59, -inf }
0x1abb   : > { %v4339_v7 = vsel %vm831_vm2, %v4315_v20, -inf }
0x1abc   : > { %4340 = vmax.xlane.f32.xlu1 %v4339_v7  ;;  %v4333_v37 = vsel %vm831_vm2, %v4307_v0, -inf }
0x1abe   : > { %4331 = vmax.xlane.f32.xlu0 %v4330_v54 }
0x1ac0   : > { %4334 = vmax.xlane.f32.xlu1 %v4333_v37 }
0x1ad1   : > { %4518 = vrot.lane.b32.xlu1 %v9944_v41, %s11696_s28 }
0x1ad4   : > { %4416 = vrot.lane.b32.xlu0 %v9954_v24, %s7774_s20  ;;  %s11697_s20 = smov 104  }
0x1b3f   : > { %v4326_v8 = vpop.xlane.xlu0 %4325 }
0x1b40   : > { %v4344_v55 = vsub.f32 %v4296_v16, %v4326_v8  ;;  %v4320_v30 = vpop.xlane.xlu1 %4319 }
0x1b41   : > { %v4342_v63 = vsub.f32 %v4288_v45, %v4320_v30 }
0x1b42   : > { %v4354_v3 = vmul.f32 1.442695, %v4344_v55 }
0x1b43   : > { %v4350_v32 = vmul.f32 1.442695, %v4342_v63  ;;  %v4323_v50 = vpop.xlane.xlu0 %4322 }
0x1b44   : > { %7475 = vpow2.f32 %v4354_v3  ;;  %v4343_v7 = vsub.f32 %v4291_v51, %v4323_v50  ;;  %v4329_v42 = vpop.xlane.xlu1 %4328 }
0x1b45   : > { %v4345_v54 = vsub.f32 %v4299_v39, %v4329_v42  ;;  %7477 = vpow2.f32 %v4350_v32 }
0x1b46   : > { %v4352_v48 = vmul.f32 1.442695, %v4343_v7 }
0x1b47   : > { %v4356_v37 = vmul.f32 1.442695, %v4345_v54  ;;  %v4338_v15 = vpop.xlane.xlu0 %4337 }
0x1b48   : > { %v4348_v3 = vsub.f32 %v4312_v49, %v4338_v15 }
0x1b49   : > { %7479 = vpow2.f32 %v4356_v37  ;;  %v4341_v63 = vpop.xlane.xlu1 %4340 }
0x1b4a   : > { %7481 = vpow2.f32 %v4352_v48  ;;  %v4362_v32 = vmul.f32 1.442695, %v4348_v3  ;;  %v4349_v54 = vsub.f32 %v4315_v20, %v4341_v63 }
0x1b4b   : > { %v4332_v6 = vpop.xlane.xlu0 %4331 }
0x1b4c   : > { %v4346_v7 = vsub.f32 %v4304_v59, %v4332_v6  ;;  %7483 = vpow2.f32 %v4362_v32  ;;  %v4364_v37 = vmul.f32 1.442695, %v4349_v54 }
0x1b4e   : > { %v10266_v33 = vpop.eup %7475  ;;  %v4358_v48 = vmul.f32 1.442695, %v4346_v7 }
0x1b4f   : > { %v4417_v35 = vpop.permute.xlu0 %4416  ;;  %v4372_v16 = vsel %vm831_vm2, %v10266_v33, 0.0  ;;  %v7478_v45 = vpop.eup %7477 }
0x1b50   : > { %4373 = vadd.xlane.f32.xlu0 %v4372_v16  ;;  %6827 = vmatprep.subr.bf16.mxu1 %v4417_v35  ;;  %v4366_v39 = vsel %vm831_vm2, %v7478_v45, 0.0 }
0x1b51   : > { %6828 = vmatpush3.bf16.msra.mxu1 %v4417_v35  ;;  %v4335_v35 = vpop.xlane.xlu1 %4334 }
0x1b52   : > { %v4347_v50 = vsub.f32 %v4307_v0, %v4335_v35 }
0x1b53   : > { %v7480_v51 = vpop.eup %7479 }
0x1b54   : > { %4367 = vadd.xlane.f32.xlu0 %v4366_v39  ;;  %v4375_v8 = vsel %vm831_vm2, %v7480_v51, 0.0  ;;  %v7482_v55 = vpop.eup %7481  ;;  %v4360_v42 = vmul.f32 1.442695, %v4347_v50 }
0x1b55   : > { %4376 = vadd.xlane.f32.xlu1 %v4375_v8  ;;  %v4369_v30 = vsel %vm831_vm2, %v7482_v55, 0.0 }
0x1b56   : > { %7485 = vpow2.f32 %v4360_v42  ;;  %v10277_v16 = vpop.eup %7483 }
0x1b57   : > { %7487 = vpow2.f32 %v4358_v48  ;;  %v4384_v39 = vsel %vm831_vm2, %v10277_v16, 0.0 }
0x1b58   : > { %7489 = vpow2.f32 %v4364_v37 }
0x1b59   : > { %4370 = vadd.xlane.f32.xlu1 %v4369_v30  ;;  %v4519_v30 = vpop.permute.xlu1 %4518 }
0x1b60   : > { %v7486_v8 = vpop.eup %7485 }
0x1b61   : > { %v7488_v15 = vpop.eup %7487  ;;  %v4381_v49 = vsel %vm831_vm2, %v7486_v8, 0.0 }
0x1b62   : > { %v4378_v6 = vsel %vm831_vm2, %v7488_v15, 0.0  ;;  %v7490_v59 = vpop.eup %7489 }
0x1b63   : > { %v4387_v20 = vsel %vm831_vm2, %v7490_v59, 0.0 }
0x1b6a   : > { %4516 = vrot.lane.b32.xlu0 %v9946_v34, %s11696_s28  ;;  %4520 = vrot.lane.b32.xlu1 %v9956_v61, %s11696_s28 }
0x1b89   : > { %4385 = vadd.xlane.f32.xlu0 %v4384_v39 }
0x1b8d   : > { %4382 = vadd.xlane.f32.xlu0 %v4381_v49 }
0x1b8e   : > { %4379 = vadd.xlane.f32.xlu1 %v4378_v6 }
0x1b92   : > { %4388 = vadd.xlane.f32.xlu1 %v4387_v20 }
0x1ba3   : > { %4508 = vrot.lane.b32.xlu1 %v9946_v34, %s11697_s20  ;;  %4522 = vrot.lane.b32.xlu0 %v9954_v24, %s11696_s28  ;;  %s499_s28 = scalar_lea.vmem %s11798_s19, %s11797_s23 }
0x1ba7   : > { %4512 = vrot.lane.b32.xlu1 %v9956_v61, %s11697_s20  ;;  %4510 = vrot.lane.b32.xlu0 %v9944_v41, %s11697_s20 }
0x1bab   : > { %4514 = vrot.lane.b32.xlu0 %v9954_v24, %s11697_s20 }
0x1bdd   : > { %v4374_v0 = vpop.xlane.xlu0 %4373 }
0x1be1   : > { %v4368_v63 = vpop.xlane.xlu0 %4367 }
0x1be2   : > { %v4377_v3 = vpop.xlane.xlu1 %4376 }
0x1be3   : > { %7491 = vrcp.f32 %v4377_v3 }
0x1be4   : > { %7493 = vrcp.f32 %v4368_v63 }
0x1be5   : > { %v4517_v35 = vpop.permute.xlu0 %4516  ;;  %7495 = vrcp.f32 %v4374_v0  ;;  %v4540_v0 = vsel %vm741_vm1, %v4519_v30, 0 }
0x1be6   : > { %6945 = vmatprep.subr.msk.bf16.mxu1 %vm741_vm1, %v4517_v35  ;;  %v4371_v32 = vpop.xlane.xlu1 %4370  ;;  %v4537_v63 = vsel %vm741_vm1, %v4517_v35, 0 }
0x1be7   : > { %7497 = vrcp.f32 %v4371_v32 }
0x1bea   : > { %v4521_v3 = vpop.permute.xlu1 %4520 }
0x1bed   : > { %v7492_v50 = vpop.eup %7491 }
0x1bee   : > { %v7494_v7 = vpop.eup %7493  ;;  %v4401_v48 = vmul.f32 %v7492_v50, %v7480_v51 }
0x1bef   : > { %v7496_v42 = vpop.eup %7495  ;;  %v4398_v37 = vmul.f32 %v7494_v7, %v7478_v45  ;;  %v4543_v45 = vsel %vm741_vm1, %v4521_v3, 0 }
0x1bf0   : > { %v4400_v49 = vmul.f32 %v7496_v42, %v10266_v33 }
0x1bf1   : > { %v7498_v54 = vpop.eup %7497 }
0x1bf2   : > { %v4399_v39 = vmul.f32 %v7498_v54, %v7482_v55  ;;  %v4407_v20 = vpack.c.bf16 %v4401_v48, %v4400_v49 }
0x1bf4   : > { %v4406_v6 = vpack.c.bf16 %v4399_v39, %v4398_v37 }
0x1bf6   : > { %6829 = vmatprep.mubr.msk.bf16.mxu1 %vm831_vm2, %v4406_v6 }
0x1bf7   : > { %6830 = vmatmul.mubr.msk.bf16.vlgmr.msra.gmra.mrb[72].mxu1 %vm831_vm2, %v4407_v20 }
0x1bf8   : > { %6838 = vmatpush3.bf16.xpose.msra.mxu1 %v4537_v63 }
0x1bf9   : > { %6946 = vmatprep.subr.msk.bf16.mxu1 %vm741_vm1, %v4519_v30 }
0x1c00   : > { %6840 = vmatpush3.bf16.xpose.msra.mxu1 %v4540_v0 }
0x1c01   : > { %6947 = vmatprep.subr.msk.bf16.mxu1 %vm741_vm1, %v4521_v3 }
0x1c08   : > { %6842 = vmatpush3.bf16.xpose.msra.mxu1 %v4543_v45 }
0x1c16   : > { %v4386_v33 = vpop.xlane.xlu0 %4385 }
0x1c1a   : > { %v4383_v51 = vpop.xlane.xlu0 %4382 }
0x1c1b   : > { %7499 = vrcp.f32 %v4383_v51  ;;  %v4380_v55 = vpop.xlane.xlu1 %4379 }
0x1c1c   : > { %7501 = vrcp.f32 %v4380_v55 }
0x1c1d   : > { %7503 = vrcp.f32 %v4386_v33 }
0x1c1e   : > { %v4523_v35 = vpop.permute.xlu0 %4522 }
0x1c1f   : > { %v4546_v32 = vsel %vm741_vm1, %v4523_v35, 0  ;;  %6948 = vmatprep.subr.msk.bf16.mxu1 %vm741_vm1, %v4523_v35  ;;  %v4389_v50 = vpop.xlane.xlu1 %4388 }
0x1c20   : > { %7505 = vrcp.f32 %v4389_v50  ;;  %6844 = vmatpush3.bf16.xpose.msra.mxu1 %v4546_v32 }
0x1c22   : > { %v4511_v0 = vpop.permute.xlu0 %4510 }
0x1c23   : > { %v4509_v63 = vpop.permute.xlu1 %4508 }
0x1c25   : > { %v7500_v30 = vpop.eup %7499 }
0x1c26   : > { %v7502_v7 = vpop.eup %7501  ;;  %v4403_v42 = vmul.f32 %v7500_v30, %v7486_v8  ;;  %v4515_v8 = vpop.permute.xlu0 %4514 }
0x1c27   : > { %v4402_v54 = vmul.f32 %v7502_v7, %v7488_v15  ;;  %v7504_v48 = vpop.eup %7503  ;;  %v4513_v3 = vpop.permute.xlu1 %4512 }
0x1c28   : > { %v4404_v49 = vmul.f32 %v7504_v48, %v10277_v16 }
0x1c29   : > { %v4408_v37 = vpack.c.bf16 %v4403_v42, %v4402_v54  ;;  %v6300_v42 = vld [vmem:[%s11377_s4 + $0x1c0] sm:$0xff] }
0x1c2a   : > { %v7506_v39 = vpop.eup %7505 }
0x1c2b   : > { %6833 = vmatprep.mubr.msk.bf16.mxu1 %vm831_vm2, %v4408_v37  ;;  %v4405_v6 = vmul.f32 %v7506_v39, %v7490_v59  ;;  %v6303_v37 = vld [vmem:[%s11377_s4 + $0x1d8] sm:$0xff]  ;;  %v6301_v39 = vld [vmem:[%s11377_s4 + $0x1c8] sm:$0xff]  ;;  %v6304_v59 = vld [vmem:[%s11377_s4 + $0x1e0] sm:$0xff] }
0x1c2d   : > { %v4409_v20 = vpack.c.bf16 %v4405_v6, %v4404_v49 }
0x1c2f   : > { %6834 = vmatmul.mubr.msk.bf16.gmra.mrb[76].mxu1 %vm831_vm2, %v4409_v20  ;;  %v6302_v20 = vld [vmem:[%s11377_s4 + $0x1d0] sm:$0xff] }
0x1c30   : > { %6845 = vmatprep.mubr.msk.bf16.mxu1 %vm741_vm1, %v4509_v63 }
0x1c37   : > { %6846 = vmatmul.mubr.msk.bf16.vlgmr.msra.gmra.mrb[80].mxu1 %vm741_vm1, %v4511_v0 }
0x1c38   : > { %6849 = vmatprep.mubr.msk.bf16.mxu1 %vm741_vm1, %v4513_v3 }
0x1c3f   : > { %6850 = vmatmul.mubr.msk.bf16.gmra.mrb[84].mxu1 %vm741_vm1, %v4515_v8 }
0x1cca   : > { %v10312_v15 = vpop.f32.mrb[72].mxu1 }
0x1ccb   : > { %v10314_v45 = vpop.f32.mrb[73].mxu1 }
0x1ccc   : > { %v10316_v16 = vpop.f32.mrb[74].mxu1 }
0x1ccd   : > { %v10320_v33 = vpop.f32.mrb[75].mxu1 }
0x1d02   : > { %v10324_v55 = vpop.f32.mrb[76].mxu1 }
0x1d03   : > { %v10326_v35 = vpop.f32.mrb[77].mxu1 }
0x1d04   : > { %v10328_v32 = vpop.f32.mrb[78].mxu1 }
0x1d05   : > { %v10332_v30 = vpop.f32.mrb[79].mxu1 }
0x1d0a   : > { %v6847_v54 = vpop.f32.mrb[80].mxu1 }
0x1d0b   : > { %v4582_v48 = vpop.f32.mrb[81].mxu1  ;;  %v4591_v7 = vadd.f32 %v6847_v54, %v6302_v20  ;;  %v6307_v20 = vld [vmem:[%s11377_s4 + $0x1f8] sm:$0xff] }
0x1d0c   : > { %v4583_v49 = vadd.f32 %v6300_v42, %v4582_v48  ;;  %v6848_v6 = vpop.f32.mrb[82].mxu1 }
0x1d0d   : > { %v4585_v63 = vpop.f32.mrb[83].mxu1  ;;  %v4594_v0 = vadd.f32 %v6848_v6, %v6303_v37  ;;  %v6305_v37 = vld [vmem:[%s11377_s4 + $0x1e8] sm:$0xff]  ;;  %v4619_v54 = vsel %vm831_vm2, %v4591_v7, -inf }
0x1d0e   : > { %v4586_v3 = vadd.f32 %v6301_v39, %v4585_v63  ;;  %v4613_v8 = vsel %vm831_vm2, %v4583_v49, -inf }
0x1d0f   : > { %4614 = vmax.xlane.f32.xlu1 %v4613_v8  ;;  %v4622_v48 = vsel %vm831_vm2, %v4594_v0, -inf }
0x1d10   : > { %v4616_v50 = vsel %vm831_vm2, %v4586_v3, -inf }
0x1d11   : > { %4617 = vmax.xlane.f32.xlu0 %v4616_v50  ;;  %v6306_v50 = vld [vmem:[%s11377_s4 + $0x1f0] sm:$0xff] }
0x1d12   : > { %v6851_v42 = vpop.f32.mrb[84].mxu1 }
0x1d13   : > { %4623 = vmax.xlane.f32.xlu1 %v4622_v48  ;;  %v4598_v51 = vpop.f32.mrb[85].mxu1  ;;  %v4607_v48 = vadd.f32 %v6851_v42, %v6306_v50 }
0x1d14   : > { %v4599_v39 = vadd.f32 %v6304_v59, %v4598_v51  ;;  %v6852_v6 = vpop.f32.mrb[86].mxu1 }
0x1d15   : > { %4620 = vmax.xlane.f32.xlu0 %v4619_v54  ;;  %v4601_v63 = vpop.f32.mrb[87].mxu1  ;;  %v4610_v4 = vadd.f32 %v6852_v6, %v6307_v20  ;;  %v4631_v25 = vsel %vm831_vm2, %v4607_v48, -inf }
0x1d16   : > { %v4602_v8 = vadd.f32 %v6305_v37, %v4601_v63  ;;  %v4625_v59 = vsel %vm831_vm2, %v4599_v39, -inf }
0x1d17   : > { %v4634_v51 = vsel %vm831_vm2, %v4610_v4, -inf }
0x1d18   : > { %v4628_v36 = vsel %vm831_vm2, %v4602_v8, -inf }
0x1d19   : > { %4629 = vmax.xlane.f32.xlu1 %v4628_v36  ;;  %4626 = vmax.xlane.f32.xlu0 %v4625_v59 }
0x1d1d   : > { %4635 = vmax.xlane.f32.xlu1 %v4634_v51  ;;  %4632 = vmax.xlane.f32.xlu0 %v4631_v25 }
0x1d2e   : > { %4707 = vrot.lane.b32.xlu1 %v9944_v41, %s7777_s13 }
0x1d33   : > { %4705 = vrot.lane.b32.xlu0 %v9946_v34, %s7777_s13 }
0x1d9c   : > { %v4615_v42 = vpop.xlane.xlu1 %4614 }
0x1d9d   : > { %v4637_v50 = vsub.f32 %v4583_v49, %v4615_v42 }
0x1d9e   : > { %v4618_v37 = vpop.xlane.xlu0 %4617 }
0x1d9f   : > { %v4638_v6 = vsub.f32 %v4586_v3, %v4618_v37  ;;  %v4645_v29 = vmul.f32 1.442695, %v4637_v50 }
0x1da0   : > { %v4624_v54 = vpop.xlane.xlu1 %4623 }
0x1da1   : > { %v4640_v20 = vsub.f32 %v4594_v0, %v4624_v54  ;;  %v4647_v36 = vmul.f32 1.442695, %v4638_v6 }
0x1da2   : > { %v4621_v63 = vpop.xlane.xlu0 %4620 }
0x1da3   : > { %v4651_v59 = vmul.f32 1.442695, %v4640_v20  ;;  %v4639_v19 = vsub.f32 %v4591_v7, %v4621_v63 }
0x1da5   : > { %7507 = vpow2.f32 %v4651_v59  ;;  %v4649_v51 = vmul.f32 1.442695, %v4639_v19 }
0x1da6   : > { %7509 = vpow2.f32 %v4647_v36  ;;  %v4627_v25 = vpop.xlane.xlu0 %4626  ;;  %v4630_v13 = vpop.xlane.xlu1 %4629 }
0x1da7   : > { %7511 = vpow2.f32 %v4649_v51  ;;  %v4641_v41 = vsub.f32 %v4599_v39, %v4627_v25  ;;  %v4642_v34 = vsub.f32 %v4602_v8, %v4630_v13 }
0x1da8   : > { %7513 = vpow2.f32 %v4645_v29 }
0x1da9   : > { %v4653_v49 = vmul.f32 1.442695, %v4641_v41  ;;  %v4655_v6 = vmul.f32 1.442695, %v4642_v34  ;;  %v11699_v41 = vpack.i.bf16 %v10214_v2, %v10208_v1  ;;  %v11701_v34 = vpack.i.bf16 %v10320_v33, %v10314_v45 }
0x1daa   : > { %v4633_v27 = vpop.xlane.xlu0 %4632  ;;  %v4636_v5 = vpop.xlane.xlu1 %4635  ;;  %v11704_v1 = vpack.i.bf16 %v10316_v16, %v10312_v15 }
0x1dab   : > { %v4643_v3 = vsub.f32 %v4607_v48, %v4633_v27  ;;  %v4644_v37 = vsub.f32 %v4610_v4, %v4636_v5 }
0x1dad   : > { %v4657_v0 = vmul.f32 1.442695, %v4643_v3  ;;  %v4659_v42 = vmul.f32 1.442695, %v4644_v37  ;;  %v11702_v3 = vpack.i.bf16 %v10210_v47, %v10206_v43 }
0x1dae   : > { %v4706_v54 = vpop.permute.xlu0 %4705  ;;  %v4708_v50 = vpop.permute.xlu1 %4707 }
0x1daf   : > { %v10372_v7 = vpop.eup %7507  ;;  %7515 = vpow2.f32 %v4657_v0  ;;  %6853 = vmatprep.subr.bf16.mxu0 %v4706_v54 }
0x1db0   : > { %v7510_v19 = vpop.eup %7509  ;;  %7517 = vpow2.f32 %v4659_v42  ;;  %6854 = vmatpush3.bf16.msra.mxu0 %v4706_v54  ;;  %v4670_v29 = vsel %vm831_vm2, %v10372_v7, 0.0 }
0x1db1   : > { %v7512_v13 = vpop.eup %7511  ;;  %7519 = vpow2.f32 %v4653_v49  ;;  %4671 = vadd.xlane.f32.xlu1 %v4670_v29  ;;  %6855 = vmatprep.subr.bf16.mxu0 %v4708_v50  ;;  %v4664_v5 = vsel %vm831_vm2, %v7510_v19, 0.0 }
0x1db2   : > { %7521 = vpow2.f32 %v4655_v6  ;;  %v4667_v27 = vsel %vm831_vm2, %v7512_v13, 0.0  ;;  %v7514_v4 = vpop.eup %7513 }
0x1db3   : > { %4668 = vadd.xlane.f32.xlu0 %v4667_v27  ;;  %v4661_v39 = vsel %vm831_vm2, %v7514_v4, 0.0 }
0x1db4   : > { %6856 = vmatpush3.bf16.msra.mxu0 %v4708_v50 }
0x1db5   : > { %4665 = vadd.xlane.f32.xlu1 %v4664_v5 }
0x1db7   : > { %4662 = vadd.xlane.f32.xlu0 %v4661_v39 }
0x1db9   : > { %v7516_v8 = vpop.eup %7515 }
0x1dba   : > { %v7518_v48 = vpop.eup %7517  ;;  %v4679_v20 = vsel %vm831_vm2, %v7516_v8, 0.0 }
0x1dbb   : > { %v7520_v36 = vpop.eup %7519  ;;  %4680 = vadd.xlane.f32.xlu0 %v4679_v20  ;;  %v4682_v63 = vsel %vm831_vm2, %v7518_v48, 0.0 }
0x1dbc   : > { %v7522_v59 = vpop.eup %7521  ;;  %4683 = vadd.xlane.f32.xlu1 %v4682_v63  ;;  %v4673_v51 = vsel %vm831_vm2, %v7520_v36, 0.0 }
0x1dbd   : > { %v4676_v25 = vsel %vm831_vm2, %v7522_v59, 0.0 }
0x1dbf   : > { %4674 = vadd.xlane.f32.xlu0 %v4673_v51 }
0x1dc0   : > { %4677 = vadd.xlane.f32.xlu1 %v4676_v25 }
0x1dd1   : > { %4709 = vrot.lane.b32.xlu1 %v9956_v61, %s7777_s13  ;;  %v11703_v61 = vpack.i.bf16 %v10226_v11, %v10220_v26 }
0x1dd5   : > { %7112 = vrot.lane.b32.xlu1 %v11699_v41, %s11698_s14  ;;  %4711 = vrot.lane.b32.xlu0 %v9954_v24, %s7777_s13  ;;  %v11705_v24 = vpack.i.bf16 %v10222_v53, %v10218_v9  ;;  %s11706_s13 = smov 24  }
0x1dd9   : > { %7122 = vrot.lane.b32.xlu1 %v11701_v34, %s11700_s29  ;;  %7117 = vrot.lane.b32.xlu0 %v11702_v3, %s11698_s14  ;;  %v4915_v34 = vld [vmem:[#allocation2 + $0x20] sm:$0xff]  ;;  %v4916_v3 = vld [vmem:[#allocation2 + $0x28] sm:$0xff] }
0x1ddd   : > { %7132 = vrot.lane.b32.xlu1 %v11703_v61, %s11698_s14  ;;  %7127 = vrot.lane.b32.xlu0 %v11704_v1, %s11700_s29  ;;  %v4923_v61 = vpack.c.bf16 %v4916_v3, %v4915_v34  ;;  %v4918_v1 = vld [vmem:[#allocation2 + $0x38] sm:$0xff] }
0x1de1   : > { %7137 = vrot.lane.b32.xlu0 %v11705_v24, %s11698_s14 }
0x1e3e   : > { %v4672_v2 = vpop.xlane.xlu1 %4671 }
0x1e40   : > { %v4669_v45 = vpop.xlane.xlu0 %4668 }
0x1e42   : > { %v4666_v33 = vpop.xlane.xlu1 %4665 }
0x1e43   : > { %7523 = vrcp.f32 %v4666_v33 }
0x1e44   : > { %v4663_v43 = vpop.xlane.xlu0 %4662 }
0x1e45   : > { %7525 = vrcp.f32 %v4663_v43  ;;  %v11707_v43 = vpack.i.bf16 %v10328_v32, %v10324_v55 }
0x1e46   : > { %7527 = vrcp.f32 %v4669_v45 }
0x1e47   : > { %7529 = vrcp.f32 %v4672_v2 }
0x1e48   : > { %v4681_v47 = vpop.xlane.xlu0 %4680 }
0x1e49   : > { %v4684_v26 = vpop.xlane.xlu1 %4683  ;;  %7531 = vrcp.f32 %v4681_v47 }
0x1e4c   : > { %v4675_v11 = vpop.xlane.xlu0 %4674 }
0x1e4d   : > { %v7524_v37 = vpop.eup %7523  ;;  %7533 = vrcp.f32 %v4675_v11  ;;  %v4678_v15 = vpop.xlane.xlu1 %4677 }
0x1e4e   : > { %7535 = vrcp.f32 %v4678_v15  ;;  %v4694_v53 = vmul.f32 %v7524_v37, %v7510_v19 }
0x1e4f   : > { %v7526_v16 = vpop.eup %7525  ;;  %7537 = vrcp.f32 %v4684_v26  ;;  %v11708_v26 = vpack.i.bf16 %v10332_v30, %v10326_v35 }
0x1e50   : > { %v4693_v9 = vmul.f32 %v7526_v16, %v7514_v4  ;;  %v7528_v49 = vpop.eup %7527  ;;  %v4712_v54 = vpop.permute.xlu0 %4711 }
0x1e51   : > { %v4710_v0 = vpop.permute.xlu1 %4709  ;;  %v7530_v6 = vpop.eup %7529  ;;  %v4695_v50 = vmul.f32 %v7528_v49, %v7512_v13 }
0x1e52   : > { %6857 = vmatprep.subr.bf16.mxu0 %v4710_v0  ;;  %v4701_v42 = vpack.c.bf16 %v4694_v53, %v4693_v9  ;;  %v4696_v27 = vmul.f32 %v7530_v6, %v10372_v7  ;;  %v4917_v7 = vld [vmem:[#allocation2 + $0x30] sm:$0xff] }
0x1e53   : > { %6858 = vmatpush3.bf16.msra.mxu0 %v4710_v0  ;;  %v7532_v29 = vpop.eup %7531  ;;  %v4924_v24 = vpack.c.bf16 %v4918_v1, %v4917_v7 }
0x1e54   : > { %6859 = vmatprep.subr.bf16.mxu0 %v4712_v54  ;;  %6861 = vmatprep.mubr.msk.bf16.mxu0 %vm831_vm2, %v4701_v42  ;;  %v4702_v20 = vpack.c.bf16 %v4696_v27, %v4695_v50  ;;  %v4699_v25 = vmul.f32 %v7532_v29, %v7516_v8  ;;  %v7118_v9 = vpop.permute.xlu0 %7117 }
0x1e55   : > { %v7113_v53 = vpop.permute.xlu1 %7112  ;;  %v7120_v55 = vunpack.i.h.bf16 %v7118_v9  ;;  %v7119_v32 = vunpack.i.l.bf16 %v7118_v9 }
0x1e56   : > { %v7115_v42 = vunpack.i.h.bf16 %v7113_v53 }
0x1e57   : > { %v7534_v5 = vpop.eup %7533  ;;  %6860 = vmatpush3.bf16.msra.mxu0 %v4712_v54  ;;  %v7114_v54 = vunpack.i.l.bf16 %v7113_v53 }
0x1e58   : > { %v7536_v39 = vpop.eup %7535  ;;  %v4697_v4 = vmul.f32 %v7534_v5, %v7520_v36  ;;  %6869 = vmatprep.subr.bf16.mxu0 %v4923_v61  ;;  %v7128_v49 = vpop.permute.xlu0 %7127  ;;  %v4893_v5 = vsel %vm741_vm1, %v10090_v18, %v7120_v55 }
0x1e59   : > { %v7538_v19 = vpop.eup %7537  ;;  %v4698_v63 = vmul.f32 %v7536_v39, %v7522_v59  ;;  %v7123_v0 = vpop.permute.xlu1 %7122  ;;  %v7129_v50 = vunpack.i.l.bf16 %v7128_v49  ;;  %v7130_v30 = vunpack.i.h.bf16 %v7128_v49  ;;  %v4892_v39 = vsel %vm741_vm1, %v10086_v17, %v7119_v32 }
0x1e5a   : > { %6862 = vmatmul.mubr.msk.bf16.vlgmr.msra.gmra.mrb[72].mxu0 %vm831_vm2, %v4702_v20  ;;  %v4700_v41 = vmul.f32 %v7538_v19, %v7518_v48  ;;  %v7124_v29 = vunpack.i.l.bf16 %v7123_v0  ;;  %v7125_v27 = vunpack.i.h.bf16 %v7123_v0  ;;  %v4891_v20 = vsel %vm741_vm1, %v10092_v12, %v7115_v42 }
0x1e5b   : > { %v4703_v51 = vpack.c.bf16 %v4698_v63, %v4697_v4  ;;  %6870 = vmatpush3.bf16.msra.mxu0 %v4923_v61  ;;  %v4890_v19 = vsel %vm741_vm1, %v10088_v14, %v7114_v54  ;;  %v4900_v63 = vsel %vm2002_vm3, %v4892_v39, %v7129_v50 }
0x1e5c   : > { %v4704_v13 = vpack.c.bf16 %v4700_v41, %v4699_v25  ;;  %6871 = vmatprep.subr.bf16.mxu0 %v4924_v24  ;;  %v7138_v6 = vpop.permute.xlu0 %7137  ;;  %v4898_v34 = vsel %vm2002_vm3, %v4890_v19, %v7124_v29  ;;  %v4899_v17 = vsel %vm2002_vm3, %v4891_v20, %v7125_v27  ;;  %v6321_v27 = vld [vmem:[%s11379_s6 + $0x1] ss:$0 sm:$0xff] }
0x1e5d   : > { %6865 = vmatprep.mubr.msk.bf16.mxu0 %vm831_vm2, %v4703_v51  ;;  %v7133_v35 = vpop.permute.xlu1 %7132  ;;  %v7140_v7 = vunpack.i.h.bf16 %v7138_v6  ;;  %v7139_v1 = vunpack.i.l.bf16 %v7138_v6 }
0x1e5f   : > { %6872 = vmatpush3.bf16.msra.mxu0 %v4924_v24 }
0x1e62   : > { %6866 = vmatmul.mubr.msk.bf16.gmra.mrb[76].mxu0 %vm831_vm2, %v4704_v13  ;;  %v4901_v13 = vsel %vm2002_vm3, %v4893_v5, %v7130_v30 }
0x1f2d   : > { %v6863_v36 = vpop.f32.mrb[72].mxu0 }
0x1f2e   : > { %v4763_v59 = vpop.f32.mrb[73].mxu0 }
0x1f2f   : > { %v6864_v2 = vpop.f32.mrb[74].mxu0 }
0x1f30   : > { %v7141_v8 = vpack.i.bf16 %v6864_v2, %v6863_v36  ;;  %v4766_v48 = vpop.f32.mrb[75].mxu0  ;;  %v7135_v2 = vunpack.i.h.bf16 %v7133_v35 }
0x1f31   : > { %v7146_v45 = vpack.i.bf16 %v4766_v48, %v4763_v59 }
0x1f32   : > { %7142 = vrot.lane.b32.xlu0 %v7141_v8, %s11706_s13  ;;  %v7134_v8 = vunpack.i.l.bf16 %v7133_v35 }
0x1f33   : > { %7147 = vrot.lane.b32.xlu1 %v7146_v45, %s11706_s13 }
0x1f34   : > { %v4894_v9 = vsel %vm741_vm1, %v10096_v56, %v7134_v8 }
0x1f35   : > { %v6867_v33 = vpop.f32.mrb[76].mxu0 }
0x1f36   : > { %7157 = vrot.lane.b32.xlu0 %v11707_v43, %s11700_s29  ;;  %v4779_v47 = vpop.f32.mrb[77].mxu0 }
0x1f37   : > { %7152 = vrot.lane.b32.xlu1 %v11708_v26, %s11700_s29  ;;  %v6868_v11 = vpop.f32.mrb[78].mxu0 }
0x1f38   : > { %v7166_v37 = vpack.i.bf16 %v6868_v11, %v6867_v33  ;;  %v4782_v15 = vpop.f32.mrb[79].mxu0  ;;  %v4897_v11 = vsel %vm741_vm1, %v10098_v22, %v7140_v7 }
0x1f39   : > { %v7161_v16 = vpack.i.bf16 %v4782_v15, %v4779_v47 }
0x1f3a   : > { %7167 = vrot.lane.b32.xlu0 %v7166_v37, %s11706_s13  ;;  %v4896_v37 = vsel %vm741_vm1, %v10094_v62, %v7139_v1 }
0x1f3b   : > { %7162 = vrot.lane.b32.xlu1 %v7161_v16, %s11706_s13  ;;  %v4895_v16 = vsel %vm741_vm1, %v10100_v23, %v7135_v2 }
0x1fa4   : > { %v7143_v4 = vpop.permute.xlu0 %7142 }
0x1fa5   : > { %v7145_v51 = vunpack.i.h.bf16 %v7143_v4  ;;  %v7144_v25 = vunpack.i.l.bf16 %v7143_v4  ;;  %v7148_v41 = vpop.permute.xlu1 %7147 }
0x1fa6   : > { %v7150_v18 = vunpack.i.h.bf16 %v7148_v41  ;;  %v7149_v3 = vunpack.i.l.bf16 %v7148_v41 }
0x1fa7   : > { %v4909_v12 = vsel %vm2011_vm4, %v4901_v13, %v7145_v51  ;;  %v4908_v61 = vsel %vm2011_vm4, %v4900_v63, %v7144_v25 }
0x1fa8   : > { %v4920_v14 = vpack.c.bf16 %v4909_v12, %v4908_v61  ;;  %v4906_v24 = vsel %vm2011_vm4, %v4898_v34, %v7149_v3  ;;  %v4907_v36 = vsel %vm2011_vm4, %v4899_v17, %v7150_v18  ;;  %v7158_v59 = vpop.permute.xlu0 %7157 }
0x1fa9   : > { %v4919_v48 = vpack.c.bf16 %v4907_v36, %v4906_v24  ;;  %v7153_v45 = vpop.permute.xlu1 %7152  ;;  %v7160_v33 = vunpack.i.h.bf16 %v7158_v59  ;;  %v7159_v43 = vunpack.i.l.bf16 %v7158_v59 }
0x1faa   : > { %v7155_v47 = vunpack.i.h.bf16 %v7153_v45  ;;  %v7154_v26 = vunpack.i.l.bf16 %v7153_v45 }
0x1fab   : > { %6873 = vmatprep.mubr.msk.bf16.mxu0 %vm517_vm0, %v4919_v48  ;;  %v4905_v55 = vsel %vm2002_vm3, %v4897_v11, %v7160_v33  ;;  %v4904_v32 = vsel %vm2002_vm3, %v4896_v37, %v7159_v43 }
0x1fac   : > { %v7168_v15 = vpop.permute.xlu0 %7167  ;;  %6874 = vmatmul.mubr.msk.bf16.vlgmr.msra.gmra.mrb[80].mxu0 %vm517_vm0, %v4920_v14  ;;  %v4902_v62 = vsel %vm2002_vm3, %v4894_v9, %v7154_v26  ;;  %v4903_v6 = vsel %vm2002_vm3, %v4895_v16, %v7155_v47 }
0x1fad   : > { %v7170_v53 = vunpack.i.h.bf16 %v7168_v15  ;;  %v7169_v49 = vunpack.i.l.bf16 %v7168_v15  ;;  %v7163_v0 = vpop.permute.xlu1 %7162 }
0x1fae   : > { %v7165_v22 = vunpack.i.h.bf16 %v7163_v0  ;;  %v7164_v42 = vunpack.i.l.bf16 %v7163_v0 }
0x1faf   : > { %v4913_v54 = vsel %vm2011_vm4, %v4905_v55, %v7170_v53  ;;  %v4912_v23 = vsel %vm2011_vm4, %v4904_v32, %v7169_v49 }
0x1fb0   : > { %v4922_v50 = vpack.c.bf16 %v4913_v54, %v4912_v23  ;;  %v4910_v56 = vsel %vm2011_vm4, %v4902_v62, %v7164_v42  ;;  %v4911_v35 = vsel %vm2011_vm4, %v4903_v6, %v7165_v22 }
0x1fb1   : > { %v4921_v30 = vpack.c.bf16 %v4911_v35, %v4910_v56 }
0x1fb3   : > { %6877 = vmatprep.mubr.msk.bf16.mxu0 %vm517_vm0, %v4921_v30 }
0x1fb4   : > { %6878 = vmatmul.mubr.msk.bf16.gmra.mrb[84].mxu0 %vm517_vm0, %v4922_v50 }
0x207f   : > { %v6875_v29 = vpop.f32.mrb[80].mxu0 }
0x2080   : > { %v4971_v5 = vpop.f32.mrb[81].mxu0  ;;  %v5004_v4 = vadd.f32 %v6875_v29, %v9841_v52 }
0x2081   : > { %v5002_v39 = vadd.f32 %v4971_v5, %v9832_v46  ;;  %v6876_v20 = vpop.f32.mrb[82].mxu0 }
0x2082   : > { %v5005_v19 = vadd.f32 %v6876_v20, %v9835_v40  ;;  %v4974_v63 = vpop.f32.mrb[83].mxu0  ;;  %v10479_v18 = vadd.f32 %v6321_v27, %v5004_v4 }
0x2083   : > { %v10470_v51 = vadd.f32 %v6321_v27, %v5002_v39  ;;  %v5003_v25 = vadd.f32 %v4974_v63, %v9837_v10 }
0x2084   : > { %v10473_v41 = vadd.f32 %v6321_v27, %v5005_v19  ;;  %11712 = vst [vmem:[#allocation64_spill] sm:$0xff] %v10479_v18  ;;  %v5032_v12 = vsel %vm517_vm0, %v10479_v18, 0.0 }
0x2085   : > { %11709 = vst [vmem:[#allocation80_spill] sm:$0xff] %v10470_v51  ;;  %v10475_v13 = vadd.f32 %v6321_v27, %v5003_v25  ;;  %v5026_v34 = vsel %vm517_vm0, %v10470_v51, 0.0 }
0x2086   : > { %11710 = vst [vmem:[#allocation86_spill] sm:$0xff] %v10473_v41  ;;  %5027 = vadd.xlane.f32.xlu1 %v5026_v34  ;;  %v5035_v10 = vsel %vm517_vm0, %v10473_v41, 0.0 }
0x2087   : > { %11711 = vst [vmem:[#allocation31_spill] sm:$0xff] %v10475_v13  ;;  %v6879_v46 = vpop.f32.mrb[84].mxu0  ;;  %v5029_v52 = vsel %vm517_vm0, %v10475_v13, 0.0 }
0x2088   : > { %5030 = vadd.xlane.f32.xlu0 %v5029_v52  ;;  %v4987_v40 = vpop.f32.mrb[85].mxu0  ;;  %v5008_v61 = vadd.f32 %v6879_v46, %v9857_v57 }
0x2089   : > { %v5006_v3 = vadd.f32 %v4987_v40, %v9851_v28  ;;  %v6880_v17 = vpop.f32.mrb[86].mxu0 }
0x208a   : > { %5036 = vadd.xlane.f32.xlu1 %v5035_v10  ;;  %v4990_v7 = vpop.f32.mrb[87].mxu0  ;;  %v5009_v14 = vadd.f32 %v6880_v17, %v9859_v58  ;;  %v10495_v28 = vadd.f32 %v6321_v27, %v5008_v61  ;;  %v5132_v17 = vld [vmem:[#allocation4 + $0x28] sm:$0xff]  ;;  %v5133_v10 = vld [vmem:[#allocation4 + $0x30] sm:$0xff] }
0x208b   : > { %v10489_v1 = vadd.f32 %v6321_v27, %v5006_v3  ;;  %v5007_v24 = vadd.f32 %v4990_v7, %v9855_v31  ;;  %v5131_v3 = vld [vmem:[#allocation4 + $0x20] sm:$0xff] }
0x208c   : > { %5033 = vadd.xlane.f32.xlu0 %v5032_v12  ;;  %11715 = vst [vmem:[#allocation81_spill] sm:$0xff] %v10495_v28  ;;  %v10497_v59 = vadd.f32 %v6321_v27, %v5009_v14  ;;  %v5044_v57 = vsel %vm517_vm0, %v10495_v28, 0.0  ;;  %v5139_v7 = vpack.c.bf16 %v5132_v17, %v5131_v3  ;;  %v5134_v12 = vld [vmem:[#allocation4 + $0x38] sm:$0xff] }
0x208d   : > { %11713 = vst [vmem:[#allocation85_spill] sm:$0xff] %v10489_v1  ;;  %v10493_v36 = vadd.f32 %v6321_v27, %v5007_v24  ;;  %v5038_v2 = vsel %vm517_vm0, %v10489_v1, 0.0  ;;  %v5140_v61 = vpack.c.bf16 %v5134_v12, %v5133_v10  ;;  %v6336_v12 = vld [vmem:[%s11384_s11 + $0xa0] sm:$0xff] }
0x208e   : > { %11716 = vst [vmem:[#allocation57_spill] sm:$0xff] %v10497_v59  ;;  %v5047_v31 = vsel %vm517_vm0, %v10497_v59, 0.0  ;;  %6881 = vmatprep.subr.bf16.mxu1 %v5139_v7 }
0x208f   : > { %11714 = vst [vmem:[#allocation52_spill] sm:$0xff] %v10493_v36  ;;  %v5041_v8 = vsel %vm517_vm0, %v10493_v36, 0.0  ;;  %6882 = vmatpush3.bf16.msra.mxu1 %v5139_v7 }
0x2090   : > { %5039 = vadd.xlane.f32.xlu0 %v5038_v2  ;;  %5042 = vadd.xlane.f32.xlu1 %v5041_v8 }
0x2091   : > { %6883 = vmatprep.subr.bf16.mxu1 %v5140_v61 }
0x2093   : > { %6884 = vmatpush3.bf16.msra.mxu1 %v5140_v61  ;;  %v6337_v61 = vld [vmem:[%s11384_s11 + $0xa8] sm:$0xff] }
0x2094   : > { %5045 = vadd.xlane.f32.xlu0 %v5044_v57  ;;  %5048 = vadd.xlane.f32.xlu1 %v5047_v31 }
0x2113   : > { %v5028_v58 = vpop.xlane.xlu1 %5027 }
0x2114   : > { %v5050_v48 = vmul.f32 0.03125, %v5028_v58 }
0x2115   : > { %v5031_v45 = vpop.xlane.xlu0 %5030 }
0x2116   : > { %v10508_v33 = vsub.f32 %v10470_v51, %v5050_v48  ;;  %v5051_v43 = vmul.f32 0.03125, %v5031_v45 }
0x2117   : > { %v5037_v47 = vpop.xlane.xlu1 %5036 }
0x2118   : > { %v10511_v26 = vsub.f32 %v10475_v13, %v5051_v43  ;;  %v5053_v11 = vmul.f32 0.03125, %v5037_v47  ;;  %v5066_v37 = vmul.f32 %v10508_v33, %v10508_v33 }
0x2119   : > { %v5034_v15 = vpop.xlane.xlu0 %5033 }
0x211a   : > { %v10516_v16 = vsub.f32 %v10473_v41, %v5053_v11  ;;  %v5052_v9 = vmul.f32 0.03125, %v5034_v15  ;;  %v5074_v53 = vsel %vm517_vm0, %v5066_v37, 0.0  ;;  %v5067_v49 = vmul.f32 %v10511_v26, %v10511_v26 }
0x211b   : > { %5075 = vadd.xlane.f32.xlu0 %v5074_v53 }
0x211c   : > { %v10522_v0 = vsub.f32 %v10479_v18, %v5052_v9  ;;  %v5077_v55 = vsel %vm517_vm0, %v5067_v49, 0.0  ;;  %v5069_v32 = vmul.f32 %v10516_v16, %v10516_v16 }
0x211d   : > { %v5040_v22 = vpop.xlane.xlu0 %5039  ;;  %5078 = vadd.xlane.f32.xlu1 %v5077_v55  ;;  %v5043_v42 = vpop.xlane.xlu1 %5042 }
0x211e   : > { %v5054_v62 = vmul.f32 0.03125, %v5040_v22  ;;  %v5055_v6 = vmul.f32 0.03125, %v5043_v42  ;;  %v5068_v54 = vmul.f32 %v10522_v0, %v10522_v0  ;;  %v5083_v35 = vsel %vm517_vm0, %v5069_v32, 0.0 }
0x2120   : > { %v10530_v23 = vsub.f32 %v10489_v1, %v5054_v62  ;;  %v10533_v50 = vsub.f32 %v10493_v36, %v5055_v6  ;;  %v5080_v56 = vsel %vm517_vm0, %v5068_v54, 0.0 }
0x2121   : > { %5081 = vadd.xlane.f32.xlu0 %v5080_v56  ;;  %v5046_v30 = vpop.xlane.xlu0 %5045  ;;  %5084 = vadd.xlane.f32.xlu1 %v5083_v35  ;;  %v5049_v29 = vpop.xlane.xlu1 %5048 }
0x2122   : > { %v5056_v27 = vmul.f32 0.03125, %v5046_v30  ;;  %v5057_v5 = vmul.f32 0.03125, %v5049_v29  ;;  %v5070_v39 = vmul.f32 %v10530_v23, %v10530_v23  ;;  %v5071_v20 = vmul.f32 %v10533_v50, %v10533_v50 }
0x2124   : > { %v10542_v4 = vsub.f32 %v10495_v28, %v5056_v27  ;;  %v10545_v19 = vsub.f32 %v10497_v59, %v5057_v5  ;;  %v5086_v63 = vsel %vm517_vm0, %v5070_v39, 0.0  ;;  %v5089_v25 = vsel %vm517_vm0, %v5071_v20, 0.0 }
0x2125   : > { %5087 = vadd.xlane.f32.xlu0 %v5086_v63  ;;  %5090 = vadd.xlane.f32.xlu1 %v5089_v25 }
0x2126   : > { %v5072_v34 = vmul.f32 %v10542_v4, %v10542_v4  ;;  %v5073_v46 = vmul.f32 %v10545_v19, %v10545_v19 }
0x2128   : > { %v5092_v52 = vsel %vm517_vm0, %v5072_v34, 0.0  ;;  %v5095_v40 = vsel %vm517_vm0, %v5073_v46, 0.0 }
0x2129   : > { %5093 = vadd.xlane.f32.xlu0 %v5092_v52  ;;  %5096 = vadd.xlane.f32.xlu1 %v5095_v40 }
0x21a8   : > { %v5076_v14 = vpop.xlane.xlu0 %5075 }
0x21a9   : > { %v5098_v24 = vmul.f32 0.03125, %v5076_v14  ;;  %v5953_v14 = vpack.c.bf16 %v6337_v61, %v6336_v12  ;;  %v11719_v61 = vld [vmem:[#allocation50_spill] sm:$0xff] }
0x21aa   : > { %v5079_v2 = vpop.xlane.xlu1 %5078 }
0x21ab   : > { %v5106_v8 = vadd.f32 1e-05, %v5098_v24  ;;  %v5099_v57 = vmul.f32 0.03125, %v5079_v2  ;;  %v6338_v24 = vld [vmem:[%s11384_s11 + $0xb0] sm:$0xff]  ;;  %v6339_v2 = vld [vmem:[%s11384_s11 + $0xb8] sm:$0xff] }
0x21ad   : > { %7539 = vrsqrt.f32 %v5106_v8  ;;  %v5107_v31 = vadd.f32 1e-05, %v5099_v57  ;;  %v5954_v8 = vpack.c.bf16 %v6339_v2, %v6338_v24  ;;  %v6340_v57 = vld [vmem:[%s11384_s11 + $0xc0] sm:$0xff] }
0x21ae   : > { %v5082_v58 = vpop.xlane.xlu0 %5081  ;;  %v5085_v48 = vpop.xlane.xlu1 %5084 }
0x21af   : > { %7541 = vrsqrt.f32 %v5107_v31  ;;  %v5100_v45 = vmul.f32 0.03125, %v5082_v58  ;;  %v5101_v43 = vmul.f32 0.03125, %v5085_v48  ;;  %v6341_v31 = vld [vmem:[%s11384_s11 + $0xc8] sm:$0xff]  ;;  %v6342_v48 = vld [vmem:[%s11384_s11 + $0xd0] sm:$0xff] }
0x21b0   : > { %v5955_v58 = vpack.c.bf16 %v6341_v31, %v6340_v57 }
0x21b1   : > { %v5108_v47 = vadd.f32 1e-05, %v5100_v45  ;;  %v5109_v11 = vadd.f32 1e-05, %v5101_v43  ;;  %v6343_v45 = vld [vmem:[%s11384_s11 + $0xd8] sm:$0xff] }
0x21b2   : > { %v5088_v37 = vpop.xlane.xlu0 %5087  ;;  %v5091_v15 = vpop.xlane.xlu1 %5090  ;;  %v5956_v43 = vpack.c.bf16 %v6343_v45, %v6342_v48 }
0x21b3   : > { %7543 = vrsqrt.f32 %v5108_v47  ;;  %v5102_v9 = vmul.f32 0.03125, %v5088_v37  ;;  %v5103_v53 = vmul.f32 0.03125, %v5091_v15  ;;  %v6344_v47 = vld [vmem:[%s11384_s11 + $0xe0] sm:$0xff]  ;;  %v6346_v15 = vld [vmem:[%s11384_s11 + $0xf0] sm:$0xff] }
0x21b4   : > { %7545 = vrsqrt.f32 %v5109_v11  ;;  %v6345_v11 = vld [vmem:[%s11384_s11 + $0xe8] sm:$0xff] }
0x21b5   : > { %v5110_v49 = vadd.f32 1e-05, %v5102_v9  ;;  %v5111_v55 = vadd.f32 1e-05, %v5103_v53  ;;  %v5957_v37 = vpack.c.bf16 %v6345_v11, %v6344_v47  ;;  %v6347_v9 = vld [vmem:[%s11384_s11 + $0xf8] sm:$0xff] }
0x21b6   : > { %v5094_v32 = vpop.xlane.xlu0 %5093  ;;  %v5097_v22 = vpop.xlane.xlu1 %5096  ;;  %v5958_v53 = vpack.c.bf16 %v6347_v9, %v6346_v15 }
0x21b7   : > { %v7540_v42 = vpop.eup %7539  ;;  %7547 = vrsqrt.f32 %v5110_v49  ;;  %v5104_v62 = vmul.f32 0.03125, %v5094_v32  ;;  %v5105_v6 = vmul.f32 0.03125, %v5097_v22  ;;  %v10615_v49 = vld [vmem:[#allocation6 + $0x1] ss:$0 sm:$0xff] }
0x21b8   : > { %7549 = vrsqrt.f32 %v5111_v55  ;;  %v5122_v30 = vmul.f32 %v7540_v42, %v10508_v33 }
0x21b9   : > { %v7542_v54 = vpop.eup %7541  ;;  %v5112_v56 = vadd.f32 1e-05, %v5104_v62  ;;  %v5113_v35 = vadd.f32 1e-05, %v5105_v6 }
0x21ba   : > { %v5123_v29 = vmul.f32 %v7542_v54, %v10511_v26 }
0x21bb   : > { %7551 = vrsqrt.f32 %v5112_v56 }
0x21bc   : > { %7553 = vrsqrt.f32 %v5113_v35  ;;  %v5135_v27 = vpack.c.bf16 %v5123_v29, %v5122_v30 }
0x21bd   : > { %v7544_v5 = vpop.eup %7543 }
0x21be   : > { %v7546_v39 = vpop.eup %7545  ;;  %v5124_v20 = vmul.f32 %v7544_v5, %v10522_v0  ;;  %6885 = vmatprep.mubr.msk.bf16.mxu1 %vm517_vm0, %v5135_v27 }
0x21bf   : > { %v5125_v63 = vmul.f32 %v7546_v39, %v10516_v16  ;;  %v6332_v16 = vld [vmem:[%s11384_s11 + $0x80] sm:$0xff] }
0x21c1   : > { %v7548_v25 = vpop.eup %7547  ;;  %v5136_v34 = vpack.c.bf16 %v5125_v63, %v5124_v20  ;;  %v6327_v20 = vld [vmem:[%s11382_s9 + $0xc] sm:$0x7] }
0x21c2   : > { %v7550_v46 = vpop.eup %7549  ;;  %v5126_v52 = vmul.f32 %v7548_v25, %v10530_v23  ;;  %v6333_v23 = vld [vmem:[%s11384_s11 + $0x88] sm:$0xff] }
0x21c3   : > { %6886 = vmatmul.mubr.msk.bf16.vlgmr.msra.gmra.mrb[88].mxu1 %vm517_vm0, %v5136_v34  ;;  %v5127_v33 = vmul.f32 %v7550_v46, %v10533_v50  ;;  %v6334_v50 = vld [vmem:[%s11384_s11 + $0x90] sm:$0xff] }
0x21c4   : > { %v6328_v46 = vld [vmem:[%s11382_s9 + $0x10] sm:$0x7] }
0x21c5   : > { %v7552_v26 = vpop.eup %7551  ;;  %v5137_v40 = vpack.c.bf16 %v5127_v33, %v5126_v52 }
0x21c6   : > { %v7554_v3 = vpop.eup %7553  ;;  %v5128_v17 = vmul.f32 %v7552_v26, %v10542_v4  ;;  %v5951_v4 = vpack.c.bf16 %v6333_v23, %v6332_v16  ;;  %v11717_v16 = vld [vmem:[#allocation48_spill] sm:$0xff] }
0x21c7   : > { %6889 = vmatprep.mubr.msk.bf16.mxu1 %vm517_vm0, %v5137_v40  ;;  %v5129_v0 = vmul.f32 %v7554_v3, %v10545_v19  ;;  %v6335_v19 = vld [vmem:[%s11384_s11 + $0x98] sm:$0xff]  ;;  %v10639_v23 = vrot.slane %v6328_v46, %v11717_v16 }
0x21c8   : > { %v5952_v7 = vpack.c.bf16 %v6335_v19, %v6334_v50  ;;  %6893 = vmatprep.subr.bf16.mxu0 %v5951_v4  ;;  %v10642_v50 = vrot.slane %v6327_v20, %v11717_v16 }
0x21c9   : > { %v5138_v10 = vpack.c.bf16 %v5129_v0, %v5128_v17  ;;  %6894 = vmatpush3.bf16.msra.mxu0 %v5951_v4  ;;  %v10635_v17 = vld [vmem:[%s11382_s9 + $0x14] sm:$0x7] }
0x21ca   : > { %6895 = vmatprep.subr.bf16.mxu0 %v5952_v7  ;;  %v10656_v57 = vrot.slane %v10635_v17, %v11717_v16 }
0x21cb   : > { %6890 = vmatmul.mubr.msk.bf16.gmra.mrb[92].mxu1 %vm517_vm0, %v5138_v10 }
0x21cd   : > { %6896 = vmatpush3.bf16.msra.mxu0 %v5952_v7  ;;  %v11718_v7 = vld [vmem:[#allocation51_spill] sm:$0xff] }
0x21ce   : > { %6897 = vmatprep.subr.bf16.mxu0 %v5953_v14  ;;  %v10645_v12 = vrot.slane %v6328_v46, %v11718_v7  ;;  %v10652_v24 = vrot.slane %v10635_v17, %v11718_v7  ;;  %v10665_v45 = vrot.slane %v6327_v20, %v11718_v7 }
0x21d1   : > { %6898 = vmatpush3.bf16.msra.mxu0 %v5953_v14  ;;  %v10648_v14 = vrot.slane %v6328_v46, %v11719_v61 }
0x21d2   : > { %6899 = vmatprep.subr.bf16.mxu0 %v5954_v8 }
0x21d5   : > { %6900 = vmatpush3.bf16.msra.mxu0 %v5954_v8 }
0x21d6   : > { %6901 = vmatprep.subr.bf16.mxu0 %v5955_v58 }
0x21d9   : > { %6902 = vmatpush3.bf16.msra.mxu0 %v5955_v58 }
0x21da   : > { %6903 = vmatprep.subr.bf16.mxu0 %v5956_v43 }
0x21dd   : > { %6904 = vmatpush3.bf16.msra.mxu0 %v5956_v43 }
0x21de   : > { %6905 = vmatprep.subr.bf16.mxu0 %v5957_v37 }
0x21e1   : > { %6906 = vmatpush3.bf16.msra.mxu0 %v5957_v37  ;;  %v10674_v37 = vrot.slane %v6327_v20, %v11719_v61 }
0x21e2   : > { %6907 = vmatprep.subr.bf16.mxu0 %v5958_v53 }
0x21e5   : > { %6908 = vmatpush3.bf16.msra.mxu0 %v5958_v53 }
0x2296   : > { %v6887_v55 = vpop.f32.mrb[88].mxu1 }
0x2297   : > { %v5204_v32 = vadd.f32 %v6887_v55, %v10615_v49  ;;  %v5195_v22 = vpop.f32.mrb[89].mxu1 }
0x2298   : > { %v5196_v42 = vadd.f32 %v10615_v49, %v5195_v22  ;;  %v6888_v62 = vpop.f32.mrb[90].mxu1 }
0x2299   : > { %v5236_v6 = vmul.f32 0.70710677, %v5204_v32  ;;  %v5207_v54 = vadd.f32 %v6888_v62, %v10615_v49  ;;  %v5198_v56 = vpop.f32.mrb[91].mxu1  ;;  %v10676_v15 = vmul.f32 0.5, %v5204_v32 }
0x229a   : > { %v5234_v35 = vmul.f32 0.70710677, %v5196_v42  ;;  %v5199_v27 = vadd.f32 %v10615_v49, %v5198_v56  ;;  %v10688_v56 = vmul.f32 0.5, %v5196_v42 }
0x229b   : > { %v5260_v30 = vand.u32 2147483647, %v5236_v6  ;;  %v10620_v29 = vmul.f32 0.70710677, %v5207_v54  ;;  %vm5244_vm1 = vcmp.ge.f32.partialorder %v5236_v6, 0.0 }
0x229c   : > { %v5258_v5 = vand.u32 2147483647, %v5234_v35  ;;  %v10630_v52 = vmul.f32 0.70710677, %v5199_v27  ;;  %vm5242_vm2 = vcmp.ge.f32.partialorder %v5234_v35, 0.0  ;;  %v10686_v6 = vsel %vm5244_vm1, 1.0, %v11687_v44 }
0x229d   : > { %v5268_v39 = vmul.f32 0.3275911, %v5260_v30  ;;  %v5261_v25 = vand.u32 2147483647, %v10620_v29  ;;  %v5364_v8 = vsub.f32 0.0, %v5260_v30  ;;  %v10694_v35 = vsel %vm5242_vm2, 1.0, %v11687_v44 }
0x229e   : > { %v5266_v63 = vmul.f32 0.3275911, %v5258_v5  ;;  %v6891_v33 = vpop.f32.mrb[92].mxu1  ;;  %v5259_v0 = vand.u32 2147483647, %v10630_v52  ;;  %v5362_v47 = vsub.f32 0.0, %v5258_v5 }
0x229f   : > { %v5276_v34 = vadd.f32 1.0, %v5268_v39  ;;  %v5269_v40 = vmul.f32 0.3275911, %v5261_v25  ;;  %v5211_v3 = vpop.f32.mrb[93].mxu1  ;;  %v10659_v31 = vadd.f32 %v6891_v33, %v10615_v49  ;;  %v5372_v53 = vmul.f32 %v5364_v8, %v5260_v30 }
0x22a0   : > { %v5274_v26 = vadd.f32 1.0, %v5266_v63  ;;  %v6892_v10 = vpop.f32.mrb[94].mxu1  ;;  %v5267_v2 = vmul.f32 0.3275911, %v5259_v0  ;;  %v10662_v58 = vadd.f32 %v10615_v49, %v5211_v3  ;;  %v5365_v55 = vsub.f32 0.0, %v5261_v25 }
0x22a1   : > { %7555 = vrcp.f32 %v5276_v34  ;;  %v5277_v4 = vadd.f32 1.0, %v5269_v40  ;;  %v5214_v19 = vpop.f32.mrb[95].mxu1  ;;  %v10668_v43 = vadd.f32 %v6892_v10, %v10615_v49  ;;  %v10671_v11 = vmul.f32 0.70710677, %v10659_v31 }
0x22a2   : > { %7557 = vrcp.f32 %v5274_v26  ;;  %v5275_v48 = vadd.f32 1.0, %v5267_v2  ;;  %v10679_v9 = vmul.f32 0.70710677, %v10662_v58  ;;  %v10690_v39 = vmul.f32 0.5, %v5207_v54 }
0x22a3   : > { %7559 = vrcp.f32 %v5277_v4  ;;  %v5264_v22 = vand.u32 2147483647, %v10671_v11  ;;  %v10683_v62 = vmul.f32 0.70710677, %v10668_v43  ;;  %v5370_v20 = vmul.f32 %v5362_v47, %v5258_v5 }
0x22a4   : > { %7561 = vrcp.f32 %v5275_v48  ;;  %v5262_v32 = vand.u32 2147483647, %v10679_v9  ;;  %v10696_v30 = vmul.f32 0.5, %v5199_v27  ;;  %vm5245_vm3 = vcmp.ge.f32.partialorder %v10620_v29, 0.0 }
0x22a5   : > { %v5272_v63 = vmul.f32 0.3275911, %v5264_v22  ;;  %v5363_v46 = vsub.f32 0.0, %v5259_v0  ;;  %v10702_v42 = vand.u32 2147483647, %v10683_v62  ;;  %v5373_v3 = vmul.f32 %v5365_v55, %v5261_v25 }
0x22a6   : > { %v5270_v33 = vmul.f32 0.3275911, %v5262_v32  ;;  %v5382_v40 = vmul.f32 1.442695, %v5372_v53  ;;  %v10710_v4 = vadd.f32 %v10615_v49, %v5214_v19  ;;  %v5378_v7 = vmul.f32 1.442695, %v5370_v20 }
0x22a7   : > { %v5280_v10 = vadd.f32 1.0, %v5272_v63  ;;  %v5273_v16 = vmul.f32 0.3275911, %v10702_v42  ;;  %v10713_v2 = vsel %vm5245_vm3, 1.0, %v11687_v44  ;;  %v5371_v47 = vmul.f32 %v5363_v46, %v5259_v0 }
0x22a8   : > { %v5278_v5 = vadd.f32 1.0, %v5270_v33  ;;  %vm5243_vm4 = vcmp.ge.f32.partialorder %v10630_v52, 0.0  ;;  %v5368_v49 = vsub.f32 0.0, %v5264_v22  ;;  %v5384_v63 = vmul.f32 1.442695, %v5373_v3 }
0x22a9   : > { %7563 = vrcp.f32 %v5280_v10  ;;  %v5281_v25 = vadd.f32 1.0, %v5273_v16  ;;  %v10724_v33 = vmul.f32 0.70710677, %v10710_v4  ;;  %vm5248_vm14 = vcmp.ge.f32.partialorder %v10671_v11, 0.0 }
0x22aa   : > { %7565 = vrcp.f32 %v5278_v5  ;;  %v5366_v5 = vsub.f32 0.0, %v5262_v32  ;;  %v5376_v36 = vmul.f32 %v5368_v49, %v5264_v22  ;;  %vm5246_vm15 = vcmp.ge.f32.partialorder %v10679_v9, 0.0 }
0x22ab   : > { %v10698_v34 = vpop.eup %7555  ;;  %7567 = vpow2.f32 %v5382_v40  ;;  %vm5249_vm5 = vcmp.ge.f32.partialorder %v10683_v62, 0.0  ;;  %v5256_v11 = vsel %vm5248_vm14, 1.0, %v11687_v44  ;;  %vm5247_vm6 = vcmp.ge.f32.partialorder %v10724_v33, 0.0 }
0x22ac   : > { %v10704_v54 = vpop.eup %7557  ;;  %v5292_v26 = vmul.f32 1.0614054, %v10698_v34  ;;  %7569 = vrcp.f32 %v5281_v25  ;;  %v10736_v25 = vand.u32 2147483647, %v10724_v33  ;;  %v5374_v22 = vmul.f32 %v5366_v5, %v5262_v32 }
0x22ad   : > { %v5290_v27 = vmul.f32 1.0614054, %v10704_v54  ;;  %v10715_v8 = vpop.eup %7559  ;;  %7571 = vpow2.f32 %v5378_v7  ;;  %v10811_v33 = vmul.f32 0.5, %v10710_v4 }
0x22ae   : > { %v5300_v29 = vadd.f32 -1.4531521, %v5292_v26  ;;  %v5293_v55 = vmul.f32 1.0614054, %v10715_v8  ;;  %v10720_v19 = vpop.eup %7561  ;;  %7573 = vpow2.f32 %v5384_v63  ;;  %v5271_v49 = vmul.f32 0.3275911, %v10736_v25 }
0x22af   : > { %v5298_v48 = vadd.f32 -1.4531521, %v5290_v27  ;;  %v5291_v46 = vmul.f32 1.0614054, %v10720_v19  ;;  %v5380_v27 = vmul.f32 1.442695, %v5371_v47 }
0x22b0   : > { %v5308_v53 = vmul.f32 %v10698_v34, %v5300_v29  ;;  %v5301_v0 = vadd.f32 -1.4531521, %v5293_v55  ;;  %v10740_v55 = vmul.f32 0.5, %v10659_v31 }
0x22b1   : > { %v5306_v20 = vmul.f32 %v10704_v54, %v5298_v48  ;;  %v5299_v40 = vadd.f32 -1.4531521, %v5291_v46  ;;  %v10733_v48 = vsel %vm5243_vm4, 1.0, %v11687_v44  ;;  %7575 = vpow2.f32 %v5380_v27 }
0x22b2   : > { %v5316_v26 = vadd.f32 1.4214138, %v5308_v53  ;;  %v5309_v29 = vmul.f32 %v10715_v8, %v5301_v0  ;;  %v5390_v46 = vmul.f32 1.442695, %v5376_v36  ;;  %v5279_v27 = vadd.f32 1.0, %v5271_v49 }
0x22b3   : > { %v5314_v10 = vadd.f32 1.4214138, %v5306_v20  ;;  %v5307_v53 = vmul.f32 %v10720_v19, %v5299_v40  ;;  %v10743_v63 = vpop.eup %7563  ;;  %v10756_v36 = vrot.slane %v10635_v17, %v11719_v61 }
0x22b4   : > { %v5324_v16 = vmul.f32 %v10698_v34, %v5316_v26  ;;  %v5317_v47 = vadd.f32 1.4214138, %v5309_v29  ;;  %v5296_v31 = vmul.f32 1.0614054, %v10743_v63  ;;  %v5369_v29 = vsub.f32 0.0, %v10702_v42 }
0x22b5   : > { %v5322_v3 = vmul.f32 %v10704_v54, %v5314_v10  ;;  %v5315_v0 = vadd.f32 1.4214138, %v5307_v53  ;;  %v10747_v10 = vpop.eup %7565  ;;  %v5386_v53 = vmul.f32 1.442695, %v5374_v22  ;;  %7577 = vrcp.f32 %v5279_v27 }
0x22b6   : > { %v5332_v7 = vadd.f32 -0.28449672, %v5324_v16  ;;  %v5325_v26 = vmul.f32 %v10715_v8, %v5317_v47  ;;  %v5304_v47 = vadd.f32 -1.4531521, %v5296_v31  ;;  %7579 = vpow2.f32 %v5390_v46 }
0x22b7   : > { %v5330_v20 = vadd.f32 -0.28449672, %v5322_v3  ;;  %v5323_v40 = vmul.f32 %v10720_v19, %v5315_v0  ;;  %v5294_v3 = vmul.f32 1.0614054, %v10747_v10  ;;  %7581 = vpow2.f32 %v5386_v53 }
0x22b8   : > { %v5340_v52 = vmul.f32 %v10698_v34, %v5332_v7  ;;  %v5333_v5 = vadd.f32 -0.28449672, %v5325_v26  ;;  %v7568_v7 = vpop.eup %7567  ;;  %v5312_v13 = vmul.f32 %v10743_v63, %v5304_v47 }
0x22b9   : > { %v5338_v16 = vmul.f32 %v10704_v54, %v5330_v20  ;;  %v10758_v20 = vpop.eup %7569  ;;  %v5302_v26 = vadd.f32 -1.4531521, %v5294_v3 }
0x22ba   : > { %v5348_v32 = vadd.f32 0.2548296, %v5340_v52  ;;  %v5341_v49 = vmul.f32 %v10715_v8, %v5333_v5  ;;  %v5331_v52 = vadd.f32 -0.28449672, %v5323_v40  ;;  %v7572_v28 = vpop.eup %7571 }
0x22bb   : > { %v5346_v59 = vadd.f32 0.2548296, %v5338_v16  ;;  %v5297_v16 = vmul.f32 1.0614054, %v10758_v20  ;;  %v5310_v61 = vmul.f32 %v10747_v10, %v5302_v26  ;;  %v7574_v41 = vpop.eup %7573 }
0x22bc   : > { %v5356_v1 = vmul.f32 %v10698_v34, %v5348_v32  ;;  %v5349_v31 = vadd.f32 0.2548296, %v5341_v49  ;;  %v5339_v17 = vmul.f32 %v10720_v19, %v5331_v52  ;;  %v5320_v32 = vadd.f32 1.4214138, %v5312_v13  ;;  %v7576_v47 = vpop.eup %7575 }
0x22bd   : > { %v5354_v0 = vmul.f32 %v10704_v54, %v5346_v59  ;;  %v5305_v5 = vadd.f32 -1.4531521, %v5297_v16  ;;  %v5318_v54 = vadd.f32 1.4214138, %v5310_v61 }
0x22be   : > { %v5396_v22 = vmul.f32 %v7568_v7, %v5356_v1  ;;  %v5357_v3 = vmul.f32 %v10715_v8, %v5349_v31  ;;  %v5347_v59 = vadd.f32 0.2548296, %v5339_v17  ;;  %v5328_v27 = vmul.f32 %v10743_v63, %v5320_v32 }
0x22bf   : > { %v5394_v34 = vmul.f32 %v7572_v28, %v5354_v0  ;;  %v5313_v1 = vmul.f32 %v10758_v20, %v5305_v5  ;;  %v5367_v7 = vsub.f32 0.0, %v10736_v25  ;;  %v5326_v28 = vmul.f32 %v10747_v10, %v5318_v54 }
0x22c0   : > { %v5404_v40 = vsub.f32 1.0, %v5396_v22  ;;  %v5397_v52 = vmul.f32 %v7574_v41, %v5357_v3  ;;  %v5355_v13 = vmul.f32 %v10720_v19, %v5347_v59  ;;  %v5336_v8 = vadd.f32 -0.28449672, %v5328_v27 }
0x22c1   : > { %v5402_v51 = vsub.f32 1.0, %v5394_v34  ;;  %v5321_v26 = vadd.f32 1.4214138, %v5313_v1  ;;  %v5377_v0 = vmul.f32 %v5369_v29, %v10702_v42  ;;  %v5334_v31 = vadd.f32 -0.28449672, %v5326_v28  ;;  %v11721_v1 = vld [vmem:[#allocation27_spill] sm:$0xff] }
0x22c2   : > { %v5412_v49 = vmul.f32 %v5404_v40, %v10686_v6  ;;  %v5405_v16 = vsub.f32 1.0, %v5397_v52  ;;  %v5395_v22 = vmul.f32 %v7576_v47, %v5355_v13  ;;  %v5344_v6 = vmul.f32 %v10743_v63, %v5336_v8  ;;  %v11722_v13 = vld [vmem:[#allocation25_spill] sm:$0xff] }
0x22c3   : > { %v5410_v46 = vmul.f32 %v5402_v51, %v10694_v35  ;;  %v5375_v41 = vmul.f32 %v5367_v7, %v10736_v25  ;;  %v5329_v51 = vmul.f32 %v10758_v20, %v5321_v26  ;;  %v10782_v35 = vpop.eup %7577  ;;  %v5342_v53 = vmul.f32 %v10747_v10, %v5334_v31 }
0x22c4   : > { %v5420_v17 = vadd.f32 1.0, %v5412_v49  ;;  %v5413_v61 = vmul.f32 %v5405_v16, %v10713_v2  ;;  %v5403_v42 = vsub.f32 1.0, %v5395_v22  ;;  %v5352_v29 = vadd.f32 0.2548296, %v5344_v6  ;;  %v7580_v9 = vpop.eup %7579  ;;  %v11723_v22 = vld [vmem:[#allocation41_spill] sm:$0xff] }
0x22c5   : > { %v5418_v19 = vadd.f32 1.0, %v5410_v46  ;;  %v10788_v34 = vmul.f32 0.5, %v10662_v58  ;;  %v10791_v25 = vmul.f32 0.5, %v10668_v43  ;;  %v5392_v2 = vmul.f32 1.442695, %v5377_v0 }
0x22c6   : > { %v10794_v32 = vmul.f32 %v5420_v17, %v10676_v15  ;;  %v5254_v5 = vsel %vm5246_vm15, 1.0, %v11687_v44  ;;  %v5388_v40 = vmul.f32 1.442695, %v5375_v41  ;;  %v5421_v3 = vadd.f32 1.0, %v5413_v61 }
0x22c7   : > { %v10799_v62 = vmul.f32 %v5418_v19, %v10688_v56  ;;  %v10802_v58 = vsel %vm5249_vm5, 1.0, %v11687_v44  ;;  %v5337_v59 = vadd.f32 -0.28449672, %v5329_v51  ;;  %v5411_v43 = vmul.f32 %v5403_v42, %v10733_v48 }
0x22c8   : > { %v5360_v54 = vmul.f32 %v10743_v63, %v5352_v29  ;;  %v5350_v47 = vadd.f32 0.2548296, %v5342_v53  ;;  %v5295_v15 = vmul.f32 1.0614054, %v10782_v35  ;;  %v10808_v27 = vmul.f32 %v5421_v3, %v10690_v39  ;;  %v7582_v63 = vpop.eup %7581  ;;  %v11724_v53 = vld [vmem:[#allocation59_spill] sm:$0xff] }
0x22c9   : > { %11720 = vst [vmem:[#allocation75_spill] sm:$0xff] %v10799_v62  ;;  %7583 = vpow2.f32 %v5392_v2  ;;  %v10814_v56 = vsel %vm5247_vm6, 1.0, %v11687_v44  ;;  %v5499_v7 = vmul.f32 %v10794_v32, %v11721_v1  ;;  %v5419_v49 = vadd.f32 1.0, %v5411_v43  ;;  %v11725_v43 = vld [vmem:[#allocation26_spill] sm:$0xff] }
0x22ca   : > { %v5358_v48 = vmul.f32 %v10747_v10, %v5350_v47  ;;  %7585 = vpow2.f32 %v5388_v40  ;;  %v5454_v52 = vrot.slane %v10794_v32, 7  ;;  %v5497_v39 = vmul.f32 %v10799_v62, %v11722_v13  ;;  %v11726_v1 = vld [vmem:[#allocation22_spill] sm:$0xff] }
0x22cb   : > { %v11512_v28 = vrot.slane %v10808_v27, 7  ;;  %v5400_v4 = vmul.f32 %v7580_v9, %v5360_v54  ;;  %v10824_v46 = vmul.f32 %v5419_v49, %v10696_v30  ;;  %v5345_v26 = vmul.f32 %v10758_v20, %v5337_v59  ;;  %v11727_v49 = vld [vmem:[#allocation23_spill] sm:$0xff] }
0x22cc   : > { %v5398_v8 = vmul.f32 %v7582_v63, %v5358_v48  ;;  %v5303_v0 = vadd.f32 -1.4531521, %v5295_v15  ;;  %v5446_v10 = vmul.f32 %v10639_v23, %v10794_v32  ;;  %v5526_v16 = vrot.slane %v10794_v32, 1 }
0x22cd   : > { %v5653_v31 = vmul.f32 %v10794_v32, %v11723_v22  ;;  %v5464_v17 = vsel %vm2562_vm11, %v5454_v52, %v11512_v28  ;;  %v5511_v30 = vmul.f32 %v10642_v50, %v5499_v7  ;;  %v10839_v6 = vmul.f32 %v10639_v23, %v10799_v62 }
0x22ce   : > { %v11511_v41 = vrot.slane %v10799_v62, 7  ;;  %v11510_v19 = vrot.slane %v10799_v62, 1  ;;  %v10844_v61 = vmul.f32 %v10642_v50, %v5497_v39  ;;  %v5453_v51 = vrot.slane %v10824_v46, 7  ;;  %v11728_v39 = vld [vmem:[#allocation39_spill] sm:$0xff] }
0x22cf   : > { %v5525_v42 = vrot.slane %v10824_v46, 1  ;;  %v5408_v29 = vsub.f32 1.0, %v5400_v4  ;;  %v5500_v2 = vmul.f32 %v10808_v27, %v11724_v53  ;;  %v5406_v9 = vsub.f32 1.0, %v5398_v8 }
0x22d0   : > { %v5353_v32 = vadd.f32 0.2548296, %v5345_v26  ;;  %v5311_v40 = vmul.f32 %v10782_v35, %v5303_v0  ;;  %v10853_v3 = vsel %vm2562_vm11, %v5453_v51, %v5454_v52  ;;  %v10859_v59 = vsel %vm2562_vm11, %v11511_v41, %v5453_v51 }
0x22d1   : > { %v5498_v54 = vmul.f32 %v10824_v46, %v11725_v43  ;;  %v10867_v47 = vsel %vm2707_vm12, %v11510_v19, %v5525_v42  ;;  %v5447_v15 = vmul.f32 %v10639_v23, %v10808_v27  ;;  %v5470_v7 = vmul.f32 %v10859_v59, %v11726_v1  ;;  %v11729_v19 = vld [vmem:[#allocation46_spill] sm:$0xff] }
0x22d2   : > { %v5471_v48 = vmul.f32 %v10853_v3, %v11727_v49  ;;  %v10876_v63 = vmul.f32 %v10656_v57, %v5653_v31  ;;  %v5527_v13 = vrot.slane %v10808_v27, 1  ;;  %v5654_v4 = vmul.f32 %v10808_v27, %v11728_v39 }
0x22d3   : > { %v7584_v52 = vpop.eup %7583  ;;  %v5416_v8 = vmul.f32 %v5408_v29, %v5256_v11  ;;  %v5414_v26 = vmul.f32 %v5406_v9, %v5254_v5  ;;  %v5482_v22 = vmul.f32 %v10665_v45, %v5470_v7  ;;  %v5361_v53 = vmul.f32 %v10758_v20, %v5353_v32  ;;  %v11730_v29 = vld [vmem:[#allocation70_spill] sm:$0xff]  ;;  %v11731_v7 = vld [vmem:[#allocation37_spill] sm:$0xff] }
0x22d4   : > { %v10881_v0 = vpop.eup %7585  ;;  %v5483_v51 = vmul.f32 %v10665_v45, %v5471_v48  ;;  %v5319_v43 = vadd.f32 1.4214138, %v5311_v40  ;;  %v5512_v31 = vmul.f32 %v10642_v50, %v5500_v2  ;;  %v5510_v1 = vmul.f32 %v10642_v50, %v5498_v54  ;;  %v11732_v40 = vld [vmem:[#allocation32_spill] sm:$0xff] }
0x22d5   : > { %v5422_v49 = vadd.f32 1.0, %v5414_v26  ;;  %v5472_v41 = vmul.f32 %v5464_v17, %v11729_v19  ;;  %v5490_v28 = vadd.f32 %v5482_v22, %v5446_v10  ;;  %v5401_v11 = vmul.f32 %v7584_v52, %v5361_v53  ;;  %v11733_v53 = vld [vmem:[#allocation38_spill] sm:$0xff] }
0x22d6   : > { %v5491_v39 = vadd.f32 %v5483_v51, %v5447_v15  ;;  %v5327_v5 = vmul.f32 %v10782_v35, %v5319_v43  ;;  %v5571_v9 = vmul.f32 %v5464_v17, %v11730_v29  ;;  %v5626_v18 = vmul.f32 %v5464_v17, %v11731_v7  ;;  %v11737_v7 = vld [vmem:[#allocation35_spill] sm:$0xff] }
0x22d7   : > { %v10893_v48 = vmul.f32 %v10656_v57, %v5654_v4  ;;  %v5424_v20 = vadd.f32 1.0, %v5416_v8  ;;  %v10897_v2 = vmul.f32 %v10639_v23, %v10824_v46  ;;  %v5518_v32 = vadd.f32 %v5510_v1, %v5490_v28 }
0x22d8   : > { %v10900_v19 = vmul.f32 %v5422_v49, %v10788_v34  ;;  %v5409_v10 = vsub.f32 1.0, %v5401_v11  ;;  %v5570_v54 = vmul.f32 %v10853_v3, %v11732_v40  ;;  %v5335_v15 = vadd.f32 -0.28449672, %v5327_v5  ;;  %v11735_v49 = vld [vmem:[#allocation60_spill] sm:$0xff] }
0x22d9   : > { %v5519_v52 = vadd.f32 %v5511_v30, %v5491_v39  ;;  %v10906_v17 = vsel %vm2707_vm12, %v5526_v16, %v5527_v13  ;;  %v5484_v28 = vmul.f32 %v10665_v45, %v5472_v41  ;;  %v10914_v26 = vmul.f32 %v5424_v20, %v10740_v55  ;;  %v11736_v5 = vld [vmem:[#allocation40_spill] sm:$0xff] }
0x22da   : > { %v5448_v4 = vmul.f32 %v10639_v23, %v10900_v19  ;;  %v11515_v8 = vrot.slane %v10900_v19, 7  ;;  %v11514_v34 = vrot.slane %v10900_v19, 1  ;;  %v5417_v22 = vmul.f32 %v5409_v10, %v10802_v58 }
0x22db   : > { %v5343_v30 = vmul.f32 %v10782_v35, %v5335_v15  ;;  %v10920_v51 = vsel %vm2707_vm12, %v5525_v42, %v5526_v16  ;;  %v10924_v43 = vmul.f32 %v10824_v46, %v11733_v53  ;;  %v11734_v41 = vrot.slane %v10808_v27, 7  ;;  %v11739_v15 = vld [vmem:[#allocation30_spill] sm:$0xff] }
0x22dc   : > { %v5492_v1 = vadd.f32 %v5484_v28, %v5448_v4  ;;  %v5535_v58 = vsel %vm2707_vm12, %v5527_v13, %v11514_v34  ;;  %v5583_v16 = vmul.f32 %v10645_v12, %v5571_v9  ;;  %v10940_v42 = vmul.f32 %v10652_v24, %v5626_v18  ;;  %v11749_v34 = vld [vmem:[#allocation53_spill] sm:$0xff] }
0x22dd   : > { %v10932_v55 = vsel %vm2562_vm11, %v11734_v41, %v11515_v8  ;;  %v5541_v46 = vmul.f32 %v10867_v47, %v11678_v38  ;;  %v5501_v27 = vmul.f32 %v10900_v19, %v11735_v49  ;;  %v5569_v39 = vmul.f32 %v10859_v59, %v11676_v60  ;;  %v11738_v60 = vld [vmem:[#allocation29_spill] sm:$0xff] }
0x22de   : > { %v10948_v11 = vadd.f32 %v5512_v31, %v5492_v1  ;;  %v5655_v29 = vmul.f32 %v10900_v19, %v11736_v5  ;;  %v5425_v13 = vadd.f32 1.0, %v5417_v22  ;;  %v5582_v9 = vmul.f32 %v10645_v12, %v5570_v54  ;;  %v11740_v22 = vld [vmem:[#allocation84_spill] sm:$0xff]  ;;  %v11741_v41 = vld [vmem:[#allocation65_spill] sm:$0xff] }
0x22df   : > { %v10955_v18 = vmul.f32 %v10639_v23, %v10914_v26  ;;  %v5599_v38 = vmul.f32 %v5535_v58, %v11737_v7  ;;  %v5351_v20 = vadd.f32 0.2548296, %v5343_v30  ;;  %v11517_v10 = vrot.slane %v10914_v26, 7 }
0x22e0   : > { %v10960_v40 = vmul.f32 %v5425_v13, %v10791_v25  ;;  %v5542_v31 = vmul.f32 %v10920_v51, %v11738_v60  ;;  %v5543_v4 = vmul.f32 %v10906_v17, %v11739_v15  ;;  %v10968_v28 = vmul.f32 %v10642_v50, %v5501_v27  ;;  %v11742_v27 = vld [vmem:[#allocation44_spill] sm:$0xff] }
0x22e1   : > { %v5627_v53 = vmul.f32 %v10932_v55, %v11740_v22  ;;  %v5359_v30 = vmul.f32 %v10782_v35, %v5351_v20  ;;  %v10974_v1 = vmul.f32 %v5535_v58, %v11741_v41  ;;  %v10977_v25 = vmul.f32 %v10656_v57, %v5655_v29  ;;  %v11746_v22 = vld [vmem:[#allocation47_spill] sm:$0xff]  ;;  %v11747_v41 = vld [vmem:[#allocation21_spill] sm:$0xff] }
0x22e2   : > { %v5459_v49 = vrot.slane %v10960_v40, 7  ;;  %v11516_v5 = vrot.slane %v10960_v40, 1  ;;  %v10982_v13 = vmul.f32 %v10648_v14, %v5599_v38  ;;  %v10985_v7 = vmul.f32 %v5535_v58, %v11742_v27  ;;  %v11748_v27 = vld [vmem:[#allocation24_spill] sm:$0xff] }
0x22e3   : > { %v5399_v60 = vmul.f32 %v10881_v0, %v5359_v30  ;;  %v5554_v35 = vmul.f32 %v10674_v37, %v5542_v31  ;;  %v11744_v20 = vrot.slane %v10799_v62, 7  ;;  %v11745_v38 = vrot.slane %v10799_v62, 1 }
0x22e4   : > { %v10993_v29 = vsel %vm2562_vm11, %v11517_v10, %v5459_v49  ;;  %v5555_v58 = vmul.f32 %v10674_v37, %v5543_v4  ;;  %v11011_v31 = vmul.f32 %v10652_v24, %v5627_v53  ;;  %v5473_v8 = vmul.f32 %v10932_v55, %v11749_v34  ;;  %v11750_v10 = vld [vmem:[#allocation28_spill] sm:$0xff] }
0x22e5   : > { %11743 = vst [vmem:[#allocation77_spill] sm:$0xff] %v10993_v29  ;;  %v10999_v15 = vsel %vm2562_vm11, %v5459_v49, %v11744_v20  ;;  %v11007_v0 = vsel %vm2707_vm12, %v11516_v5, %v11745_v38  ;;  %v5468_v30 = vmul.f32 %v10993_v29, %v11746_v22  ;;  %v5496_v20 = vmul.f32 %v10960_v40, %v11748_v27  ;;  %v11751_v29 = vld [vmem:[#allocation68_spill] sm:$0xff] }
0x22e6   : > { %v5469_v49 = vmul.f32 %v10999_v15, %v11747_v41  ;;  %v5407_v54 = vsub.f32 1.0, %v5399_v60  ;;  %v5562_v38 = vadd.f32 %v5554_v35, %v5518_v32  ;;  %v5563_v5 = vadd.f32 %v5555_v58, %v5519_v52  ;;  %v11752_v35 = vld [vmem:[#allocation34_spill] sm:$0xff] }
0x22e7   : > { %v5480_v4 = vmul.f32 %v10665_v45, %v5468_v30  ;;  %v5540_v44 = vmul.f32 %v11007_v0, %v11750_v10  ;;  %v5553_v22 = vmul.f32 %v10674_v37, %v5541_v46  ;;  %v5568_v41 = vmul.f32 %v10999_v15, %v11751_v29 }
0x22e8   : > { %v5481_v53 = vmul.f32 %v10665_v45, %v5469_v49  ;;  %v5415_v27 = vmul.f32 %v5407_v54, %v10814_v56  ;;  %v5590_v60 = vadd.f32 %v5582_v9, %v5562_v38  ;;  %v5591_v62 = vadd.f32 %v5583_v16, %v5563_v5  ;;  %v11753_v49 = vld [vmem:[#allocation33_spill] sm:$0xff]  ;;  %v11754_v5 = vld [vmem:[#allocation79_spill] sm:$0xff] }
0x22e9   : > { %v5488_v34 = vadd.f32 %v5480_v4, %v10839_v6  ;;  %v5508_v32 = vmul.f32 %v10642_v50, %v5496_v20  ;;  %v5598_v58 = vmul.f32 %v10906_v17, %v11752_v35  ;;  %v5485_v10 = vmul.f32 %v10665_v45, %v5473_v8  ;;  %v11755_v20 = vld [vmem:[#allocation83_spill] sm:$0xff] }
0x22ea   : > { %v5489_v52 = vadd.f32 %v5481_v53, %v10897_v2  ;;  %v5423_v30 = vadd.f32 1.0, %v5415_v27  ;;  %v5581_v46 = vmul.f32 %v10645_v12, %v5569_v39  ;;  %v5596_v29 = vmul.f32 %v10867_v47, %v11753_v49  ;;  %v11756_v27 = vld [vmem:[#allocation36_spill] sm:$0xff] }
0x22eb   : > { %v5516_v56 = vadd.f32 %v5508_v32, %v5488_v34  ;;  %v5552_v6 = vmul.f32 %v10674_v37, %v5540_v44  ;;  %v5610_v9 = vmul.f32 %v10648_v14, %v5598_v58  ;;  %v5580_v54 = vmul.f32 %v10645_v12, %v5568_v41  ;;  %v11757_v41 = vld [vmem:[#allocation43_spill] sm:$0xff] }
0x22ec   : > { %v5517_v16 = vadd.f32 %v10844_v61, %v5489_v52  ;;  %v11042_v2 = vmul.f32 %v5423_v30, %v10811_v33  ;;  %v5597_v8 = vmul.f32 %v10920_v51, %v11754_v5  ;;  %v5624_v39 = vmul.f32 %v10859_v59, %v11755_v20  ;;  %v11758_v52 = vld [vmem:[#allocation63_spill] sm:$0xff]  ;;  %v11763_v20 = vld [vmem:[#allocation42_spill] sm:$0xff] }
0x22ed   : > { %v5560_v38 = vadd.f32 %v5552_v6, %v5516_v56  ;;  %v5618_v53 = vadd.f32 %v5610_v9, %v5590_v60  ;;  %v5625_v61 = vmul.f32 %v10853_v3, %v11756_v27  ;;  %v5680_v32 = vmul.f32 %v10920_v51, %v11757_v41  ;;  %v11765_v41 = vld [vmem:[#allocation45_spill] sm:$0xff] }
0x22ee   : > { %v5561_v4 = vadd.f32 %v5553_v22, %v5517_v16  ;;  %v5449_v44 = vmul.f32 %v10639_v23, %v11042_v2  ;;  %v5457_v33 = vrot.slane %v11042_v2, 7  ;;  %v5529_v34 = vrot.slane %v11042_v2, 1  ;;  %v11761_v16 = vld [vmem:[#allocation49_spill] sm:$0xff] }
0x22ef   : > { %v5502_v35 = vmul.f32 %v11042_v2, %v11758_v52  ;;  %v5588_v59 = vadd.f32 %v5580_v54, %v5560_v38  ;;  %v5608_v22 = vmul.f32 %v10648_v14, %v5596_v29  ;;  %v11759_v60 = vrot.slane %v10914_v26, 7 }
0x22f0   : > { %v5589_v58 = vadd.f32 %v5581_v46, %v5561_v4  ;;  %v11760_v30 = vrot.slane %v10900_v19, 7  ;;  %v5493_v51 = vadd.f32 %v5485_v10, %v5449_v44  ;;  %v5609_v56 = vmul.f32 %v10648_v14, %v5597_v8 }
0x22f1   : > { %v11064_v3 = vsel %vm2562_vm11, %v5457_v33, %v11759_v60  ;;  %v11762_v29 = vrot.slane %v10900_v19, 1  ;;  %v5636_v9 = vmul.f32 %v10652_v24, %v5624_v39  ;;  %v5664_v54 = vmul.f32 %v10656_v57, %v10924_v43 }
0x22f2   : > { %v11070_v49 = vsel %vm2562_vm11, %v11760_v30, %v5457_v33  ;;  %v5521_v5 = vadd.f32 %v10968_v28, %v5493_v51  ;;  %v5637_v10 = vmul.f32 %v10652_v24, %v5625_v61  ;;  %v5681_v8 = vmul.f32 %v10906_v17, %v11763_v20  ;;  %v11764_v33 = vld [vmem:[#allocation66_spill] sm:$0xff] }
0x22f3   : > { %v5474_v46 = vmul.f32 %v11070_v49, %v11761_v16  ;;  %v11079_v6 = vsel %vm2707_vm12, %v11762_v29, %v5529_v34  ;;  %v5692_v38 = vmul.f32 %v10756_v36, %v5680_v32  ;;  %v5514_v4 = vmul.f32 %v10642_v50, %v5502_v35 }
0x22f4   : > { %v5616_v27 = vadd.f32 %v5608_v22, %v5588_v59  ;;  %v5617_v44 = vadd.f32 %v5609_v56, %v5589_v58  ;;  %v5545_v39 = vmul.f32 %v11079_v6, %v11764_v33  ;;  %v5683_v43 = vmul.f32 %v11079_v6, %v11765_v41 }
0x22f5   : > { %v5486_v19 = vmul.f32 %v10665_v45, %v5474_v46  ;;  %v5619_v28 = vadd.f32 %v10982_v13, %v5591_v62  ;;  %v5646_v61 = vadd.f32 %v10940_v42, %v5618_v53  ;;  %v5694_v60 = vmul.f32 %v10756_v36, %v10985_v7 }
0x22f6   : > { %v5644_v52 = vadd.f32 %v5636_v9, %v5616_v27  ;;  %v5645_v32 = vadd.f32 %v5637_v10, %v5617_v44  ;;  %v11766_v58 = vrot.slane %v10960_v40, 1  ;;  %v11767_v22 = vrot.slane %v10914_v26, 1 }
0x22f7   : > { %v5494_v17 = vadd.f32 %v5486_v19, %v10955_v18  ;;  %v5647_v35 = vadd.f32 %v11011_v31, %v5619_v28  ;;  %v5674_v59 = vadd.f32 %v10893_v48, %v5646_v61  ;;  %v11121_v48 = vld [vmem:[%s11383_s10 + $0x1] ss:$0 sm:$0xff]  ;;  %v5693_v53 = vmul.f32 %v10756_v36, %v5681_v8  ;;  %v11770_v8 = vld [vmem:[#allocation93_spill] sm:$0xff]  ;;  %v11771_v19 = vld [vmem:[#allocation75_spill] sm:$0xff] }
0x22f8   : > { %v11108_v62 = vsel %vm2707_vm12, %v11767_v22, %v11766_v58  ;;  %v11768_v42 = vmov %v11767_v22  ;;  %v5672_v7 = vadd.f32 %v5664_v54, %v5644_v52  ;;  %v5673_v31 = vadd.f32 %v10876_v63, %v5645_v32  ;;  %v11774_v28 = vld [vmem:[#allocation72_spill] sm:$0xff]  ;;  %v11775_v32 = vld [vmem:[#allocation74_spill] sm:$0xff] }
0x22f9   : > { %v11114_v18 = vsel %vm2707_vm12, %v5529_v34, %v11768_v42  ;;  %v11116_v13 = vadd.f32 %v5514_v4, %v5494_v17  ;;  %v5675_v30 = vadd.f32 %v10977_v25, %v5647_v35  ;;  %v5695_v51 = vmul.f32 %v10756_v36, %v5683_v43  ;;  %v11769_v34 = vld [vmem:[#allocation62_spill] sm:$0xff]  ;;  %v11777_v35 = vld [vmem:[#allocation61_spill] sm:$0xff] }
0x22fa   : > { %v5702_v56 = vadd.f32 %v5694_v60, %v5674_v59  ;;  %v5556_v21 = vmul.f32 %v10674_v37, %v10974_v1  ;;  %v5503_v16 = vmul.f32 %v10914_v26, %v11769_v34  ;;  %v5700_v46 = vadd.f32 %v5692_v38, %v5672_v7  ;;  %v11772_v38 = vld [vmem:[#allocation55_spill] sm:$0xff]  ;;  %v11776_v60 = vld [vmem:[#allocation77_spill] sm:$0xff] }
0x22fb   : > { %v5701_v29 = vadd.f32 %v5693_v53, %v5673_v31  ;;  %v5557_v9 = vmul.f32 %v10674_v37, %v5545_v39  ;;  %v5703_v54 = vadd.f32 %v5695_v51, %v5675_v30  ;;  %v11144_v4 = vmul.f32 %v11771_v19, %v11770_v8  ;;  %v11773_v39 = vld [vmem:[#allocation92_spill] sm:$0xff]  ;;  %v11779_v7 = vld [vmem:[#allocation73_spill] sm:$0xff]  ;;  %v11780_v53 = vld [vmem:[#allocation90_spill] sm:$0xff] }
0x22fc   : > { %v11133_v63 = vadd.f32 %v11121_v48, %v5702_v56  ;;  %v5564_v10 = vadd.f32 %v5556_v21, %v10948_v11  ;;  %v11137_v25 = vadd.f32 %v11121_v48, %v5700_v46  ;;  %v5475_v27 = vmul.f32 %v11064_v3, %v11772_v38  ;;  %v11782_v8 = vld [vmem:[#allocation69_spill] sm:$0xff] }
0x22fd   : > { %v11140_v20 = vadd.f32 %v11121_v48, %v5701_v29  ;;  %v5565_v1 = vadd.f32 %v5557_v9, %v5521_v5  ;;  %v11149_v44 = vadd.f32 %v11121_v48, %v5703_v54  ;;  %v11155_v11 = vmul.f32 %v10642_v50, %v5503_v16  ;;  %v11781_v29 = vld [vmem:[#allocation67_spill] sm:$0xff] }
0x22fe   : > { %v11152_v33 = vmul.f32 0.70710677, %v11133_v63  ;;  %v5657_v41 = vmul.f32 %v10914_v26, %v11773_v39  ;;  %v11160_v5 = vmul.f32 0.70710677, %v11137_v25  ;;  %v5572_v61 = vmul.f32 %v10932_v55, %v11774_v28 }
0x22ff   : > { %v11163_v43 = vmul.f32 0.70710677, %v11140_v20  ;;  %v5451_v17 = vmul.f32 %v10639_v23, %v10960_v40  ;;  %v11170_v52 = vmul.f32 0.70710677, %v11149_v44  ;;  %v11175_v26 = vmul.f32 %v11776_v60, %v11775_v32  ;;  %v11778_v23 = vld [vmem:[#allocation71_spill] sm:$0xff] }
0x2300   : > { %v5756_v50 = vand.u32 2147483647, %v11152_v33  ;;  %v11179_v59 = vmul.f32 %v10960_v40, %v11777_v35  ;;  %v5754_v58 = vand.u32 2147483647, %v11160_v5  ;;  %v5487_v22 = vmul.f32 %v10665_v45, %v5475_v27 }
0x2301   : > { %v5755_v55 = vand.u32 2147483647, %v11163_v43  ;;  %v5573_v42 = vmul.f32 %v11070_v49, %v11778_v23  ;;  %v5574_v31 = vmul.f32 %v11064_v3, %v11779_v7  ;;  %v5656_v30 = vmul.f32 %v11042_v2, %v11780_v53 }
0x2302   : > { %v5762_v51 = vmul.f32 0.3275911, %v5754_v58  ;;  %v5858_v21 = vsub.f32 0.0, %v5754_v58  ;;  %v5757_v34 = vand.u32 2147483647, %v11170_v52  ;;  %v5860_v46 = vsub.f32 0.0, %v5756_v50 }
0x2303   : > { %v5763_v56 = vmul.f32 0.3275911, %v5755_v55  ;;  %v5859_v40 = vsub.f32 0.0, %v5755_v55  ;;  %v5764_v16 = vmul.f32 0.3275911, %v5756_v50  ;;  %v5546_v45 = vmul.f32 %v11114_v18, %v11781_v29 }
0x2304   : > { %v5770_v9 = vadd.f32 1.0, %v5762_v51  ;;  %v5547_v19 = vmul.f32 %v11108_v62, %v11782_v8  ;;  %v5584_v38 = vmul.f32 %v10645_v12, %v5572_v61  ;;  %v5866_v27 = vmul.f32 %v5858_v21, %v5754_v58  ;;  %v11783_v8 = vld [vmem:[#allocation76_spill] sm:$0xff] }
0x2305   : > { %v5771_v54 = vadd.f32 1.0, %v5763_v56  ;;  %v5867_v2 = vmul.f32 %v5859_v40, %v5755_v55  ;;  %v5765_v39 = vmul.f32 0.3275911, %v5757_v34  ;;  %v5861_v28 = vsub.f32 0.0, %v5757_v34  ;;  %v11784_v58 = vld [vmem:[#allocation56_spill] sm:$0xff] }
0x2306   : > { %7587 = vrcp.f32 %v5770_v9  ;;  %v5772_v32 = vadd.f32 1.0, %v5764_v16  ;;  %v5585_v35 = vmul.f32 %v10645_v12, %v5573_v42  ;;  %v5592_v23 = vadd.f32 %v5584_v38, %v5564_v10  ;;  %v11785_v42 = vld [vmem:[#allocation89_spill] sm:$0xff] }
0x2307   : > { %7589 = vrcp.f32 %v5771_v54  ;;  %v5773_v7 = vadd.f32 1.0, %v5765_v39  ;;  %v5868_v53 = vmul.f32 %v5860_v46, %v5756_v50  ;;  %v5558_v51 = vmul.f32 %v10674_v37, %v5546_v45  ;;  %v11787_v45 = vld [vmem:[#allocation54_spill] sm:$0xff] }
0x2308   : > { %v5559_v56 = vmul.f32 %v10674_v37, %v5547_v19  ;;  %v5593_v29 = vadd.f32 %v5585_v35, %v5565_v1  ;;  %v5600_v61 = vmul.f32 %v11079_v6, %v11783_v8  ;;  %v5601_v55 = vmul.f32 %v11114_v18, %v11784_v58  ;;  %v11786_v37 = vld [vmem:[#allocation58_spill] sm:$0xff] }
0x2309   : > { %v5874_v21 = vmul.f32 1.442695, %v5866_v27  ;;  %v11203_v40 = vmul.f32 1.442695, %v5867_v2  ;;  %v5869_v16 = vmul.f32 %v5861_v28, %v5757_v34  ;;  %v5628_v10 = vmul.f32 %v11070_v49, %v11785_v42  ;;  %v11788_v2 = vld [vmem:[#allocation94_spill] sm:$0xff]  ;;  %v11791_v42 = vld [vmem:[#allocation87_spill] sm:$0xff] }
0x230a   : > { %7591 = vrcp.f32 %v5772_v32  ;;  %v5612_v50 = vmul.f32 %v10648_v14, %v5600_v61  ;;  %v5613_v46 = vmul.f32 %v10648_v14, %v5601_v55  ;;  %v5629_v1 = vmul.f32 %v11064_v3, %v11786_v37  ;;  %v11789_v3 = vld [vmem:[#allocation95_spill] sm:$0xff] }
0x230b   : > { %7593 = vrcp.f32 %v5773_v7  ;;  %v11211_v6 = vmul.f32 1.442695, %v5868_v53  ;;  %v5602_v9 = vmul.f32 %v11108_v62, %v11787_v45  ;;  %v5640_v54 = vmul.f32 %v10652_v24, %v5628_v10  ;;  %v11792_v45 = vld [vmem:[#allocation91_spill] sm:$0xff] }
0x230c   : > { %v5620_v34 = vadd.f32 %v5612_v50, %v5592_v23  ;;  %v5621_v19 = vadd.f32 %v5613_v46, %v5593_v29  ;;  %v5641_v49 = vmul.f32 %v10652_v24, %v5629_v1  ;;  %v5668_v38 = vmul.f32 %v10656_v57, %v5656_v30 }
0x230d   : > { %v5669_v27 = vmul.f32 %v10656_v57, %v5657_v41  ;;  %v5684_v39 = vmul.f32 %v11114_v18, %v11788_v2  ;;  %v5685_v28 = vmul.f32 %v11108_v62, %v11789_v3  ;;  %v5495_v32 = vadd.f32 %v5487_v22, %v5451_v17  ;;  %v11790_v22 = vld [vmem:[#allocation82_spill] sm:$0xff] }
0x230e   : > { %v5648_v35 = vadd.f32 %v5640_v54, %v5620_v34  ;;  %v5649_v7 = vadd.f32 %v5641_v49, %v5621_v19  ;;  %v5566_v53 = vadd.f32 %v5558_v51, %v11116_v13  ;;  %v5586_v23 = vmul.f32 %v10645_v12, %v5574_v31 }
0x230f   : > { %v5696_v29 = vmul.f32 %v10756_v36, %v5684_v39  ;;  %v5697_v8 = vmul.f32 %v10756_v36, %v5685_v28  ;;  %v5523_v30 = vadd.f32 %v11155_v11, %v5495_v32  ;;  %v5587_v41 = vmul.f32 %v10645_v12, %v11175_v26 }
0x2310   : > { %v11230_v18 = vpop.eup %7587  ;;  %v5676_v61 = vadd.f32 %v5668_v38, %v5648_v35  ;;  %v5677_v62 = vadd.f32 %v5669_v27, %v5649_v7  ;;  %v5594_v17 = vadd.f32 %v5586_v23, %v5566_v53  ;;  %v5603_v58 = vmul.f32 %v11007_v0, %v11790_v22 }
0x2311   : > { %v11234_v13 = vpop.eup %7589  ;;  %v5786_v31 = vmul.f32 1.0614054, %v11230_v18  ;;  %v5567_v51 = vadd.f32 %v5559_v56, %v5523_v30  ;;  %v5614_v55 = vmul.f32 %v10648_v14, %v5602_v9  ;;  %v5630_v11 = vmul.f32 %v11776_v60, %v11791_v42 }
0x2312   : > { %v5787_v12 = vmul.f32 1.0614054, %v11234_v13  ;;  %v5704_v26 = vadd.f32 %v5696_v29, %v5676_v61  ;;  %v5705_v10 = vadd.f32 %v5697_v8, %v5677_v62  ;;  %v5615_v50 = vmul.f32 %v10648_v14, %v5603_v58 }
0x2313   : > { %v5794_v46 = vadd.f32 -1.4531521, %v5786_v31  ;;  %v5595_v37 = vadd.f32 %v5587_v41, %v5567_v51  ;;  %v5622_v1 = vadd.f32 %v5614_v55, %v5594_v17  ;;  %v5631_v54 = vmul.f32 %v10999_v15, %v11792_v45 }
0x2314   : > { %v11244_v34 = vpop.eup %7591  ;;  %v5795_v56 = vadd.f32 -1.4531521, %v5787_v12  ;;  %7595 = vpow2.f32 %v5874_v21  ;;  %v11247_v9 = vadd.f32 %v11121_v48, %v5704_v26  ;;  %v11250_v60 = vadd.f32 %v11121_v48, %v5705_v10 }
0x2315   : > { %v11252_v19 = vpop.eup %7593  ;;  %v5802_v14 = vmul.f32 %v11230_v18, %v5794_v46  ;;  %v5788_v49 = vmul.f32 1.0614054, %v11244_v34  ;;  %v5623_v38 = vadd.f32 %v5615_v50, %v5595_v37  ;;  %v5642_v27 = vmul.f32 %v10652_v24, %v5630_v11 }
0x2316   : > { %v5803_v15 = vmul.f32 %v11234_v13, %v5795_v56  ;;  %v5789_v2 = vmul.f32 1.0614054, %v11252_v19  ;;  %v5880_v21 = vmul.f32 1.442695, %v5869_v16  ;;  %v5643_v39 = vmul.f32 %v10652_v24, %v5631_v54 }
0x2317   : > { %v5810_v3 = vadd.f32 1.4214138, %v5802_v14  ;;  %v5796_v28 = vadd.f32 -1.4531521, %v5788_v49  ;;  %v11261_v32 = vmul.f32 0.70710677, %v11247_v9  ;;  %v5650_v35 = vadd.f32 %v5642_v27, %v5622_v1 }
0x2318   : > { %v5811_v7 = vadd.f32 1.4214138, %v5803_v15  ;;  %v5797_v53 = vadd.f32 -1.4531521, %v5789_v2  ;;  %v11264_v23 = vmul.f32 0.70710677, %v11250_v60  ;;  %v5651_v29 = vadd.f32 %v5643_v39, %v5623_v38 }
0x2319   : > { %v5818_v8 = vmul.f32 %v11230_v18, %v5810_v3  ;;  %7597 = vpow2.f32 %v11203_v40  ;;  %v5804_v16 = vmul.f32 %v11244_v34, %v5796_v28  ;;  %v11270_v24 = vand.u32 2147483647, %v11261_v32 }
0x231a   : > { %v5819_v30 = vmul.f32 %v11234_v13, %v5811_v7  ;;  %v5805_v41 = vmul.f32 %v11252_v19, %v5797_v53  ;;  %v5671_v61 = vmul.f32 %v10656_v57, %v11144_v4  ;;  %v11277_v17 = vmul.f32 0.5, %v11133_v63 }
0x231b   : > { %v5826_v62 = vadd.f32 -0.28449672, %v5818_v8  ;;  %v5812_v22 = vadd.f32 1.4214138, %v5804_v16  ;;  %7599 = vpow2.f32 %v11211_v6  ;;  %v11281_v31 = vand.u32 2147483647, %v11264_v23 }
0x231c   : > { %v5827_v40 = vadd.f32 -0.28449672, %v5819_v30  ;;  %v5813_v58 = vadd.f32 1.4214138, %v5805_v41  ;;  %7601 = vpow2.f32 %v5880_v21  ;;  %v5766_v42 = vmul.f32 0.3275911, %v11270_v24 }
0x231d   : > { %v5834_v51 = vmul.f32 %v11230_v18, %v5826_v62  ;;  %v5820_v55 = vmul.f32 %v11244_v34, %v5812_v22  ;;  %v5670_v4 = vmul.f32 %v10656_v57, %v11179_v59  ;;  %v5722_v11 = vmul.f32 0.5, %v11137_v25  ;;  %v11794_v21 = vld [vmem:[#allocation78_spill] sm:$0xff] }
0x231e   : > { %v7596_v63 = vpop.eup %7595  ;;  %v5835_v6 = vmul.f32 %v11234_v13, %v5827_v40  ;;  %v5821_v12 = vmul.f32 %v11252_v19, %v5813_v58  ;;  %v5767_v26 = vmul.f32 0.3275911, %v11281_v31  ;;  %v5774_v46 = vadd.f32 1.0, %v5766_v42 }
0x231f   : > { %v5842_v10 = vadd.f32 0.2548296, %v5834_v51  ;;  %v5828_v50 = vadd.f32 -0.28449672, %v5820_v55  ;;  %v5678_v37 = vadd.f32 %v5670_v4, %v5650_v35  ;;  %v5723_v1 = vmul.f32 0.5, %v11140_v20  ;;  %v11795_v35 = vld [vmem:[#allocation88_spill] sm:$0xff] }
0x2320   : > { %v5843_v45 = vadd.f32 0.2548296, %v5835_v6  ;;  %v5829_v54 = vadd.f32 -0.28449672, %v5821_v12  ;;  %v5775_v56 = vadd.f32 1.0, %v5767_v26  ;;  %vm5738_vm11 = vcmp.ge.f32.partialorder %v11160_v5, 0.0 }
0x2321   : > { %v5850_v57 = vmul.f32 %v11230_v18, %v5842_v10  ;;  %v5836_v25 = vmul.f32 %v11244_v34, %v5828_v50  ;;  %7603 = vrcp.f32 %v5774_v46  ;;  %vm5739_vm12 = vcmp.ge.f32.partialorder %v11163_v43, 0.0 }
0x2322   : > { %v5851_v59 = vmul.f32 %v11234_v13, %v5843_v45  ;;  %v5837_v14 = vmul.f32 %v11252_v19, %v5829_v54  ;;  %7605 = vrcp.f32 %v5775_v56  ;;  %vm5740_vm7 = vcmp.ge.f32.partialorder %v11152_v33, 0.0 }
0x2323   : > { %v7598_v49 = vpop.eup %7597  ;;  %v5890_v38 = vmul.f32 %v7596_v63, %v5850_v57  ;;  %v5844_v20 = vadd.f32 0.2548296, %v5836_v25  ;;  %v5679_v27 = vadd.f32 %v5671_v61, %v5651_v29  ;;  %v11793_v15 = vmov -1.0  }
0x2324   : > { %v5746_v5 = vsel %vm5738_vm11, 1.0, %v11793_v15  ;;  %v5891_v2 = vmul.f32 %v7598_v49, %v5851_v59  ;;  %v5845_v18 = vadd.f32 0.2548296, %v5837_v14  ;;  %v5686_v39 = vmul.f32 %v11007_v0, %v11794_v21 }
0x2325   : > { %v7600_v3 = vpop.eup %7599  ;;  %v5747_v43 = vsel %vm5739_vm12, 1.0, %v11793_v15  ;;  %v5898_v13 = vsub.f32 1.0, %v5890_v38  ;;  %v5852_v28 = vmul.f32 %v11244_v34, %v5844_v20  ;;  %v5687_v7 = vmul.f32 %v10867_v47, %v11795_v35 }
0x2326   : > { %v7602_v53 = vpop.eup %7601  ;;  %v5899_v8 = vsub.f32 1.0, %v5891_v2  ;;  %vm5741_vm8 = vcmp.ge.f32.partialorder %v11170_v52, 0.0  ;;  %v5853_v29 = vmul.f32 %v11252_v19, %v5845_v18  ;;  %v5698_v16 = vmul.f32 %v10756_v36, %v5686_v39 }
0x2327   : > { %v5906_v30 = vmul.f32 %v5898_v13, %v5746_v5  ;;  %v5892_v41 = vmul.f32 %v7600_v3, %v5852_v28  ;;  %v5862_v0 = vsub.f32 0.0, %v11270_v24  ;;  %v5699_v61 = vmul.f32 %v10756_v36, %v5687_v7 }
0x2328   : > { %v5907_v62 = vmul.f32 %v5899_v8, %v5747_v43  ;;  %v5893_v22 = vmul.f32 %v7602_v53, %v5853_v29  ;;  %v5863_v34 = vsub.f32 0.0, %v11281_v31  ;;  %v5706_v40 = vadd.f32 %v5698_v16, %v5678_v37 }
0x2329   : > { %v5914_v47 = vadd.f32 1.0, %v5906_v30  ;;  %v5748_v58 = vsel %vm5740_vm7, 1.0, %v11793_v15  ;;  %v5900_v51 = vsub.f32 1.0, %v5892_v41  ;;  %v5707_v19 = vadd.f32 %v5699_v61, %v5679_v27 }
0x232a   : > { %v5915_v55 = vadd.f32 1.0, %v5907_v62  ;;  %v5749_v42 = vsel %vm5741_vm8, 1.0, %v11793_v15  ;;  %v5901_v4 = vsub.f32 1.0, %v5893_v22  ;;  %v11320_v36 = vadd.f32 %v11121_v48, %v5706_v40 }
0x232b   : > { %v7604_v63 = vpop.eup %7603  ;;  %v5922_v6 = vmul.f32 %v5914_v47, %v5722_v11  ;;  %v5908_v12 = vmul.f32 %v5900_v51, %v5748_v58  ;;  %v5870_v26 = vmul.f32 %v5862_v0, %v11270_v24  ;;  %v11324_v10 = vadd.f32 %v11121_v48, %v5707_v19 }
0x232c   : > { %v7606_v33 = vpop.eup %7605  ;;  %v5923_v50 = vmul.f32 %v5915_v55, %v5723_v1  ;;  %v5909_v46 = vmul.f32 %v5901_v4, %v5749_v42  ;;  %v5790_v37 = vmul.f32 1.0614054, %v7604_v63  ;;  %v5871_v45 = vmul.f32 %v5863_v34, %v11281_v31 }
0x232d   : > { %v5725_v52 = vmul.f32 0.5, %v11149_v44  ;;  %v5916_v54 = vadd.f32 1.0, %v5908_v12  ;;  %v5791_v56 = vmul.f32 1.0614054, %v7606_v33  ;;  %v11329_v57 = vmul.f32 0.70710677, %v11320_v36 }
0x232e   : > { %v5947_v11 = vpack.c.bf16 %v5923_v50, %v5922_v6  ;;  %v5917_v25 = vadd.f32 1.0, %v5909_v46  ;;  %v5798_v59 = vadd.f32 -1.4531521, %v5790_v37  ;;  %v11332_v24 = vmul.f32 0.70710677, %v11324_v10 }
0x232f   : > { %v5924_v48 = vmul.f32 %v5916_v54, %v11277_v17  ;;  %v5799_v1 = vadd.f32 -1.4531521, %v5791_v56  ;;  %v5882_v14 = vmul.f32 1.442695, %v5870_v26  ;;  %v5760_v49 = vand.u32 2147483647, %v11329_v57 }
0x2330   : > { %6909 = vmatprep.mubr.bf16.mxu0 %v5947_v11  ;;  %v5925_v31 = vmul.f32 %v5917_v25, %v5725_v52  ;;  %v5806_v44 = vmul.f32 %v7604_v63, %v5798_v59  ;;  %v5884_v38 = vmul.f32 1.442695, %v5871_v45  ;;  %v5761_v27 = vand.u32 2147483647, %v11332_v24 }
0x2331   : > { %v5807_v20 = vmul.f32 %v7606_v33, %v5799_v1  ;;  %v5768_v5 = vmul.f32 0.3275911, %v5760_v49  ;;  %7607 = vpow2.f32 %v5882_v14  ;;  %v5864_v16 = vsub.f32 0.0, %v5760_v49 }
0x2332   : > { %v5948_v2 = vpack.c.bf16 %v5925_v31, %v5924_v48  ;;  %v5814_v18 = vadd.f32 1.4214138, %v5806_v44  ;;  %v5769_v39 = vmul.f32 0.3275911, %v5761_v27  ;;  %7609 = vpow2.f32 %v5884_v38 }
0x2333   : > { %v5815_v21 = vadd.f32 1.4214138, %v5807_v20  ;;  %v5776_v3 = vadd.f32 1.0, %v5768_v5  ;;  %v5865_v61 = vsub.f32 0.0, %v5761_v27  ;;  %vm5742_vm9 = vcmp.ge.f32.partialorder %v11261_v32, 0.0 }
0x2334   : > { %6910 = vmatmul.mubr.bf16.vlgmr.msra.gmra.mrb[88].mxu0 %v5948_v2  ;;  %v5822_v17 = vmul.f32 %v7604_v63, %v5814_v18  ;;  %v5777_v13 = vadd.f32 1.0, %v5769_v39  ;;  %vm5743_vm10 = vcmp.ge.f32.partialorder %v11264_v23, 0.0  ;;  %v5872_v47 = vmul.f32 %v5864_v16, %v5760_v49 }
0x2335   : > { %v5823_v43 = vmul.f32 %v7606_v33, %v5815_v21  ;;  %7611 = vrcp.f32 %v5776_v3  ;;  %v5750_v55 = vsel %vm5742_vm9, 1.0, %v11793_v15  ;;  %v5873_v4 = vmul.f32 %v5865_v61, %v5761_v27 }
0x2336   : > { %v5830_v28 = vadd.f32 -0.28449672, %v5822_v17  ;;  %7613 = vrcp.f32 %v5777_v13  ;;  %v5886_v32 = vmul.f32 1.442695, %v5872_v47  ;;  %v5726_v23 = vmul.f32 0.5, %v11247_v9 }
0x2337   : > { %v5831_v35 = vadd.f32 -0.28449672, %v5823_v43  ;;  %v5727_v45 = vmul.f32 0.5, %v11250_v60  ;;  %v5888_v54 = vmul.f32 1.442695, %v5873_v4  ;;  %vm5744_vm13 = vcmp.ge.f32.partialorder %v11329_v57, 0.0 }
0x2338   : > { %v5838_v7 = vmul.f32 %v7604_v63, %v5830_v28  ;;  %7615 = vpow2.f32 %v5886_v32  ;;  %vm5745_vm1 = vcmp.ge.f32.partialorder %v11332_v24, 0.0  ;;  %v5752_v17 = vsel %vm5744_vm13, 1.0, %v11793_v15 }
0x2339   : > { %v5839_v53 = vmul.f32 %v7606_v33, %v5831_v35  ;;  %7617 = vpow2.f32 %v5888_v54  ;;  %v5753_v28 = vsel %vm5745_vm1, 1.0, %v11793_v15  ;;  %v5728_v35 = vmul.f32 0.5, %v11320_v36 }
0x233a   : > { %v5846_v8 = vadd.f32 0.2548296, %v5838_v7  ;;  %v5729_v57 = vmul.f32 0.5, %v11324_v10  ;;  %v11800_v10 = vld [vmem:[#allocation86_spill] sm:$0xff] }
0x233b   : > { %v5847_v29 = vadd.f32 0.2548296, %v5839_v53  ;;  %v7608_v41 = vpop.eup %7607 }
0x233c   : > { %v5854_v30 = vmul.f32 %v7604_v63, %v5846_v8  ;;  %v7610_v62 = vpop.eup %7609  ;;  %v5751_v63 = vsel %vm5743_vm10, 1.0, %v11793_v15  ;;  %v11799_v15 = vld [vmem:[#allocation80_spill] sm:$0xff] }
0x233d   : > { %v5855_v0 = vmul.f32 %v7606_v33, %v5847_v29 }
0x233e   : > { %v5894_v22 = vmul.f32 %v7608_v41, %v5854_v30  ;;  %v6348_v41 = vld [vmem:[#allocation7 + $0x1] ss:$0 sm:$0xff] }
0x233f   : > { %v7612_v34 = vpop.eup %7611  ;;  %v5895_v40 = vmul.f32 %v7610_v62, %v5855_v0  ;;  %v11796_v0 = vld [vmem:[#allocation64_spill] sm:$0xff] }
0x2340   : > { %v5902_v58 = vsub.f32 1.0, %v5894_v22  ;;  %v5792_v51 = vmul.f32 1.0614054, %v7612_v34  ;;  %v7614_v19 = vpop.eup %7613 }
0x2341   : > { %v5903_v42 = vsub.f32 1.0, %v5895_v40  ;;  %v5793_v12 = vmul.f32 1.0614054, %v7614_v19 }
0x2342   : > { %v5910_v6 = vmul.f32 %v5902_v58, %v5750_v55  ;;  %v5800_v26 = vadd.f32 -1.4531521, %v5792_v51  ;;  %v7616_v5 = vpop.eup %7615  ;;  %v11801_v51 = vld [vmem:[#allocation31_spill] sm:$0xff] }
0x2343   : > { %v5911_v33 = vmul.f32 %v5903_v42, %v5751_v63  ;;  %v5801_v46 = vadd.f32 -1.4531521, %v5793_v12  ;;  %v7618_v21 = vpop.eup %7617  ;;  %v11802_v63 = vld [vmem:[#allocation81_spill] sm:$0xff] }
0x2344   : > { %v5918_v50 = vadd.f32 1.0, %v5910_v6  ;;  %v5808_v37 = vmul.f32 %v7612_v34, %v5800_v26  ;;  %v11803_v26 = vld [vmem:[#allocation85_spill] sm:$0xff] }
0x2345   : > { %v5919_v52 = vadd.f32 1.0, %v5911_v33  ;;  %v5809_v56 = vmul.f32 %v7614_v19, %v5801_v46  ;;  %v11804_v46 = vld [vmem:[#allocation57_spill] sm:$0xff] }
0x2346   : > { %v5816_v11 = vadd.f32 1.4214138, %v5808_v37  ;;  %v5926_v25 = vmul.f32 %v5918_v50, %v5726_v23 }
0x2347   : > { %v5927_v59 = vmul.f32 %v5919_v52, %v5727_v45  ;;  %v5817_v48 = vadd.f32 1.4214138, %v5809_v56  ;;  %v11805_v52 = vld [vmem:[#allocation52_spill] sm:$0xff] }
0x2348   : > { %v5824_v1 = vmul.f32 %v7612_v34, %v5816_v11 }
0x2349   : > { %v5949_v14 = vpack.c.bf16 %v5927_v59, %v5926_v25  ;;  %v5825_v49 = vmul.f32 %v7614_v19, %v5817_v48 }
0x234a   : > { %v5832_v31 = vadd.f32 -0.28449672, %v5824_v1 }
0x234b   : > { %6913 = vmatprep.mubr.bf16.mxu0 %v5949_v14  ;;  %v5833_v44 = vadd.f32 -0.28449672, %v5825_v49 }
0x234c   : > { %v5840_v38 = vmul.f32 %v7612_v34, %v5832_v31 }
0x234d   : > { %v5841_v20 = vmul.f32 %v7614_v19, %v5833_v44 }
0x234e   : > { %v5848_v9 = vadd.f32 0.2548296, %v5840_v38 }
0x234f   : > { %v5849_v27 = vadd.f32 0.2548296, %v5841_v20 }
0x2350   : > { %v5856_v60 = vmul.f32 %v7612_v34, %v5848_v9 }
0x2351   : > { %v5857_v2 = vmul.f32 %v7614_v19, %v5849_v27 }
0x2352   : > { %v5896_v18 = vmul.f32 %v7616_v5, %v5856_v60 }
0x2353   : > { %v5897_v39 = vmul.f32 %v7618_v21, %v5857_v2 }
0x2354   : > { %v5904_v3 = vsub.f32 1.0, %v5896_v18 }
0x2355   : > { %v5905_v43 = vsub.f32 1.0, %v5897_v39 }
0x2356   : > { %v5912_v13 = vmul.f32 %v5904_v3, %v5752_v17 }
0x2357   : > { %v5913_v7 = vmul.f32 %v5905_v43, %v5753_v28 }
0x2358   : > { %v5920_v53 = vadd.f32 1.0, %v5912_v13 }
0x2359   : > { %v5921_v8 = vadd.f32 1.0, %v5913_v7 }
0x235a   : > { %v5928_v29 = vmul.f32 %v5920_v53, %v5728_v35 }
0x235b   : > { %v5929_v16 = vmul.f32 %v5921_v8, %v5729_v57 }
0x235d   : > { %v5950_v30 = vpack.c.bf16 %v5929_v16, %v5928_v29 }
0x235f   : > { %6914 = vmatmul.mubr.bf16.gmra.mrb[92].mxu0 %v5950_v30 }
0x2407   : > { %v6911_v24 = vpop.f32.mrb[88].mxu0 }
0x2408   : > { %v6026_v61 = vadd.f32 %v6911_v24, %v11796_v0  ;;  %v5993_v62 = vpop.f32.mrb[89].mxu0 }
0x2409   : > { %v6024_v36 = vadd.f32 %v5993_v62, %v11799_v15  ;;  %v6912_v22 = vpop.f32.mrb[90].mxu0 }
0x240a   : > { %v6042_v34 = vadd.f32 %v6348_v41, %v6026_v61  ;;  %v6027_v40 = vadd.f32 %v6912_v22, %v11800_v10  ;;  %v5996_v47 = vpop.f32.mrb[91].mxu0 }
0x240b   : > { %v6040_v58 = vadd.f32 %v6348_v41, %v6024_v36  ;;  %v6025_v19 = vadd.f32 %v5996_v47, %v11801_v51 }
0x240c   : > { %6050 = vst.msk [vmem:[%s499_s28 + $0x10] sm:$0xff] %vm517_vm0, %v6042_v34  ;;  %v6043_v55 = vadd.f32 %v6348_v41, %v6027_v40 }
0x240d   : > { %6048 = vst.msk [vmem:[%s499_s28] sm:$0xff] %vm517_vm0, %v6040_v58  ;;  %v6041_v42 = vadd.f32 %v6348_v41, %v6025_v19 }
0x240e   : > { %6051 = vst.msk [vmem:[%s499_s28 + $0x18] sm:$0xff] %vm517_vm0, %v6043_v55 }
0x240f   : > { %6049 = vst.msk [vmem:[%s499_s28 + $0x8] sm:$0xff] %vm517_vm0, %v6041_v42 }
0x2432   : > { %v6915_v4 = vpop.f32.mrb[92].mxu0 }
0x2433   : > { %v6030_v6 = vadd.f32 %v6915_v4, %v11802_v63  ;;  %v6009_v12 = vpop.f32.mrb[93].mxu0 }
0x2434   : > { %v6028_v33 = vadd.f32 %v6009_v12, %v11803_v26  ;;  %v6916_v32 = vpop.f32.mrb[94].mxu0 }
0x2435   : > { %v6046_v50 = vadd.f32 %v6348_v41, %v6030_v6  ;;  %v6031_v37 = vadd.f32 %v6916_v32, %v11804_v46  ;;  %v6012_v23 = vpop.f32.mrb[95].mxu0 }
0x2436   : > { %v6044_v45 = vadd.f32 %v6348_v41, %v6028_v33  ;;  %v6029_v54 = vadd.f32 %v6012_v23, %v11805_v52 }
0x2437   : > { %6054 = vst.msk [vmem:[%s499_s28 + $0x30] sm:$0xff] %vm517_vm0, %v6046_v50  ;;  %v6047_v56 = vadd.f32 %v6348_v41, %v6031_v37 }
0x2438   : > { %6052 = vst.msk [vmem:[%s499_s28 + $0x20] sm:$0xff] %vm517_vm0, %v6044_v45  ;;  %v6045_v11 = vadd.f32 %v6348_v41, %v6029_v54 }
0x2439   : > { %6055 = vst.msk [vmem:[%s499_s28 + $0x38] sm:$0xff] %vm517_vm0, %v6047_v56 }
0x243a   : > { %6053 = vst.msk [vmem:[%s499_s28 + $0x28] sm:$0xff] %vm517_vm0, %v6045_v11 }
0x243b PF: > { %s11806_s26 = sld [smem:[#allocation12_spill]] }
0x2441   : > { %s26_s25 = sadd.s32 1, %s11806_s26  }
0x2442   : > { %p23_p6 = scmp.ge.s32.totalorder %s26_s25, 4  }
0x2444   :  { %25 = sbr.rel (!%p23_p6) target bundleno = 5 (0x5), region = 136 }
0x244b   :  { %6077 = vsyncpa [#allocation3], 1 }
0x244c   :  { %6079 = vsyncpa [#allocation3 + $0x1], 1 }
0x244d   :  { %6080 = vsyncpa [#allocation5], 1 }
0x244e   :  { %6081 = vsyncpa [#allocation8], 1 }

</bundles_post_ra>
